<compile_context>
chip_gen: v7x
topology: tpu7x:2x2x1
jax: 0.10.0
libtpu: 0.0.40
codegen_flags: <defaults>
</compile_context>

<pallas_src>
import functools

import jax
import jax.numpy as jnp
from jax.experimental import pallas as pl
from jax.experimental.pallas import tpu as pltpu


VMEM_LIMIT_BYTES = 64 * 1024 * 1024


# ----------------------------------------------------------------------------
# helpers
# ----------------------------------------------------------------------------
def _round_up(x, m):
    return ((x + m - 1) // m) * m


def _pick_tile(dim, targets):
    """Pad `dim` to a multiple of 128 and pick the largest tile in `targets`
    (descending, ending in 128) that divides the padded extent."""
    padded = _round_up(dim, 128)
    for t in targets:
        if padded % t == 0:
            return t, padded
    t = targets[-1]
    return t, _round_up(padded, t)


# ----------------------------------------------------------------------------
# Kernel 1: fused tiled matmul   out = [relu]( X @ W + shift [+ residual] )
#   X, W, residual: bf16   accumulation / epilogue: f32   out: bf16
# ----------------------------------------------------------------------------
def _make_mm_kernel(relu, has_residual):
    def kernel(*refs):
        if has_residual:
            x_ref, w_ref, sh_ref, r_ref, o_ref, acc_ref = refs
        else:
            x_ref, w_ref, sh_ref, o_ref, acc_ref = refs
            r_ref = None
        k = pl.program_id(2)

        @pl.when(k == 0)
        def _():
            acc_ref[...] = jnp.zeros_like(acc_ref)

        acc_ref[...] += jnp.dot(x_ref[...], w_ref[...],
                                preferred_element_type=jnp.float32)

        @pl.when(k == pl.num_programs(2) - 1)
        def _():
            y = acc_ref[...] + sh_ref[...].astype(jnp.float32)
            if r_ref is not None:
                y = y + r_ref[...].astype(jnp.float32)
            if relu:
                y = jnp.maximum(y, 0.0)
            o_ref[...] = y.astype(o_ref.dtype)

    return kernel


def fused_matmul_bn(x2d, w, shift, residual=None, relu=False):
    """x2d: [M,K] bf16, w: [K,N] bf16 (BN scale pre-folded), shift: [1,N] f32,
    residual: [M,N] bf16 or None.  Returns [M, N_padded] bf16 (lane-dense)."""
    M, K = x2d.shape
    Kw, N = w.shape
    assert K == Kw, (K, Kw)

    TM, Mp = _pick_tile(M, (1024, 512, 256, 128))
    TK, Kp = _pick_tile(K, (1024, 512, 256, 128))
    TN, Np = _pick_tile(N, (512, 256, 128))
    # Keep >=2 blocks on the (parallel) M axis so the grid can shard across
    # the 2 TensorCores on v7x.
    while Mp // TM < 2 and TM > 128:
        TM //= 2

    if (Mp, Kp) != (M, K):
        x2d = jnp.pad(x2d, ((0, Mp - M), (0, Kp - K)))
    if (Kp, Np) != (K, N):
        w = jnp.pad(w, ((0, Kp - K), (0, Np - N)))
    if Np != N:
        shift = jnp.pad(shift, ((0, 0), (0, Np - N)))

    args = [x2d, w, shift]
    in_specs = [
        pl.BlockSpec((TM, TK), lambda i, j, k: (i, k)),
        pl.BlockSpec((TK, TN), lambda i, j, k: (k, j)),
        pl.BlockSpec((1, TN), lambda i, j, k: (0, j)),
    ]
    bytes_accessed = 2 * (Mp * Kp + Kp * Np + Mp * Np) + 4 * Np
    if residual is not None:
        assert residual.shape == (M, Np), (residual.shape, (M, Np))
        if Mp != M:
            residual = jnp.pad(residual, ((0, Mp - M), (0, 0)))
        args.append(residual)
        in_specs.append(pl.BlockSpec((TM, TN), lambda i, j, k: (i, j)))
        bytes_accessed += 2 * Mp * Np

    out = pl.pallas_call(
        _make_mm_kernel(relu, residual is not None),
        out_shape=jax.ShapeDtypeStruct((Mp, Np), jnp.bfloat16),
        grid_spec=pltpu.PrefetchScalarGridSpec(
            num_scalar_prefetch=0,
            grid=(Mp // TM, Np // TN, Kp // TK),
            in_specs=in_specs,
            out_specs=pl.BlockSpec((TM, TN), lambda i, j, k: (i, j)),
            scratch_shapes=[pltpu.VMEM((TM, TN), jnp.float32)],
        ),
        compiler_params=pltpu.CompilerParams(
            dimension_semantics=("parallel", "parallel", "arbitrary"),
            vmem_limit_bytes=VMEM_LIMIT_BYTES),
        cost_estimate=pl.CostEstimate(flops=int(2 * Mp * Np * Kp),
                                      transcendentals=0,
                                      bytes_accessed=int(bytes_accessed)),
    )(*args)

    if Mp != M:
        out = out[:M]
    return out  # [M, Np] bf16 (channels stay lane-dense for downstream layers)


def conv1x1(x_nhwc, w, shift, relu=False, residual_nhwc=None):
    """1x1 stride-1 conv (+ folded-BN shift + optional residual + ReLU)."""
    b, h, wd, c = x_nhwc.shape
    assert w.shape[0] == c, (w.shape, c)
    x2 = x_nhwc.reshape(b * h * wd, c)
    res2 = None
    if residual_nhwc is not None:
        res2 = residual_nhwc.reshape(b * h * wd, residual_nhwc.shape[-1])
    y = fused_matmul_bn(x2, w, shift, residual=res2, relu=relu)
    return y.reshape(b, h, wd, y.shape[-1])


# ----------------------------------------------------------------------------
# Kernel 2: stride-1 spatial (kh x kw) conv.
# One whole output image (M = ho*wo rows) per (batch, co-tile, kc-tile) grid
# step; the kh*kw taps are unrolled in-kernel as static-sliced MXU matmuls, so
# the weight block is DMA'd once per step instead of once per output row.
# ----------------------------------------------------------------------------
def _make_conv_kernel(kh, kw, ho, wo, relu):
    def kernel(x_ref, w_ref, sh_ref, o_ref, acc_ref):
        kc = pl.program_id(2)

        @pl.when(kc == 0)
        def _():
            acc_ref[...] = jnp.zeros_like(acc_ref)

        contrib = None
        for ky in range(kh):
            for kx in range(kw):
                xs = x_ref[0, ky:ky + ho, kx:kx + wo, :]      # (ho, wo, TKC)
                xs = xs.reshape(ho * wo, xs.shape[-1])
                part = jnp.dot(xs, w_ref[ky, kx],
                               preferred_element_type=jnp.float32)
                contrib = part if contrib is None else contrib + part
        acc_ref[...] += contrib

        @pl.when(kc == pl.num_programs(2) - 1)
        def _():
            y = acc_ref[...] + sh_ref[...].astype(jnp.float32)
            if relu:
                y = jnp.maximum(y, 0.0)
            o_ref[...] = y.reshape(1, ho, wo, -1).astype(o_ref.dtype)

    return kernel


def conv_spatial_s1(x_nhwc, w4, shift, *, pad, relu):
    """Stride-1 (kh x kw) conv + folded-BN shift (+ ReLU).
    x_nhwc: [B,H,W,C] bf16 (C multiple of 128), w4: [kh,kw,C,Cout] bf16
    (BN scale pre-folded), shift: [1,Cout] f32,
    pad: ((top,bottom),(left,right)).  Returns [B,Ho,Wo,Cout] bf16."""
    b, h, wd, c = x_nhwc.shape
    kh, kw, cin, cop = w4.shape
    assert cin == c and c % 128 == 0 and cop % 128 == 0, (w4.shape, c)
    (pad_t, pad_b), (pad_l, pad_r) = pad
    ho = h + pad_t + pad_b - kh + 1
    wo = wd + pad_l + pad_r - kw + 1

    TKC, _ = _pick_tile(c, (512, 256, 128))
    TN, _ = _pick_tile(cop, (256, 128))
    n_kc = c // TKC
    n_co = cop // TN

    xp = x_nhwc
    if pad_t or pad_b or pad_l or pad_r:
        # TODO(synk): halo pad is a separate HBM pass; could be folded into the
        # producing kernel's output layout.
        xp = jnp.pad(xp, ((0, 0), (pad_t, pad_b), (pad_l, pad_r), (0, 0)))
    hp, wp = xp.shape[1], xp.shape[2]

    flops = 2 * b * ho * wo * cop * c * kh * kw
    bytes_accessed = 2 * (xp.size + w4.size + b * ho * wo * cop) + 4 * shift.size

    out = pl.pallas_call(
        _make_conv_kernel(kh, kw, ho, wo, relu),
        out_shape=jax.ShapeDtypeStruct((b, ho, wo, cop), jnp.bfloat16),
        grid_spec=pltpu.PrefetchScalarGridSpec(
            num_scalar_prefetch=0,
            grid=(b, n_co, n_kc),
            in_specs=[
                pl.BlockSpec((1, hp, wp, TKC),
                             lambda bi, co, kc: (bi, 0, 0, kc)),
                pl.BlockSpec((kh, kw, TKC, TN),
                             lambda bi, co, kc: (0, 0, kc, co)),
                pl.BlockSpec((1, TN), lambda bi, co, kc: (0, co)),
            ],
            out_specs=pl.BlockSpec((1, ho, wo, TN),
                                   lambda bi, co, kc: (bi, 0, 0, co)),
            scratch_shapes=[pltpu.VMEM((ho * wo, TN), jnp.float32)],
        ),
        compiler_params=pltpu.CompilerParams(
            dimension_semantics=("parallel", "parallel", "arbitrary"),
            vmem_limit_bytes=VMEM_LIMIT_BYTES),
        cost_estimate=pl.CostEstimate(flops=int(flops), transcendentals=0,
                                      bytes_accessed=int(bytes_accessed)),
    )(xp, w4, shift)
    return out


# ----------------------------------------------------------------------------
# Space-to-depth transform so the stride-2 3x3 conv becomes a stride-1 2x2 conv
# (no strided loads anywhere in the Pallas kernels).
# ----------------------------------------------------------------------------
def space_to_depth_2x2(x_nhwc):
    b, h, w, c = x_nhwc.shape
    assert h % 2 == 0 and w % 2 == 0, (h, w)
    x = x_nhwc.reshape(b, h // 2, 2, w // 2, 2, c)
    x = jnp.transpose(x, (0, 1, 3, 2, 4, 5))       # (b, h/2, w/2, p, q, c)
    return x.reshape(b, h // 2, w // 2, 4 * c)


def _make_s2d_weights(w2):
    """Rearrange a (3,3,C,Co) stride-2/pad-1 kernel into the equivalent
    (2,2,4C,Co) stride-1 kernel acting on the 2x2 space-to-depth input with
    top/left padding of 1.  Phase channel-block order matches
    space_to_depth_2x2: block index = 2*row_phase + col_phase."""
    kh, kw, C, Co = w2.shape
    assert kh == 3 and kw == 3, (kh, kw)
    kmap = {(0, 1): 0, (1, 0): 1, (1, 1): 2}       # (tap, phase) -> orig index
    w_out = jnp.zeros((2, 2, 4 * C, Co), w2.dtype)
    for ty in range(2):
        for tx in range(2):
            for p in range(2):
                for q in range(2):
                    ky = kmap.get((ty, p))
                    kx = kmap.get((tx, q))
                    if ky is None or kx is None:
                        continue
                    ph = 2 * p + q
                    w_out = w_out.at[ty, tx, ph * C:(ph + 1) * C, :].set(
                        w2[ky, kx])
    return w_out


# ----------------------------------------------------------------------------
# Parameter construction (deterministic, synthetic) + one-time prep
# ----------------------------------------------------------------------------
def _bn_scale_shift(key, c, eps=1e-5):
    k1, k2, k3, k4 = jax.random.split(key, 4)
    gamma = 1.0 + 0.1 * jax.random.normal(k1, (c,), jnp.float32)
    beta = 0.1 * jax.random.normal(k2, (c,), jnp.float32)
    mean = 0.1 * jax.random.normal(k3, (c,), jnp.float32)
    var = 0.5 + jnp.abs(jax.random.normal(k4, (c,), jnp.float32))
    scale = gamma / jnp.sqrt(var + eps)
    shift = beta - mean * scale
    return scale.reshape(1, c), shift.reshape(1, c)


def init_corblock_s_params(key, in_channels, out_channels, times):
    s = 4  # CORblock_S.scale
    keys = jax.random.split(key, 8 + 3 * times)

    def w_init(k, shape, fan_in):
        return jax.random.normal(k, shape, jnp.float32) / jnp.sqrt(fan_in)

    p = {}
    p["w_input"] = w_init(keys[0], (in_channels, out_channels), in_channels)
    p["w_skip"] = w_init(keys[1], (out_channels, out_channels), out_channels)
    p["skip_scale"], p["skip_shift"] = _bn_scale_shift(keys[2], out_channels)
    p["w1"] = w_init(keys[3], (out_channels, out_channels * s), out_channels)
    p["w2"] = w_init(keys[4], (3, 3, out_channels * s, out_channels * s),
                     9 * out_channels * s)
    p["w3"] = w_init(keys[5], (out_channels * s, out_channels),
                     out_channels * s)
    p["n1"] = [_bn_scale_shift(keys[6 + 3 * t], out_channels * s)
               for t in range(times)]
    p["n2"] = [_bn_scale_shift(keys[7 + 3 * t], out_channels * s)
               for t in range(times)]
    p["n3"] = [_bn_scale_shift(keys[8 + 3 * t], out_channels)
               for t in range(times)]
    return p


def prepare_params(params, times):
    """One-time prep (outside the jitted forward): fold inference-mode BN scale
    into weight columns (per timestep), pad channel dims to multiples of 128
    (lane-dense), cast matmul operands to bf16 (shifts stay f32).  The t==0
    3x3 stride-2 weights are rearranged into the space-to-depth 2x2 form."""
    in_c, out_c = params["w_input"].shape
    c4 = params["w1"].shape[1]
    kin_p = _round_up(in_c, 128)
    cp = _round_up(out_c, 128)
    c4p = _round_up(c4, 128)

    def pad_mm(w, kp, np_):
        return jnp.pad(w, ((0, kp - w.shape[0]),
                           (0, np_ - w.shape[1]))).astype(jnp.bfloat16)

    def pad_shift(sh, np_):
        sh = sh.reshape(1, -1).astype(jnp.float32)
        return jnp.pad(sh, ((0, 0), (0, np_ - sh.shape[1])))

    w_skip = params["w_skip"] * params["skip_scale"].reshape(1, out_c)

    prepped = {
        "w_input": pad_mm(params["w_input"], kin_p, cp),
        "zero_shift": jnp.zeros((1, cp), jnp.float32),
        "w_skip": pad_mm(w_skip, cp, cp),
        "skip_shift": pad_shift(params["skip_shift"], cp),
        "w1": [], "h1": [], "w2": [], "h2": [], "w3": [], "h3": [],
    }
    for t in range(times):
        s1, h1 = params["n1"][t]
        s2, h2 = params["n2"][t]
        s3, h3 = params["n3"][t]
        prepped["w1"].append(pad_mm(params["w1"] * s1.reshape(1, c4), cp, c4p))
        prepped["h1"].append(pad_shift(h1, c4p))
        w2 = params["w2"] * s2.reshape(1, 1, 1, c4)             # (3,3,c4,c4)
        w2 = jnp.pad(w2, ((0, 0), (0, 0), (0, c4p - c4), (0, c4p - c4)))
        if t == 0:
            prepped["w2"].append(_make_s2d_weights(w2).astype(jnp.bfloat16))
        else:
            prepped["w2"].append(w2.astype(jnp.bfloat16))
        prepped["h2"].append(pad_shift(h2, c4p))
        prepped["w3"].append(pad_mm(params["w3"] * s3.reshape(1, out_c),
                                    c4p, cp))
        prepped["h3"].append(pad_shift(h3, cp))
    return prepped


# ----------------------------------------------------------------------------
# CORblock_S forward
# ----------------------------------------------------------------------------
@functools.partial(jax.jit, static_argnames=("times", "out_channels"))
def corblock_s_forward(inp_nchw, prepped, times, out_channels):
    # TODO(synk): NCHW<->NHWC boundary transposes kept only to match the
    # PyTorch interface; an NHWC caller could drop them.
    x = jnp.transpose(inp_nchw, (0, 2, 3, 1)).astype(jnp.bfloat16)
    kin_p = prepped["w_input"].shape[0]
    if kin_p != x.shape[-1]:
        x = jnp.pad(x, ((0, 0), (0, 0), (0, 0), (0, kin_p - x.shape[-1])))

    # conv_input: 1x1, no BN, no ReLU
    x = conv1x1(x, prepped["w_input"], prepped["zero_shift"], relu=False)

    for t in range(times):
        if t == 0:
            # skip = norm_skip(skip(x)): 1x1 stride-2 conv + BN (no ReLU),
            # routed through the big-M GEMM path on the strided subsample.
            skip = conv1x1(x[:, ::2, ::2, :], prepped["w_skip"],
                           prepped["skip_shift"], relu=False)
        else:
            skip = x

        # conv1 -> norm1 -> ReLU   (1x1)
        x = conv1x1(x, prepped["w1"][t], prepped["h1"][t], relu=True)

        # conv2 -> norm2 -> ReLU   (3x3; stride 2 at t==0 via space-to-depth)
        if t == 0:
            x = space_to_depth_2x2(x)
            x = conv_spatial_s1(x, prepped["w2"][t], prepped["h2"][t],
                                pad=((1, 0), (1, 0)), relu=True)
        else:
            x = conv_spatial_s1(x, prepped["w2"][t], prepped["h2"][t],
                                pad=((1, 1), (1, 1)), relu=True)

        # conv3 -> norm3 -> += skip -> ReLU, fused in one kernel epilogue
        x = conv1x1(x, prepped["w3"][t], prepped["h3"][t], relu=True,
                    residual_nhwc=skip)

    x = x[..., :out_channels]                                  # drop lane pad
    return jnp.transpose(x, (0, 3, 1, 2)).astype(jnp.float32)  # NHWC -> NCHW


# TODO(synk): BatchNorm is folded to inference-mode scale/shift (running
# stats); training-mode batch statistics are not modeled.

if __name__ == "__main__":
    key = jax.random.PRNGKey(0)
    k_in, k_par = jax.random.split(key)

    batch, in_channels, out_channels, spatial, times = 2, 4, 8, 16, 2
    x = jax.random.normal(k_in, (batch, in_channels, spatial, spatial),
                          jnp.float32)
    params = init_corblock_s_params(k_par, in_channels, out_channels, times)
    prepped = prepare_params(params, times)

    out = corblock_s_forward(x, prepped, times, out_channels)
    out = jax.block_until_ready(out)

    expected_shape = (batch, out_channels, spatial // 2, spatial // 2)
    assert out.shape == expected_shape, (out.shape, expected_shape)
    assert bool(jnp.all(jnp.isfinite(out)))
    print("KERNEL_OK")
</pallas_src>

<mosaic_0001>
module attributes {stable_mosaic.version = 11 : i64} {
  func.func @kernel(%arg0: i32, %arg1: i32, %arg2: i32, %arg3: memref<256x128xbf16, #tpu.memory_space<vmem>>, %arg4: memref<128x128xbf16, #tpu.memory_space<vmem>>, %arg5: memref<1x128xf32, #tpu.memory_space<vmem>>, %arg6: memref<256x128xbf16, #tpu.memory_space<vmem>>, %arg7: memref<256x128xf32, #tpu.memory_space<vmem>>) attributes {dimension_semantics = [#tpu.dimension_semantics<parallel>, #tpu.dimension_semantics<parallel>, #tpu.dimension_semantics<arbitrary>], iteration_bounds = array<i64: 2, 1, 1>, scalar_prefetch = 0 : i64, scratch_operands = 1 : i64, tpu.core_type = #tpu.core_type<tc>, window_params = [{transform_indices = @transform_0, window_bounds = array<i64: 256, 128>}, {transform_indices = @transform_1, window_bounds = array<i64: 128, 128>}, {transform_indices = @transform_2, window_bounds = array<i64: 1, 128>}, {transform_indices = @transform_3, window_bounds = array<i64: 256, 128>}]} {
    %c0_i32 = arith.constant 0 : i32
    %0 = arith.cmpi eq, %arg2, %c0_i32 : i32
    %1 = arith.extui %0 : i1 to i32
    %c0_i32_0 = arith.constant 0 : i32
    %2 = arith.cmpi ne, %1, %c0_i32_0 : i32
    scf.if %2 {
      %cst_10 = arith.constant 0.000000e+00 : f32
      %12 = vector.broadcast %cst_10 : f32 to vector<256x128xf32>
      %c0_11 = arith.constant 0 : index
      %c0_12 = arith.constant 0 : index
      %13 = vector.load %arg7[%c0_11, %c0_12] : memref<256x128xf32, #tpu.memory_space<vmem>>, vector<256x128xf32>
      tpu.vector_store %arg7[%c0_11, %c0_12], %12 {strides = array<i32>} : memref<256x128xf32, #tpu.memory_space<vmem>>, vector<256x128xf32>,
    } else {
    }
    %c0 = arith.constant 0 : index
    %c0_1 = arith.constant 0 : index
    %3 = vector.load %arg7[%c0, %c0_1] : memref<256x128xf32, #tpu.memory_space<vmem>>, vector<256x128xf32>
    %c0_2 = arith.constant 0 : index
    %c0_3 = arith.constant 0 : index
    %4 = vector.load %arg3[%c0_2, %c0_3] : memref<256x128xbf16, #tpu.memory_space<vmem>>, vector<256x128xbf16>
    %c0_4 = arith.constant 0 : index
    %c0_5 = arith.constant 0 : index
    %5 = vector.load %arg4[%c0_4, %c0_5] : memref<128x128xbf16, #tpu.memory_space<vmem>>, vector<128x128xbf16>
    %cst = arith.constant dense<0.000000e+00> : vector<256x128xf32>
    %6 = tpu.matmul %4, %5, %cst {dimension_numbers = #tpu.dot_dimension_numbers<[1], [0], [0], [1], [0, 0, 1, 1], [], []>} : vector<256x128xbf16>, vector<128x128xbf16>, vector<256x128xf32> -> vector<256x128xf32>
    %7 = arith.addf %3, %6 : vector<256x128xf32>
    %c0_6 = arith.constant 0 : index
    %c0_7 = arith.constant 0 : index
    %8 = vector.load %arg7[%c0_6, %c0_7] : memref<256x128xf32, #tpu.memory_space<vmem>>, vector<256x128xf32>
    tpu.vector_store %arg7[%c0_6, %c0_7], %7 {strides = array<i32>} : memref<256x128xf32, #tpu.memory_space<vmem>>, vector<256x128xf32>,
    %c0_i32_8 = arith.constant 0 : i32
    %9 = arith.cmpi eq, %arg2, %c0_i32_8 : i32
    %10 = arith.extui %9 : i1 to i32
    %c0_i32_9 = arith.constant 0 : i32
    %11 = arith.cmpi ne, %10, %c0_i32_9 : i32
    scf.if %11 {
      %c0_10 = arith.constant 0 : index
      %c0_11 = arith.constant 0 : index
      %12 = vector.load %arg7[%c0_10, %c0_11] : memref<256x128xf32, #tpu.memory_space<vmem>>, vector<256x128xf32>
      %c0_12 = arith.constant 0 : index
      %c0_13 = arith.constant 0 : index
      %13 = vector.load %arg5[%c0_12, %c0_13] : memref<1x128xf32, #tpu.memory_space<vmem>>, vector<1x128xf32>
      %14 = vector.broadcast %13 : vector<1x128xf32> to vector<256x128xf32>
      %15 = arith.addf %12, %14 : vector<256x128xf32>
      %16 = arith.truncf %15 : vector<256x128xf32> to vector<256x128xbf16>
      %c0_14 = arith.constant 0 : index
      %c0_15 = arith.constant 0 : index
      %17 = vector.load %arg6[%c0_14, %c0_15] : memref<256x128xbf16, #tpu.memory_space<vmem>>, vector<256x128xbf16>
      tpu.vector_store %arg6[%c0_14, %c0_15], %16 {strides = array<i32>} : memref<256x128xbf16, #tpu.memory_space<vmem>>, vector<256x128xbf16>,
    } else {
    }
    return
  }
  func.func @transform_0(%arg0: i32, %arg1: i32, %arg2: i32) -> (i32, i32) {
    %c0_i32 = arith.constant 0 : i32
    return %arg0, %arg2 : i32, i32
  }
  func.func @transform_1(%arg0: i32, %arg1: i32, %arg2: i32) -> (i32, i32) {
    %c0_i32 = arith.constant 0 : i32
    return %arg2, %arg1 : i32, i32
  }
  func.func @transform_2(%arg0: i32, %arg1: i32, %arg2: i32) -> (i32, i32) {
    %c0_i32 = arith.constant 0 : i32
    %c0_i32_0 = arith.constant 0 : i32
    return %c0_i32, %arg1 : i32, i32
  }
  func.func @transform_3(%arg0: i32, %arg1: i32, %arg2: i32) -> (i32, i32) {
    %c0_i32 = arith.constant 0 : i32
    return %arg0, %arg1 : i32, i32
  }
}

module attributes {stable_mosaic.version = 11 : i64} {
  func.func @kernel(%arg0: i32, %arg1: i32, %arg2: i32, %arg3: memref<256x128xbf16, #tpu.memory_space<vmem>>, %arg4: memref<128x128xbf16, #tpu.memory_space<vmem>>, %arg5: memref<1x128xf32, #tpu.memory_space<vmem>>, %arg6: memref<256x128xbf16, #tpu.memory_space<vmem>>, %arg7: memref<256x128xf32, #tpu.memory_space<vmem>>) attributes {dimension_semantics = [#tpu.dimension_semantics<parallel>, #tpu.dimension_semantics<parallel>, #tpu.dimension_semantics<arbitrary>], iteration_bounds = array<i64: 2, 1, 1>, scalar_prefetch = 0 : i64, scratch_operands = 1 : i64, tpu.core_type = #tpu.core_type<tc>, window_params = [{transform_indices = @transform_0, window_bounds = array<i64: 256, 128>}, {transform_indices = @transform_1, window_bounds = array<i64: 128, 128>}, {transform_indices = @transform_2, window_bounds = array<i64: 1, 128>}, {transform_indices = @transform_3, window_bounds = array<i64: 256, 128>}]} {
    %c0_i32 = arith.constant 0 : i32
    %0 = arith.cmpi eq, %arg2, %c0_i32 : i32
    %1 = arith.extui %0 : i1 to i32
    %c0_i32_0 = arith.constant 0 : i32
    %2 = arith.cmpi ne, %1, %c0_i32_0 : i32
    scf.if %2 {
      %cst_10 = arith.constant 0.000000e+00 : f32
      %12 = vector.broadcast %cst_10 : f32 to vector<256x128xf32>
      %c0_11 = arith.constant 0 : index
      %c0_12 = arith.constant 0 : index
      %13 = vector.load %arg7[%c0_11, %c0_12] : memref<256x128xf32, #tpu.memory_space<vmem>>, vector<256x128xf32>
      tpu.vector_store %arg7[%c0_11, %c0_12], %12 {strides = array<i32>} : memref<256x128xf32, #tpu.memory_space<vmem>>, vector<256x128xf32>,
    } else {
    }
    %c0 = arith.constant 0 : index
    %c0_1 = arith.constant 0 : index
    %3 = vector.load %arg7[%c0, %c0_1] : memref<256x128xf32, #tpu.memory_space<vmem>>, vector<256x128xf32>
    %c0_2 = arith.constant 0 : index
    %c0_3 = arith.constant 0 : index
    %4 = vector.load %arg3[%c0_2, %c0_3] : memref<256x128xbf16, #tpu.memory_space<vmem>>, vector<256x128xbf16>
    %c0_4 = arith.constant 0 : index
    %c0_5 = arith.constant 0 : index
    %5 = vector.load %arg4[%c0_4, %c0_5] : memref<128x128xbf16, #tpu.memory_space<vmem>>, vector<128x128xbf16>
    %cst = arith.constant dense<0.000000e+00> : vector<256x128xf32>
    %6 = tpu.matmul %4, %5, %cst {dimension_numbers = #tpu.dot_dimension_numbers<[1], [0], [0], [1], [0, 0, 1, 1], [], []>} : vector<256x128xbf16>, vector<128x128xbf16>, vector<256x128xf32> -> vector<256x128xf32>
    %7 = arith.addf %3, %6 : vector<256x128xf32>
    %c0_6 = arith.constant 0 : index
    %c0_7 = arith.constant 0 : index
    %8 = vector.load %arg7[%c0_6, %c0_7] : memref<256x128xf32, #tpu.memory_space<vmem>>, vector<256x128xf32>
    tpu.vector_store %arg7[%c0_6, %c0_7], %7 {strides = array<i32>} : memref<256x128xf32, #tpu.memory_space<vmem>>, vector<256x128xf32>,
    %c0_i32_8 = arith.constant 0 : i32
    %9 = arith.cmpi eq, %arg2, %c0_i32_8 : i32
    %10 = arith.extui %9 : i1 to i32
    %c0_i32_9 = arith.constant 0 : i32
    %11 = arith.cmpi ne, %10, %c0_i32_9 : i32
    scf.if %11 {
      %c0_10 = arith.constant 0 : index
      %c0_11 = arith.constant 0 : index
      %12 = vector.load %arg7[%c0_10, %c0_11] : memref<256x128xf32, #tpu.memory_space<vmem>>, vector<256x128xf32>
      %c0_12 = arith.constant 0 : index
      %c0_13 = arith.constant 0 : index
      %13 = vector.load %arg5[%c0_12, %c0_13] : memref<1x128xf32, #tpu.memory_space<vmem>>, vector<1x128xf32>
      %14 = vector.broadcast %13 : vector<1x128xf32> to vector<256x128xf32>
      %15 = arith.addf %12, %14 : vector<256x128xf32>
      %cst_14 = arith.constant 0.000000e+00 : f32
      %16 = vector.broadcast %cst_14 : f32 to vector<256x128xf32>
      %17 = arith.maximumf %15, %16 : vector<256x128xf32>
      %18 = arith.truncf %17 : vector<256x128xf32> to vector<256x128xbf16>
      %c0_15 = arith.constant 0 : index
      %c0_16 = arith.constant 0 : index
      %19 = vector.load %arg6[%c0_15, %c0_16] : memref<256x128xbf16, #tpu.memory_space<vmem>>, vector<256x128xbf16>
      tpu.vector_store %arg6[%c0_15, %c0_16], %18 {strides = array<i32>} : memref<256x128xbf16, #tpu.memory_space<vmem>>, vector<256x128xbf16>,
    } else {
    }
    return
  }
  func.func @transform_0(%arg0: i32, %arg1: i32, %arg2: i32) -> (i32, i32) {
    %c0_i32 = arith.constant 0 : i32
    return %arg0, %arg2 : i32, i32
  }
  func.func @transform_1(%arg0: i32, %arg1: i32, %arg2: i32) -> (i32, i32) {
    %c0_i32 = arith.constant 0 : i32
    return %arg2, %arg1 : i32, i32
  }
  func.func @transform_2(%arg0: i32, %arg1: i32, %arg2: i32) -> (i32, i32) {
    %c0_i32 = arith.constant 0 : i32
    %c0_i32_0 = arith.constant 0 : i32
    return %c0_i32, %arg1 : i32, i32
  }
  func.func @transform_3(%arg0: i32, %arg1: i32, %arg2: i32) -> (i32, i32) {
    %c0_i32 = arith.constant 0 : i32
    return %arg0, %arg1 : i32, i32
  }
}

module attributes {stable_mosaic.version = 11 : i64} {
  func.func @kernel(%arg0: i32, %arg1: i32, %arg2: i32, %arg3: memref<128x128xbf16, #tpu.memory_space<vmem>>, %arg4: memref<128x128xbf16, #tpu.memory_space<vmem>>, %arg5: memref<1x128xf32, #tpu.memory_space<vmem>>, %arg6: memref<128x128xbf16, #tpu.memory_space<vmem>>, %arg7: memref<128x128xf32, #tpu.memory_space<vmem>>) attributes {dimension_semantics = [#tpu.dimension_semantics<parallel>, #tpu.dimension_semantics<parallel>, #tpu.dimension_semantics<arbitrary>], iteration_bounds = array<i64: 1, 1, 1>, scalar_prefetch = 0 : i64, scratch_operands = 1 : i64, tpu.core_type = #tpu.core_type<tc>, window_params = [{transform_indices = @transform_0, window_bounds = array<i64: 128, 128>}, {transform_indices = @transform_1, window_bounds = array<i64: 128, 128>}, {transform_indices = @transform_2, window_bounds = array<i64: 1, 128>}, {transform_indices = @transform_3, window_bounds = array<i64: 128, 128>}]} {
    %c0_i32 = arith.constant 0 : i32
    %0 = arith.cmpi eq, %arg2, %c0_i32 : i32
    %1 = arith.extui %0 : i1 to i32
    %c0_i32_0 = arith.constant 0 : i32
    %2 = arith.cmpi ne, %1, %c0_i32_0 : i32
    scf.if %2 {
      %cst_10 = arith.constant 0.000000e+00 : f32
      %12 = vector.broadcast %cst_10 : f32 to vector<128x128xf32>
      %c0_11 = arith.constant 0 : index
      %c0_12 = arith.constant 0 : index
      %13 = vector.load %arg7[%c0_11, %c0_12] : memref<128x128xf32, #tpu.memory_space<vmem>>, vector<128x128xf32>
      tpu.vector_store %arg7[%c0_11, %c0_12], %12 {strides = array<i32>} : memref<128x128xf32, #tpu.memory_space<vmem>>, vector<128x128xf32>,
    } else {
    }
    %c0 = arith.constant 0 : index
    %c0_1 = arith.constant 0 : index
    %3 = vector.load %arg7[%c0, %c0_1] : memref<128x128xf32, #tpu.memory_space<vmem>>, vector<128x128xf32>
    %c0_2 = arith.constant 0 : index
    %c0_3 = arith.constant 0 : index
    %4 = vector.load %arg3[%c0_2, %c0_3] : memref<128x128xbf16, #tpu.memory_space<vmem>>, vector<128x128xbf16>
    %c0_4 = arith.constant 0 : index
    %c0_5 = arith.constant 0 : index
    %5 = vector.load %arg4[%c0_4, %c0_5] : memref<128x128xbf16, #tpu.memory_space<vmem>>, vector<128x128xbf16>
    %cst = arith.constant dense<0.000000e+00> : vector<128x128xf32>
    %6 = tpu.matmul %4, %5, %cst {dimension_numbers = #tpu.dot_dimension_numbers<[1], [0], [0], [1], [0, 0, 1, 1], [], []>} : vector<128x128xbf16>, vector<128x128xbf16>, vector<128x128xf32> -> vector<128x128xf32>
    %7 = arith.addf %3, %6 : vector<128x128xf32>
    %c0_6 = arith.constant 0 : index
    %c0_7 = arith.constant 0 : index
    %8 = vector.load %arg7[%c0_6, %c0_7] : memref<128x128xf32, #tpu.memory_space<vmem>>, vector<128x128xf32>
    tpu.vector_store %arg7[%c0_6, %c0_7], %7 {strides = array<i32>} : memref<128x128xf32, #tpu.memory_space<vmem>>, vector<128x128xf32>,
    %c0_i32_8 = arith.constant 0 : i32
    %9 = arith.cmpi eq, %arg2, %c0_i32_8 : i32
    %10 = arith.extui %9 : i1 to i32
    %c0_i32_9 = arith.constant 0 : i32
    %11 = arith.cmpi ne, %10, %c0_i32_9 : i32
    scf.if %11 {
      %c0_10 = arith.constant 0 : index
      %c0_11 = arith.constant 0 : index
      %12 = vector.load %arg7[%c0_10, %c0_11] : memref<128x128xf32, #tpu.memory_space<vmem>>, vector<128x128xf32>
      %c0_12 = arith.constant 0 : index
      %c0_13 = arith.constant 0 : index
      %13 = vector.load %arg5[%c0_12, %c0_13] : memref<1x128xf32, #tpu.memory_space<vmem>>, vector<1x128xf32>
      %14 = vector.broadcast %13 : vector<1x128xf32> to vector<128x128xf32>
      %15 = arith.addf %12, %14 : vector<128x128xf32>
      %16 = arith.truncf %15 : vector<128x128xf32> to vector<128x128xbf16>
      %c0_14 = arith.constant 0 : index
      %c0_15 = arith.constant 0 : index
      %17 = vector.load %arg6[%c0_14, %c0_15] : memref<128x128xbf16, #tpu.memory_space<vmem>>, vector<128x128xbf16>
      tpu.vector_store %arg6[%c0_14, %c0_15], %16 {strides = array<i32>} : memref<128x128xbf16, #tpu.memory_space<vmem>>, vector<128x128xbf16>,
    } else {
    }
    return
  }
  func.func @transform_0(%arg0: i32, %arg1: i32, %arg2: i32) -> (i32, i32) {
    %c0_i32 = arith.constant 0 : i32
    return %arg0, %arg2 : i32, i32
  }
  func.func @transform_1(%arg0: i32, %arg1: i32, %arg2: i32) -> (i32, i32) {
    %c0_i32 = arith.constant 0 : i32
    return %arg2, %arg1 : i32, i32
  }
  func.func @transform_2(%arg0: i32, %arg1: i32, %arg2: i32) -> (i32, i32) {
    %c0_i32 = arith.constant 0 : i32
    %c0_i32_0 = arith.constant 0 : i32
    return %c0_i32, %arg1 : i32, i32
  }
  func.func @transform_3(%arg0: i32, %arg1: i32, %arg2: i32) -> (i32, i32) {
    %c0_i32 = arith.constant 0 : i32
    return %arg0, %arg1 : i32, i32
  }
}

module attributes {stable_mosaic.version = 11 : i64} {
  func.func @kernel(%arg0: i32, %arg1: i32, %arg2: i32, %arg3: memref<1x9x9x512xbf16, #tpu.memory_space<vmem>>, %arg4: memref<2x2x512x128xbf16, #tpu.memory_space<vmem>>, %arg5: memref<1x128xf32, #tpu.memory_space<vmem>>, %arg6: memref<1x8x8x128xbf16, #tpu.memory_space<vmem>>, %arg7: memref<64x128xf32, #tpu.memory_space<vmem>>) attributes {dimension_semantics = [#tpu.dimension_semantics<parallel>, #tpu.dimension_semantics<parallel>, #tpu.dimension_semantics<arbitrary>], iteration_bounds = array<i64: 2, 1, 1>, scalar_prefetch = 0 : i64, scratch_operands = 1 : i64, tpu.core_type = #tpu.core_type<tc>, window_params = [{transform_indices = @transform_0, window_bounds = array<i64: 1, 9, 9, 512>}, {transform_indices = @transform_1, window_bounds = array<i64: 2, 2, 512, 128>}, {transform_indices = @transform_2, window_bounds = array<i64: 1, 128>}, {transform_indices = @transform_3, window_bounds = array<i64: 1, 8, 8, 128>}]} {
    %c0_i32 = arith.constant 0 : i32
    %0 = arith.cmpi eq, %arg2, %c0_i32 : i32
    %1 = arith.extui %0 : i1 to i32
    %c0_i32_0 = arith.constant 0 : i32
    %2 = arith.cmpi ne, %1, %c0_i32_0 : i32
    scf.if %2 {
      %cst_40 = arith.constant 0.000000e+00 : f32
      %36 = vector.broadcast %cst_40 : f32 to vector<64x128xf32>
      %c0_41 = arith.constant 0 : index
      %c0_42 = arith.constant 0 : index
      %37 = vector.load %arg7[%c0_41, %c0_42] : memref<64x128xf32, #tpu.memory_space<vmem>>, vector<64x128xf32>
      tpu.vector_store %arg7[%c0_41, %c0_42], %36 {strides = array<i32>} : memref<64x128xf32, #tpu.memory_space<vmem>>, vector<64x128xf32>,
    } else {
    }
    %c0 = arith.constant 0 : index
    %c0_1 = arith.constant 0 : index
    %c0_2 = arith.constant 0 : index
    %c0_3 = arith.constant 0 : index
    %3 = vector.load %arg3[%c0, %c0_1, %c0_2, %c0_3] : memref<1x9x9x512xbf16, #tpu.memory_space<vmem>>, vector<1x8x8x512xbf16>
    %4 = vector.shape_cast %3 : vector<1x8x8x512xbf16> to vector<8x8x512xbf16>
    %5 = vector.shape_cast %4 : vector<8x8x512xbf16> to vector<64x512xbf16>
    %c0_4 = arith.constant 0 : index
    %c0_5 = arith.constant 0 : index
    %c0_6 = arith.constant 0 : index
    %c0_7 = arith.constant 0 : index
    %6 = vector.load %arg4[%c0_4, %c0_5, %c0_6, %c0_7] : memref<2x2x512x128xbf16, #tpu.memory_space<vmem>>, vector<1x1x512x128xbf16>
    %7 = vector.shape_cast %6 : vector<1x1x512x128xbf16> to vector<512x128xbf16>
    %cst = arith.constant dense<0.000000e+00> : vector<64x128xf32>
    %8 = tpu.matmul %5, %7, %cst {dimension_numbers = #tpu.dot_dimension_numbers<[1], [0], [0], [1], [0, 0, 1, 1], [], []>} : vector<64x512xbf16>, vector<512x128xbf16>, vector<64x128xf32> -> vector<64x128xf32>
    %c0_8 = arith.constant 0 : index
    %c0_9 = arith.constant 0 : index
    %c1 = arith.constant 1 : index
    %c0_10 = arith.constant 0 : index
    %9 = vector.load %arg3[%c0_8, %c0_9, %c1, %c0_10] : memref<1x9x9x512xbf16, #tpu.memory_space<vmem>>, vector<1x8x8x512xbf16>
    %10 = vector.shape_cast %9 : vector<1x8x8x512xbf16> to vector<8x8x512xbf16>
    %11 = vector.shape_cast %10 : vector<8x8x512xbf16> to vector<64x512xbf16>
    %c0_11 = arith.constant 0 : index
    %c1_12 = arith.constant 1 : index
    %c0_13 = arith.constant 0 : index
    %c0_14 = arith.constant 0 : index
    %12 = vector.load %arg4[%c0_11, %c1_12, %c0_13, %c0_14] : memref<2x2x512x128xbf16, #tpu.memory_space<vmem>>, vector<1x1x512x128xbf16>
    %13 = vector.shape_cast %12 : vector<1x1x512x128xbf16> to vector<512x128xbf16>
    %cst_15 = arith.constant dense<0.000000e+00> : vector<64x128xf32>
    %14 = tpu.matmul %11, %13, %cst_15 {dimension_numbers = #tpu.dot_dimension_numbers<[1], [0], [0], [1], [0, 0, 1, 1], [], []>} : vector<64x512xbf16>, vector<512x128xbf16>, vector<64x128xf32> -> vector<64x128xf32>
    %15 = arith.addf %8, %14 : vector<64x128xf32>
    %c0_16 = arith.constant 0 : index
    %c1_17 = arith.constant 1 : index
    %c0_18 = arith.constant 0 : index
    %c0_19 = arith.constant 0 : index
    %16 = vector.load %arg3[%c0_16, %c1_17, %c0_18, %c0_19] : memref<1x9x9x512xbf16, #tpu.memory_space<vmem>>, vector<1x8x8x512xbf16>
    %17 = vector.shape_cast %16 : vector<1x8x8x512xbf16> to vector<8x8x512xbf16>
    %18 = vector.shape_cast %17 : vector<8x8x512xbf16> to vector<64x512xbf16>
    %c1_20 = arith.constant 1 : index
    %c0_21 = arith.constant 0 : index
    %c0_22 = arith.constant 0 : index
    %c0_23 = arith.constant 0 : index
    %19 = vector.load %arg4[%c1_20, %c0_21, %c0_22, %c0_23] : memref<2x2x512x128xbf16, #tpu.memory_space<vmem>>, vector<1x1x512x128xbf16>
    %20 = vector.shape_cast %19 : vector<1x1x512x128xbf16> to vector<512x128xbf16>
    %cst_24 = arith.constant dense<0.000000e+00> : vector<64x128xf32>
    %21 = tpu.matmul %18, %20, %cst_24 {dimension_numbers = #tpu.dot_dimension_numbers<[1], [0], [0], [1], [0, 0, 1, 1], [], []>} : vector<64x512xbf16>, vector<512x128xbf16>, vector<64x128xf32> -> vector<64x128xf32>
    %22 = arith.addf %15, %21 : vector<64x128xf32>
    %c0_25 = arith.constant 0 : index
    %c1_26 = arith.constant 1 : index
    %c1_27 = arith.constant 1 : index
    %c0_28 = arith.constant 0 : index
    %23 = vector.load %arg3[%c0_25, %c1_26, %c1_27, %c0_28] : memref<1x9x9x512xbf16, #tpu.memory_space<vmem>>, vector<1x8x8x512xbf16>
    %24 = vector.shape_cast %23 : vector<1x8x8x512xbf16> to vector<8x8x512xbf16>
    %25 = vector.shape_cast %24 : vector<8x8x512xbf16> to vector<64x512xbf16>
    %c1_29 = arith.constant 1 : index
    %c1_30 = arith.constant 1 : index
    %c0_31 = arith.constant 0 : index
    %c0_32 = arith.constant 0 : index
    %26 = vector.load %arg4[%c1_29, %c1_30, %c0_31, %c0_32] : memref<2x2x512x128xbf16, #tpu.memory_space<vmem>>, vector<1x1x512x128xbf16>
    %27 = vector.shape_cast %26 : vector<1x1x512x128xbf16> to vector<512x128xbf16>
    %cst_33 = arith.constant dense<0.000000e+00> : vector<64x128xf32>
    %28 = tpu.matmul %25, %27, %cst_33 {dimension_numbers = #tpu.dot_dimension_numbers<[1], [0], [0], [1], [0, 0, 1, 1], [], []>} : vector<64x512xbf16>, vector<512x128xbf16>, vector<64x128xf32> -> vector<64x128xf32>
    %29 = arith.addf %22, %28 : vector<64x128xf32>
    %c0_34 = arith.constant 0 : index
    %c0_35 = arith.constant 0 : index
    %30 = vector.load %arg7[%c0_34, %c0_35] : memref<64x128xf32, #tpu.memory_space<vmem>>, vector<64x128xf32>
    %31 = arith.addf %30, %29 : vector<64x128xf32>
    %c0_36 = arith.constant 0 : index
    %c0_37 = arith.constant 0 : index
    %32 = vector.load %arg7[%c0_36, %c0_37] : memref<64x128xf32, #tpu.memory_space<vmem>>, vector<64x128xf32>
    tpu.vector_store %arg7[%c0_36, %c0_37], %31 {strides = array<i32>} : memref<64x128xf32, #tpu.memory_space<vmem>>, vector<64x128xf32>,
    %c0_i32_38 = arith.constant 0 : i32
    %33 = arith.cmpi eq, %arg2, %c0_i32_38 : i32
    %34 = arith.extui %33 : i1 to i32
    %c0_i32_39 = arith.constant 0 : i32
    %35 = arith.cmpi ne, %34, %c0_i32_39 : i32
    scf.if %35 {
      %c0_40 = arith.constant 0 : index
      %c0_41 = arith.constant 0 : index
      %36 = vector.load %arg7[%c0_40, %c0_41] : memref<64x128xf32, #tpu.memory_space<vmem>>, vector<64x128xf32>
      %c0_42 = arith.constant 0 : index
      %c0_43 = arith.constant 0 : index
      %37 = vector.load %arg5[%c0_42, %c0_43] : memref<1x128xf32, #tpu.memory_space<vmem>>, vector<1x128xf32>
      %38 = vector.broadcast %37 : vector<1x128xf32> to vector<64x128xf32>
      %39 = arith.addf %36, %38 : vector<64x128xf32>
      %cst_44 = arith.constant 0.000000e+00 : f32
      %40 = vector.broadcast %cst_44 : f32 to vector<64x128xf32>
      %41 = arith.maximumf %39, %40 : vector<64x128xf32>
      %42 = vector.shape_cast %41 : vector<64x128xf32> to vector<1x8x8x128xf32>
      %43 = arith.truncf %42 : vector<1x8x8x128xf32> to vector<1x8x8x128xbf16>
      %c0_45 = arith.constant 0 : index
      %c0_46 = arith.constant 0 : index
      %c0_47 = arith.constant 0 : index
      %c0_48 = arith.constant 0 : index
      %44 = vector.load %arg6[%c0_45, %c0_46, %c0_47, %c0_48] : memref<1x8x8x128xbf16, #tpu.memory_space<vmem>>, vector<1x8x8x128xbf16>
      tpu.vector_store %arg6[%c0_45, %c0_46, %c0_47, %c0_48], %43 {strides = array<i32>} : memref<1x8x8x128xbf16, #tpu.memory_space<vmem>>, vector<1x8x8x128xbf16>,
    } else {
    }
    return
  }
  func.func @transform_0(%arg0: i32, %arg1: i32, %arg2: i32) -> (i32, i32, i32, i32) {
    %c0_i32 = arith.constant 0 : i32
    %c0_i32_0 = arith.constant 0 : i32
    %c0_i32_1 = arith.constant 0 : i32
    return %arg0, %c0_i32, %c0_i32_0, %arg2 : i32, i32, i32, i32
  }
  func.func @transform_1(%arg0: i32, %arg1: i32, %arg2: i32) -> (i32, i32, i32, i32) {
    %c0_i32 = arith.constant 0 : i32
    %c0_i32_0 = arith.constant 0 : i32
    %c0_i32_1 = arith.constant 0 : i32
    return %c0_i32, %c0_i32_0, %arg2, %arg1 : i32, i32, i32, i32
  }
  func.func @transform_2(%arg0: i32, %arg1: i32, %arg2: i32) -> (i32, i32) {
    %c0_i32 = arith.constant 0 : i32
    %c0_i32_0 = arith.constant 0 : i32
    return %c0_i32, %arg1 : i32, i32
  }
  func.func @transform_3(%arg0: i32, %arg1: i32, %arg2: i32) -> (i32, i32, i32, i32) {
    %c0_i32 = arith.constant 0 : i32
    %c0_i32_0 = arith.constant 0 : i32
    %c0_i32_1 = arith.constant 0 : i32
    return %arg0, %c0_i32, %c0_i32_0, %arg1 : i32, i32, i32, i32
  }
}

module attributes {stable_mosaic.version = 11 : i64} {
  func.func @kernel(%arg0: i32, %arg1: i32, %arg2: i32, %arg3: memref<128x128xbf16, #tpu.memory_space<vmem>>, %arg4: memref<128x128xbf16, #tpu.memory_space<vmem>>, %arg5: memref<1x128xf32, #tpu.memory_space<vmem>>, %arg6: memref<128x128xbf16, #tpu.memory_space<vmem>>, %arg7: memref<128x128xf32, #tpu.memory_space<vmem>>) attributes {dimension_semantics = [#tpu.dimension_semantics<parallel>, #tpu.dimension_semantics<parallel>, #tpu.dimension_semantics<arbitrary>], iteration_bounds = array<i64: 1, 1, 1>, scalar_prefetch = 0 : i64, scratch_operands = 1 : i64, tpu.core_type = #tpu.core_type<tc>, window_params = [{transform_indices = @transform_0, window_bounds = array<i64: 128, 128>}, {transform_indices = @transform_1, window_bounds = array<i64: 128, 128>}, {transform_indices = @transform_2, window_bounds = array<i64: 1, 128>}, {transform_indices = @transform_3, window_bounds = array<i64: 128, 128>}]} {
    %c0_i32 = arith.constant 0 : i32
    %0 = arith.cmpi eq, %arg2, %c0_i32 : i32
    %1 = arith.extui %0 : i1 to i32
    %c0_i32_0 = arith.constant 0 : i32
    %2 = arith.cmpi ne, %1, %c0_i32_0 : i32
    scf.if %2 {
      %cst_10 = arith.constant 0.000000e+00 : f32
      %12 = vector.broadcast %cst_10 : f32 to vector<128x128xf32>
      %c0_11 = arith.constant 0 : index
      %c0_12 = arith.constant 0 : index
      %13 = vector.load %arg7[%c0_11, %c0_12] : memref<128x128xf32, #tpu.memory_space<vmem>>, vector<128x128xf32>
      tpu.vector_store %arg7[%c0_11, %c0_12], %12 {strides = array<i32>} : memref<128x128xf32, #tpu.memory_space<vmem>>, vector<128x128xf32>,
    } else {
    }
    %c0 = arith.constant 0 : index
    %c0_1 = arith.constant 0 : index
    %3 = vector.load %arg7[%c0, %c0_1] : memref<128x128xf32, #tpu.memory_space<vmem>>, vector<128x128xf32>
    %c0_2 = arith.constant 0 : index
    %c0_3 = arith.constant 0 : index
    %4 = vector.load %arg3[%c0_2, %c0_3] : memref<128x128xbf16, #tpu.memory_space<vmem>>, vector<128x128xbf16>
    %c0_4 = arith.constant 0 : index
    %c0_5 = arith.constant 0 : index
    %5 = vector.load %arg4[%c0_4, %c0_5] : memref<128x128xbf16, #tpu.memory_space<vmem>>, vector<128x128xbf16>
    %cst = arith.constant dense<0.000000e+00> : vector<128x128xf32>
    %6 = tpu.matmul %4, %5, %cst {dimension_numbers = #tpu.dot_dimension_numbers<[1], [0], [0], [1], [0, 0, 1, 1], [], []>} : vector<128x128xbf16>, vector<128x128xbf16>, vector<128x128xf32> -> vector<128x128xf32>
    %7 = arith.addf %3, %6 : vector<128x128xf32>
    %c0_6 = arith.constant 0 : index
    %c0_7 = arith.constant 0 : index
    %8 = vector.load %arg7[%c0_6, %c0_7] : memref<128x128xf32, #tpu.memory_space<vmem>>, vector<128x128xf32>
    tpu.vector_store %arg7[%c0_6, %c0_7], %7 {strides = array<i32>} : memref<128x128xf32, #tpu.memory_space<vmem>>, vector<128x128xf32>,
    %c0_i32_8 = arith.constant 0 : i32
    %9 = arith.cmpi eq, %arg2, %c0_i32_8 : i32
    %10 = arith.extui %9 : i1 to i32
    %c0_i32_9 = arith.constant 0 : i32
    %11 = arith.cmpi ne, %10, %c0_i32_9 : i32
    scf.if %11 {
      %c0_10 = arith.constant 0 : index
      %c0_11 = arith.constant 0 : index
      %12 = vector.load %arg7[%c0_10, %c0_11] : memref<128x128xf32, #tpu.memory_space<vmem>>, vector<128x128xf32>
      %c0_12 = arith.constant 0 : index
      %c0_13 = arith.constant 0 : index
      %13 = vector.load %arg5[%c0_12, %c0_13] : memref<1x128xf32, #tpu.memory_space<vmem>>, vector<1x128xf32>
      %14 = vector.broadcast %13 : vector<1x128xf32> to vector<128x128xf32>
      %15 = arith.addf %12, %14 : vector<128x128xf32>
      %cst_14 = arith.constant 0.000000e+00 : f32
      %16 = vector.broadcast %cst_14 : f32 to vector<128x128xf32>
      %17 = arith.maximumf %15, %16 : vector<128x128xf32>
      %18 = arith.truncf %17 : vector<128x128xf32> to vector<128x128xbf16>
      %c0_15 = arith.constant 0 : index
      %c0_16 = arith.constant 0 : index
      %19 = vector.load %arg6[%c0_15, %c0_16] : memref<128x128xbf16, #tpu.memory_space<vmem>>, vector<128x128xbf16>
      tpu.vector_store %arg6[%c0_15, %c0_16], %18 {strides = array<i32>} : memref<128x128xbf16, #tpu.memory_space<vmem>>, vector<128x128xbf16>,
    } else {
    }
    return
  }
  func.func @transform_0(%arg0: i32, %arg1: i32, %arg2: i32) -> (i32, i32) {
    %c0_i32 = arith.constant 0 : i32
    return %arg0, %arg2 : i32, i32
  }
  func.func @transform_1(%arg0: i32, %arg1: i32, %arg2: i32) -> (i32, i32) {
    %c0_i32 = arith.constant 0 : i32
    return %arg2, %arg1 : i32, i32
  }
  func.func @transform_2(%arg0: i32, %arg1: i32, %arg2: i32) -> (i32, i32) {
    %c0_i32 = arith.constant 0 : i32
    %c0_i32_0 = arith.constant 0 : i32
    return %c0_i32, %arg1 : i32, i32
  }
  func.func @transform_3(%arg0: i32, %arg1: i32, %arg2: i32) -> (i32, i32) {
    %c0_i32 = arith.constant 0 : i32
    return %arg0, %arg1 : i32, i32
  }
}

module attributes {stable_mosaic.version = 11 : i64} {
  func.func @kernel(%arg0: i32, %arg1: i32, %arg2: i32, %arg3: memref<128x128xbf16, #tpu.memory_space<vmem>>, %arg4: memref<128x128xbf16, #tpu.memory_space<vmem>>, %arg5: memref<1x128xf32, #tpu.memory_space<vmem>>, %arg6: memref<128x128xbf16, #tpu.memory_space<vmem>>, %arg7: memref<128x128xbf16, #tpu.memory_space<vmem>>, %arg8: memref<128x128xf32, #tpu.memory_space<vmem>>) attributes {dimension_semantics = [#tpu.dimension_semantics<parallel>, #tpu.dimension_semantics<parallel>, #tpu.dimension_semantics<arbitrary>], iteration_bounds = array<i64: 1, 1, 1>, scalar_prefetch = 0 : i64, scratch_operands = 1 : i64, tpu.core_type = #tpu.core_type<tc>, window_params = [{transform_indices = @transform_0, window_bounds = array<i64: 128, 128>}, {transform_indices = @transform_1, window_bounds = array<i64: 128, 128>}, {transform_indices = @transform_2, window_bounds = array<i64: 1, 128>}, {transform_indices = @transform_3, window_bounds = array<i64: 128, 128>}, {transform_indices = @transform_4, window_bounds = array<i64: 128, 128>}]} {
    %c0_i32 = arith.constant 0 : i32
    %0 = arith.cmpi eq, %arg2, %c0_i32 : i32
    %1 = arith.extui %0 : i1 to i32
    %c0_i32_0 = arith.constant 0 : i32
    %2 = arith.cmpi ne, %1, %c0_i32_0 : i32
    scf.if %2 {
      %cst_10 = arith.constant 0.000000e+00 : f32
      %12 = vector.broadcast %cst_10 : f32 to vector<128x128xf32>
      %c0_11 = arith.constant 0 : index
      %c0_12 = arith.constant 0 : index
      %13 = vector.load %arg8[%c0_11, %c0_12] : memref<128x128xf32, #tpu.memory_space<vmem>>, vector<128x128xf32>
      tpu.vector_store %arg8[%c0_11, %c0_12], %12 {strides = array<i32>} : memref<128x128xf32, #tpu.memory_space<vmem>>, vector<128x128xf32>,
    } else {
    }
    %c0 = arith.constant 0 : index
    %c0_1 = arith.constant 0 : index
    %3 = vector.load %arg8[%c0, %c0_1] : memref<128x128xf32, #tpu.memory_space<vmem>>, vector<128x128xf32>
    %c0_2 = arith.constant 0 : index
    %c0_3 = arith.constant 0 : index
    %4 = vector.load %arg3[%c0_2, %c0_3] : memref<128x128xbf16, #tpu.memory_space<vmem>>, vector<128x128xbf16>
    %c0_4 = arith.constant 0 : index
    %c0_5 = arith.constant 0 : index
    %5 = vector.load %arg4[%c0_4, %c0_5] : memref<128x128xbf16, #tpu.memory_space<vmem>>, vector<128x128xbf16>
    %cst = arith.constant dense<0.000000e+00> : vector<128x128xf32>
    %6 = tpu.matmul %4, %5, %cst {dimension_numbers = #tpu.dot_dimension_numbers<[1], [0], [0], [1], [0, 0, 1, 1], [], []>} : vector<128x128xbf16>, vector<128x128xbf16>, vector<128x128xf32> -> vector<128x128xf32>
    %7 = arith.addf %3, %6 : vector<128x128xf32>
    %c0_6 = arith.constant 0 : index
    %c0_7 = arith.constant 0 : index
    %8 = vector.load %arg8[%c0_6, %c0_7] : memref<128x128xf32, #tpu.memory_space<vmem>>, vector<128x128xf32>
    tpu.vector_store %arg8[%c0_6, %c0_7], %7 {strides = array<i32>} : memref<128x128xf32, #tpu.memory_space<vmem>>, vector<128x128xf32>,
    %c0_i32_8 = arith.constant 0 : i32
    %9 = arith.cmpi eq, %arg2, %c0_i32_8 : i32
    %10 = arith.extui %9 : i1 to i32
    %c0_i32_9 = arith.constant 0 : i32
    %11 = arith.cmpi ne, %10, %c0_i32_9 : i32
    scf.if %11 {
      %c0_10 = arith.constant 0 : index
      %c0_11 = arith.constant 0 : index
      %12 = vector.load %arg8[%c0_10, %c0_11] : memref<128x128xf32, #tpu.memory_space<vmem>>, vector<128x128xf32>
      %c0_12 = arith.constant 0 : index
      %c0_13 = arith.constant 0 : index
      %13 = vector.load %arg5[%c0_12, %c0_13] : memref<1x128xf32, #tpu.memory_space<vmem>>, vector<1x128xf32>
      %14 = vector.broadcast %13 : vector<1x128xf32> to vector<128x128xf32>
      %15 = arith.addf %12, %14 : vector<128x128xf32>
      %c0_14 = arith.constant 0 : index
      %c0_15 = arith.constant 0 : index
      %16 = vector.load %arg6[%c0_14, %c0_15] : memref<128x128xbf16, #tpu.memory_space<vmem>>, vector<128x128xbf16>
      %17 = arith.extf %16 : vector<128x128xbf16> to vector<128x128xf32>
      %18 = arith.addf %15, %17 : vector<128x128xf32>
      %cst_16 = arith.constant 0.000000e+00 : f32
      %19 = vector.broadcast %cst_16 : f32 to vector<128x128xf32>
      %20 = arith.maximumf %18, %19 : vector<128x128xf32>
      %21 = arith.truncf %20 : vector<128x128xf32> to vector<128x128xbf16>
      %c0_17 = arith.constant 0 : index
      %c0_18 = arith.constant 0 : index
      %22 = vector.load %arg7[%c0_17, %c0_18] : memref<128x128xbf16, #tpu.memory_space<vmem>>, vector<128x128xbf16>
      tpu.vector_store %arg7[%c0_17, %c0_18], %21 {strides = array<i32>} : memref<128x128xbf16, #tpu.memory_space<vmem>>, vector<128x128xbf16>,
    } else {
    }
    return
  }
  func.func @transform_0(%arg0: i32, %arg1: i32, %arg2: i32) -> (i32, i32) {
    %c0_i32 = arith.constant 0 : i32
    return %arg0, %arg2 : i32, i32
  }
  func.func @transform_1(%arg0: i32, %arg1: i32, %arg2: i32) -> (i32, i32) {
    %c0_i32 = arith.constant 0 : i32
    return %arg2, %arg1 : i32, i32
  }
  func.func @transform_2(%arg0: i32, %arg1: i32, %arg2: i32) -> (i32, i32) {
    %c0_i32 = arith.constant 0 : i32
    %c0_i32_0 = arith.constant 0 : i32
    return %c0_i32, %arg1 : i32, i32
  }
  func.func @transform_3(%arg0: i32, %arg1: i32, %arg2: i32) -> (i32, i32) {
    %c0_i32 = arith.constant 0 : i32
    return %arg0, %arg1 : i32, i32
  }
  func.func @transform_4(%arg0: i32, %arg1: i32, %arg2: i32) -> (i32, i32) {
    %c0_i32 = arith.constant 0 : i32
    return %arg0, %arg1 : i32, i32
  }
}

module attributes {stable_mosaic.version = 11 : i64} {
  func.func @kernel(%arg0: i32, %arg1: i32, %arg2: i32, %arg3: memref<1x10x10x128xbf16, #tpu.memory_space<vmem>>, %arg4: memref<3x3x128x128xbf16, #tpu.memory_space<vmem>>, %arg5: memref<1x128xf32, #tpu.memory_space<vmem>>, %arg6: memref<1x8x8x128xbf16, #tpu.memory_space<vmem>>, %arg7: memref<64x128xf32, #tpu.memory_space<vmem>>) attributes {dimension_semantics = [#tpu.dimension_semantics<parallel>, #tpu.dimension_semantics<parallel>, #tpu.dimension_semantics<arbitrary>], iteration_bounds = array<i64: 2, 1, 1>, scalar_prefetch = 0 : i64, scratch_operands = 1 : i64, tpu.core_type = #tpu.core_type<tc>, window_params = [{transform_indices = @transform_0, window_bounds = array<i64: 1, 10, 10, 128>}, {transform_indices = @transform_1, window_bounds = array<i64: 3, 3, 128, 128>}, {transform_indices = @transform_2, window_bounds = array<i64: 1, 128>}, {transform_indices = @transform_3, window_bounds = array<i64: 1, 8, 8, 128>}]} {
    %c0_i32 = arith.constant 0 : i32
    %0 = arith.cmpi eq, %arg2, %c0_i32 : i32
    %1 = arith.extui %0 : i1 to i32
    %c0_i32_0 = arith.constant 0 : i32
    %2 = arith.cmpi ne, %1, %c0_i32_0 : i32
    scf.if %2 {
      %cst_84 = arith.constant 0.000000e+00 : f32
      %71 = vector.broadcast %cst_84 : f32 to vector<64x128xf32>
      %c0_85 = arith.constant 0 : index
      %c0_86 = arith.constant 0 : index
      %72 = vector.load %arg7[%c0_85, %c0_86] : memref<64x128xf32, #tpu.memory_space<vmem>>, vector<64x128xf32>
      tpu.vector_store %arg7[%c0_85, %c0_86], %71 {strides = array<i32>} : memref<64x128xf32, #tpu.memory_space<vmem>>, vector<64x128xf32>,
    } else {
    }
    %c0 = arith.constant 0 : index
    %c0_1 = arith.constant 0 : index
    %c0_2 = arith.constant 0 : index
    %c0_3 = arith.constant 0 : index
    %3 = vector.load %arg3[%c0, %c0_1, %c0_2, %c0_3] : memref<1x10x10x128xbf16, #tpu.memory_space<vmem>>, vector<1x8x8x128xbf16>
    %4 = vector.shape_cast %3 : vector<1x8x8x128xbf16> to vector<8x8x128xbf16>
    %5 = vector.shape_cast %4 : vector<8x8x128xbf16> to vector<64x128xbf16>
    %c0_4 = arith.constant 0 : index
    %c0_5 = arith.constant 0 : index
    %c0_6 = arith.constant 0 : index
    %c0_7 = arith.constant 0 : index
    %6 = vector.load %arg4[%c0_4, %c0_5, %c0_6, %c0_7] : memref<3x3x128x128xbf16, #tpu.memory_space<vmem>>, vector<1x1x128x128xbf16>
    %7 = vector.shape_cast %6 : vector<1x1x128x128xbf16> to vector<128x128xbf16>
    %cst = arith.constant dense<0.000000e+00> : vector<64x128xf32>
    %8 = tpu.matmul %5, %7, %cst {dimension_numbers = #tpu.dot_dimension_numbers<[1], [0], [0], [1], [0, 0, 1, 1], [], []>} : vector<64x128xbf16>, vector<128x128xbf16>, vector<64x128xf32> -> vector<64x128xf32>
    %c0_8 = arith.constant 0 : index
    %c0_9 = arith.constant 0 : index
    %c1 = arith.constant 1 : index
    %c0_10 = arith.constant 0 : index
    %9 = vector.load %arg3[%c0_8, %c0_9, %c1, %c0_10] : memref<1x10x10x128xbf16, #tpu.memory_space<vmem>>, vector<1x8x8x128xbf16>
    %10 = vector.shape_cast %9 : vector<1x8x8x128xbf16> to vector<8x8x128xbf16>
    %11 = vector.shape_cast %10 : vector<8x8x128xbf16> to vector<64x128xbf16>
    %c0_11 = arith.constant 0 : index
    %c1_12 = arith.constant 1 : index
    %c0_13 = arith.constant 0 : index
    %c0_14 = arith.constant 0 : index
    %12 = vector.load %arg4[%c0_11, %c1_12, %c0_13, %c0_14] : memref<3x3x128x128xbf16, #tpu.memory_space<vmem>>, vector<1x1x128x128xbf16>
    %13 = vector.shape_cast %12 : vector<1x1x128x128xbf16> to vector<128x128xbf16>
    %cst_15 = arith.constant dense<0.000000e+00> : vector<64x128xf32>
    %14 = tpu.matmul %11, %13, %cst_15 {dimension_numbers = #tpu.dot_dimension_numbers<[1], [0], [0], [1], [0, 0, 1, 1], [], []>} : vector<64x128xbf16>, vector<128x128xbf16>, vector<64x128xf32> -> vector<64x128xf32>
    %15 = arith.addf %8, %14 : vector<64x128xf32>
    %c0_16 = arith.constant 0 : index
    %c0_17 = arith.constant 0 : index
    %c2 = arith.constant 2 : index
    %c0_18 = arith.constant 0 : index
    %16 = vector.load %arg3[%c0_16, %c0_17, %c2, %c0_18] : memref<1x10x10x128xbf16, #tpu.memory_space<vmem>>, vector<1x8x8x128xbf16>
    %17 = vector.shape_cast %16 : vector<1x8x8x128xbf16> to vector<8x8x128xbf16>
    %18 = vector.shape_cast %17 : vector<8x8x128xbf16> to vector<64x128xbf16>
    %c0_19 = arith.constant 0 : index
    %c2_20 = arith.constant 2 : index
    %c0_21 = arith.constant 0 : index
    %c0_22 = arith.constant 0 : index
    %19 = vector.load %arg4[%c0_19, %c2_20, %c0_21, %c0_22] : memref<3x3x128x128xbf16, #tpu.memory_space<vmem>>, vector<1x1x128x128xbf16>
    %20 = vector.shape_cast %19 : vector<1x1x128x128xbf16> to vector<128x128xbf16>
    %cst_23 = arith.constant dense<0.000000e+00> : vector<64x128xf32>
    %21 = tpu.matmul %18, %20, %cst_23 {dimension_numbers = #tpu.dot_dimension_numbers<[1], [0], [0], [1], [0, 0, 1, 1], [], []>} : vector<64x128xbf16>, vector<128x128xbf16>, vector<64x128xf32> -> vector<64x128xf32>
    %22 = arith.addf %15, %21 : vector<64x128xf32>
    %c0_24 = arith.constant 0 : index
    %c1_25 = arith.constant 1 : index
    %c0_26 = arith.constant 0 : index
    %c0_27 = arith.constant 0 : index
    %23 = vector.load %arg3[%c0_24, %c1_25, %c0_26, %c0_27] : memref<1x10x10x128xbf16, #tpu.memory_space<vmem>>, vector<1x8x8x128xbf16>
    %24 = vector.shape_cast %23 : vector<1x8x8x128xbf16> to vector<8x8x128xbf16>
    %25 = vector.shape_cast %24 : vector<8x8x128xbf16> to vector<64x128xbf16>
    %c1_28 = arith.constant 1 : index
    %c0_29 = arith.constant 0 : index
    %c0_30 = arith.constant 0 : index
    %c0_31 = arith.constant 0 : index
    %26 = vector.load %arg4[%c1_28, %c0_29, %c0_30, %c0_31] : memref<3x3x128x128xbf16, #tpu.memory_space<vmem>>, vector<1x1x128x128xbf16>
    %27 = vector.shape_cast %26 : vector<1x1x128x128xbf16> to vector<128x128xbf16>
    %cst_32 = arith.constant dense<0.000000e+00> : vector<64x128xf32>
    %28 = tpu.matmul %25, %27, %cst_32 {dimension_numbers = #tpu.dot_dimension_numbers<[1], [0], [0], [1], [0, 0, 1, 1], [], []>} : vector<64x128xbf16>, vector<128x128xbf16>, vector<64x128xf32> -> vector<64x128xf32>
    %29 = arith.addf %22, %28 : vector<64x128xf32>
    %c0_33 = arith.constant 0 : index
    %c1_34 = arith.constant 1 : index
    %c1_35 = arith.constant 1 : index
    %c0_36 = arith.constant 0 : index
    %30 = vector.load %arg3[%c0_33, %c1_34, %c1_35, %c0_36] : memref<1x10x10x128xbf16, #tpu.memory_space<vmem>>, vector<1x8x8x128xbf16>
    %31 = vector.shape_cast %30 : vector<1x8x8x128xbf16> to vector<8x8x128xbf16>
    %32 = vector.shape_cast %31 : vector<8x8x128xbf16> to vector<64x128xbf16>
    %c1_37 = arith.constant 1 : index
    %c1_38 = arith.constant 1 : index
    %c0_39 = arith.constant 0 : index
    %c0_40 = arith.constant 0 : index
    %33 = vector.load %arg4[%c1_37, %c1_38, %c0_39, %c0_40] : memref<3x3x128x128xbf16, #tpu.memory_space<vmem>>, vector<1x1x128x128xbf16>
    %34 = vector.shape_cast %33 : vector<1x1x128x128xbf16> to vector<128x128xbf16>
    %cst_41 = arith.constant dense<0.000000e+00> : vector<64x128xf32>
    %35 = tpu.matmul %32, %34, %cst_41 {dimension_numbers = #tpu.dot_dimension_numbers<[1], [0], [0], [1], [0, 0, 1, 1], [], []>} : vector<64x128xbf16>, vector<128x128xbf16>, vector<64x128xf32> -> vector<64x128xf32>
    %36 = arith.addf %29, %35 : vector<64x128xf32>
    %c0_42 = arith.constant 0 : index
    %c1_43 = arith.constant 1 : index
    %c2_44 = arith.constant 2 : index
    %c0_45 = arith.constant 0 : index
    %37 = vector.load %arg3[%c0_42, %c1_43, %c2_44, %c0_45] : memref<1x10x10x128xbf16, #tpu.memory_space<vmem>>, vector<1x8x8x128xbf16>
    %38 = vector.shape_cast %37 : vector<1x8x8x128xbf16> to vector<8x8x128xbf16>
    %39 = vector.shape_cast %38 : vector<8x8x128xbf16> to vector<64x128xbf16>
    %c1_46 = arith.constant 1 : index
    %c2_47 = arith.constant 2 : index
    %c0_48 = arith.constant 0 : index
    %c0_49 = arith.constant 0 : index
    %40 = vector.load %arg4[%c1_46, %c2_47, %c0_48, %c0_49] : memref<3x3x128x128xbf16, #tpu.memory_space<vmem>>, vector<1x1x128x128xbf16>
    %41 = vector.shape_cast %40 : vector<1x1x128x128xbf16> to vector<128x128xbf16>
    %cst_50 = arith.constant dense<0.000000e+00> : vector<64x128xf32>
    %42 = tpu.matmul %39, %41, %cst_50 {dimension_numbers = #tpu.dot_dimension_numbers<[1], [0], [0], [1], [0, 0, 1, 1], [], []>} : vector<64x128xbf16>, vector<128x128xbf16>, vector<64x128xf32> -> vector<64x128xf32>
    %43 = arith.addf %36, %42 : vector<64x128xf32>
    %c0_51 = arith.constant 0 : index
    %c2_52 = arith.constant 2 : index
    %c0_53 = arith.constant 0 : index
    %c0_54 = arith.constant 0 : index
    %44 = vector.load %arg3[%c0_51, %c2_52, %c0_53, %c0_54] : memref<1x10x10x128xbf16, #tpu.memory_space<vmem>>, vector<1x8x8x128xbf16>
    %45 = vector.shape_cast %44 : vector<1x8x8x128xbf16> to vector<8x8x128xbf16>
    %46 = vector.shape_cast %45 : vector<8x8x128xbf16> to vector<64x128xbf16>
    %c2_55 = arith.constant 2 : index
    %c0_56 = arith.constant 0 : index
    %c0_57 = arith.constant 0 : index
    %c0_58 = arith.constant 0 : index
    %47 = vector.load %arg4[%c2_55, %c0_56, %c0_57, %c0_58] : memref<3x3x128x128xbf16, #tpu.memory_space<vmem>>, vector<1x1x128x128xbf16>
    %48 = vector.shape_cast %47 : vector<1x1x128x128xbf16> to vector<128x128xbf16>
    %cst_59 = arith.constant dense<0.000000e+00> : vector<64x128xf32>
    %49 = tpu.matmul %46, %48, %cst_59 {dimension_numbers = #tpu.dot_dimension_numbers<[1], [0], [0], [1], [0, 0, 1, 1], [], []>} : vector<64x128xbf16>, vector<128x128xbf16>, vector<64x128xf32> -> vector<64x128xf32>
    %50 = arith.addf %43, %49 : vector<64x128xf32>
    %c0_60 = arith.constant 0 : index
    %c2_61 = arith.constant 2 : index
    %c1_62 = arith.constant 1 : index
    %c0_63 = arith.constant 0 : index
    %51 = vector.load %arg3[%c0_60, %c2_61, %c1_62, %c0_63] : memref<1x10x10x128xbf16, #tpu.memory_space<vmem>>, vector<1x8x8x128xbf16>
    %52 = vector.shape_cast %51 : vector<1x8x8x128xbf16> to vector<8x8x128xbf16>
    %53 = vector.shape_cast %52 : vector<8x8x128xbf16> to vector<64x128xbf16>
    %c2_64 = arith.constant 2 : index
    %c1_65 = arith.constant 1 : index
    %c0_66 = arith.constant 0 : index
    %c0_67 = arith.constant 0 : index
    %54 = vector.load %arg4[%c2_64, %c1_65, %c0_66, %c0_67] : memref<3x3x128x128xbf16, #tpu.memory_space<vmem>>, vector<1x1x128x128xbf16>
    %55 = vector.shape_cast %54 : vector<1x1x128x128xbf16> to vector<128x128xbf16>
    %cst_68 = arith.constant dense<0.000000e+00> : vector<64x128xf32>
    %56 = tpu.matmul %53, %55, %cst_68 {dimension_numbers = #tpu.dot_dimension_numbers<[1], [0], [0], [1], [0, 0, 1, 1], [], []>} : vector<64x128xbf16>, vector<128x128xbf16>, vector<64x128xf32> -> vector<64x128xf32>
    %57 = arith.addf %50, %56 : vector<64x128xf32>
    %c0_69 = arith.constant 0 : index
    %c2_70 = arith.constant 2 : index
    %c2_71 = arith.constant 2 : index
    %c0_72 = arith.constant 0 : index
    %58 = vector.load %arg3[%c0_69, %c2_70, %c2_71, %c0_72] : memref<1x10x10x128xbf16, #tpu.memory_space<vmem>>, vector<1x8x8x128xbf16>
    %59 = vector.shape_cast %58 : vector<1x8x8x128xbf16> to vector<8x8x128xbf16>
    %60 = vector.shape_cast %59 : vector<8x8x128xbf16> to vector<64x128xbf16>
    %c2_73 = arith.constant 2 : index
    %c2_74 = arith.constant 2 : index
    %c0_75 = arith.constant 0 : index
    %c0_76 = arith.constant 0 : index
    %61 = vector.load %arg4[%c2_73, %c2_74, %c0_75, %c0_76] : memref<3x3x128x128xbf16, #tpu.memory_space<vmem>>, vector<1x1x128x128xbf16>
    %62 = vector.shape_cast %61 : vector<1x1x128x128xbf16> to vector<128x128xbf16>
    %cst_77 = arith.constant dense<0.000000e+00> : vector<64x128xf32>
    %63 = tpu.matmul %60, %62, %cst_77 {dimension_numbers = #tpu.dot_dimension_numbers<[1], [0], [0], [1], [0, 0, 1, 1], [], []>} : vector<64x128xbf16>, vector<128x128xbf16>, vector<64x128xf32> -> vector<64x128xf32>
    %64 = arith.addf %57, %63 : vector<64x128xf32>
    %c0_78 = arith.constant 0 : index
    %c0_79 = arith.constant 0 : index
    %65 = vector.load %arg7[%c0_78, %c0_79] : memref<64x128xf32, #tpu.memory_space<vmem>>, vector<64x128xf32>
    %66 = arith.addf %65, %64 : vector<64x128xf32>
    %c0_80 = arith.constant 0 : index
    %c0_81 = arith.constant 0 : index
    %67 = vector.load %arg7[%c0_80, %c0_81] : memref<64x128xf32, #tpu.memory_space<vmem>>, vector<64x128xf32>
    tpu.vector_store %arg7[%c0_80, %c0_81], %66 {strides = array<i32>} : memref<64x128xf32, #tpu.memory_space<vmem>>, vector<64x128xf32>,
    %c0_i32_82 = arith.constant 0 : i32
    %68 = arith.cmpi eq, %arg2, %c0_i32_82 : i32
    %69 = arith.extui %68 : i1 to i32
    %c0_i32_83 = arith.constant 0 : i32
    %70 = arith.cmpi ne, %69, %c0_i32_83 : i32
    scf.if %70 {
      %c0_84 = arith.constant 0 : index
      %c0_85 = arith.constant 0 : index
      %71 = vector.load %arg7[%c0_84, %c0_85] : memref<64x128xf32, #tpu.memory_space<vmem>>, vector<64x128xf32>
      %c0_86 = arith.constant 0 : index
      %c0_87 = arith.constant 0 : index
      %72 = vector.load %arg5[%c0_86, %c0_87] : memref<1x128xf32, #tpu.memory_space<vmem>>, vector<1x128xf32>
      %73 = vector.broadcast %72 : vector<1x128xf32> to vector<64x128xf32>
      %74 = arith.addf %71, %73 : vector<64x128xf32>
      %cst_88 = arith.constant 0.000000e+00 : f32
      %75 = vector.broadcast %cst_88 : f32 to vector<64x128xf32>
      %76 = arith.maximumf %74, %75 : vector<64x128xf32>
      %77 = vector.shape_cast %76 : vector<64x128xf32> to vector<1x8x8x128xf32>
      %78 = arith.truncf %77 : vector<1x8x8x128xf32> to vector<1x8x8x128xbf16>
      %c0_89 = arith.constant 0 : index
      %c0_90 = arith.constant 0 : index
      %c0_91 = arith.constant 0 : index
      %c0_92 = arith.constant 0 : index
      %79 = vector.load %arg6[%c0_89, %c0_90, %c0_91, %c0_92] : memref<1x8x8x128xbf16, #tpu.memory_space<vmem>>, vector<1x8x8x128xbf16>
      tpu.vector_store %arg6[%c0_89, %c0_90, %c0_91, %c0_92], %78 {strides = array<i32>} : memref<1x8x8x128xbf16, #tpu.memory_space<vmem>>, vector<1x8x8x128xbf16>,
    } else {
    }
    return
  }
  func.func @transform_0(%arg0: i32, %arg1: i32, %arg2: i32) -> (i32, i32, i32, i32) {
    %c0_i32 = arith.constant 0 : i32
    %c0_i32_0 = arith.constant 0 : i32
    %c0_i32_1 = arith.constant 0 : i32
    return %arg0, %c0_i32, %c0_i32_0, %arg2 : i32, i32, i32, i32
  }
  func.func @transform_1(%arg0: i32, %arg1: i32, %arg2: i32) -> (i32, i32, i32, i32) {
    %c0_i32 = arith.constant 0 : i32
    %c0_i32_0 = arith.constant 0 : i32
    %c0_i32_1 = arith.constant 0 : i32
    return %c0_i32, %c0_i32_0, %arg2, %arg1 : i32, i32, i32, i32
  }
  func.func @transform_2(%arg0: i32, %arg1: i32, %arg2: i32) -> (i32, i32) {
    %c0_i32 = arith.constant 0 : i32
    %c0_i32_0 = arith.constant 0 : i32
    return %c0_i32, %arg1 : i32, i32
  }
  func.func @transform_3(%arg0: i32, %arg1: i32, %arg2: i32) -> (i32, i32, i32, i32) {
    %c0_i32 = arith.constant 0 : i32
    %c0_i32_0 = arith.constant 0 : i32
    %c0_i32_1 = arith.constant 0 : i32
    return %arg0, %c0_i32, %c0_i32_0, %arg1 : i32, i32, i32, i32
  }
}

</mosaic_0001>

<bundles_post_ra>
// kernel: corblock_s_forward.10
= control target key start
LH: loop header
LB: loop body
LE: loop exit
PB: predicated region body
PF: predicated region fallthrough
CT: control target
= control target key end

     0   :  { %8 = vsyncpa [#allocation4], 0  ;;  %s2084_s0 = inlined_call_operand.hbm [shape: bf16[512,128], index: 0, kind: input, shape index: {}]   ;;  %s2085_s1 = inlined_call_operand.hbm [shape: bf16[128,128], index: 1, kind: input, shape index: {}]   ;;  %s2086_s2 = inlined_call_operand.hbm [shape: f32[1,128], index: 2, kind: input, shape index: {}]   ;;  %s2087_s3 = inlined_call_operand.hbm [shape: bf16[512,128], index: 3, kind: output, shape index: {}]  }
   0x1   :  { %10 = vsyncpa [#allocation4 + $0x1], 0 }
   0x2   :  { %11 = vsyncpa [#allocation7], 0 }
   0x3   :  { %12 = vsyncpa [#allocation5], 0 }
   0x4   :  { %14 = vsyncpa [#allocation5 + $0x1], 0  ;;  %s1747_s12 = smov 0   ;;  %s1749_s13 = smov 0  }
   0x5   :  { %s1751_s14 = smov 0   ;;  %s1753_s15 = smov 0  }
   0x6   :  { %s1755_s16 = smov 0   ;;  %s1757_s17 = smov 0  }
   0x7 LB: > { %s1141_s18 = sadd.s32 4294967295, %s1717_s17   ;;  %s1142_s19 = sadd.s32 4294967294, %s1717_s17   ;;  %s1717_s17 = sphi %s1757_s17, %s20_s17   ;;  %s1713_s16 = sphi %s1755_s16, %s2109_s16   ;;  %s1709_s15 = sphi %s1753_s15, %s2108_s15   ;;  %s1705_s14 = sphi %s1751_s14, %s2107_s14   ;;  %s1701_s13 = sphi %s1749_s13, %s2106_s13   ;;  %s1697_s12 = sphi %s1747_s12, %s2105_s12  }
   0x8   : > { %p61_p0 = scmp.ne.s32.totalorder %s1701_s13, %s1697_s12  ;;  %p1781_p1 = scmp.eq.s32.totalorder %s1141_s18, 0 }
   0x9   : > { %p1785_p2 = scmp.eq.s32.totalorder %s1141_s18, 1  ;;  %p147_p3 = scmp.eq.s32.totalorder %s1142_s19, 1 }
   0xa   : > { %s2092_s20 = scalar_select %p1781_p1, 1, 0 }
   0xb   : > { %p1791_p4 = por %p1781_p1, %p61_p0  ;;  %p1143_p5 = scmp.ge.s32.totalorder %s1717_s17, 1 }
   0xc   : > { %p1796_p6 = por %p147_p3, %p61_p0  ;;  %p154_p7 = scmp.lt.s32.totalorder %s1717_s17, 3 }
   0xd   : > { %s2094_s22 = scalar_select %p1791_p4, 1, 0 }
   0xe   : > { %s2095_s23 = scalar_select %p1796_p6, 1, 0 }
   0xf   : > { %p1801_p8 = pnand %p1143_p5, %p154_p7  ;;  %s1719_s25 = smov [#allocation6]  }
  0x10   : > { %s170_s26 = sshll.u32 %s1719_s25, 4  ;;  %s1720_s28 = smov [#allocation8]   ;;  %s1805_s26 = int_to_ptr.vmem [resolvable:$true] %s170_s26 }
  0x11   : > { %p1446_p9 = pneg %p1801_p8  ;;  %s186_s29 = sshll.u32 %s1720_s28, 4  ;;  %s1816_s29 = int_to_ptr.vmem [resolvable:$true] %s186_s29 }
  0x12   : > { %s1545_s5 = scalar_lea.hbm %s2085_s1, 1024 }
  0x13   : > { %p1812_p11 = pnand %p1446_p9, %p1781_p1  ;;  %p1546_p12 = scmp.ne.s32.totalorder %s2085_s1, %s1545_s5 }
  0x14   : > { %p1552_p5 = scmp.lt.u32.totalorder %s1545_s5, %s2085_s1 }
  0x15   : > { %p1547_p13 = pneg %p1812_p11 }
  0x17   : > { %p1548_p0 = pnand %p1547_p13, %p1546_p12 }
  0x19   : > { %p1549_p3 = pneg %p1548_p0 }
  0x1b   : > { %p1554_p7 = pnand %p1552_p5, %p1549_p3 }
  0x1d   : > { %1557 = shalt.err (!%p1554_p7)
}
  0x1e   : > { %s1558_s10 = scalar_lea.vmem %s1805_s26, 1024  ;;  %p1566_p1 = scmp.lt.s32.totalorder %s1805_s26, %s1805_s26 }
  0x1f   : > { %p1559_p9 = scmp.ne.s32.totalorder %s1805_s26, %s1558_s10  ;;  %p1567_p12 = scmp.lt.s32.totalorder %s1558_s10, %s1558_s10 }
  0x21   : > { %p1561_p10 = pnand %p1559_p9, %p1547_p13  ;;  %p1568_p0 = por %p1567_p12, %p1566_p1 }
  0x23   : > { %p1562_p6 = pneg %p1561_p10 }
  0x25   : > { %p1569_p4 = pnand %p1568_p0, %p1562_p6 }
  0x27   : > { %1572 = shalt.err (!%p1569_p4)
}
  0x28   : > { %s1721_s11 = smov 64   ;;  %s1722_s18 = smov 4  }
  0x29   : > { %1449 = dma.hbm_to_vmem [thread:$0]  (!%p1812_p11), %s2085_s1, 1024, %s1805_s26, [#allocation7], %s1721_s11, %s1721_s11, %s1722_s18  }
  0x2a   : > { %s1573_s4 = scalar_lea.hbm %s2086_s2, 16 }
  0x2b   : > { %p1574_p1 = scmp.ne.s32.totalorder %s2086_s2, %s1573_s4  ;;  %p1580_p10 = scmp.lt.u32.totalorder %s1573_s4, %s2086_s2 }
  0x2d   : > { %p1576_p4 = pnand %p1574_p1, %p1547_p13 }
  0x2f   : > { %p1577_p6 = pneg %p1576_p4 }
  0x31   : > { %p1582_p3 = pnand %p1580_p10, %p1577_p6 }
  0x33   : > { %1585 = shalt.err (!%p1582_p3)
}
  0x34   : > { %s1586_s26 = scalar_lea.vmem %s1816_s29, 16  ;;  %s1593_s9 = scalar_lea.vmem %s1816_s29, 32 }
  0x35   : > { %p1587_p5 = scmp.ne.s32.totalorder %s1816_s29, %s1586_s26  ;;  %p1594_p12 = scmp.lt.s32.totalorder %s1816_s29, %s1816_s29 }
  0x36   : > { %p1595_p0 = scmp.lt.s32.totalorder %s1593_s9, %s1586_s26 }
  0x37   : > { %p1589_p7 = pnand %p1587_p5, %p1547_p13 }
  0x38   : > { %p1596_p1 = por %p1595_p0, %p1594_p12 }
  0x39   : > { %p1590_p9 = pneg %p1589_p7 }
  0x3b   : > { %p1597_p4 = pnand %p1596_p1, %p1590_p9 }
  0x3d   : > { %1600 = shalt.err (!%p1597_p4)
}
  0x3e   : > { %1452 = dma.hbm_to_vmem [thread:$0]  (!%p1812_p11), %s2086_s2, 16, %s1816_s29, [#allocation7]  }
  0x3f   : > { %s39_s25 = sadd.s32 1, %s1713_s16  ;;  %s48_s28 = sadd.s32 1, %s1705_s14 }
  0x40   : > { %p41_p13 = scmp.ge.s32.totalorder %s39_s25, 2  ;;  %p55_p6 = scmp.ne.s32.totalorder %s1705_s14, %s1701_s13 }
  0x41   : > { %p56_p10 = scmp.eq.s32.totalorder %s1717_s17, 0  ;;  %p1463_p3 = scmp.lt.s32.totalorder %s1717_s17, 2 }
  0x42   : > { %s2111_s25 = smov (%p41_p13, %s39_s25), 0  ;;  %p1884_p7 = por %p1785_p2, %p55_p6 }
  0x43   : > { %p57_p5 = por %p56_p10, %p55_p6  ;;  %s43_s30 = ssub.s32 %s1713_s16, %s2111_s25 }
  0x44   : > { %s2098_s27 = scalar_select %p1884_p7, 1, 0 }
  0x45   : > { %s197_s4 = sand.u32 1, %s1705_s14   ;;  %p46_p9 = scmp.eq.s32.totalorder %s43_s30, 0 }
  0x46   : > { %s1147_s29 = sshll.u32 %s197_s4, 7  ;;  %s1217_s5 = sshll.u32 %s1713_s16, 11 }
  0x47   : > { %s1893_s6 = scalar_select %p46_p9, %s1705_s14, %s48_s28  }
  0x48   : > { %s1898_s26 = scalar_lea.hbm %s2084_s0, %s1217_s5  ;;  %s201_s21 = scalar_lea.vmem [#allocation3], %s1147_s29 }
  0x49   : > { %s209_s9 = sshll.u32 %s201_s21, 4  ;;  %p1902_p2 = pnand %p1463_p3, %p57_p5  ;;  %s1906_s9 = int_to_ptr.vmem [resolvable:$true] %s209_s9 }
  0x4a   : > { %s1908_s19 = scalar_lea.sflag [#allocation4], %s197_s4  ;;  %s1601_s28 = scalar_lea.hbm %s1898_s26, 2048 }
  0x4b   : > { %p1602_p11 = scmp.ne.s32.totalorder %s1898_s26, %s1601_s28  ;;  %p1603_p12 = pneg %p1902_p2 }
  0x4c   : > { %s1606_s5 = scalar_lea.hbm %s2084_s0, 4096  ;;  %p1607_p4 = scmp.lt.u32.totalorder %s1898_s26, %s2084_s0 }
  0x4d   : > { %p1604_p0 = pnand %p1603_p12, %p1602_p11  ;;  %p1608_p13 = scmp.lt.u32.totalorder %s1606_s5, %s1601_s28 }
  0x4e   : > { %p1610_p10 = scmp.lt.u32.totalorder %s1601_s28, %s1898_s26 }
  0x4f   : > { %p1605_p1 = pneg %p1604_p0  ;;  %p1609_p6 = por %p1608_p13, %p1607_p4 }
  0x51   : > { %p1611_p3 = por %p1610_p10, %p1609_p6 }
  0x53   : > { %p1612_p5 = pnand %p1611_p3, %p1605_p1 }
  0x55   : > { %1615 = shalt.err (!%p1612_p5)
}
  0x56   : > { %s1616_s4 = scalar_lea.vmem %s1906_s9, 2048  ;;  %s1723_s21 = smov [#allocation3]  }
  0x57   : > { %p1617_p9 = scmp.ne.s32.totalorder %s1906_s9, %s1616_s4  ;;  %s1621_s30 = sshll.u32 %s1723_s21, 4  ;;  %s1622_s30 = int_to_ptr.vmem [resolvable:$false] %s1621_s30 }
  0x58   : > { %s1623_s29 = scalar_lea.vmem %s1622_s30, 4096  ;;  %p1624_p7 = scmp.lt.s32.totalorder %s1906_s9, %s1622_s30 }
  0x59   : > { %p1619_p11 = pnand %p1617_p9, %p1603_p12  ;;  %p1625_p4 = scmp.lt.s32.totalorder %s1623_s29, %s1616_s4 }
  0x5b   : > { %p1620_p0 = pneg %p1619_p11  ;;  %p1626_p13 = por %p1625_p4, %p1624_p7 }
  0x5d   : > { %p1627_p6 = pnand %p1626_p13, %p1620_p0 }
  0x5f   : > { %1630 = shalt.err (!%p1627_p6)
}
  0x60   : > { %1456 = dma.hbm_to_vmem [thread:$0]  (!%p1902_p2), %s1898_s26, 2048, %s1906_s9, %s1908_s19, %s1721_s11, %s1721_s11, %s1722_s18  }
  0x61   : > { %221 = sbr.rel (%p1801_p8) target bundleno = 401 (0x191), region = 32  ;;  %s1942_s28 = sand.u32 (!%p1801_p8), 1, %s1701_s13  }
  0x62   : > { %s1151_s5 = sshll.u32 (!%p1801_p8), %s1942_s28, 7  ;;  %s224_s7 = scalar_lea.sflag (!%p1801_p8), [#allocation4], %s1942_s28 }
  0x63   : > { %s1948_s10 = scalar_lea.vmem (!%p1801_p8), [#allocation3], %s1151_s5  ;;  %p2100_p7 = scmp.ne.s32.totalorder (!%p1801_p8), %s2094_s22, 0 }
  0x68   : > { %1684 = dma.done.wait (%p2100_p7), %s224_s7, 2048  }
  0x69   : > { %1686 = vsyncadd (%p2100_p7), %s224_s7, 4294965248  ;;  %p2101_p2 = scmp.ne.s32.totalorder %s2092_s20, 0 }
  0x6b   : > { %1688 = dma.done.wait (%p2101_p2), [#allocation7], 1040  }
  0x6c   : > { %1690 = vsyncadd (%p2101_p2), [#allocation7], 4294966256  ;;  %v1521_v0 = vld [vmem:[#allocation6] sm:$0xff]   ;;  %v1522_v1 = vld [vmem:[#allocation6 + $0x8] sm:$0xff]   ;;  %s1986_s20 = scalar_lea.vmem [#allocation9], %s1151_s5  ;;  %s1250_s22 = sshll.u32 %s1709_s15, 11 }
  0x6d   : > { %1370 = vmatprep.subr.bf16.mxu0 %v1521_v0  ;;  %1418 = vmatprep.subr.bf16.mxu1 %v1521_v0  ;;  %v1523_v2 = vld [vmem:[#allocation6 + $0x10] sm:$0xff]   ;;  %v1524_v3 = vld [vmem:[#allocation6 + $0x18] sm:$0xff]   ;;  %v1529_v4 = vld [vmem:[%s1948_s10] sm:$0xff]   ;;  %s1028_s24 = sshll.u32 %s1986_s20, 4  ;;  %s2029_s15 = scalar_lea.hbm %s2087_s3, %s1250_s22  ;;  %s2031_s24 = int_to_ptr.vmem [resolvable:$true] %s1028_s24 }
  0x6e   : > { %1371 = vmatpush3.bf16.msra.mxu0 %v1521_v0  ;;  %1426 = vmatpush3.bf16.msra.mxu1 %v1521_v0  ;;  %v1530_v5 = vld [vmem:[%s1948_s10 + $0x40] sm:$0xff]   ;;  %v1526_v7 = vld [vmem:[#allocation6 + $0x28] sm:$0xff]   ;;  %v1527_v8 = vld [vmem:[#allocation6 + $0x30] sm:$0xff]   ;;  %s1014_s26 = scalar_lea.sflag [#allocation5], %s1942_s28  ;;  %s1631_s9 = scalar_lea.vmem %s2031_s24, 2048 }
  0x6f   : > { %1372 = vmatprep.subr.bf16.mxu0 %v1522_v1  ;;  %1419 = vmatprep.subr.bf16.mxu1 %v1522_v1  ;;  %v1525_v6 = vld [vmem:[#allocation6 + $0x20] sm:$0xff]   ;;  %v1528_v9 = vld [vmem:[#allocation6 + $0x38] sm:$0xff]   ;;  %v1531_v10 = vld [vmem:[%s1948_s10 + $0x8] sm:$0xff]   ;;  %p1632_p8 = scmp.ne.s32.totalorder %s2031_s24, %s1631_s9  ;;  %p2102_p12 = scmp.ne.s32.totalorder %s2098_s27, 0 }
  0x70   : > { %1386 = vmatprep.mubr.bf16.mxu0 %v1529_v4  ;;  %1402 = vmatprep.mubr.bf16.mxu1 %v1530_v5  ;;  %v1532_v11 = vld [vmem:[%s1948_s10 + $0x48] sm:$0xff]   ;;  %v1533_v12 = vld [vmem:[%s1948_s10 + $0x10] sm:$0xff]   ;;  %v1535_v14 = vld [vmem:[%s1948_s10 + $0x18] sm:$0xff]   ;;  %s1724_s19 = smov [#allocation9]  }
  0x71   : > { %v1534_v13 = vld [vmem:[%s1948_s10 + $0x50] sm:$0xff]   ;;  %v1536_v15 = vld [vmem:[%s1948_s10 + $0x58] sm:$0xff]   ;;  %v1537_v16 = vld [vmem:[%s1948_s10 + $0x20] sm:$0xff]   ;;  %p1633_p1 = pnand %p1632_p8, %p2102_p12  ;;  %s1635_s8 = sshll.u32 %s1724_s19, 4  ;;  %s1636_s8 = int_to_ptr.vmem [resolvable:$false] %s1635_s8 }
  0x72   : > { %1373 = vmatpush3.bf16.msra.mxu0 %v1522_v1  ;;  %1427 = vmatpush3.bf16.msra.mxu1 %v1522_v1  ;;  %v1538_v17 = vld [vmem:[%s1948_s10 + $0x60] sm:$0xff]   ;;  %v1539_v18 = vld [vmem:[%s1948_s10 + $0x28] sm:$0xff]   ;;  %v1541_v20 = vld [vmem:[%s1948_s10 + $0x30] sm:$0xff]   ;;  %s1637_s4 = scalar_lea.vmem %s1636_s8, 4096  ;;  %p1638_p3 = scmp.lt.s32.totalorder %s2031_s24, %s1636_s8 }
  0x73   : > { %1374 = vmatprep.subr.bf16.mxu0 %v1523_v2  ;;  %1420 = vmatprep.subr.bf16.mxu1 %v1523_v2  ;;  %v1540_v19 = vld [vmem:[%s1948_s10 + $0x68] sm:$0xff]   ;;  %v1542_v21 = vld [vmem:[%s1948_s10 + $0x70] sm:$0xff]   ;;  %v1543_v22 = vld [vmem:[%s1948_s10 + $0x38] sm:$0xff]   ;;  %p1634_p10 = pneg %p1633_p1  ;;  %p1639_p5 = scmp.lt.s32.totalorder %s1637_s4, %s1631_s9 }
  0x74   : > { %v1544_v23 = vld [vmem:[%s1948_s10 + $0x78] sm:$0xff]   ;;  %v1974_v24 = vld [vmem:[#allocation8] ss:$0 sm:$0xff] }
  0x75   : > { %p1640_p9 = por %p1639_p5, %p1638_p3 }
  0x76   : > { %1375 = vmatpush3.bf16.msra.mxu0 %v1523_v2  ;;  %1428 = vmatpush3.bf16.msra.mxu1 %v1523_v2 }
  0x77   : > { %1376 = vmatprep.subr.bf16.mxu0 %v1524_v3  ;;  %1421 = vmatprep.subr.bf16.mxu1 %v1524_v3  ;;  %p1641_p11 = pnand %p1640_p9, %p1634_p10 }
  0x7a   : > { %1377 = vmatpush3.bf16.msra.mxu0 %v1524_v3  ;;  %1429 = vmatpush3.bf16.msra.mxu1 %v1524_v3 }
  0x7b   : > { %1378 = vmatprep.subr.bf16.mxu0 %v1525_v6  ;;  %1422 = vmatprep.subr.bf16.mxu1 %v1525_v6 }
  0x7e   : > { %1379 = vmatpush3.bf16.msra.mxu0 %v1525_v6  ;;  %1430 = vmatpush3.bf16.msra.mxu1 %v1525_v6 }
  0x7f   : > { %1380 = vmatprep.subr.bf16.mxu0 %v1526_v7  ;;  %1423 = vmatprep.subr.bf16.mxu1 %v1526_v7 }
  0x82   : > { %1381 = vmatpush3.bf16.msra.mxu0 %v1526_v7  ;;  %1431 = vmatpush3.bf16.msra.mxu1 %v1526_v7 }
  0x83   : > { %1382 = vmatprep.subr.bf16.mxu0 %v1527_v8  ;;  %1424 = vmatprep.subr.bf16.mxu1 %v1527_v8 }
  0x86   : > { %1383 = vmatpush3.bf16.msra.mxu0 %v1527_v8  ;;  %1432 = vmatpush3.bf16.msra.mxu1 %v1527_v8 }
  0x87   : > { %1384 = vmatprep.subr.bf16.mxu0 %v1528_v9  ;;  %1425 = vmatprep.subr.bf16.mxu1 %v1528_v9 }
  0x8a   : > { %1385 = vmatpush3.bf16.msra.mxu0 %v1528_v9  ;;  %1433 = vmatpush3.bf16.msra.mxu1 %v1528_v9 }
  0x8d   : > { %1387 = vmatmul.mubr.bf16.vlgmr.msra.gmra.mrb[0].mxu0 %v1531_v10  ;;  %1403 = vmatmul.mubr.bf16.vlgmr.msra.gmra.mrb[0].mxu1 %v1532_v11 }
  0x8e   : > { %1390 = vmatprep.mubr.bf16.mxu0 %v1533_v12  ;;  %1406 = vmatprep.mubr.bf16.mxu1 %v1534_v13 }
  0x95   : > { %1391 = vmatmul.mubr.bf16.gmra.mrb[4].mxu0 %v1535_v14  ;;  %1407 = vmatmul.mubr.bf16.gmra.mrb[4].mxu1 %v1536_v15 }
  0x96   : > { %1394 = vmatprep.mubr.bf16.mxu0 %v1537_v16  ;;  %1410 = vmatprep.mubr.bf16.mxu1 %v1538_v17 }
  0x9d   : > { %1395 = vmatmul.mubr.bf16.gmra.mrb[8].mxu0 %v1539_v18  ;;  %1411 = vmatmul.mubr.bf16.gmra.mrb[8].mxu1 %v1540_v19 }
  0x9e   : > { %1398 = vmatprep.mubr.bf16.mxu0 %v1541_v20  ;;  %1414 = vmatprep.mubr.bf16.mxu1 %v1542_v21 }
  0xa5   : > { %1399 = vmatmul.mubr.bf16.gmra.mrb[12].mxu0 %v1543_v22  ;;  %1415 = vmatmul.mubr.bf16.gmra.mrb[12].mxu1 %v1544_v23 }
 0x160   : > { %v1388_v25 = vpop.f32.mrb[0].mxu0  ;;  %v1404_v26 = vpop.f32.mrb[0].mxu1 }
 0x161   : > { %v791_v27 = vadd.f32 %v1388_v25, %v1974_v24  ;;  %v807_v28 = vadd.f32 %v1404_v26, %v1974_v24  ;;  %v556_v29 = vpop.f32.mrb[1].mxu0  ;;  %v620_v30 = vpop.f32.mrb[1].mxu1 }
 0x162   : > { %v789_v31 = vadd.f32 %v1974_v24, %v556_v29  ;;  %v805_v32 = vadd.f32 %v1974_v24, %v620_v30  ;;  %v1389_v33 = vpop.f32.mrb[2].mxu0  ;;  %v1405_v34 = vpop.f32.mrb[2].mxu1 }
 0x163   : > { %v792_v35 = vadd.f32 %v1389_v33, %v1974_v24  ;;  %v808_v36 = vadd.f32 %v1405_v34, %v1974_v24  ;;  %v559_v37 = vpop.f32.mrb[3].mxu0  ;;  %v623_v38 = vpop.f32.mrb[3].mxu1  ;;  %v823_v41 = vmax.f32 %v791_v27, 0.0  ;;  %v839_v42 = vmax.f32 %v807_v28, 0.0 }
 0x164   : > { %v790_v39 = vadd.f32 %v1974_v24, %v559_v37  ;;  %v806_v40 = vadd.f32 %v1974_v24, %v623_v38  ;;  %v821_v45 = vmax.f32 %v789_v31, 0.0  ;;  %v837_v46 = vmax.f32 %v805_v32, 0.0 }
 0x165   : > { %v824_v43 = vmax.f32 %v792_v35, 0.0  ;;  %v840_v44 = vmax.f32 %v808_v36, 0.0 }
 0x166   : > { %v822_v47 = vmax.f32 %v790_v39, 0.0  ;;  %v838_v48 = vmax.f32 %v806_v40, 0.0 }
 0x167   : > { %v1259_v49 = vpack.c.bf16 %v824_v43, %v823_v41  ;;  %v1299_v50 = vpack.c.bf16 %v840_v44, %v839_v42 }
 0x168   : > { %v1254_v51 = vpack.c.bf16 %v822_v47, %v821_v45  ;;  %v1294_v52 = vpack.c.bf16 %v838_v48, %v837_v46  ;;  %v1392_v53 = vpop.f32.mrb[4].mxu0  ;;  %v1408_v54 = vpop.f32.mrb[4].mxu1 }
 0x169   : > { %1331 = vst [vmem:[%s1986_s20 + $0x8] sm:$0xff] %v1259_v49   ;;  %1339 = vst [vmem:[%s1986_s20 + $0x48] sm:$0xff] %v1299_v50   ;;  %v795_v55 = vadd.f32 %v1392_v53, %v1974_v24  ;;  %v811_v56 = vadd.f32 %v1408_v54, %v1974_v24  ;;  %v572_v57 = vpop.f32.mrb[5].mxu0  ;;  %v636_v58 = vpop.f32.mrb[5].mxu1 }
 0x16a   : > { %1255 = vst [vmem:[%s1986_s20] sm:$0xff] %v1254_v51   ;;  %1338 = vst [vmem:[%s1986_s20 + $0x40] sm:$0xff] %v1294_v52   ;;  %v793_v59 = vadd.f32 %v1974_v24, %v572_v57  ;;  %v809_v60 = vadd.f32 %v1974_v24, %v636_v58  ;;  %v1393_v61 = vpop.f32.mrb[6].mxu0  ;;  %v1409_v62 = vpop.f32.mrb[6].mxu1 }
 0x16b   : > { %v796_v63 = vadd.f32 %v1393_v61, %v1974_v24  ;;  %v812_v0 = vadd.f32 %v1409_v62, %v1974_v24  ;;  %v575_v1 = vpop.f32.mrb[7].mxu0  ;;  %v639_v2 = vpop.f32.mrb[7].mxu1  ;;  %v827_v5 = vmax.f32 %v795_v55, 0.0  ;;  %v843_v6 = vmax.f32 %v811_v56, 0.0 }
 0x16c   : > { %v794_v3 = vadd.f32 %v1974_v24, %v575_v1  ;;  %v810_v4 = vadd.f32 %v1974_v24, %v639_v2  ;;  %v825_v9 = vmax.f32 %v793_v59, 0.0  ;;  %v841_v10 = vmax.f32 %v809_v60, 0.0 }
 0x16d   : > { %v828_v7 = vmax.f32 %v796_v63, 0.0  ;;  %v844_v8 = vmax.f32 %v812_v0, 0.0 }
 0x16e   : > { %v826_v11 = vmax.f32 %v794_v3, 0.0  ;;  %v842_v12 = vmax.f32 %v810_v4, 0.0 }
 0x16f   : > { %v1269_v13 = vpack.c.bf16 %v828_v7, %v827_v5  ;;  %v1309_v14 = vpack.c.bf16 %v844_v8, %v843_v6 }
 0x170   : > { %v1264_v15 = vpack.c.bf16 %v826_v11, %v825_v9  ;;  %v1304_v16 = vpack.c.bf16 %v842_v12, %v841_v10  ;;  %v1396_v17 = vpop.f32.mrb[8].mxu0  ;;  %v1412_v18 = vpop.f32.mrb[8].mxu1 }
 0x171   : > { %1333 = vst [vmem:[%s1986_s20 + $0x18] sm:$0xff] %v1269_v13   ;;  %1341 = vst [vmem:[%s1986_s20 + $0x58] sm:$0xff] %v1309_v14   ;;  %v799_v19 = vadd.f32 %v1396_v17, %v1974_v24  ;;  %v815_v20 = vadd.f32 %v1412_v18, %v1974_v24  ;;  %v588_v21 = vpop.f32.mrb[9].mxu0  ;;  %v652_v22 = vpop.f32.mrb[9].mxu1 }
 0x172   : > { %1332 = vst [vmem:[%s1986_s20 + $0x10] sm:$0xff] %v1264_v15   ;;  %1340 = vst [vmem:[%s1986_s20 + $0x50] sm:$0xff] %v1304_v16   ;;  %v797_v23 = vadd.f32 %v1974_v24, %v588_v21  ;;  %v813_v25 = vadd.f32 %v1974_v24, %v652_v22  ;;  %v1397_v26 = vpop.f32.mrb[10].mxu0  ;;  %v1413_v27 = vpop.f32.mrb[10].mxu1 }
 0x173   : > { %v800_v28 = vadd.f32 %v1397_v26, %v1974_v24  ;;  %v816_v29 = vadd.f32 %v1413_v27, %v1974_v24  ;;  %v591_v30 = vpop.f32.mrb[11].mxu0  ;;  %v655_v31 = vpop.f32.mrb[11].mxu1  ;;  %v831_v34 = vmax.f32 %v799_v19, 0.0  ;;  %v847_v35 = vmax.f32 %v815_v20, 0.0 }
 0x174   : > { %v798_v32 = vadd.f32 %v1974_v24, %v591_v30  ;;  %v814_v33 = vadd.f32 %v1974_v24, %v655_v31  ;;  %v829_v38 = vmax.f32 %v797_v23, 0.0  ;;  %v845_v39 = vmax.f32 %v813_v25, 0.0 }
 0x175   : > { %v832_v36 = vmax.f32 %v800_v28, 0.0  ;;  %v848_v37 = vmax.f32 %v816_v29, 0.0 }
 0x176   : > { %v830_v40 = vmax.f32 %v798_v32, 0.0  ;;  %v846_v41 = vmax.f32 %v814_v33, 0.0 }
 0x177   : > { %v1279_v42 = vpack.c.bf16 %v832_v36, %v831_v34  ;;  %v1319_v43 = vpack.c.bf16 %v848_v37, %v847_v35 }
 0x178   : > { %v1274_v44 = vpack.c.bf16 %v830_v40, %v829_v38  ;;  %v1314_v45 = vpack.c.bf16 %v846_v41, %v845_v39  ;;  %v1400_v46 = vpop.f32.mrb[12].mxu0  ;;  %v1416_v47 = vpop.f32.mrb[12].mxu1 }
 0x179   : > { %1335 = vst [vmem:[%s1986_s20 + $0x28] sm:$0xff] %v1279_v42   ;;  %1343 = vst [vmem:[%s1986_s20 + $0x68] sm:$0xff] %v1319_v43   ;;  %v803_v48 = vadd.f32 %v1400_v46, %v1974_v24  ;;  %v819_v49 = vadd.f32 %v1416_v47, %v1974_v24  ;;  %v604_v50 = vpop.f32.mrb[13].mxu0  ;;  %v668_v51 = vpop.f32.mrb[13].mxu1 }
 0x17a   : > { %1334 = vst [vmem:[%s1986_s20 + $0x20] sm:$0xff] %v1274_v44   ;;  %1342 = vst [vmem:[%s1986_s20 + $0x60] sm:$0xff] %v1314_v45   ;;  %v801_v52 = vadd.f32 %v1974_v24, %v604_v50  ;;  %v817_v53 = vadd.f32 %v1974_v24, %v668_v51  ;;  %v1401_v54 = vpop.f32.mrb[14].mxu0  ;;  %v1417_v55 = vpop.f32.mrb[14].mxu1 }
 0x17b   : > { %v804_v56 = vadd.f32 %v1401_v54, %v1974_v24  ;;  %v820_v57 = vadd.f32 %v1417_v55, %v1974_v24  ;;  %v607_v58 = vpop.f32.mrb[15].mxu0  ;;  %v671_v59 = vpop.f32.mrb[15].mxu1  ;;  %v835_v62 = vmax.f32 %v803_v48, 0.0  ;;  %v851_v63 = vmax.f32 %v819_v49, 0.0 }
 0x17c   : > { %v802_v60 = vadd.f32 %v1974_v24, %v607_v58  ;;  %v818_v61 = vadd.f32 %v1974_v24, %v671_v59  ;;  %v833_v2 = vmax.f32 %v801_v52, 0.0  ;;  %v849_v3 = vmax.f32 %v817_v53, 0.0 }
 0x17d   : > { %v836_v0 = vmax.f32 %v804_v56, 0.0  ;;  %v852_v1 = vmax.f32 %v820_v57, 0.0 }
 0x17e   : > { %v834_v4 = vmax.f32 %v802_v60, 0.0  ;;  %v850_v5 = vmax.f32 %v818_v61, 0.0 }
 0x17f   : > { %v1289_v6 = vpack.c.bf16 %v836_v0, %v835_v62  ;;  %v1329_v7 = vpack.c.bf16 %v852_v1, %v851_v63 }
 0x180   : > { %v1284_v24 = vpack.c.bf16 %v834_v4, %v833_v2  ;;  %v1324_v8 = vpack.c.bf16 %v850_v5, %v849_v3 }
 0x181   : > { %1337 = vst [vmem:[%s1986_s20 + $0x38] sm:$0xff] %v1289_v6   ;;  %1345 = vst [vmem:[%s1986_s20 + $0x78] sm:$0xff] %v1329_v7  }
 0x182   : > { %1336 = vst [vmem:[%s1986_s20 + $0x30] sm:$0xff] %v1284_v24   ;;  %1344 = vst [vmem:[%s1986_s20 + $0x70] sm:$0xff] %v1324_v8  }
 0x183   : > { %1644 = shalt.err (!%p1641_p11)
}
 0x184   : > { %s1645_s21 = scalar_lea.hbm %s2029_s15, 2048  ;;  %s1649_s5 = scalar_lea.hbm %s2087_s3, 4096 }
 0x185   : > { %p1646_p0 = scmp.ne.s32.totalorder %s2029_s15, %s1645_s21  ;;  %p1650_p6 = scmp.lt.u32.totalorder %s2029_s15, %s2087_s3 }
 0x186   : > { %p1651_p7 = scmp.lt.u32.totalorder %s1649_s5, %s1645_s21  ;;  %p1653_p8 = scmp.lt.u32.totalorder %s1645_s21, %s2029_s15 }
 0x187   : > { %p1647_p4 = pnand %p1646_p0, %p2102_p12 }
 0x188   : > { %p1652_p2 = por %p1651_p7, %p1650_p6 }
 0x189   : > { %p1648_p13 = pneg %p1647_p4 }
 0x18a   : > { %p1654_p1 = por %p1653_p8, %p1652_p2 }
 0x18c   : > { %p1655_p10 = pnand %p1654_p1, %p1648_p13 }
 0x18e   : > { %1658 = shalt.err (!%p1655_p10)
}
 0x18f   : > { %s1725_s20 = smov 64   ;;  %s1726_s22 = smov 4  }
 0x190   : > { %1444 = dma.vmem_to_hbm [thread:$0]  (%p2102_p12), %s2031_s24, 2048, %s2029_s15, %s1014_s26, %s1725_s20, %s1725_s20, %s1726_s22  }
 0x191 PF: > { %s1043_s11 = sand.u32 1, %s1697_s12   ;;  %p2103_p3 = scmp.ne.s32.totalorder %s2095_s23, 0 }
 0x192   : > { %p2104_p5 = scmp.ge.s32.totalorder %s1717_s17, 2  ;;  %s1044_s18 = scalar_lea.sflag [#allocation5], %s1043_s11 }
 0x194   : > { %p1458_p9 = pnand %p2104_p5, %p2103_p3 }
 0x196   : > { %1692 = dma.done.wait (!%p1458_p9), %s1044_s18, 2048  }
 0x197   : > { %1694 = vsyncadd (!%p1458_p9), %s1044_s18, 4294965248  ;;  %s20_s17 = sadd.s32 1, %s1717_s17   ;;  %s2105_s12 = smov %s1701_s13 }
 0x198   : > { %p17_p11 = scmp.ge.s32.totalorder %s20_s17, 4   ;;  %s2106_s13 = smov %s1705_s14 }
 0x199   : > { %s2107_s14 = smov %s1893_s6  ;;  %s2108_s15 = smov %s1713_s16 }
 0x19a   : > { %s2109_s16 = smov %s2111_s25  ;;  %19 = sbr.rel (!%p17_p11) target bundleno = 7 (0x7), region = 95 }
 0x1a1   :  { %1049 = vsyncpa [#allocation4], 1 }
 0x1a2   :  { %1051 = vsyncpa [#allocation4 + $0x1], 1 }
 0x1a3   :  { %1052 = vsyncpa [#allocation7], 1 }
 0x1a4   :  { %1053 = vsyncpa [#allocation5], 1 }
 0x1a5   :  { %1055 = vsyncpa [#allocation5 + $0x1], 1 }

// kernel: corblock_s_forward.9
= control target key start
LH: loop header
LB: loop body
LE: loop exit
PB: predicated region body
PF: predicated region fallthrough
CT: control target
= control target key end

     0   :  { %8 = vsyncpa [#allocation4], 0  ;;  %s854_s0 = inlined_call_operand.hbm [shape: bf16[128,128], index: 0, kind: input, shape index: {}]   ;;  %s855_s1 = inlined_call_operand.hbm [shape: bf16[128,128], index: 1, kind: input, shape index: {}]   ;;  %s856_s2 = inlined_call_operand.hbm [shape: f32[1,128], index: 2, kind: input, shape index: {}]   ;;  %s857_s3 = inlined_call_operand.hbm [shape: bf16[128,128], index: 3, kind: output, shape index: {}]  }
   0x1   :  { %9 = vsyncpa [#allocation7], 0 }
   0x2   :  { %10 = vsyncpa [#allocation5], 0  ;;  %s764_s12 = smov [#allocation6]   ;;  %s765_s14 = smov [#allocation3]  }
   0x3   :  { %s28_s13 = sshll.u32 %s764_s12, 4  ;;  %s16_s15 = sshll.u32 %s765_s14, 4  ;;  %s29_s13 = int_to_ptr.vmem [resolvable:$true] %s28_s13  ;;  %s790_s15 = int_to_ptr.vmem [resolvable:$true] %s16_s15 }
   0x4   :  { %s670_s18 = scalar_lea.hbm %s855_s1, 1024 }
   0x5   :  { %p671_p0 = scmp.ne.s32.totalorder %s855_s1, %s670_s18  ;;  %p674_p1 = scmp.lt.u32.totalorder %s670_s18, %s855_s1 }
   0x7   :  { %p676_p2 = pnand %p674_p1, %p671_p0 }
   0x9   :  { %679 = shalt.err (!%p676_p2)
}
   0xa   :  { %s680_s23 = scalar_lea.vmem %s29_s13, 1024  ;;  %p685_p4 = scmp.lt.s32.totalorder %s29_s13, %s29_s13 }
   0xb   :  { %p681_p3 = scmp.ne.s32.totalorder %s29_s13, %s680_s23  ;;  %p686_p5 = scmp.lt.s32.totalorder %s680_s23, %s680_s23 }
   0xd   :  { %p687_p6 = por %p686_p5, %p685_p4 }
   0xf   :  { %p688_p7 = pnand %p687_p6, %p681_p3 }
  0x11   :  { %691 = shalt.err (!%p688_p7)
}
  0x12   :  { %s766_s24 = smov 64   ;;  %s767_s25 = smov 4  }
  0x13   :  { %34 = dma.hbm_to_vmem [thread:$0]  %s855_s1, 1024, %s29_s13, [#allocation7], %s766_s24, %s766_s24, %s767_s25  }
  0x14   :  { %s692_s30 = scalar_lea.hbm %s854_s0, 1024 }
  0x15   :  { %p693_p8 = scmp.ne.s32.totalorder %s854_s0, %s692_s30  ;;  %p696_p9 = scmp.lt.u32.totalorder %s692_s30, %s854_s0 }
  0x17   :  { %p698_p10 = pnand %p696_p9, %p693_p8 }
  0x19   :  { %701 = shalt.err (!%p698_p10)
}
  0x1a   :  { %s702_s8 = scalar_lea.vmem %s790_s15, 1024  ;;  %p707_p12 = scmp.lt.s32.totalorder %s790_s15, %s790_s15 }
  0x1b   :  { %p703_p11 = scmp.ne.s32.totalorder %s790_s15, %s702_s8  ;;  %p708_p13 = scmp.lt.s32.totalorder %s702_s8, %s702_s8 }
  0x1d   :  { %p709_p0 = por %p708_p13, %p707_p12 }
  0x1f   :  { %p710_p1 = pnand %p709_p0, %p703_p11 }
  0x21   :  { %713 = shalt.err (!%p710_p1)
}
  0x22   :  { %22 = dma.hbm_to_vmem [thread:$0]  %s854_s0, 1024, %s790_s15, [#allocation4], %s766_s24, %s766_s24, %s767_s25  }
  0x23   :  { %s768_s10 = smov [#allocation8]   ;;  %s714_s14 = scalar_lea.hbm %s856_s2, 16 }
  0x24   :  { %s41_s11 = sshll.u32 %s768_s10, 4  ;;  %p715_p2 = scmp.ne.s32.totalorder %s856_s2, %s714_s14  ;;  %s42_s11 = int_to_ptr.vmem [resolvable:$true] %s41_s11 }
  0x25   :  { %p718_p3 = scmp.lt.u32.totalorder %s714_s14, %s856_s2 }
  0x27   :  { %p720_p4 = pnand %p718_p3, %p715_p2 }
  0x29   :  { %723 = shalt.err (!%p720_p4)
}
  0x2a   :  { %s724_s20 = scalar_lea.vmem %s42_s11, 16  ;;  %s728_s0 = scalar_lea.vmem %s42_s11, 32 }
  0x2b   :  { %p725_p5 = scmp.ne.s32.totalorder %s42_s11, %s724_s20  ;;  %p729_p6 = scmp.lt.s32.totalorder %s42_s11, %s42_s11 }
  0x2c   :  { %p730_p7 = scmp.lt.s32.totalorder %s728_s0, %s724_s20 }
  0x2e   :  { %p731_p8 = por %p730_p7, %p729_p6 }
  0x30   :  { %p732_p9 = pnand %p731_p8, %p725_p5 }
  0x32   :  { %735 = shalt.err (!%p732_p9)
}
  0x33   :  { %44 = dma.hbm_to_vmem [thread:$0]  %s856_s2, 16, %s42_s11, [#allocation7]  }
  0x34   :  { %758 = dma.done.wait [#allocation4], 1024  }
  0x35   :  { %759 = vsyncadd [#allocation4], 4294966272 }
  0x36   :  { %760 = dma.done.wait [#allocation7], 1040  }
  0x37   :  { %761 = vsyncadd [#allocation7], 4294966256  ;;  %v654_v0 = vld [vmem:[#allocation6] sm:$0xff]   ;;  %v655_v1 = vld [vmem:[#allocation6 + $0x8] sm:$0xff]   ;;  %s769_s2 = smov [#allocation9]  }
  0x38   :  { %600 = vmatprep.subr.bf16.mxu0 %v654_v0  ;;  %632 = vmatprep.subr.bf16.mxu1 %v654_v0  ;;  %v656_v2 = vld [vmem:[#allocation6 + $0x10] sm:$0xff]   ;;  %v657_v3 = vld [vmem:[#allocation6 + $0x18] sm:$0xff]   ;;  %v662_v4 = vld [vmem:[#allocation3] sm:$0xff]   ;;  %s475_s22 = sshll.u32 %s769_s2, 4  ;;  %s476_s22 = int_to_ptr.vmem [resolvable:$true] %s475_s22 }
  0x39   :  { %601 = vmatpush3.bf16.msra.mxu0 %v654_v0  ;;  %640 = vmatpush3.bf16.msra.mxu1 %v654_v0  ;;  %v663_v5 = vld [vmem:[#allocation3 + $0x20] sm:$0xff]   ;;  %v659_v7 = vld [vmem:[#allocation6 + $0x28] sm:$0xff]   ;;  %v660_v8 = vld [vmem:[#allocation6 + $0x30] sm:$0xff]   ;;  %s736_s23 = scalar_lea.vmem %s476_s22, 1024  ;;  %p741_p11 = scmp.lt.s32.totalorder %s476_s22, %s476_s22 }
  0x3a   :  { %602 = vmatprep.subr.bf16.mxu0 %v655_v1  ;;  %633 = vmatprep.subr.bf16.mxu1 %v655_v1  ;;  %v658_v6 = vld [vmem:[#allocation6 + $0x20] sm:$0xff]   ;;  %v661_v9 = vld [vmem:[#allocation6 + $0x38] sm:$0xff]   ;;  %v664_v10 = vld [vmem:[#allocation3 + $0x8] sm:$0xff]   ;;  %p737_p10 = scmp.ne.s32.totalorder %s476_s22, %s736_s23  ;;  %p742_p12 = scmp.lt.s32.totalorder %s736_s23, %s736_s23 }
  0x3b   :  { %616 = vmatprep.mubr.bf16.mxu0 %v662_v4  ;;  %624 = vmatprep.mubr.bf16.mxu1 %v663_v5  ;;  %v665_v11 = vld [vmem:[#allocation3 + $0x28] sm:$0xff]   ;;  %v666_v12 = vld [vmem:[#allocation3 + $0x10] sm:$0xff]   ;;  %v668_v14 = vld [vmem:[#allocation3 + $0x18] sm:$0xff]  }
  0x3c   :  { %v667_v13 = vld [vmem:[#allocation3 + $0x30] sm:$0xff]   ;;  %v669_v15 = vld [vmem:[#allocation3 + $0x38] sm:$0xff]   ;;  %v504_v17 = vld [vmem:[#allocation8] ss:$0 sm:$0xff]  ;;  %p743_p13 = por %p742_p12, %p741_p11 }
  0x3d   :  { %603 = vmatpush3.bf16.msra.mxu0 %v655_v1  ;;  %641 = vmatpush3.bf16.msra.mxu1 %v655_v1 }
  0x3e   :  { %604 = vmatprep.subr.bf16.mxu0 %v656_v2  ;;  %634 = vmatprep.subr.bf16.mxu1 %v656_v2  ;;  %p744_p0 = pnand %p743_p13, %p737_p10 }
  0x41   :  { %605 = vmatpush3.bf16.msra.mxu0 %v656_v2  ;;  %642 = vmatpush3.bf16.msra.mxu1 %v656_v2 }
  0x42   :  { %606 = vmatprep.subr.bf16.mxu0 %v657_v3  ;;  %635 = vmatprep.subr.bf16.mxu1 %v657_v3 }
  0x45   :  { %607 = vmatpush3.bf16.msra.mxu0 %v657_v3  ;;  %643 = vmatpush3.bf16.msra.mxu1 %v657_v3 }
  0x46   :  { %608 = vmatprep.subr.bf16.mxu0 %v658_v6  ;;  %636 = vmatprep.subr.bf16.mxu1 %v658_v6 }
  0x49   :  { %609 = vmatpush3.bf16.msra.mxu0 %v658_v6  ;;  %644 = vmatpush3.bf16.msra.mxu1 %v658_v6 }
  0x4a   :  { %610 = vmatprep.subr.bf16.mxu0 %v659_v7  ;;  %637 = vmatprep.subr.bf16.mxu1 %v659_v7 }
  0x4d   :  { %611 = vmatpush3.bf16.msra.mxu0 %v659_v7  ;;  %645 = vmatpush3.bf16.msra.mxu1 %v659_v7 }
  0x4e   :  { %612 = vmatprep.subr.bf16.mxu0 %v660_v8  ;;  %638 = vmatprep.subr.bf16.mxu1 %v660_v8 }
  0x51   :  { %613 = vmatpush3.bf16.msra.mxu0 %v660_v8  ;;  %646 = vmatpush3.bf16.msra.mxu1 %v660_v8 }
  0x52   :  { %614 = vmatprep.subr.bf16.mxu0 %v661_v9  ;;  %639 = vmatprep.subr.bf16.mxu1 %v661_v9 }
  0x55   :  { %615 = vmatpush3.bf16.msra.mxu0 %v661_v9  ;;  %647 = vmatpush3.bf16.msra.mxu1 %v661_v9 }
  0x58   :  { %617 = vmatmul.mubr.bf16.vlgmr.msra.gmra.mrb[0].mxu0 %v664_v10  ;;  %625 = vmatmul.mubr.bf16.vlgmr.msra.gmra.mrb[0].mxu1 %v665_v11 }
  0x59   :  { %620 = vmatprep.mubr.bf16.mxu0 %v666_v12  ;;  %628 = vmatprep.mubr.bf16.mxu1 %v667_v13 }
  0x60   :  { %621 = vmatmul.mubr.bf16.gmra.mrb[4].mxu0 %v668_v14  ;;  %629 = vmatmul.mubr.bf16.gmra.mrb[4].mxu1 %v669_v15 }
 0x12b   :  { %v618_v16 = vpop.f32.mrb[0].mxu0  ;;  %v626_v18 = vpop.f32.mrb[0].mxu1 }
 0x12c   :  { %v253_v19 = vpop.f32.mrb[1].mxu0  ;;  %v285_v20 = vpop.f32.mrb[1].mxu1  ;;  %v376_v23 = vadd.f32 %v618_v16, %v504_v17  ;;  %v384_v24 = vadd.f32 %v626_v18, %v504_v17 }
 0x12d   :  { %v619_v21 = vpop.f32.mrb[2].mxu0  ;;  %v627_v22 = vpop.f32.mrb[2].mxu1  ;;  %v374_v29 = vadd.f32 %v504_v17, %v253_v19  ;;  %v382_v30 = vadd.f32 %v504_v17, %v285_v20 }
 0x12e   :  { %v377_v25 = vadd.f32 %v619_v21, %v504_v17  ;;  %v385_v26 = vadd.f32 %v627_v22, %v504_v17  ;;  %v256_v27 = vpop.f32.mrb[3].mxu0  ;;  %v288_v28 = vpop.f32.mrb[3].mxu1 }
 0x12f   :  { %v375_v31 = vadd.f32 %v504_v17, %v256_v27  ;;  %v383_v32 = vadd.f32 %v504_v17, %v288_v28 }
 0x130   :  { %v545_v33 = vpack.c.bf16 %v377_v25, %v376_v23  ;;  %v565_v34 = vpack.c.bf16 %v385_v26, %v384_v24 }
 0x131   :  { %v540_v35 = vpack.c.bf16 %v375_v31, %v374_v29  ;;  %v560_v36 = vpack.c.bf16 %v383_v32, %v382_v30 }
 0x132   :  { %577 = vst [vmem:[#allocation9 + $0x8] sm:$0xff] %v545_v33   ;;  %581 = vst [vmem:[#allocation9 + $0x28] sm:$0xff] %v565_v34  }
 0x133   :  { %541 = vst [vmem:[#allocation9] sm:$0xff] %v540_v35   ;;  %580 = vst [vmem:[#allocation9 + $0x20] sm:$0xff] %v560_v36   ;;  %v622_v37 = vpop.f32.mrb[4].mxu0  ;;  %v630_v38 = vpop.f32.mrb[4].mxu1 }
 0x134   :  { %v269_v39 = vpop.f32.mrb[5].mxu0  ;;  %v301_v40 = vpop.f32.mrb[5].mxu1  ;;  %v380_v43 = vadd.f32 %v622_v37, %v504_v17  ;;  %v388_v44 = vadd.f32 %v630_v38, %v504_v17 }
 0x135   :  { %v623_v41 = vpop.f32.mrb[6].mxu0  ;;  %v631_v42 = vpop.f32.mrb[6].mxu1  ;;  %v378_v49 = vadd.f32 %v504_v17, %v269_v39  ;;  %v386_v50 = vadd.f32 %v504_v17, %v301_v40 }
 0x136   :  { %v381_v45 = vadd.f32 %v623_v41, %v504_v17  ;;  %v389_v46 = vadd.f32 %v631_v42, %v504_v17  ;;  %v272_v47 = vpop.f32.mrb[7].mxu0  ;;  %v304_v48 = vpop.f32.mrb[7].mxu1 }
 0x137   :  { %v379_v51 = vadd.f32 %v504_v17, %v272_v47  ;;  %v387_v52 = vadd.f32 %v504_v17, %v304_v48 }
 0x138   :  { %v555_v53 = vpack.c.bf16 %v381_v45, %v380_v43  ;;  %v575_v54 = vpack.c.bf16 %v389_v46, %v388_v44 }
 0x139   :  { %v550_v55 = vpack.c.bf16 %v379_v51, %v378_v49  ;;  %v570_v56 = vpack.c.bf16 %v387_v52, %v386_v50 }
 0x13a   :  { %579 = vst [vmem:[#allocation9 + $0x18] sm:$0xff] %v555_v53   ;;  %583 = vst [vmem:[#allocation9 + $0x38] sm:$0xff] %v575_v54  }
 0x13b   :  { %578 = vst [vmem:[#allocation9 + $0x10] sm:$0xff] %v550_v55   ;;  %582 = vst [vmem:[#allocation9 + $0x30] sm:$0xff] %v570_v56  }
 0x13c   :  { %747 = shalt.err (!%p744_p0)
}
 0x13d   :  { %s748_s28 = scalar_lea.hbm %s857_s3, 1024 }
 0x13e   :  { %p749_p1 = scmp.ne.s32.totalorder %s857_s3, %s748_s28  ;;  %p752_p2 = scmp.lt.u32.totalorder %s748_s28, %s857_s3 }
 0x140   :  { %p754_p3 = pnand %p752_p2, %p749_p1 }
 0x142   :  { %757 = shalt.err (!%p754_p3)
}
 0x143   :  { %481 = dma.vmem_to_hbm [thread:$0]  %s476_s22, 1024, %s857_s3, [#allocation5], %s766_s24, %s766_s24, %s767_s25  }
 0x144   :  { %762 = dma.done.wait [#allocation5], 1024  }
 0x145   :  { %763 = vsyncadd [#allocation5], 4294966272 }
 0x146   :  { %485 = vsyncpa [#allocation4], 1 }
 0x147   :  { %486 = vsyncpa [#allocation7], 1 }
 0x148   :  { %487 = vsyncpa [#allocation5], 1 }

// kernel: corblock_s_forward.8
= control target key start
LH: loop header
LB: loop body
LE: loop exit
PB: predicated region body
PF: predicated region fallthrough
CT: control target
= control target key end

     0   :  { %8 = vsyncpa [#allocation4], 0  ;;  %s2052_s0 = inlined_call_operand.hbm [shape: bf16[512,128], index: 0, kind: input, shape index: {}]   ;;  %s2053_s1 = inlined_call_operand.hbm [shape: bf16[128,128], index: 1, kind: input, shape index: {}]   ;;  %s2054_s2 = inlined_call_operand.hbm [shape: f32[1,128], index: 2, kind: input, shape index: {}]   ;;  %s2055_s3 = inlined_call_operand.hbm [shape: bf16[512,128], index: 3, kind: output, shape index: {}]  }
   0x1   :  { %10 = vsyncpa [#allocation4 + $0x1], 0 }
   0x2   :  { %11 = vsyncpa [#allocation7], 0 }
   0x3   :  { %12 = vsyncpa [#allocation5], 0 }
   0x4   :  { %14 = vsyncpa [#allocation5 + $0x1], 0  ;;  %s1715_s12 = smov 0   ;;  %s1717_s13 = smov 0  }
   0x5   :  { %s1719_s14 = smov 0   ;;  %s1721_s15 = smov 0  }
   0x6   :  { %s1723_s16 = smov 0   ;;  %s1725_s17 = smov 0  }
   0x7 LB: > { %s1109_s18 = sadd.s32 4294967295, %s1685_s17   ;;  %s1110_s19 = sadd.s32 4294967294, %s1685_s17   ;;  %s1685_s17 = sphi %s1725_s17, %s20_s17   ;;  %s1681_s16 = sphi %s1723_s16, %s2077_s16   ;;  %s1677_s15 = sphi %s1721_s15, %s2076_s15   ;;  %s1673_s14 = sphi %s1719_s14, %s2075_s14   ;;  %s1669_s13 = sphi %s1717_s13, %s2074_s13   ;;  %s1665_s12 = sphi %s1715_s12, %s2073_s12  }
   0x8   : > { %p61_p0 = scmp.ne.s32.totalorder %s1669_s13, %s1665_s12  ;;  %p1749_p1 = scmp.eq.s32.totalorder %s1109_s18, 0 }
   0x9   : > { %p1753_p2 = scmp.eq.s32.totalorder %s1109_s18, 1  ;;  %p147_p3 = scmp.eq.s32.totalorder %s1110_s19, 1 }
   0xa   : > { %s2060_s20 = scalar_select %p1749_p1, 1, 0 }
   0xb   : > { %p1759_p4 = por %p1749_p1, %p61_p0  ;;  %p1111_p5 = scmp.ge.s32.totalorder %s1685_s17, 1 }
   0xc   : > { %p1764_p6 = por %p147_p3, %p61_p0  ;;  %p154_p7 = scmp.lt.s32.totalorder %s1685_s17, 3 }
   0xd   : > { %s2062_s22 = scalar_select %p1759_p4, 1, 0 }
   0xe   : > { %s2063_s23 = scalar_select %p1764_p6, 1, 0 }
   0xf   : > { %p1769_p8 = pnand %p1111_p5, %p154_p7  ;;  %s1687_s25 = smov [#allocation6]  }
  0x10   : > { %s170_s26 = sshll.u32 %s1687_s25, 4  ;;  %s1688_s28 = smov [#allocation8]   ;;  %s1773_s26 = int_to_ptr.vmem [resolvable:$true] %s170_s26 }
  0x11   : > { %p1414_p9 = pneg %p1769_p8  ;;  %s186_s29 = sshll.u32 %s1688_s28, 4  ;;  %s1784_s29 = int_to_ptr.vmem [resolvable:$true] %s186_s29 }
  0x12   : > { %s1513_s5 = scalar_lea.hbm %s2053_s1, 1024 }
  0x13   : > { %p1780_p11 = pnand %p1414_p9, %p1749_p1  ;;  %p1514_p12 = scmp.ne.s32.totalorder %s2053_s1, %s1513_s5 }
  0x14   : > { %p1520_p5 = scmp.lt.u32.totalorder %s1513_s5, %s2053_s1 }
  0x15   : > { %p1515_p13 = pneg %p1780_p11 }
  0x17   : > { %p1516_p0 = pnand %p1515_p13, %p1514_p12 }
  0x19   : > { %p1517_p3 = pneg %p1516_p0 }
  0x1b   : > { %p1522_p7 = pnand %p1520_p5, %p1517_p3 }
  0x1d   : > { %1525 = shalt.err (!%p1522_p7)
}
  0x1e   : > { %s1526_s10 = scalar_lea.vmem %s1773_s26, 1024  ;;  %p1534_p1 = scmp.lt.s32.totalorder %s1773_s26, %s1773_s26 }
  0x1f   : > { %p1527_p9 = scmp.ne.s32.totalorder %s1773_s26, %s1526_s10  ;;  %p1535_p12 = scmp.lt.s32.totalorder %s1526_s10, %s1526_s10 }
  0x21   : > { %p1529_p10 = pnand %p1527_p9, %p1515_p13  ;;  %p1536_p0 = por %p1535_p12, %p1534_p1 }
  0x23   : > { %p1530_p6 = pneg %p1529_p10 }
  0x25   : > { %p1537_p4 = pnand %p1536_p0, %p1530_p6 }
  0x27   : > { %1540 = shalt.err (!%p1537_p4)
}
  0x28   : > { %s1689_s11 = smov 64   ;;  %s1690_s18 = smov 4  }
  0x29   : > { %1417 = dma.hbm_to_vmem [thread:$0]  (!%p1780_p11), %s2053_s1, 1024, %s1773_s26, [#allocation7], %s1689_s11, %s1689_s11, %s1690_s18  }
  0x2a   : > { %s1541_s4 = scalar_lea.hbm %s2054_s2, 16 }
  0x2b   : > { %p1542_p1 = scmp.ne.s32.totalorder %s2054_s2, %s1541_s4  ;;  %p1548_p10 = scmp.lt.u32.totalorder %s1541_s4, %s2054_s2 }
  0x2d   : > { %p1544_p4 = pnand %p1542_p1, %p1515_p13 }
  0x2f   : > { %p1545_p6 = pneg %p1544_p4 }
  0x31   : > { %p1550_p3 = pnand %p1548_p10, %p1545_p6 }
  0x33   : > { %1553 = shalt.err (!%p1550_p3)
}
  0x34   : > { %s1554_s26 = scalar_lea.vmem %s1784_s29, 16  ;;  %s1561_s9 = scalar_lea.vmem %s1784_s29, 32 }
  0x35   : > { %p1555_p5 = scmp.ne.s32.totalorder %s1784_s29, %s1554_s26  ;;  %p1562_p12 = scmp.lt.s32.totalorder %s1784_s29, %s1784_s29 }
  0x36   : > { %p1563_p0 = scmp.lt.s32.totalorder %s1561_s9, %s1554_s26 }
  0x37   : > { %p1557_p7 = pnand %p1555_p5, %p1515_p13 }
  0x38   : > { %p1564_p1 = por %p1563_p0, %p1562_p12 }
  0x39   : > { %p1558_p9 = pneg %p1557_p7 }
  0x3b   : > { %p1565_p4 = pnand %p1564_p1, %p1558_p9 }
  0x3d   : > { %1568 = shalt.err (!%p1565_p4)
}
  0x3e   : > { %1420 = dma.hbm_to_vmem [thread:$0]  (!%p1780_p11), %s2054_s2, 16, %s1784_s29, [#allocation7]  }
  0x3f   : > { %s39_s25 = sadd.s32 1, %s1681_s16  ;;  %s48_s28 = sadd.s32 1, %s1673_s14 }
  0x40   : > { %p41_p13 = scmp.ge.s32.totalorder %s39_s25, 2  ;;  %p55_p6 = scmp.ne.s32.totalorder %s1673_s14, %s1669_s13 }
  0x41   : > { %p56_p10 = scmp.eq.s32.totalorder %s1685_s17, 0  ;;  %p1431_p3 = scmp.lt.s32.totalorder %s1685_s17, 2 }
  0x42   : > { %s2079_s25 = smov (%p41_p13, %s39_s25), 0  ;;  %p1852_p7 = por %p1753_p2, %p55_p6 }
  0x43   : > { %p57_p5 = por %p56_p10, %p55_p6  ;;  %s43_s30 = ssub.s32 %s1681_s16, %s2079_s25 }
  0x44   : > { %s2066_s27 = scalar_select %p1852_p7, 1, 0 }
  0x45   : > { %s197_s4 = sand.u32 1, %s1673_s14   ;;  %p46_p9 = scmp.eq.s32.totalorder %s43_s30, 0 }
  0x46   : > { %s1115_s29 = sshll.u32 %s197_s4, 7  ;;  %s1185_s5 = sshll.u32 %s1681_s16, 11 }
  0x47   : > { %s1861_s6 = scalar_select %p46_p9, %s1673_s14, %s48_s28  }
  0x48   : > { %s1866_s26 = scalar_lea.hbm %s2052_s0, %s1185_s5  ;;  %s201_s21 = scalar_lea.vmem [#allocation3], %s1115_s29 }
  0x49   : > { %s209_s9 = sshll.u32 %s201_s21, 4  ;;  %p1870_p2 = pnand %p1431_p3, %p57_p5  ;;  %s1874_s9 = int_to_ptr.vmem [resolvable:$true] %s209_s9 }
  0x4a   : > { %s1876_s19 = scalar_lea.sflag [#allocation4], %s197_s4  ;;  %s1569_s28 = scalar_lea.hbm %s1866_s26, 2048 }
  0x4b   : > { %p1570_p11 = scmp.ne.s32.totalorder %s1866_s26, %s1569_s28  ;;  %p1571_p12 = pneg %p1870_p2 }
  0x4c   : > { %s1574_s5 = scalar_lea.hbm %s2052_s0, 4096  ;;  %p1575_p4 = scmp.lt.u32.totalorder %s1866_s26, %s2052_s0 }
  0x4d   : > { %p1572_p0 = pnand %p1571_p12, %p1570_p11  ;;  %p1576_p13 = scmp.lt.u32.totalorder %s1574_s5, %s1569_s28 }
  0x4e   : > { %p1578_p10 = scmp.lt.u32.totalorder %s1569_s28, %s1866_s26 }
  0x4f   : > { %p1573_p1 = pneg %p1572_p0  ;;  %p1577_p6 = por %p1576_p13, %p1575_p4 }
  0x51   : > { %p1579_p3 = por %p1578_p10, %p1577_p6 }
  0x53   : > { %p1580_p5 = pnand %p1579_p3, %p1573_p1 }
  0x55   : > { %1583 = shalt.err (!%p1580_p5)
}
  0x56   : > { %s1584_s4 = scalar_lea.vmem %s1874_s9, 2048  ;;  %s1691_s21 = smov [#allocation3]  }
  0x57   : > { %p1585_p9 = scmp.ne.s32.totalorder %s1874_s9, %s1584_s4  ;;  %s1589_s30 = sshll.u32 %s1691_s21, 4  ;;  %s1590_s30 = int_to_ptr.vmem [resolvable:$false] %s1589_s30 }
  0x58   : > { %s1591_s29 = scalar_lea.vmem %s1590_s30, 4096  ;;  %p1592_p7 = scmp.lt.s32.totalorder %s1874_s9, %s1590_s30 }
  0x59   : > { %p1587_p11 = pnand %p1585_p9, %p1571_p12  ;;  %p1593_p4 = scmp.lt.s32.totalorder %s1591_s29, %s1584_s4 }
  0x5b   : > { %p1588_p0 = pneg %p1587_p11  ;;  %p1594_p13 = por %p1593_p4, %p1592_p7 }
  0x5d   : > { %p1595_p6 = pnand %p1594_p13, %p1588_p0 }
  0x5f   : > { %1598 = shalt.err (!%p1595_p6)
}
  0x60   : > { %1424 = dma.hbm_to_vmem [thread:$0]  (!%p1870_p2), %s1866_s26, 2048, %s1874_s9, %s1876_s19, %s1689_s11, %s1689_s11, %s1690_s18  }
  0x61   : > { %221 = sbr.rel (%p1769_p8) target bundleno = 399 (0x18f), region = 32  ;;  %s1910_s28 = sand.u32 (!%p1769_p8), 1, %s1669_s13  }
  0x62   : > { %s1119_s5 = sshll.u32 (!%p1769_p8), %s1910_s28, 7  ;;  %s224_s7 = scalar_lea.sflag (!%p1769_p8), [#allocation4], %s1910_s28 }
  0x63   : > { %s1916_s10 = scalar_lea.vmem (!%p1769_p8), [#allocation3], %s1119_s5  ;;  %p2068_p7 = scmp.ne.s32.totalorder (!%p1769_p8), %s2062_s22, 0 }
  0x68   : > { %1652 = dma.done.wait (%p2068_p7), %s224_s7, 2048  }
  0x69   : > { %1654 = vsyncadd (%p2068_p7), %s224_s7, 4294965248  ;;  %p2069_p2 = scmp.ne.s32.totalorder %s2060_s20, 0 }
  0x6b   : > { %1656 = dma.done.wait (%p2069_p2), [#allocation7], 1040  }
  0x6c   : > { %1658 = vsyncadd (%p2069_p2), [#allocation7], 4294966256  ;;  %v1489_v0 = vld [vmem:[#allocation6] sm:$0xff]   ;;  %v1490_v1 = vld [vmem:[#allocation6 + $0x8] sm:$0xff]   ;;  %s1954_s20 = scalar_lea.vmem [#allocation9], %s1119_s5  ;;  %s1218_s22 = sshll.u32 %s1677_s15, 11 }
  0x6d   : > { %1338 = vmatprep.subr.bf16.mxu0 %v1489_v0  ;;  %1386 = vmatprep.subr.bf16.mxu1 %v1489_v0  ;;  %v1491_v2 = vld [vmem:[#allocation6 + $0x10] sm:$0xff]   ;;  %v1492_v3 = vld [vmem:[#allocation6 + $0x18] sm:$0xff]   ;;  %v1497_v4 = vld [vmem:[%s1916_s10] sm:$0xff]   ;;  %s996_s24 = sshll.u32 %s1954_s20, 4  ;;  %s1997_s18 = scalar_lea.hbm %s2055_s3, %s1218_s22  ;;  %s1999_s24 = int_to_ptr.vmem [resolvable:$true] %s996_s24 }
  0x6e   : > { %1339 = vmatpush3.bf16.msra.mxu0 %v1489_v0  ;;  %1394 = vmatpush3.bf16.msra.mxu1 %v1489_v0  ;;  %v1498_v5 = vld [vmem:[%s1916_s10 + $0x40] sm:$0xff]   ;;  %v1494_v7 = vld [vmem:[#allocation6 + $0x28] sm:$0xff]   ;;  %v1495_v8 = vld [vmem:[#allocation6 + $0x30] sm:$0xff]   ;;  %s982_s26 = scalar_lea.sflag [#allocation5], %s1910_s28  ;;  %s1599_s9 = scalar_lea.vmem %s1999_s24, 2048 }
  0x6f   : > { %1340 = vmatprep.subr.bf16.mxu0 %v1490_v1  ;;  %1387 = vmatprep.subr.bf16.mxu1 %v1490_v1  ;;  %v1493_v6 = vld [vmem:[#allocation6 + $0x20] sm:$0xff]   ;;  %v1496_v9 = vld [vmem:[#allocation6 + $0x38] sm:$0xff]   ;;  %v1499_v10 = vld [vmem:[%s1916_s10 + $0x8] sm:$0xff]   ;;  %p1600_p8 = scmp.ne.s32.totalorder %s1999_s24, %s1599_s9  ;;  %p2070_p12 = scmp.ne.s32.totalorder %s2066_s27, 0 }
  0x70   : > { %1354 = vmatprep.mubr.bf16.mxu0 %v1497_v4  ;;  %1370 = vmatprep.mubr.bf16.mxu1 %v1498_v5  ;;  %v1500_v11 = vld [vmem:[%s1916_s10 + $0x48] sm:$0xff]   ;;  %v1501_v12 = vld [vmem:[%s1916_s10 + $0x10] sm:$0xff]   ;;  %v1503_v14 = vld [vmem:[%s1916_s10 + $0x18] sm:$0xff]   ;;  %s1692_s19 = smov [#allocation9]  }
  0x71   : > { %v1502_v13 = vld [vmem:[%s1916_s10 + $0x50] sm:$0xff]   ;;  %v1504_v15 = vld [vmem:[%s1916_s10 + $0x58] sm:$0xff]   ;;  %v1505_v16 = vld [vmem:[%s1916_s10 + $0x20] sm:$0xff]   ;;  %p1601_p1 = pnand %p1600_p8, %p2070_p12  ;;  %s1603_s8 = sshll.u32 %s1692_s19, 4  ;;  %s1604_s8 = int_to_ptr.vmem [resolvable:$false] %s1603_s8 }
  0x72   : > { %1341 = vmatpush3.bf16.msra.mxu0 %v1490_v1  ;;  %1395 = vmatpush3.bf16.msra.mxu1 %v1490_v1  ;;  %v1506_v17 = vld [vmem:[%s1916_s10 + $0x60] sm:$0xff]   ;;  %v1507_v18 = vld [vmem:[%s1916_s10 + $0x28] sm:$0xff]   ;;  %v1509_v20 = vld [vmem:[%s1916_s10 + $0x30] sm:$0xff]   ;;  %s1605_s4 = scalar_lea.vmem %s1604_s8, 4096  ;;  %p1606_p3 = scmp.lt.s32.totalorder %s1999_s24, %s1604_s8 }
  0x73   : > { %1342 = vmatprep.subr.bf16.mxu0 %v1491_v2  ;;  %1388 = vmatprep.subr.bf16.mxu1 %v1491_v2  ;;  %v1508_v19 = vld [vmem:[%s1916_s10 + $0x68] sm:$0xff]   ;;  %v1510_v21 = vld [vmem:[%s1916_s10 + $0x70] sm:$0xff]   ;;  %v1511_v22 = vld [vmem:[%s1916_s10 + $0x38] sm:$0xff]   ;;  %p1602_p10 = pneg %p1601_p1  ;;  %p1607_p5 = scmp.lt.s32.totalorder %s1605_s4, %s1599_s9 }
  0x74   : > { %v1512_v23 = vld [vmem:[%s1916_s10 + $0x78] sm:$0xff]   ;;  %v1942_v25 = vld [vmem:[#allocation8] ss:$0 sm:$0xff] }
  0x75   : > { %p1608_p9 = por %p1607_p5, %p1606_p3 }
  0x76   : > { %1343 = vmatpush3.bf16.msra.mxu0 %v1491_v2  ;;  %1396 = vmatpush3.bf16.msra.mxu1 %v1491_v2 }
  0x77   : > { %1344 = vmatprep.subr.bf16.mxu0 %v1492_v3  ;;  %1389 = vmatprep.subr.bf16.mxu1 %v1492_v3  ;;  %p1609_p11 = pnand %p1608_p9, %p1602_p10 }
  0x7a   : > { %1345 = vmatpush3.bf16.msra.mxu0 %v1492_v3  ;;  %1397 = vmatpush3.bf16.msra.mxu1 %v1492_v3 }
  0x7b   : > { %1346 = vmatprep.subr.bf16.mxu0 %v1493_v6  ;;  %1390 = vmatprep.subr.bf16.mxu1 %v1493_v6 }
  0x7e   : > { %1347 = vmatpush3.bf16.msra.mxu0 %v1493_v6  ;;  %1398 = vmatpush3.bf16.msra.mxu1 %v1493_v6 }
  0x7f   : > { %1348 = vmatprep.subr.bf16.mxu0 %v1494_v7  ;;  %1391 = vmatprep.subr.bf16.mxu1 %v1494_v7 }
  0x82   : > { %1349 = vmatpush3.bf16.msra.mxu0 %v1494_v7  ;;  %1399 = vmatpush3.bf16.msra.mxu1 %v1494_v7 }
  0x83   : > { %1350 = vmatprep.subr.bf16.mxu0 %v1495_v8  ;;  %1392 = vmatprep.subr.bf16.mxu1 %v1495_v8 }
  0x86   : > { %1351 = vmatpush3.bf16.msra.mxu0 %v1495_v8  ;;  %1400 = vmatpush3.bf16.msra.mxu1 %v1495_v8 }
  0x87   : > { %1352 = vmatprep.subr.bf16.mxu0 %v1496_v9  ;;  %1393 = vmatprep.subr.bf16.mxu1 %v1496_v9 }
  0x8a   : > { %1353 = vmatpush3.bf16.msra.mxu0 %v1496_v9  ;;  %1401 = vmatpush3.bf16.msra.mxu1 %v1496_v9 }
  0x8d   : > { %1355 = vmatmul.mubr.bf16.vlgmr.msra.gmra.mrb[0].mxu0 %v1499_v10  ;;  %1371 = vmatmul.mubr.bf16.vlgmr.msra.gmra.mrb[0].mxu1 %v1500_v11 }
  0x8e   : > { %1358 = vmatprep.mubr.bf16.mxu0 %v1501_v12  ;;  %1374 = vmatprep.mubr.bf16.mxu1 %v1502_v13 }
  0x95   : > { %1359 = vmatmul.mubr.bf16.gmra.mrb[4].mxu0 %v1503_v14  ;;  %1375 = vmatmul.mubr.bf16.gmra.mrb[4].mxu1 %v1504_v15 }
  0x96   : > { %1362 = vmatprep.mubr.bf16.mxu0 %v1505_v16  ;;  %1378 = vmatprep.mubr.bf16.mxu1 %v1506_v17 }
  0x9d   : > { %1363 = vmatmul.mubr.bf16.gmra.mrb[8].mxu0 %v1507_v18  ;;  %1379 = vmatmul.mubr.bf16.gmra.mrb[8].mxu1 %v1508_v19 }
  0x9e   : > { %1366 = vmatprep.mubr.bf16.mxu0 %v1509_v20  ;;  %1382 = vmatprep.mubr.bf16.mxu1 %v1510_v21 }
  0xa5   : > { %1367 = vmatmul.mubr.bf16.gmra.mrb[12].mxu0 %v1511_v22  ;;  %1383 = vmatmul.mubr.bf16.gmra.mrb[12].mxu1 %v1512_v23 }
 0x160   : > { %v1356_v24 = vpop.f32.mrb[0].mxu0  ;;  %v1372_v26 = vpop.f32.mrb[0].mxu1 }
 0x161   : > { %v556_v27 = vpop.f32.mrb[1].mxu0  ;;  %v620_v28 = vpop.f32.mrb[1].mxu1  ;;  %v791_v31 = vadd.f32 %v1356_v24, %v1942_v25  ;;  %v807_v32 = vadd.f32 %v1372_v26, %v1942_v25 }
 0x162   : > { %v1357_v29 = vpop.f32.mrb[2].mxu0  ;;  %v1373_v30 = vpop.f32.mrb[2].mxu1  ;;  %v789_v37 = vadd.f32 %v1942_v25, %v556_v27  ;;  %v805_v38 = vadd.f32 %v1942_v25, %v620_v28 }
 0x163   : > { %v792_v33 = vadd.f32 %v1357_v29, %v1942_v25  ;;  %v808_v34 = vadd.f32 %v1373_v30, %v1942_v25  ;;  %v559_v35 = vpop.f32.mrb[3].mxu0  ;;  %v623_v36 = vpop.f32.mrb[3].mxu1 }
 0x164   : > { %v790_v39 = vadd.f32 %v1942_v25, %v559_v35  ;;  %v806_v40 = vadd.f32 %v1942_v25, %v623_v36 }
 0x165   : > { %v1227_v41 = vpack.c.bf16 %v792_v33, %v791_v31  ;;  %v1267_v42 = vpack.c.bf16 %v808_v34, %v807_v32 }
 0x166   : > { %v1222_v43 = vpack.c.bf16 %v790_v39, %v789_v37  ;;  %v1262_v44 = vpack.c.bf16 %v806_v40, %v805_v38 }
 0x167   : > { %1299 = vst [vmem:[%s1954_s20 + $0x8] sm:$0xff] %v1227_v41   ;;  %1307 = vst [vmem:[%s1954_s20 + $0x48] sm:$0xff] %v1267_v42  }
 0x168   : > { %1223 = vst [vmem:[%s1954_s20] sm:$0xff] %v1222_v43   ;;  %1306 = vst [vmem:[%s1954_s20 + $0x40] sm:$0xff] %v1262_v44   ;;  %v1360_v45 = vpop.f32.mrb[4].mxu0  ;;  %v1376_v46 = vpop.f32.mrb[4].mxu1 }
 0x169   : > { %v572_v47 = vpop.f32.mrb[5].mxu0  ;;  %v636_v48 = vpop.f32.mrb[5].mxu1  ;;  %v795_v51 = vadd.f32 %v1360_v45, %v1942_v25  ;;  %v811_v52 = vadd.f32 %v1376_v46, %v1942_v25 }
 0x16a   : > { %v1361_v49 = vpop.f32.mrb[6].mxu0  ;;  %v1377_v50 = vpop.f32.mrb[6].mxu1  ;;  %v793_v57 = vadd.f32 %v1942_v25, %v572_v47  ;;  %v809_v58 = vadd.f32 %v1942_v25, %v636_v48 }
 0x16b   : > { %v796_v53 = vadd.f32 %v1361_v49, %v1942_v25  ;;  %v812_v54 = vadd.f32 %v1377_v50, %v1942_v25  ;;  %v575_v55 = vpop.f32.mrb[7].mxu0  ;;  %v639_v56 = vpop.f32.mrb[7].mxu1 }
 0x16c   : > { %v794_v59 = vadd.f32 %v1942_v25, %v575_v55  ;;  %v810_v60 = vadd.f32 %v1942_v25, %v639_v56 }
 0x16d   : > { %v1237_v61 = vpack.c.bf16 %v796_v53, %v795_v51  ;;  %v1277_v62 = vpack.c.bf16 %v812_v54, %v811_v52 }
 0x16e   : > { %v1232_v63 = vpack.c.bf16 %v794_v59, %v793_v57  ;;  %v1272_v0 = vpack.c.bf16 %v810_v60, %v809_v58 }
 0x16f   : > { %1301 = vst [vmem:[%s1954_s20 + $0x18] sm:$0xff] %v1237_v61   ;;  %1309 = vst [vmem:[%s1954_s20 + $0x58] sm:$0xff] %v1277_v62  }
 0x170   : > { %1300 = vst [vmem:[%s1954_s20 + $0x10] sm:$0xff] %v1232_v63   ;;  %1308 = vst [vmem:[%s1954_s20 + $0x50] sm:$0xff] %v1272_v0   ;;  %v1364_v1 = vpop.f32.mrb[8].mxu0  ;;  %v1380_v2 = vpop.f32.mrb[8].mxu1 }
 0x171   : > { %v588_v3 = vpop.f32.mrb[9].mxu0  ;;  %v652_v4 = vpop.f32.mrb[9].mxu1  ;;  %v799_v7 = vadd.f32 %v1364_v1, %v1942_v25  ;;  %v815_v8 = vadd.f32 %v1380_v2, %v1942_v25 }
 0x172   : > { %v1365_v5 = vpop.f32.mrb[10].mxu0  ;;  %v1381_v6 = vpop.f32.mrb[10].mxu1  ;;  %v797_v13 = vadd.f32 %v1942_v25, %v588_v3  ;;  %v813_v14 = vadd.f32 %v1942_v25, %v652_v4 }
 0x173   : > { %v800_v9 = vadd.f32 %v1365_v5, %v1942_v25  ;;  %v816_v10 = vadd.f32 %v1381_v6, %v1942_v25  ;;  %v591_v11 = vpop.f32.mrb[11].mxu0  ;;  %v655_v12 = vpop.f32.mrb[11].mxu1 }
 0x174   : > { %v798_v15 = vadd.f32 %v1942_v25, %v591_v11  ;;  %v814_v16 = vadd.f32 %v1942_v25, %v655_v12 }
 0x175   : > { %v1247_v17 = vpack.c.bf16 %v800_v9, %v799_v7  ;;  %v1287_v18 = vpack.c.bf16 %v816_v10, %v815_v8 }
 0x176   : > { %v1242_v19 = vpack.c.bf16 %v798_v15, %v797_v13  ;;  %v1282_v20 = vpack.c.bf16 %v814_v16, %v813_v14 }
 0x177   : > { %1303 = vst [vmem:[%s1954_s20 + $0x28] sm:$0xff] %v1247_v17   ;;  %1311 = vst [vmem:[%s1954_s20 + $0x68] sm:$0xff] %v1287_v18  }
 0x178   : > { %1302 = vst [vmem:[%s1954_s20 + $0x20] sm:$0xff] %v1242_v19   ;;  %1310 = vst [vmem:[%s1954_s20 + $0x60] sm:$0xff] %v1282_v20   ;;  %v1368_v21 = vpop.f32.mrb[12].mxu0  ;;  %v1384_v22 = vpop.f32.mrb[12].mxu1 }
 0x179   : > { %v604_v23 = vpop.f32.mrb[13].mxu0  ;;  %v668_v24 = vpop.f32.mrb[13].mxu1  ;;  %v803_v28 = vadd.f32 %v1368_v21, %v1942_v25  ;;  %v819_v29 = vadd.f32 %v1384_v22, %v1942_v25 }
 0x17a   : > { %v1369_v26 = vpop.f32.mrb[14].mxu0  ;;  %v1385_v27 = vpop.f32.mrb[14].mxu1  ;;  %v801_v34 = vadd.f32 %v1942_v25, %v604_v23  ;;  %v817_v35 = vadd.f32 %v1942_v25, %v668_v24 }
 0x17b   : > { %v804_v30 = vadd.f32 %v1369_v26, %v1942_v25  ;;  %v820_v31 = vadd.f32 %v1385_v27, %v1942_v25  ;;  %v607_v32 = vpop.f32.mrb[15].mxu0  ;;  %v671_v33 = vpop.f32.mrb[15].mxu1 }
 0x17c   : > { %v802_v36 = vadd.f32 %v1942_v25, %v607_v32  ;;  %v818_v37 = vadd.f32 %v1942_v25, %v671_v33 }
 0x17d   : > { %v1257_v38 = vpack.c.bf16 %v804_v30, %v803_v28  ;;  %v1297_v39 = vpack.c.bf16 %v820_v31, %v819_v29 }
 0x17e   : > { %v1252_v40 = vpack.c.bf16 %v802_v36, %v801_v34  ;;  %v1292_v41 = vpack.c.bf16 %v818_v37, %v817_v35 }
 0x17f   : > { %1305 = vst [vmem:[%s1954_s20 + $0x38] sm:$0xff] %v1257_v38   ;;  %1313 = vst [vmem:[%s1954_s20 + $0x78] sm:$0xff] %v1297_v39  }
 0x180   : > { %1304 = vst [vmem:[%s1954_s20 + $0x30] sm:$0xff] %v1252_v40   ;;  %1312 = vst [vmem:[%s1954_s20 + $0x70] sm:$0xff] %v1292_v41  }
 0x181   : > { %1612 = shalt.err (!%p1609_p11)
}
 0x182   : > { %s1613_s21 = scalar_lea.hbm %s1997_s18, 2048  ;;  %s1617_s5 = scalar_lea.hbm %s2055_s3, 4096 }
 0x183   : > { %p1614_p0 = scmp.ne.s32.totalorder %s1997_s18, %s1613_s21  ;;  %p1618_p6 = scmp.lt.u32.totalorder %s1997_s18, %s2055_s3 }
 0x184   : > { %p1619_p7 = scmp.lt.u32.totalorder %s1617_s5, %s1613_s21  ;;  %p1621_p8 = scmp.lt.u32.totalorder %s1613_s21, %s1997_s18 }
 0x185   : > { %p1615_p4 = pnand %p1614_p0, %p2070_p12 }
 0x186   : > { %p1620_p2 = por %p1619_p7, %p1618_p6 }
 0x187   : > { %p1616_p13 = pneg %p1615_p4 }
 0x188   : > { %p1622_p1 = por %p1621_p8, %p1620_p2 }
 0x18a   : > { %p1623_p10 = pnand %p1622_p1, %p1616_p13 }
 0x18c   : > { %1626 = shalt.err (!%p1623_p10)
}
 0x18d   : > { %s1693_s20 = smov 64   ;;  %s1694_s22 = smov 4  }
 0x18e   : > { %1412 = dma.vmem_to_hbm [thread:$0]  (%p2070_p12), %s1999_s24, 2048, %s1997_s18, %s982_s26, %s1693_s20, %s1693_s20, %s1694_s22  }
 0x18f PF: > { %s1011_s15 = sand.u32 1, %s1665_s12   ;;  %p2071_p3 = scmp.ne.s32.totalorder %s2063_s23, 0 }
 0x190   : > { %p2072_p5 = scmp.ge.s32.totalorder %s1685_s17, 2  ;;  %s1012_s11 = scalar_lea.sflag [#allocation5], %s1011_s15 }
 0x192   : > { %p1426_p9 = pnand %p2072_p5, %p2071_p3 }
 0x194   : > { %1660 = dma.done.wait (!%p1426_p9), %s1012_s11, 2048  }
 0x195   : > { %1662 = vsyncadd (!%p1426_p9), %s1012_s11, 4294965248  ;;  %s20_s17 = sadd.s32 1, %s1685_s17   ;;  %s2073_s12 = smov %s1669_s13 }
 0x196   : > { %p17_p11 = scmp.ge.s32.totalorder %s20_s17, 4   ;;  %s2074_s13 = smov %s1673_s14 }
 0x197   : > { %s2075_s14 = smov %s1861_s6  ;;  %s2076_s15 = smov %s1681_s16 }
 0x198   : > { %s2077_s16 = smov %s2079_s25  ;;  %19 = sbr.rel (!%p17_p11) target bundleno = 7 (0x7), region = 95 }
 0x19f   :  { %1017 = vsyncpa [#allocation4], 1 }
 0x1a0   :  { %1019 = vsyncpa [#allocation4 + $0x1], 1 }
 0x1a1   :  { %1020 = vsyncpa [#allocation7], 1 }
 0x1a2   :  { %1021 = vsyncpa [#allocation5], 1 }
 0x1a3   :  { %1023 = vsyncpa [#allocation5 + $0x1], 1 }

// kernel: corblock_s_forward.13
= control target key start
LH: loop header
LB: loop body
LE: loop exit
PB: predicated region body
PF: predicated region fallthrough
CT: control target
= control target key end

     0   :  { %8 = vsyncpa [#allocation4], 0  ;;  %s870_s0 = inlined_call_operand.hbm [shape: bf16[128,128], index: 0, kind: input, shape index: {}]   ;;  %s871_s1 = inlined_call_operand.hbm [shape: bf16[128,128], index: 1, kind: input, shape index: {}]   ;;  %s872_s2 = inlined_call_operand.hbm [shape: f32[1,128], index: 2, kind: input, shape index: {}]   ;;  %s873_s3 = inlined_call_operand.hbm [shape: bf16[128,128], index: 3, kind: output, shape index: {}]  }
   0x1   :  { %9 = vsyncpa [#allocation7], 0 }
   0x2   :  { %10 = vsyncpa [#allocation5], 0  ;;  %s780_s12 = smov [#allocation6]   ;;  %s781_s14 = smov [#allocation3]  }
   0x3   :  { %s28_s13 = sshll.u32 %s780_s12, 4  ;;  %s16_s15 = sshll.u32 %s781_s14, 4  ;;  %s29_s13 = int_to_ptr.vmem [resolvable:$true] %s28_s13  ;;  %s806_s15 = int_to_ptr.vmem [resolvable:$true] %s16_s15 }
   0x4   :  { %s686_s18 = scalar_lea.hbm %s871_s1, 1024 }
   0x5   :  { %p687_p0 = scmp.ne.s32.totalorder %s871_s1, %s686_s18  ;;  %p690_p1 = scmp.lt.u32.totalorder %s686_s18, %s871_s1 }
   0x7   :  { %p692_p2 = pnand %p690_p1, %p687_p0 }
   0x9   :  { %695 = shalt.err (!%p692_p2)
}
   0xa   :  { %s696_s23 = scalar_lea.vmem %s29_s13, 1024  ;;  %p701_p4 = scmp.lt.s32.totalorder %s29_s13, %s29_s13 }
   0xb   :  { %p697_p3 = scmp.ne.s32.totalorder %s29_s13, %s696_s23  ;;  %p702_p5 = scmp.lt.s32.totalorder %s696_s23, %s696_s23 }
   0xd   :  { %p703_p6 = por %p702_p5, %p701_p4 }
   0xf   :  { %p704_p7 = pnand %p703_p6, %p697_p3 }
  0x11   :  { %707 = shalt.err (!%p704_p7)
}
  0x12   :  { %s782_s24 = smov 64   ;;  %s783_s25 = smov 4  }
  0x13   :  { %34 = dma.hbm_to_vmem [thread:$0]  %s871_s1, 1024, %s29_s13, [#allocation7], %s782_s24, %s782_s24, %s783_s25  }
  0x14   :  { %s708_s30 = scalar_lea.hbm %s870_s0, 1024 }
  0x15   :  { %p709_p8 = scmp.ne.s32.totalorder %s870_s0, %s708_s30  ;;  %p712_p9 = scmp.lt.u32.totalorder %s708_s30, %s870_s0 }
  0x17   :  { %p714_p10 = pnand %p712_p9, %p709_p8 }
  0x19   :  { %717 = shalt.err (!%p714_p10)
}
  0x1a   :  { %s718_s8 = scalar_lea.vmem %s806_s15, 1024  ;;  %p723_p12 = scmp.lt.s32.totalorder %s806_s15, %s806_s15 }
  0x1b   :  { %p719_p11 = scmp.ne.s32.totalorder %s806_s15, %s718_s8  ;;  %p724_p13 = scmp.lt.s32.totalorder %s718_s8, %s718_s8 }
  0x1d   :  { %p725_p0 = por %p724_p13, %p723_p12 }
  0x1f   :  { %p726_p1 = pnand %p725_p0, %p719_p11 }
  0x21   :  { %729 = shalt.err (!%p726_p1)
}
  0x22   :  { %22 = dma.hbm_to_vmem [thread:$0]  %s870_s0, 1024, %s806_s15, [#allocation4], %s782_s24, %s782_s24, %s783_s25  }
  0x23   :  { %s784_s10 = smov [#allocation8]   ;;  %s730_s14 = scalar_lea.hbm %s872_s2, 16 }
  0x24   :  { %s41_s11 = sshll.u32 %s784_s10, 4  ;;  %p731_p2 = scmp.ne.s32.totalorder %s872_s2, %s730_s14  ;;  %s42_s11 = int_to_ptr.vmem [resolvable:$true] %s41_s11 }
  0x25   :  { %p734_p3 = scmp.lt.u32.totalorder %s730_s14, %s872_s2 }
  0x27   :  { %p736_p4 = pnand %p734_p3, %p731_p2 }
  0x29   :  { %739 = shalt.err (!%p736_p4)
}
  0x2a   :  { %s740_s20 = scalar_lea.vmem %s42_s11, 16  ;;  %s744_s0 = scalar_lea.vmem %s42_s11, 32 }
  0x2b   :  { %p741_p5 = scmp.ne.s32.totalorder %s42_s11, %s740_s20  ;;  %p745_p6 = scmp.lt.s32.totalorder %s42_s11, %s42_s11 }
  0x2c   :  { %p746_p7 = scmp.lt.s32.totalorder %s744_s0, %s740_s20 }
  0x2e   :  { %p747_p8 = por %p746_p7, %p745_p6 }
  0x30   :  { %p748_p9 = pnand %p747_p8, %p741_p5 }
  0x32   :  { %751 = shalt.err (!%p748_p9)
}
  0x33   :  { %44 = dma.hbm_to_vmem [thread:$0]  %s872_s2, 16, %s42_s11, [#allocation7]  }
  0x34   :  { %774 = dma.done.wait [#allocation4], 1024  }
  0x35   :  { %775 = vsyncadd [#allocation4], 4294966272 }
  0x36   :  { %776 = dma.done.wait [#allocation7], 1040  }
  0x37   :  { %777 = vsyncadd [#allocation7], 4294966256  ;;  %v670_v0 = vld [vmem:[#allocation6] sm:$0xff]   ;;  %v671_v1 = vld [vmem:[#allocation6 + $0x8] sm:$0xff]   ;;  %s785_s2 = smov [#allocation9]  }
  0x38   :  { %616 = vmatprep.subr.bf16.mxu0 %v670_v0  ;;  %648 = vmatprep.subr.bf16.mxu1 %v670_v0  ;;  %v672_v2 = vld [vmem:[#allocation6 + $0x10] sm:$0xff]   ;;  %v673_v3 = vld [vmem:[#allocation6 + $0x18] sm:$0xff]   ;;  %v678_v4 = vld [vmem:[#allocation3] sm:$0xff]   ;;  %s491_s22 = sshll.u32 %s785_s2, 4  ;;  %s492_s22 = int_to_ptr.vmem [resolvable:$true] %s491_s22 }
  0x39   :  { %617 = vmatpush3.bf16.msra.mxu0 %v670_v0  ;;  %656 = vmatpush3.bf16.msra.mxu1 %v670_v0  ;;  %v679_v5 = vld [vmem:[#allocation3 + $0x20] sm:$0xff]   ;;  %v675_v7 = vld [vmem:[#allocation6 + $0x28] sm:$0xff]   ;;  %v676_v8 = vld [vmem:[#allocation6 + $0x30] sm:$0xff]   ;;  %s752_s23 = scalar_lea.vmem %s492_s22, 1024  ;;  %p757_p11 = scmp.lt.s32.totalorder %s492_s22, %s492_s22 }
  0x3a   :  { %618 = vmatprep.subr.bf16.mxu0 %v671_v1  ;;  %649 = vmatprep.subr.bf16.mxu1 %v671_v1  ;;  %v674_v6 = vld [vmem:[#allocation6 + $0x20] sm:$0xff]   ;;  %v677_v9 = vld [vmem:[#allocation6 + $0x38] sm:$0xff]   ;;  %v680_v10 = vld [vmem:[#allocation3 + $0x8] sm:$0xff]   ;;  %p753_p10 = scmp.ne.s32.totalorder %s492_s22, %s752_s23  ;;  %p758_p12 = scmp.lt.s32.totalorder %s752_s23, %s752_s23 }
  0x3b   :  { %632 = vmatprep.mubr.bf16.mxu0 %v678_v4  ;;  %640 = vmatprep.mubr.bf16.mxu1 %v679_v5  ;;  %v681_v11 = vld [vmem:[#allocation3 + $0x28] sm:$0xff]   ;;  %v682_v12 = vld [vmem:[#allocation3 + $0x10] sm:$0xff]   ;;  %v684_v14 = vld [vmem:[#allocation3 + $0x18] sm:$0xff]  }
  0x3c   :  { %v683_v13 = vld [vmem:[#allocation3 + $0x30] sm:$0xff]   ;;  %v685_v15 = vld [vmem:[#allocation3 + $0x38] sm:$0xff]   ;;  %v520_v16 = vld [vmem:[#allocation8] ss:$0 sm:$0xff]  ;;  %p759_p13 = por %p758_p12, %p757_p11 }
  0x3d   :  { %619 = vmatpush3.bf16.msra.mxu0 %v671_v1  ;;  %657 = vmatpush3.bf16.msra.mxu1 %v671_v1 }
  0x3e   :  { %620 = vmatprep.subr.bf16.mxu0 %v672_v2  ;;  %650 = vmatprep.subr.bf16.mxu1 %v672_v2  ;;  %p760_p0 = pnand %p759_p13, %p753_p10 }
  0x41   :  { %621 = vmatpush3.bf16.msra.mxu0 %v672_v2  ;;  %658 = vmatpush3.bf16.msra.mxu1 %v672_v2 }
  0x42   :  { %622 = vmatprep.subr.bf16.mxu0 %v673_v3  ;;  %651 = vmatprep.subr.bf16.mxu1 %v673_v3 }
  0x45   :  { %623 = vmatpush3.bf16.msra.mxu0 %v673_v3  ;;  %659 = vmatpush3.bf16.msra.mxu1 %v673_v3 }
  0x46   :  { %624 = vmatprep.subr.bf16.mxu0 %v674_v6  ;;  %652 = vmatprep.subr.bf16.mxu1 %v674_v6 }
  0x49   :  { %625 = vmatpush3.bf16.msra.mxu0 %v674_v6  ;;  %660 = vmatpush3.bf16.msra.mxu1 %v674_v6 }
  0x4a   :  { %626 = vmatprep.subr.bf16.mxu0 %v675_v7  ;;  %653 = vmatprep.subr.bf16.mxu1 %v675_v7 }
  0x4d   :  { %627 = vmatpush3.bf16.msra.mxu0 %v675_v7  ;;  %661 = vmatpush3.bf16.msra.mxu1 %v675_v7 }
  0x4e   :  { %628 = vmatprep.subr.bf16.mxu0 %v676_v8  ;;  %654 = vmatprep.subr.bf16.mxu1 %v676_v8 }
  0x51   :  { %629 = vmatpush3.bf16.msra.mxu0 %v676_v8  ;;  %662 = vmatpush3.bf16.msra.mxu1 %v676_v8 }
  0x52   :  { %630 = vmatprep.subr.bf16.mxu0 %v677_v9  ;;  %655 = vmatprep.subr.bf16.mxu1 %v677_v9 }
  0x55   :  { %631 = vmatpush3.bf16.msra.mxu0 %v677_v9  ;;  %663 = vmatpush3.bf16.msra.mxu1 %v677_v9 }
  0x58   :  { %633 = vmatmul.mubr.bf16.vlgmr.msra.gmra.mrb[0].mxu0 %v680_v10  ;;  %641 = vmatmul.mubr.bf16.vlgmr.msra.gmra.mrb[0].mxu1 %v681_v11 }
  0x59   :  { %636 = vmatprep.mubr.bf16.mxu0 %v682_v12  ;;  %644 = vmatprep.mubr.bf16.mxu1 %v683_v13 }
  0x60   :  { %637 = vmatmul.mubr.bf16.gmra.mrb[4].mxu0 %v684_v14  ;;  %645 = vmatmul.mubr.bf16.gmra.mrb[4].mxu1 %v685_v15 }
 0x12b   :  { %v634_v17 = vpop.f32.mrb[0].mxu0  ;;  %v642_v18 = vpop.f32.mrb[0].mxu1 }
 0x12c   :  { %v376_v19 = vadd.f32 %v634_v17, %v520_v16  ;;  %v384_v20 = vadd.f32 %v642_v18, %v520_v16  ;;  %v253_v21 = vpop.f32.mrb[1].mxu0  ;;  %v285_v22 = vpop.f32.mrb[1].mxu1 }
 0x12d   :  { %v374_v23 = vadd.f32 %v520_v16, %v253_v21  ;;  %v382_v24 = vadd.f32 %v520_v16, %v285_v22  ;;  %v635_v25 = vpop.f32.mrb[2].mxu0  ;;  %v643_v26 = vpop.f32.mrb[2].mxu1 }
 0x12e   :  { %v377_v27 = vadd.f32 %v635_v25, %v520_v16  ;;  %v385_v28 = vadd.f32 %v643_v26, %v520_v16  ;;  %v256_v29 = vpop.f32.mrb[3].mxu0  ;;  %v288_v30 = vpop.f32.mrb[3].mxu1  ;;  %v392_v33 = vmax.f32 %v376_v19, 0.0  ;;  %v400_v34 = vmax.f32 %v384_v20, 0.0 }
 0x12f   :  { %v375_v31 = vadd.f32 %v520_v16, %v256_v29  ;;  %v383_v32 = vadd.f32 %v520_v16, %v288_v30  ;;  %v390_v37 = vmax.f32 %v374_v23, 0.0  ;;  %v398_v38 = vmax.f32 %v382_v24, 0.0 }
 0x130   :  { %v393_v35 = vmax.f32 %v377_v27, 0.0  ;;  %v401_v36 = vmax.f32 %v385_v28, 0.0 }
 0x131   :  { %v391_v39 = vmax.f32 %v375_v31, 0.0  ;;  %v399_v40 = vmax.f32 %v383_v32, 0.0 }
 0x132   :  { %v561_v41 = vpack.c.bf16 %v393_v35, %v392_v33  ;;  %v581_v42 = vpack.c.bf16 %v401_v36, %v400_v34 }
 0x133   :  { %v556_v43 = vpack.c.bf16 %v391_v39, %v390_v37  ;;  %v576_v44 = vpack.c.bf16 %v399_v40, %v398_v38  ;;  %v638_v45 = vpop.f32.mrb[4].mxu0  ;;  %v646_v46 = vpop.f32.mrb[4].mxu1 }
 0x134   :  { %593 = vst [vmem:[#allocation9 + $0x8] sm:$0xff] %v561_v41   ;;  %597 = vst [vmem:[#allocation9 + $0x28] sm:$0xff] %v581_v42   ;;  %v380_v47 = vadd.f32 %v638_v45, %v520_v16  ;;  %v388_v48 = vadd.f32 %v646_v46, %v520_v16  ;;  %v269_v49 = vpop.f32.mrb[5].mxu0  ;;  %v301_v50 = vpop.f32.mrb[5].mxu1 }
 0x135   :  { %557 = vst [vmem:[#allocation9] sm:$0xff] %v556_v43   ;;  %596 = vst [vmem:[#allocation9 + $0x20] sm:$0xff] %v576_v44   ;;  %v378_v51 = vadd.f32 %v520_v16, %v269_v49  ;;  %v386_v52 = vadd.f32 %v520_v16, %v301_v50  ;;  %v639_v53 = vpop.f32.mrb[6].mxu0  ;;  %v647_v54 = vpop.f32.mrb[6].mxu1 }
 0x136   :  { %v381_v55 = vadd.f32 %v639_v53, %v520_v16  ;;  %v389_v56 = vadd.f32 %v647_v54, %v520_v16  ;;  %v272_v57 = vpop.f32.mrb[7].mxu0  ;;  %v304_v58 = vpop.f32.mrb[7].mxu1  ;;  %v396_v61 = vmax.f32 %v380_v47, 0.0  ;;  %v404_v62 = vmax.f32 %v388_v48, 0.0 }
 0x137   :  { %v379_v59 = vadd.f32 %v520_v16, %v272_v57  ;;  %v387_v60 = vadd.f32 %v520_v16, %v304_v58  ;;  %v394_v1 = vmax.f32 %v378_v51, 0.0  ;;  %v402_v2 = vmax.f32 %v386_v52, 0.0 }
 0x138   :  { %v397_v63 = vmax.f32 %v381_v55, 0.0  ;;  %v405_v0 = vmax.f32 %v389_v56, 0.0 }
 0x139   :  { %v395_v3 = vmax.f32 %v379_v59, 0.0  ;;  %v403_v4 = vmax.f32 %v387_v60, 0.0 }
 0x13a   :  { %v571_v5 = vpack.c.bf16 %v397_v63, %v396_v61  ;;  %v591_v6 = vpack.c.bf16 %v405_v0, %v404_v62 }
 0x13b   :  { %v566_v7 = vpack.c.bf16 %v395_v3, %v394_v1  ;;  %v586_v8 = vpack.c.bf16 %v403_v4, %v402_v2 }
 0x13c   :  { %595 = vst [vmem:[#allocation9 + $0x18] sm:$0xff] %v571_v5   ;;  %599 = vst [vmem:[#allocation9 + $0x38] sm:$0xff] %v591_v6  }
 0x13d   :  { %594 = vst [vmem:[#allocation9 + $0x10] sm:$0xff] %v566_v7   ;;  %598 = vst [vmem:[#allocation9 + $0x30] sm:$0xff] %v586_v8  }
 0x13e   :  { %763 = shalt.err (!%p760_p0)
}
 0x13f   :  { %s764_s28 = scalar_lea.hbm %s873_s3, 1024 }
 0x140   :  { %p765_p1 = scmp.ne.s32.totalorder %s873_s3, %s764_s28  ;;  %p768_p2 = scmp.lt.u32.totalorder %s764_s28, %s873_s3 }
 0x142   :  { %p770_p3 = pnand %p768_p2, %p765_p1 }
 0x144   :  { %773 = shalt.err (!%p770_p3)
}
 0x145   :  { %497 = dma.vmem_to_hbm [thread:$0]  %s492_s22, 1024, %s873_s3, [#allocation5], %s782_s24, %s782_s24, %s783_s25  }
 0x146   :  { %778 = dma.done.wait [#allocation5], 1024  }
 0x147   :  { %779 = vsyncadd [#allocation5], 4294966272 }
 0x148   :  { %501 = vsyncpa [#allocation4], 1 }
 0x149   :  { %502 = vsyncpa [#allocation7], 1 }
 0x14a   :  { %503 = vsyncpa [#allocation5], 1 }

// kernel: corblock_s_forward.12
= control target key start
LH: loop header
LB: loop body
LE: loop exit
PB: predicated region body
PF: predicated region fallthrough
CT: control target
= control target key end

     0   :  { %9 = vsyncpa [#allocation4], 0  ;;  %s1062_s0 = inlined_call_operand.hbm [shape: bf16[128,128], index: 0, kind: input, shape index: {}]   ;;  %s1063_s1 = inlined_call_operand.hbm [shape: bf16[128,128], index: 1, kind: input, shape index: {}]   ;;  %s1064_s2 = inlined_call_operand.hbm [shape: f32[1,128], index: 2, kind: input, shape index: {}]   ;;  %s1065_s3 = inlined_call_operand.hbm [shape: bf16[128,128], index: 3, kind: input, shape index: {}]   ;;  %s1066_s4 = inlined_call_operand.hbm [shape: bf16[128,128], index: 4, kind: output, shape index: {}]  }
   0x1   :  { %10 = vsyncpa [#allocation7], 0 }
   0x2   :  { %11 = vsyncpa [#allocation10], 0 }
   0x3   :  { %12 = vsyncpa [#allocation5], 0  ;;  %s910_s15 = smov [#allocation6]   ;;  %s911_s17 = smov [#allocation3]  }
   0x4   :  { %s30_s16 = sshll.u32 %s910_s15, 4  ;;  %s18_s18 = sshll.u32 %s911_s17, 4  ;;  %s31_s16 = int_to_ptr.vmem [resolvable:$true] %s30_s16  ;;  %s942_s18 = int_to_ptr.vmem [resolvable:$true] %s18_s18 }
   0x5   :  { %s792_s21 = scalar_lea.hbm %s1063_s1, 1024 }
   0x6   :  { %p793_p0 = scmp.ne.s32.totalorder %s1063_s1, %s792_s21  ;;  %p796_p1 = scmp.lt.u32.totalorder %s792_s21, %s1063_s1 }
   0x8   :  { %p798_p2 = pnand %p796_p1, %p793_p0 }
   0xa   :  { %801 = shalt.err (!%p798_p2)
}
   0xb   :  { %s802_s26 = scalar_lea.vmem %s31_s16, 1024  ;;  %p807_p4 = scmp.lt.s32.totalorder %s31_s16, %s31_s16 }
   0xc   :  { %p803_p3 = scmp.ne.s32.totalorder %s31_s16, %s802_s26  ;;  %p808_p5 = scmp.lt.s32.totalorder %s802_s26, %s802_s26 }
   0xe   :  { %p809_p6 = por %p808_p5, %p807_p4 }
  0x10   :  { %p810_p7 = pnand %p809_p6, %p803_p3 }
  0x12   :  { %813 = shalt.err (!%p810_p7)
}
  0x13   :  { %s912_s27 = smov 64   ;;  %s913_s28 = smov 4  }
  0x14   :  { %36 = dma.hbm_to_vmem [thread:$0]  %s1063_s1, 1024, %s31_s16, [#allocation7], %s912_s27, %s912_s27, %s913_s28  }
  0x15   :  { %s814_s7 = scalar_lea.hbm %s1062_s0, 1024 }
  0x16   :  { %p815_p8 = scmp.ne.s32.totalorder %s1062_s0, %s814_s7  ;;  %p818_p9 = scmp.lt.u32.totalorder %s814_s7, %s1062_s0 }
  0x18   :  { %p820_p10 = pnand %p818_p9, %p815_p8 }
  0x1a   :  { %823 = shalt.err (!%p820_p10)
}
  0x1b   :  { %s824_s12 = scalar_lea.vmem %s942_s18, 1024  ;;  %p829_p12 = scmp.lt.s32.totalorder %s942_s18, %s942_s18 }
  0x1c   :  { %p825_p11 = scmp.ne.s32.totalorder %s942_s18, %s824_s12  ;;  %p830_p13 = scmp.lt.s32.totalorder %s824_s12, %s824_s12 }
  0x1e   :  { %p831_p0 = por %p830_p13, %p829_p12 }
  0x20   :  { %p832_p1 = pnand %p831_p0, %p825_p11 }
  0x22   :  { %835 = shalt.err (!%p832_p1)
}
  0x23   :  { %24 = dma.hbm_to_vmem [thread:$0]  %s1062_s0, 1024, %s942_s18, [#allocation4], %s912_s27, %s912_s27, %s913_s28  }
  0x24   :  { %s914_s14 = smov [#allocation8]   ;;  %s915_s16 = smov [#allocation9]  }
  0x25   :  { %s43_s15 = sshll.u32 %s914_s14, 4  ;;  %s52_s17 = sshll.u32 %s915_s16, 4  ;;  %s44_s15 = int_to_ptr.vmem [resolvable:$true] %s43_s15  ;;  %s979_s17 = int_to_ptr.vmem [resolvable:$true] %s52_s17 }
  0x26   :  { %s836_s21 = scalar_lea.hbm %s1064_s2, 16 }
  0x27   :  { %p837_p2 = scmp.ne.s32.totalorder %s1064_s2, %s836_s21  ;;  %p840_p3 = scmp.lt.u32.totalorder %s836_s21, %s1064_s2 }
  0x29   :  { %p842_p4 = pnand %p840_p3, %p837_p2 }
  0x2b   :  { %845 = shalt.err (!%p842_p4)
}
  0x2c   :  { %s846_s0 = scalar_lea.vmem %s44_s15, 16  ;;  %s850_s18 = scalar_lea.vmem %s44_s15, 32 }
  0x2d   :  { %p847_p5 = scmp.ne.s32.totalorder %s44_s15, %s846_s0  ;;  %p851_p6 = scmp.lt.s32.totalorder %s44_s15, %s44_s15 }
  0x2e   :  { %p852_p7 = scmp.lt.s32.totalorder %s850_s18, %s846_s0 }
  0x30   :  { %p853_p8 = por %p852_p7, %p851_p6 }
  0x32   :  { %p854_p9 = pnand %p853_p8, %p847_p5 }
  0x34   :  { %857 = shalt.err (!%p854_p9)
}
  0x35   :  { %46 = dma.hbm_to_vmem [thread:$0]  %s1064_s2, 16, %s44_s15, [#allocation7]  }
  0x36   :  { %s858_s6 = scalar_lea.hbm %s1065_s3, 1024 }
  0x37   :  { %p859_p10 = scmp.ne.s32.totalorder %s1065_s3, %s858_s6  ;;  %p862_p11 = scmp.lt.u32.totalorder %s858_s6, %s1065_s3 }
  0x39   :  { %p864_p12 = pnand %p862_p11, %p859_p10 }
  0x3b   :  { %867 = shalt.err (!%p864_p12)
}
  0x3c   :  { %s868_s11 = scalar_lea.vmem %s979_s17, 1024  ;;  %p873_p0 = scmp.lt.s32.totalorder %s979_s17, %s979_s17 }
  0x3d   :  { %p869_p13 = scmp.ne.s32.totalorder %s979_s17, %s868_s11  ;;  %p874_p1 = scmp.lt.s32.totalorder %s868_s11, %s868_s11 }
  0x3f   :  { %p875_p2 = por %p874_p1, %p873_p0 }
  0x41   :  { %p876_p3 = pnand %p875_p2, %p869_p13 }
  0x43   :  { %879 = shalt.err (!%p876_p3)
}
  0x44   :  { %58 = dma.hbm_to_vmem [thread:$0]  %s1065_s3, 1024, %s979_s17, [#allocation10], %s912_s27, %s912_s27, %s913_s28  }
  0x45   :  { %902 = dma.done.wait [#allocation4], 1024  }
  0x46   :  { %903 = vsyncadd [#allocation4], 4294966272 }
  0x47   :  { %904 = dma.done.wait [#allocation7], 1040  }
  0x48   :  { %905 = vsyncadd [#allocation7], 4294966256 }
  0x49   :  { %906 = dma.done.wait [#allocation10], 1024  }
  0x4a   :  { %907 = vsyncadd [#allocation10], 4294966272  ;;  %v776_v0 = vld [vmem:[#allocation6] sm:$0xff]   ;;  %v777_v1 = vld [vmem:[#allocation6 + $0x8] sm:$0xff]   ;;  %s916_s3 = smov [#allocation11]  }
  0x4b   :  { %721 = vmatprep.subr.bf16.mxu0 %v776_v0  ;;  %753 = vmatprep.subr.bf16.mxu1 %v776_v0  ;;  %v778_v2 = vld [vmem:[#allocation6 + $0x10] sm:$0xff]   ;;  %v779_v3 = vld [vmem:[#allocation6 + $0x18] sm:$0xff]   ;;  %v784_v4 = vld [vmem:[#allocation3] sm:$0xff]   ;;  %s556_s1 = sshll.u32 %s916_s3, 4  ;;  %s557_s1 = int_to_ptr.vmem [resolvable:$true] %s556_s1 }
  0x4c   :  { %722 = vmatpush3.bf16.msra.mxu0 %v776_v0  ;;  %761 = vmatpush3.bf16.msra.mxu1 %v776_v0  ;;  %v785_v5 = vld [vmem:[#allocation3 + $0x20] sm:$0xff]   ;;  %v781_v7 = vld [vmem:[#allocation6 + $0x28] sm:$0xff]   ;;  %v782_v8 = vld [vmem:[#allocation6 + $0x30] sm:$0xff]   ;;  %s880_s13 = scalar_lea.vmem %s557_s1, 1024  ;;  %p885_p5 = scmp.lt.s32.totalorder %s557_s1, %s557_s1 }
  0x4d   :  { %723 = vmatprep.subr.bf16.mxu0 %v777_v1  ;;  %754 = vmatprep.subr.bf16.mxu1 %v777_v1  ;;  %v780_v6 = vld [vmem:[#allocation6 + $0x20] sm:$0xff]   ;;  %v783_v9 = vld [vmem:[#allocation6 + $0x38] sm:$0xff]   ;;  %v786_v10 = vld [vmem:[#allocation3 + $0x8] sm:$0xff]   ;;  %p881_p4 = scmp.ne.s32.totalorder %s557_s1, %s880_s13  ;;  %p886_p6 = scmp.lt.s32.totalorder %s880_s13, %s880_s13 }
  0x4e   :  { %737 = vmatprep.mubr.bf16.mxu0 %v784_v4  ;;  %745 = vmatprep.mubr.bf16.mxu1 %v785_v5  ;;  %v787_v11 = vld [vmem:[#allocation3 + $0x28] sm:$0xff]   ;;  %v788_v12 = vld [vmem:[#allocation3 + $0x10] sm:$0xff]   ;;  %v790_v14 = vld [vmem:[#allocation3 + $0x18] sm:$0xff]  }
  0x4f   :  { %v789_v13 = vld [vmem:[#allocation3 + $0x30] sm:$0xff]   ;;  %v791_v15 = vld [vmem:[#allocation3 + $0x38] sm:$0xff]   ;;  %v620_v18 = vld [vmem:[#allocation9] sm:$0xff]   ;;  %p887_p7 = por %p886_p6, %p885_p5 }
  0x50   :  { %724 = vmatpush3.bf16.msra.mxu0 %v777_v1  ;;  %762 = vmatpush3.bf16.msra.mxu1 %v777_v1  ;;  %v691_v16 = vld [vmem:[#allocation9 + $0x8] sm:$0xff]   ;;  %v694_v19 = vld [vmem:[#allocation9 + $0x20] sm:$0xff]   ;;  %v1013_v20 = vld [vmem:[#allocation8] ss:$0 sm:$0xff]  ;;  %v621_v25 = vunpack.c.l.bf16 %v620_v18  ;;  %v622_v33 = vunpack.c.h.bf16 %v620_v18 }
  0x51   :  { %725 = vmatprep.subr.bf16.mxu0 %v778_v2  ;;  %755 = vmatprep.subr.bf16.mxu1 %v778_v2  ;;  %v695_v17 = vld [vmem:[#allocation9 + $0x28] sm:$0xff]   ;;  %v1015_v21 = vld [vmem:[#allocation9 + $0x18] sm:$0xff]   ;;  %v625_v23 = vunpack.c.l.bf16 %v691_v16  ;;  %v637_v26 = vunpack.c.l.bf16 %v694_v19  ;;  %v1019_v27 = vld [vmem:[#allocation9 + $0x10] sm:$0xff]   ;;  %v626_v31 = vunpack.c.h.bf16 %v691_v16  ;;  %v638_v34 = vunpack.c.h.bf16 %v694_v19  ;;  %p888_p8 = pnand %p887_p7, %p881_p4 }
  0x52   :  { %v1017_v22 = vld [vmem:[#allocation9 + $0x38] sm:$0xff]   ;;  %v641_v24 = vunpack.c.l.bf16 %v695_v17  ;;  %v1021_v28 = vld [vmem:[#allocation9 + $0x30] sm:$0xff]   ;;  %v642_v32 = vunpack.c.h.bf16 %v695_v17  ;;  %v633_v39 = vunpack.c.l.bf16 %v1015_v21  ;;  %v629_v45 = vunpack.c.l.bf16 %v1019_v27 }
  0x53   :  { %v649_v40 = vunpack.c.l.bf16 %v1017_v22  ;;  %v645_v46 = vunpack.c.l.bf16 %v1021_v28  ;;  %v634_v59 = vunpack.c.h.bf16 %v1015_v21  ;;  %v650_v60 = vunpack.c.h.bf16 %v1017_v22 }
  0x54   :  { %726 = vmatpush3.bf16.msra.mxu0 %v778_v2  ;;  %763 = vmatpush3.bf16.msra.mxu1 %v778_v2  ;;  %v630_v63 = vunpack.c.h.bf16 %v1019_v27  ;;  %v646_v0 = vunpack.c.h.bf16 %v1021_v28 }
  0x55   :  { %727 = vmatprep.subr.bf16.mxu0 %v779_v3  ;;  %756 = vmatprep.subr.bf16.mxu1 %v779_v3 }
  0x58   :  { %728 = vmatpush3.bf16.msra.mxu0 %v779_v3  ;;  %764 = vmatpush3.bf16.msra.mxu1 %v779_v3 }
  0x59   :  { %729 = vmatprep.subr.bf16.mxu0 %v780_v6  ;;  %757 = vmatprep.subr.bf16.mxu1 %v780_v6 }
  0x5c   :  { %730 = vmatpush3.bf16.msra.mxu0 %v780_v6  ;;  %765 = vmatpush3.bf16.msra.mxu1 %v780_v6 }
  0x5d   :  { %731 = vmatprep.subr.bf16.mxu0 %v781_v7  ;;  %758 = vmatprep.subr.bf16.mxu1 %v781_v7 }
  0x60   :  { %732 = vmatpush3.bf16.msra.mxu0 %v781_v7  ;;  %766 = vmatpush3.bf16.msra.mxu1 %v781_v7 }
  0x61   :  { %733 = vmatprep.subr.bf16.mxu0 %v782_v8  ;;  %759 = vmatprep.subr.bf16.mxu1 %v782_v8 }
  0x64   :  { %734 = vmatpush3.bf16.msra.mxu0 %v782_v8  ;;  %767 = vmatpush3.bf16.msra.mxu1 %v782_v8 }
  0x65   :  { %735 = vmatprep.subr.bf16.mxu0 %v783_v9  ;;  %760 = vmatprep.subr.bf16.mxu1 %v783_v9 }
  0x68   :  { %736 = vmatpush3.bf16.msra.mxu0 %v783_v9  ;;  %768 = vmatpush3.bf16.msra.mxu1 %v783_v9 }
  0x6b   :  { %738 = vmatmul.mubr.bf16.vlgmr.msra.gmra.mrb[0].mxu0 %v786_v10  ;;  %746 = vmatmul.mubr.bf16.vlgmr.msra.gmra.mrb[0].mxu1 %v787_v11 }
  0x6c   :  { %741 = vmatprep.mubr.bf16.mxu0 %v788_v12  ;;  %749 = vmatprep.mubr.bf16.mxu1 %v789_v13 }
  0x73   :  { %742 = vmatmul.mubr.bf16.gmra.mrb[4].mxu0 %v790_v14  ;;  %750 = vmatmul.mubr.bf16.gmra.mrb[4].mxu1 %v791_v15 }
 0x13e   :  { %v739_v29 = vpop.f32.mrb[0].mxu0  ;;  %v747_v30 = vpop.f32.mrb[0].mxu1 }
 0x13f   :  { %v393_v35 = vadd.f32 %v739_v29, %v1013_v20  ;;  %v401_v36 = vadd.f32 %v747_v30, %v1013_v20  ;;  %v270_v37 = vpop.f32.mrb[1].mxu0  ;;  %v302_v38 = vpop.f32.mrb[1].mxu1 }
 0x140   :  { %v391_v41 = vadd.f32 %v1013_v20, %v270_v37  ;;  %v399_v42 = vadd.f32 %v1013_v20, %v302_v38  ;;  %v740_v43 = vpop.f32.mrb[2].mxu0  ;;  %v748_v44 = vpop.f32.mrb[2].mxu1 }
 0x141   :  { %v441_v47 = vadd.f32 %v625_v23, %v393_v35  ;;  %v449_v48 = vadd.f32 %v641_v24, %v401_v36  ;;  %v394_v49 = vadd.f32 %v740_v43, %v1013_v20  ;;  %v402_v50 = vadd.f32 %v748_v44, %v1013_v20  ;;  %v273_v51 = vpop.f32.mrb[3].mxu0  ;;  %v305_v52 = vpop.f32.mrb[3].mxu1 }
 0x142   :  { %v439_v53 = vadd.f32 %v621_v25, %v391_v41  ;;  %v447_v54 = vadd.f32 %v637_v26, %v399_v42  ;;  %v392_v55 = vadd.f32 %v1013_v20, %v273_v51  ;;  %v400_v56 = vadd.f32 %v1013_v20, %v305_v52 }
 0x143   :  { %v442_v57 = vadd.f32 %v626_v31, %v394_v49  ;;  %v450_v58 = vadd.f32 %v642_v32, %v402_v50  ;;  %v457_v1 = vmax.f32 %v441_v47, 0.0  ;;  %v465_v2 = vmax.f32 %v449_v48, 0.0 }
 0x144   :  { %v440_v61 = vadd.f32 %v622_v33, %v392_v55  ;;  %v448_v62 = vadd.f32 %v638_v34, %v400_v56  ;;  %v455_v5 = vmax.f32 %v439_v53, 0.0  ;;  %v463_v6 = vmax.f32 %v447_v54, 0.0 }
 0x145   :  { %v458_v3 = vmax.f32 %v442_v57, 0.0  ;;  %v466_v4 = vmax.f32 %v450_v58, 0.0 }
 0x146   :  { %v456_v7 = vmax.f32 %v440_v61, 0.0  ;;  %v464_v8 = vmax.f32 %v448_v62, 0.0  ;;  %v743_v9 = vpop.f32.mrb[4].mxu0  ;;  %v751_v10 = vpop.f32.mrb[4].mxu1 }
 0x147   :  { %v659_v11 = vpack.c.bf16 %v458_v3, %v457_v1  ;;  %v679_v12 = vpack.c.bf16 %v466_v4, %v465_v2  ;;  %v397_v13 = vadd.f32 %v743_v9, %v1013_v20  ;;  %v405_v14 = vadd.f32 %v751_v10, %v1013_v20  ;;  %v286_v15 = vpop.f32.mrb[5].mxu0  ;;  %v318_v16 = vpop.f32.mrb[5].mxu1 }
 0x148   :  { %v654_v17 = vpack.c.bf16 %v456_v7, %v455_v5  ;;  %v674_v18 = vpack.c.bf16 %v464_v8, %v463_v6  ;;  %v395_v19 = vadd.f32 %v1013_v20, %v286_v15  ;;  %v403_v21 = vadd.f32 %v1013_v20, %v318_v16  ;;  %v744_v22 = vpop.f32.mrb[6].mxu0  ;;  %v752_v23 = vpop.f32.mrb[6].mxu1 }
 0x149   :  { %698 = vst [vmem:[#allocation11 + $0x8] sm:$0xff] %v659_v11   ;;  %702 = vst [vmem:[#allocation11 + $0x28] sm:$0xff] %v679_v12   ;;  %v445_v24 = vadd.f32 %v633_v39, %v397_v13  ;;  %v453_v25 = vadd.f32 %v649_v40, %v405_v14  ;;  %v398_v26 = vadd.f32 %v744_v22, %v1013_v20  ;;  %v289_v28 = vpop.f32.mrb[7].mxu0  ;;  %v321_v29 = vpop.f32.mrb[7].mxu1 }
 0x14a   :  { %v406_v27 = vadd.f32 %v752_v23, %v1013_v20  ;;  %655 = vst [vmem:[#allocation11] sm:$0xff] %v654_v17   ;;  %701 = vst [vmem:[#allocation11 + $0x20] sm:$0xff] %v674_v18   ;;  %v443_v30 = vadd.f32 %v629_v45, %v395_v19  ;;  %v451_v31 = vadd.f32 %v645_v46, %v403_v21 }
 0x14b   :  { %v396_v32 = vadd.f32 %v1013_v20, %v289_v28  ;;  %v404_v33 = vadd.f32 %v1013_v20, %v321_v29  ;;  %v446_v34 = vadd.f32 %v634_v59, %v398_v26  ;;  %v461_v38 = vmax.f32 %v445_v24, 0.0 }
 0x14c   :  { %v454_v35 = vadd.f32 %v650_v60, %v406_v27  ;;  %v469_v39 = vmax.f32 %v453_v25, 0.0  ;;  %v459_v42 = vmax.f32 %v443_v30, 0.0  ;;  %v467_v43 = vmax.f32 %v451_v31, 0.0 }
 0x14d   :  { %v444_v36 = vadd.f32 %v630_v63, %v396_v32  ;;  %v452_v37 = vadd.f32 %v646_v0, %v404_v33  ;;  %v462_v40 = vmax.f32 %v446_v34, 0.0 }
 0x14e   :  { %v470_v41 = vmax.f32 %v454_v35, 0.0 }
 0x14f   :  { %v460_v44 = vmax.f32 %v444_v36, 0.0  ;;  %v468_v47 = vmax.f32 %v452_v37, 0.0  ;;  %v669_v45 = vpack.c.bf16 %v462_v40, %v461_v38 }
 0x150   :  { %v689_v46 = vpack.c.bf16 %v470_v41, %v469_v39 }
 0x151   :  { %v664_v48 = vpack.c.bf16 %v460_v44, %v459_v42  ;;  %v684_v49 = vpack.c.bf16 %v468_v47, %v467_v43  ;;  %700 = vst [vmem:[#allocation11 + $0x18] sm:$0xff] %v669_v45  }
 0x152   :  { %704 = vst [vmem:[#allocation11 + $0x38] sm:$0xff] %v689_v46  }
 0x153   :  { %699 = vst [vmem:[#allocation11 + $0x10] sm:$0xff] %v664_v48   ;;  %703 = vst [vmem:[#allocation11 + $0x30] sm:$0xff] %v684_v49  }
 0x154   :  { %891 = shalt.err (!%p888_p8)
}
 0x155   :  { %s892_s16 = scalar_lea.hbm %s1066_s4, 1024 }
 0x156   :  { %p893_p9 = scmp.ne.s32.totalorder %s1066_s4, %s892_s16  ;;  %p896_p10 = scmp.lt.u32.totalorder %s892_s16, %s1066_s4 }
 0x158   :  { %p898_p11 = pnand %p896_p10, %p893_p9 }
 0x15a   :  { %901 = shalt.err (!%p898_p11)
}
 0x15b   :  { %562 = dma.vmem_to_hbm [thread:$0]  %s557_s1, 1024, %s1066_s4, [#allocation5], %s912_s27, %s912_s27, %s913_s28  }
 0x15c   :  { %908 = dma.done.wait [#allocation5], 1024  }
 0x15d   :  { %909 = vsyncadd [#allocation5], 4294966272 }
 0x15e   :  { %566 = vsyncpa [#allocation4], 1 }
 0x15f   :  { %567 = vsyncpa [#allocation7], 1 }
 0x160   :  { %568 = vsyncpa [#allocation10], 1 }
 0x161   :  { %569 = vsyncpa [#allocation5], 1 }

// kernel: corblock_s_forward.11
= control target key start
LH: loop header
LB: loop body
LE: loop exit
PB: predicated region body
PF: predicated region fallthrough
CT: control target
= control target key end

     0   :  { %8 = vsyncpa [#allocation4], 0  ;;  %s4501_s0 = inlined_call_operand.hbm [shape: bf16[2,9,9,512], index: 0, kind: input, shape index: {}]   ;;  %s4502_s1 = inlined_call_operand.hbm [shape: bf16[2,2,512,128], index: 1, kind: input, shape index: {}]   ;;  %s4503_s2 = inlined_call_operand.hbm [shape: f32[1,128], index: 2, kind: input, shape index: {}]   ;;  %s4504_s3 = inlined_call_operand.hbm [shape: bf16[2,8,8,128], index: 3, kind: output, shape index: {}]  }
   0x1   :  { %10 = vsyncpa [#allocation4 + $0x1], 0 }
   0x2   :  { %11 = vsyncpa [#allocation7], 0 }
   0x3   :  { %12 = vsyncpa [#allocation5], 0 }
   0x4   :  { %14 = vsyncpa [#allocation5 + $0x1], 0  ;;  %s3885_s12 = smov 0   ;;  %s3887_s13 = smov 0  }
   0x5   :  { %s3889_s14 = smov 0   ;;  %s3891_s15 = smov 0  }
   0x6   :  { %s3893_s16 = smov 0   ;;  %s3895_s17 = smov 0  }
   0x7 LB: > { %s2860_s18 = sadd.s32 4294967295, %s3853_s17   ;;  %s2861_s19 = sadd.s32 4294967294, %s3853_s17   ;;  %s3853_s17 = sphi %s3895_s17, %s20_s17   ;;  %s3849_s16 = sphi %s3893_s16, %s4528_s16   ;;  %s3845_s15 = sphi %s3891_s15, %s4527_s15   ;;  %s3841_s14 = sphi %s3889_s14, %s4526_s14   ;;  %s3837_s13 = sphi %s3887_s13, %s4525_s13   ;;  %s3833_s12 = sphi %s3885_s12, %s4524_s12  }
   0x8   : > { %p61_p0 = scmp.ne.s32.totalorder %s3837_s13, %s3833_s12  ;;  %p3919_p1 = scmp.eq.s32.totalorder %s2860_s18, 0 }
   0x9   : > { %p3923_p2 = scmp.eq.s32.totalorder %s2860_s18, 1  ;;  %p147_p3 = scmp.eq.s32.totalorder %s2861_s19, 1 }
   0xa   : > { %s4509_s20 = scalar_select %p3919_p1, 1, 0 }
   0xb   : > { %p3929_p4 = por %p3919_p1, %p61_p0  ;;  %p2862_p5 = scmp.ge.s32.totalorder %s3853_s17, 1 }
   0xc   : > { %p3934_p6 = por %p147_p3, %p61_p0  ;;  %p154_p7 = scmp.lt.s32.totalorder %s3853_s17, 3 }
   0xd   : > { %s4511_s22 = scalar_select %p3929_p4, 1, 0 }
   0xe   : > { %s4512_s23 = scalar_select %p3934_p6, 1, 0 }
   0xf   : > { %p3939_p8 = pnand %p2862_p5, %p154_p7  ;;  %s3855_s25 = smov [#allocation6]  }
  0x10   : > { %s170_s26 = sshll.u32 %s3855_s25, 4  ;;  %s3856_s28 = smov [#allocation8]   ;;  %s3943_s26 = int_to_ptr.vmem [resolvable:$true] %s170_s26 }
  0x11   : > { %p3476_p9 = pneg %p3939_p8  ;;  %s186_s29 = sshll.u32 %s3856_s28, 4  ;;  %s3954_s29 = int_to_ptr.vmem [resolvable:$true] %s186_s29 }
  0x12   : > { %s3681_s5 = scalar_lea.hbm %s4502_s1, 16384 }
  0x13   : > { %p3950_p11 = pnand %p3476_p9, %p3919_p1  ;;  %p3682_p12 = scmp.ne.s32.totalorder %s4502_s1, %s3681_s5 }
  0x14   : > { %p3688_p5 = scmp.lt.u32.totalorder %s3681_s5, %s4502_s1 }
  0x15   : > { %p3683_p13 = pneg %p3950_p11 }
  0x17   : > { %p3684_p0 = pnand %p3683_p13, %p3682_p12 }
  0x19   : > { %p3685_p3 = pneg %p3684_p0 }
  0x1b   : > { %p3690_p7 = pnand %p3688_p5, %p3685_p3 }
  0x1d   : > { %3693 = shalt.err (!%p3690_p7)
}
  0x1e   : > { %s3694_s10 = scalar_lea.vmem %s3943_s26, 16384  ;;  %p3702_p1 = scmp.lt.s32.totalorder %s3943_s26, %s3943_s26 }
  0x1f   : > { %p3695_p9 = scmp.ne.s32.totalorder %s3943_s26, %s3694_s10  ;;  %p3703_p12 = scmp.lt.s32.totalorder %s3694_s10, %s3694_s10 }
  0x21   : > { %p3697_p10 = pnand %p3695_p9, %p3683_p13  ;;  %p3704_p0 = por %p3703_p12, %p3702_p1 }
  0x23   : > { %p3698_p6 = pneg %p3697_p10 }
  0x25   : > { %p3705_p4 = pnand %p3704_p0, %p3698_p6 }
  0x27   : > { %3708 = shalt.err (!%p3705_p4)
}
  0x28   : > { %s3857_s11 = smov 64   ;;  %s3858_s18 = smov 4  }
  0x29   : > { %3479 = dma.hbm_to_vmem [thread:$0]  (!%p3950_p11), %s4502_s1, 16384, %s3943_s26, [#allocation7], %s3857_s11, %s3857_s11, %s3858_s18  }
  0x2a   : > { %s3709_s4 = scalar_lea.hbm %s4503_s2, 16 }
  0x2b   : > { %p3710_p1 = scmp.ne.s32.totalorder %s4503_s2, %s3709_s4  ;;  %p3716_p10 = scmp.lt.u32.totalorder %s3709_s4, %s4503_s2 }
  0x2d   : > { %p3712_p4 = pnand %p3710_p1, %p3683_p13 }
  0x2f   : > { %p3713_p6 = pneg %p3712_p4 }
  0x31   : > { %p3718_p3 = pnand %p3716_p10, %p3713_p6 }
  0x33   : > { %3721 = shalt.err (!%p3718_p3)
}
  0x34   : > { %s3722_s26 = scalar_lea.vmem %s3954_s29, 16  ;;  %s3729_s9 = scalar_lea.vmem %s3954_s29, 32 }
  0x35   : > { %p3723_p5 = scmp.ne.s32.totalorder %s3954_s29, %s3722_s26  ;;  %p3730_p12 = scmp.lt.s32.totalorder %s3954_s29, %s3954_s29 }
  0x36   : > { %p3731_p0 = scmp.lt.s32.totalorder %s3729_s9, %s3722_s26 }
  0x37   : > { %p3725_p7 = pnand %p3723_p5, %p3683_p13 }
  0x38   : > { %p3732_p1 = por %p3731_p0, %p3730_p12 }
  0x39   : > { %p3726_p9 = pneg %p3725_p7 }
  0x3b   : > { %p3733_p4 = pnand %p3732_p1, %p3726_p9 }
  0x3d   : > { %3736 = shalt.err (!%p3733_p4)
}
  0x3e   : > { %3482 = dma.hbm_to_vmem [thread:$0]  (!%p3950_p11), %s4503_s2, 16, %s3954_s29, [#allocation7]  }
  0x3f   : > { %s39_s18 = sadd.s32 1, %s3849_s16  ;;  %s48_s19 = sadd.s32 1, %s3841_s14 }
  0x40   : > { %p41_p13 = scmp.ge.s32.totalorder %s39_s18, 2  ;;  %p55_p6 = scmp.ne.s32.totalorder %s3841_s14, %s3837_s13 }
  0x41   : > { %p56_p10 = scmp.eq.s32.totalorder %s3853_s17, 0  ;;  %p3493_p3 = scmp.lt.s32.totalorder %s3853_s17, 2 }
  0x42   : > { %s4530_s18 = smov (%p41_p13, %s39_s18), 0  ;;  %p4019_p7 = por %p3923_p2, %p55_p6 }
  0x43   : > { %p57_p5 = por %p56_p10, %p55_p6  ;;  %s43_s25 = ssub.s32 %s3849_s16, %s4530_s18 }
  0x44   : > { %s4515_s27 = scalar_select %p4019_p7, 1, 0 }
  0x45   : > { %s197_s28 = sand.u32 1, %s3841_s14   ;;  %p46_p9 = scmp.eq.s32.totalorder %s43_s25, 0 }
  0x46   : > { %s3461_s29 = smul.u32 288, %s197_s28  ;;  %p4026_p11 = pnand %p3493_p3, %p57_p5 }
  0x47   : > { %s4031_s4 = scalar_select %p46_p9, %s3841_s14, %s48_s19  }
  0x48   : > { %s3462_s5 = smul.u32 4608, %s3849_s16  ;;  %s201_s6 = scalar_lea.vmem [#allocation3], %s3461_s29 }
  0x49   : > { %s210_s7 = sshll.u32 %s201_s6, 4  ;;  %s4041_s9 = scalar_lea.sflag [#allocation4], %s197_s28  ;;  %s4039_s7 = int_to_ptr.vmem [resolvable:$true] %s210_s7 }
  0x4a   : > { %s4037_s26 = scalar_lea.hbm %s4501_s0, %s3462_s5  ;;  %p3739_p12 = pneg %p4026_p11 }
  0x4b   : > { %s3737_s10 = scalar_lea.hbm %s4037_s26, 4608  ;;  %s3742_s25 = scalar_lea.hbm %s4501_s0, 9216 }
  0x4c   : > { %p3738_p2 = scmp.ne.s32.totalorder %s4037_s26, %s3737_s10  ;;  %p3743_p4 = scmp.lt.u32.totalorder %s4037_s26, %s4501_s0 }
  0x4d   : > { %p3744_p13 = scmp.lt.u32.totalorder %s3742_s25, %s3737_s10  ;;  %p3746_p10 = scmp.lt.u32.totalorder %s3737_s10, %s4037_s26 }
  0x4e   : > { %p3740_p0 = pnand %p3739_p12, %p3738_p2 }
  0x4f   : > { %p3745_p6 = por %p3744_p13, %p3743_p4 }
  0x50   : > { %p3741_p1 = pneg %p3740_p0 }
  0x51   : > { %p3747_p3 = por %p3746_p10, %p3745_p6 }
  0x53   : > { %p3748_p5 = pnand %p3747_p3, %p3741_p1 }
  0x55   : > { %3751 = shalt.err (!%p3748_p5)
}
  0x56   : > { %s3752_s28 = scalar_lea.vmem %s4039_s7, 4608  ;;  %s3859_s6 = smov [#allocation3]  }
  0x57   : > { %p3753_p9 = scmp.ne.s32.totalorder %s4039_s7, %s3752_s28  ;;  %s3757_s21 = sshll.u32 %s3859_s6, 4  ;;  %s3758_s21 = int_to_ptr.vmem [resolvable:$false] %s3757_s21 }
  0x58   : > { %s3759_s8 = scalar_lea.vmem %s3758_s21, 9216  ;;  %p3760_p7 = scmp.lt.s32.totalorder %s4039_s7, %s3758_s21 }
  0x59   : > { %p3755_p2 = pnand %p3753_p9, %p3739_p12  ;;  %p3761_p4 = scmp.lt.s32.totalorder %s3759_s8, %s3752_s28 }
  0x5b   : > { %p3756_p0 = pneg %p3755_p2  ;;  %p3762_p13 = por %p3761_p4, %p3760_p7 }
  0x5d   : > { %p3763_p6 = pnand %p3762_p13, %p3756_p0 }
  0x5f   : > { %3766 = shalt.err (!%p3763_p6)
}
  0x60   : > { %s3860_s10 = smov 256   ;;  %s3861_s11 = smov 16  }
  0x61   : > { %3486 = dma.hbm_to_vmem [thread:$0]  (!%p4026_p11), %s4037_s26, 4608, %s4039_s7, %s4041_s9, %s3860_s10, %s3860_s10, %s3861_s11  }
  0x62   : > { %222 = sbr.rel (%p3939_p8) target bundleno = 510 (0x1fe), region = 32  ;;  %s4072_s19 = sand.u32 (!%p3939_p8), 1, %s3837_s13  }
  0x63   : > { %s3463_s25 = smul.u32 (!%p3939_p8), 288, %s4072_s19  ;;  %s225_s29 = scalar_lea.sflag (!%p3939_p8), [#allocation4], %s4072_s19 }
  0x64   : > { %p4517_p7 = scmp.ne.s32.totalorder (!%p3939_p8), %s4511_s22, 0 }
  0x65   : > { %s4076_s5 = scalar_lea.vmem (!%p3939_p8), [#allocation3], %s3463_s25 }
  0x69   : > { %3820 = dma.done.wait (%p4517_p7), %s225_s29, 4608  }
  0x6a   : > { %3822 = vsyncadd (%p4517_p7), %s225_s29, 4294962688  ;;  %p4518_p11 = scmp.ne.s32.totalorder %s4509_s20, 0 }
  0x6c   : > { %3824 = dma.done.wait (%p4518_p11), [#allocation7], 16400  }
  0x6d   : > { %3826 = vsyncadd (%p4518_p11), [#allocation7], 4294950896  ;;  %v3553_v0 = vld [vmem:[#allocation6 + $0x140] sm:$0xff]   ;;  %v3557_v4 = vld [vmem:[#allocation6 + $0x148] sm:$0xff]   ;;  %vm370_vm0 = vsmask.f32 3328 }
  0x6e   : > { %v3554_v1 = vld [vmem:[#allocation6 + $0x1c0] sm:$0xff]   ;;  %3141 = vmatprep.subr.bf16.mxu0 %v3553_v0  ;;  %v3558_v5 = vld [vmem:[#allocation6 + $0x1c8] sm:$0xff]   ;;  %v3561_v8 = vld [vmem:[#allocation6 + $0x150] sm:$0xff]   ;;  %vm371_vm1 = vsmask.f32 7440  ;;  %s2870_s20 = sshll.u32 %s4072_s19, 5 }
  0x6f   : > { %v3555_v2 = vld [vmem:[#allocation6 + $0x100] sm:$0xff]   ;;  %3181 = vmatprep.subr.bf16.mxu1 %v3554_v1  ;;  %v3559_v6 = vld [vmem:[#allocation6 + $0x108] sm:$0xff]   ;;  %v3562_v9 = vld [vmem:[#allocation6 + $0x1d0] sm:$0xff]   ;;  %s4427_s22 = scalar_lea.vmem [#allocation9], %s2870_s20  ;;  %s3117_s24 = sshll.u32 %s3845_s15, 9 }
  0x70   : > { %v3556_v3 = vld [vmem:[#allocation6 + $0x180] sm:$0xff]   ;;  %3142 = vmatpush3.bf16.msra.mxu0 %v3555_v2  ;;  %v3560_v7 = vld [vmem:[#allocation6 + $0x188] sm:$0xff]   ;;  %v3563_v10 = vld [vmem:[#allocation6 + $0x110] sm:$0xff]   ;;  %s2746_s30 = sshll.u32 %s4427_s22, 4  ;;  %s4449_s9 = scalar_lea.hbm %s4504_s3, %s3117_s24  ;;  %s4451_s30 = int_to_ptr.vmem [resolvable:$true] %s2746_s30 }
  0x71   : > { %3182 = vmatpush3.bf16.msra.mxu1 %v3556_v3  ;;  %3143 = vmatprep.subr.bf16.mxu0 %v3557_v4  ;;  %v3564_v11 = vld [vmem:[#allocation6 + $0x190] sm:$0xff]   ;;  %v3565_v12 = vld [vmem:[#allocation6 + $0x158] sm:$0xff]   ;;  %v3569_v16 = vld [vmem:[#allocation6 + $0x160] sm:$0xff]   ;;  %s2732_s28 = scalar_lea.sflag [#allocation5], %s4072_s19  ;;  %s3767_s6 = scalar_lea.vmem %s4451_s30, 512 }
  0x72   : > { %3183 = vmatprep.subr.bf16.mxu1 %v3558_v5  ;;  %v3566_v13 = vld [vmem:[#allocation6 + $0x1d8] sm:$0xff]   ;;  %v3570_v17 = vld [vmem:[#allocation6 + $0x1e0] sm:$0xff]   ;;  %v3573_v20 = vld [vmem:[#allocation6 + $0x168] sm:$0xff]   ;;  %p3768_p8 = scmp.ne.s32.totalorder %s4451_s30, %s3767_s6  ;;  %p4521_p12 = scmp.ne.s32.totalorder %s4515_s27, 0 }
  0x73   : > { %v3567_v14 = vld [vmem:[#allocation6 + $0x118] sm:$0xff]   ;;  %v3571_v18 = vld [vmem:[#allocation6 + $0x120] sm:$0xff]   ;;  %v3574_v21 = vld [vmem:[#allocation6 + $0x1e8] sm:$0xff]   ;;  %s3862_s15 = smov [#allocation9]  }
  0x74   : > { %3144 = vmatpush3.bf16.msra.mxu0 %v3559_v6  ;;  %v3568_v15 = vld [vmem:[#allocation6 + $0x198] sm:$0xff]   ;;  %v3572_v19 = vld [vmem:[#allocation6 + $0x1a0] sm:$0xff]   ;;  %v3575_v22 = vld [vmem:[#allocation6 + $0x128] sm:$0xff]   ;;  %p3769_p1 = pnand %p3768_p8, %p4521_p12  ;;  %s3771_s21 = sshll.u32 %s3862_s15, 4  ;;  %s3772_s21 = int_to_ptr.vmem [resolvable:$false] %s3771_s21 }
  0x75   : > { %3184 = vmatpush3.bf16.msra.mxu1 %v3560_v7  ;;  %3145 = vmatprep.subr.bf16.mxu0 %v3561_v8  ;;  %v3576_v23 = vld [vmem:[#allocation6 + $0x1a8] sm:$0xff]   ;;  %v3577_v24 = vld [vmem:[#allocation6 + $0x170] sm:$0xff]   ;;  %v3581_v28 = vld [vmem:[#allocation6 + $0x178] sm:$0xff]   ;;  %s3773_s8 = scalar_lea.vmem %s3772_s21, 1024  ;;  %p3774_p3 = scmp.lt.s32.totalorder %s4451_s30, %s3772_s21 }
  0x76   : > { %3185 = vmatprep.subr.bf16.mxu1 %v3562_v9  ;;  %v3578_v25 = vld [vmem:[#allocation6 + $0x1f0] sm:$0xff]   ;;  %v3582_v29 = vld [vmem:[#allocation6 + $0x1f8] sm:$0xff]   ;;  %v4087_v32 = vld [vmem:[%s4076_s5] sm:$0xff]  ;;  %p3770_p10 = pneg %p3769_p1  ;;  %p3775_p5 = scmp.lt.s32.totalorder %s3773_s8, %s3767_s6 }
  0x77   : > { %v3579_v26 = vld [vmem:[#allocation6 + $0x130] sm:$0xff]   ;;  %v3583_v30 = vld [vmem:[#allocation6 + $0x138] sm:$0xff]   ;;  %v4090_v33 = vld [vmem:[%s4076_s5 + $0x20] sm:$0xff]  ;;  %v374_v36 = vshrl.u32 %v4087_v32, 16  ;;  %v377_v37 = vshll.u32 %v4087_v32, 16 }
  0x78   : > { %3146 = vmatpush3.bf16.msra.mxu0 %v3563_v10  ;;  %v3580_v27 = vld [vmem:[#allocation6 + $0x1b0] sm:$0xff]   ;;  %v3584_v31 = vld [vmem:[#allocation6 + $0x1b8] sm:$0xff]   ;;  %v402_v39 = vshrl.u32 %v4090_v33, 16  ;;  %v405_v40 = vshll.u32 %v4090_v33, 16  ;;  %v4099_v42 = vld [vmem:[%s4076_s5 + $0x8] sm:$0xff]  ;;  %p3776_p9 = por %p3775_p5, %p3774_p3 }
  0x79   : > { %3186 = vmatpush3.bf16.msra.mxu1 %v3564_v11  ;;  %3147 = vmatprep.subr.bf16.mxu0 %v3565_v12  ;;  %v354_v34 = vld [vmem:[%s4076_s5 + $0x10] sm:$0x11]  ;;  %v4102_v43 = vld [vmem:[%s4076_s5 + $0x28] sm:$0xff]  ;;  %v355_v44 = vld [vmem:[%s4076_s5 + $0x18] sm:$0x11]  ;;  %v376_v45 = vrot.slane %v374_v36, 4 }
  0x7a   : > { %3187 = vmatprep.subr.bf16.mxu1 %v3566_v13  ;;  %v356_v35 = vld [vmem:[%s4076_s5 + $0x30] sm:$0x11]  ;;  %v383_v38 = vshll.u32 %v354_v34, 16  ;;  %v379_v46 = vrot.slane %v377_v37, 5  ;;  %v404_v48 = vrot.slane %v402_v39, 4  ;;  %v407_v50 = vrot.slane %v405_v40, 5  ;;  %vm4112_vm2 = vmor %vm370_vm0, %vm371_vm1  ;;  %p3777_p2 = pnand %p3776_p9, %p3770_p10 }
  0x7b   : > { %v411_v41 = vshll.u32 %v356_v35, 16  ;;  %v357_v49 = vld [vmem:[%s4076_s5 + $0x38] sm:$0x11]  ;;  %v388_v52 = vshrl.u32 %v4099_v42, 16  ;;  %v391_v53 = vshll.u32 %v4099_v42, 16  ;;  %v397_v55 = vshll.u32 %v355_v44, 16 }
  0x7c   : > { %3148 = vmatpush3.bf16.msra.mxu0 %v3567_v14  ;;  %v385_v47 = vrot.slane %v383_v38, 5  ;;  %v380_v54 = vor.u32 %v379_v46, %v376_v45  ;;  %v416_v56 = vshrl.u32 %v4102_v43, 16  ;;  %v419_v57 = vshll.u32 %v4102_v43, 16  ;;  %v3585_v58 = vld [vmem:[#allocation6 + $0x40] sm:$0xff]   ;;  %v4137_v37 = vld [vmem:[%s4076_s5 + $0x48] sm:$0xff] }
  0x7d   : > { %3188 = vmatpush3.bf16.msra.mxu1 %v3568_v15  ;;  %3149 = vmatprep.subr.bf16.mxu0 %v3569_v16  ;;  %v413_v51 = vrot.slane %v411_v41, 5  ;;  %v408_v60 = vor.u32 %v407_v50, %v404_v48  ;;  %v390_v61 = vrot.slane %v388_v52, 4  ;;  %v393_v62 = vrot.slane %v391_v53, 5  ;;  %v3586_v0 = vld [vmem:[#allocation6 + $0xc0] sm:$0xff]   ;;  %v4140_v38 = vld [vmem:[%s4076_s5 + $0x68] sm:$0xff]  ;;  %v3593_v53 = vld [vmem:[#allocation6 + $0x50] sm:$0xff]  }
  0x7e   : > { %3189 = vmatprep.subr.bf16.mxu1 %v3570_v17  ;;  %v425_v63 = vshll.u32 %v357_v49, 16  ;;  %v381_v1 = vrot.slane %v380_v54, 4  ;;  %v418_v2 = vrot.slane %v416_v56, 4  ;;  %v421_v3 = vrot.slane %v419_v57, 5  ;;  %v3587_v15 = vld [vmem:[#allocation6] sm:$0xff]  }
  0x7f   : > { %v409_v4 = vrot.slane %v408_v60, 4  ;;  %v394_v5 = vor.u32 %v393_v62, %v390_v61  ;;  %v399_v6 = vrot.slane %v397_v55, 5  ;;  %v3588_v17 = vld [vmem:[#allocation6 + $0x80] sm:$0xff]   ;;  %v359_v41 = vld [vmem:[%s4076_s5 + $0x58] sm:$0x11]  ;;  %v444_v50 = vshrl.u32 %v4137_v37, 16 }
  0x80   : > { %3150 = vmatpush3.bf16.msra.mxu0 %v3571_v18  ;;  %v386_v7 = vsel %vm4112_vm2, %v381_v1, %v385_v47  ;;  %v422_v8 = vor.u32 %v421_v3, %v418_v2  ;;  %v427_v9 = vrot.slane %v425_v63, 5  ;;  %v3589_v18 = vld [vmem:[#allocation6 + $0x48] sm:$0xff]   ;;  %v361_v44 = vld [vmem:[%s4076_s5 + $0x78] sm:$0x11]  ;;  %v453_v52 = vshll.u32 %v359_v41, 16 }
  0x81   : > { %3190 = vmatpush3.bf16.msra.mxu1 %v3572_v19  ;;  %3151 = vmatprep.subr.bf16.mxu0 %v3573_v20  ;;  %v414_v10 = vsel %vm4112_vm2, %v409_v4, %v413_v51  ;;  %v395_v11 = vrot.slane %v394_v5, 4  ;;  %v3590_v20 = vld [vmem:[#allocation6 + $0xc8] sm:$0xff]   ;;  %v447_v51 = vshll.u32 %v4137_v37, 16  ;;  %v472_v55 = vshrl.u32 %v4140_v38, 16 }
  0x82   : > { %3191 = vmatprep.subr.bf16.mxu1 %v3574_v21  ;;  %v2871_v12 = vcombine.low %v386_v7, %v414_v10  ;;  %v2872_v13 = vcombine.high %v386_v7, %v414_v10  ;;  %v423_v14 = vrot.slane %v422_v8, 4  ;;  %v475_v56 = vshll.u32 %v4140_v38, 16 }
  0x83   : > { %v400_v16 = vsel %vm4112_vm2, %v395_v11, %v399_v6  ;;  %v481_v57 = vshll.u32 %v361_v44, 16  ;;  %v446_v61 = vrot.slane %v444_v50, 4  ;;  %v449_v62 = vrot.slane %v447_v51, 5  ;;  %v3595_v6 = vld [vmem:[#allocation6 + $0x10] sm:$0xff]   ;;  %v4179_v44 = vld [vmem:[%s4076_s5 + $0x88] sm:$0xff] }
  0x84   : > { %3152 = vmatpush3.bf16.msra.mxu0 %v3575_v22  ;;  %950 = vmatprep.mubr.bf16.mxu0 %v2872_v13  ;;  %v428_v19 = vsel %vm4112_vm2, %v423_v14, %v427_v9  ;;  %v455_v63 = vrot.slane %v453_v52, 5  ;;  %v474_v1 = vrot.slane %v472_v55, 4  ;;  %v477_v2 = vrot.slane %v475_v56, 5  ;;  %v3596_v11 = vld [vmem:[#allocation6 + $0x90] sm:$0xff]  }
  0x85   : > { %3192 = vmatpush3.bf16.msra.mxu1 %v3576_v23  ;;  %3153 = vmatprep.subr.bf16.mxu0 %v3577_v24  ;;  %v2873_v21 = vcombine.low %v400_v16, %v428_v19  ;;  %v2874_v22 = vcombine.high %v400_v16, %v428_v19  ;;  %v3591_v23 = vld [vmem:[#allocation6 + $0x8] sm:$0xff]   ;;  %v4125_v24 = vld [vmem:[%s4076_s5 + $0x40] sm:$0xff]  ;;  %v483_v3 = vrot.slane %v481_v57, 5  ;;  %v450_v5 = vor.u32 %v449_v62, %v446_v61  ;;  %v3598_v19 = vld [vmem:[#allocation6 + $0xd8] sm:$0xff]  }
  0x86   : > { %3193 = vmatprep.subr.bf16.mxu1 %v3578_v25  ;;  %v4128_v25 = vld [vmem:[%s4076_s5 + $0x60] sm:$0xff]  ;;  %v2983_v7 = vcombine.low %v4090_v33, %v4125_v24  ;;  %v2984_v8 = vcombine.high %v4090_v33, %v4125_v24  ;;  %v478_v10 = vor.u32 %v477_v2, %v474_v1  ;;  %v2986_v13 = vcombine.high %v4102_v43, %v4137_v37 }
  0x87   : > { %1015 = vmatprep.mubr.bf16.mxu1 %v2874_v22  ;;  %v458_v34 = vshrl.u32 %v4128_v25, 16  ;;  %v461_v35 = vshll.u32 %v4128_v25, 16  ;;  %v500_v55 = vshrl.u32 %v4179_v44, 16  ;;  %v503_v56 = vshll.u32 %v4179_v44, 16 }
  0x88   : > { %3154 = vmatpush3.bf16.msra.mxu0 %v3579_v26  ;;  %v358_v26 = vld [vmem:[%s4076_s5 + $0x50] sm:$0x11] }
  0x89   : > { %3194 = vmatpush3.bf16.msra.mxu1 %v3580_v27  ;;  %3155 = vmatprep.subr.bf16.mxu0 %v3581_v28  ;;  %v360_v27 = vld [vmem:[%s4076_s5 + $0x70] sm:$0x11]  ;;  %v430_v28 = vshrl.u32 %v4125_v24, 16  ;;  %v460_v46 = vrot.slane %v458_v34, 4  ;;  %v463_v47 = vrot.slane %v461_v35, 5  ;;  %v502_v1 = vrot.slane %v500_v55, 4 }
  0x8a   : > { %3195 = vmatprep.subr.bf16.mxu1 %v3582_v29  ;;  %v433_v29 = vshll.u32 %v4125_v24, 16  ;;  %v467_v36 = vshll.u32 %v360_v27, 16  ;;  %v505_v2 = vrot.slane %v503_v56, 5 }
  0x8b   : > { %v432_v39 = vrot.slane %v430_v28, 4  ;;  %v464_v54 = vor.u32 %v463_v47, %v460_v46 }
  0x8c   : > { %3156 = vmatpush3.bf16.msra.mxu0 %v3583_v30  ;;  %v3592_v30 = vld [vmem:[#allocation6 + $0x88] sm:$0xff]   ;;  %v435_v40 = vrot.slane %v433_v29, 5  ;;  %v469_v48 = vrot.slane %v467_v36, 5  ;;  %v4168_v29 = vld [vmem:[%s4076_s5 + $0xa0] sm:$0xff] }
  0x8d   : > { %3196 = vmatpush3.bf16.msra.mxu1 %v3584_v31  ;;  %3221 = vmatprep.subr.bf16.mxu0 %v3585_v58  ;;  %v439_v31 = vshll.u32 %v358_v26, 16  ;;  %v3594_v58 = vld [vmem:[#allocation6 + $0xd0] sm:$0xff]   ;;  %v4165_v26 = vld [vmem:[%s4076_s5 + $0x80] sm:$0xff]  ;;  %v517_v41 = vshll.u32 %v4168_v29, 16 }
  0x8e   : > { %3261 = vmatprep.subr.bf16.mxu1 %v3586_v0  ;;  %v436_v49 = vor.u32 %v435_v40, %v432_v39  ;;  %v465_v0 = vrot.slane %v464_v54, 4  ;;  %v486_v34 = vshrl.u32 %v4165_v26, 16  ;;  %v2988_v35 = vcombine.high %v4128_v25, %v4165_v26 }
  0x8f   : > { %951 = vmatmul.mubr.bf16.vlgmr.msra.gmra.mrb[0].mxu0 %v2871_v12  ;;  %v441_v45 = vrot.slane %v439_v31, 5  ;;  %v2985_v12 = vcombine.low %v4102_v43, %v4137_v37  ;;  %v364_v31 = vld [vmem:[%s4076_s5 + $0xb0] sm:$0x11]  ;;  %v489_v36 = vshll.u32 %v4165_v26, 16  ;;  %v514_v40 = vshrl.u32 %v4168_v29, 16 }
  0x90   : > { %3222 = vmatpush3.bf16.msra.mxu0 %v3587_v15  ;;  %1016 = vmatmul.mubr.bf16.vlgmr.msra.gmra.mrb[0].mxu1 %v2873_v21  ;;  %v437_v60 = vrot.slane %v436_v49, 4  ;;  %v470_v9 = vsel %vm4112_vm2, %v465_v0, %v469_v48  ;;  %v451_v15 = vrot.slane %v450_v5, 4  ;;  %v3599_v21 = vld [vmem:[#allocation6 + $0x18] sm:$0xff]   ;;  %v488_v46 = vrot.slane %v486_v34, 4  ;;  %v3602_v0 = vld [vmem:[#allocation6 + $0xe0] sm:$0xff]  }
  0x91   : > { %3223 = vmatprep.subr.bf16.mxu0 %v3589_v18  ;;  %3262 = vmatpush3.bf16.msra.mxu1 %v3588_v17  ;;  %v3597_v17 = vld [vmem:[#allocation6 + $0x58] sm:$0xff]   ;;  %v479_v18 = vrot.slane %v478_v10, 4  ;;  %v523_v47 = vshll.u32 %v364_v31, 16  ;;  %v491_v50 = vrot.slane %v489_v36, 5  ;;  %v516_v52 = vrot.slane %v514_v40, 4  ;;  %v3606_v31 = vld [vmem:[#allocation6 + $0xe8] sm:$0xff]  }
  0x92   : > { %3263 = vmatprep.subr.bf16.mxu1 %v3590_v20  ;;  %v442_v4 = vsel %vm4112_vm2, %v437_v60, %v441_v45  ;;  %v456_v20 = vsel %vm4112_vm2, %v451_v15, %v455_v63  ;;  %v4182_v45 = vld [vmem:[%s4076_s5 + $0xa8] sm:$0xff]  ;;  %v363_v48 = vld [vmem:[%s4076_s5 + $0x98] sm:$0x11]  ;;  %v3601_v63 = vld [vmem:[#allocation6 + $0x60] sm:$0xff]   ;;  %v2989_v34 = vcombine.low %v4140_v38, %v4179_v44 }
  0x93   : > { %v2876_v14 = vcombine.high %v442_v4, %v470_v9  ;;  %v2875_v16 = vcombine.low %v442_v4, %v470_v9  ;;  %v484_v22 = vsel %vm4112_vm2, %v479_v18, %v483_v3  ;;  %v365_v49 = vld [vmem:[%s4076_s5 + $0xb8] sm:$0x11]  ;;  %v525_v54 = vrot.slane %v523_v47, 5  ;;  %v3603_v15 = vld [vmem:[#allocation6 + $0x20] sm:$0xff]  }
  0x94   : > { %3224 = vmatpush3.bf16.msra.mxu0 %v3591_v23  ;;  %v3600_v23 = vld [vmem:[#allocation6 + $0x98] sm:$0xff]   ;;  %v2878_v27 = vcombine.high %v456_v20, %v484_v22  ;;  %v2877_v28 = vcombine.low %v456_v20, %v484_v22  ;;  %v509_v57 = vshll.u32 %v363_v48, 16  ;;  %v528_v61 = vshrl.u32 %v4182_v45, 16 }
  0x95   : > { %3225 = vmatprep.subr.bf16.mxu0 %v3593_v53  ;;  %3264 = vmatpush3.bf16.msra.mxu1 %v3592_v30  ;;  %v362_v30 = vld [vmem:[%s4076_s5 + $0x90] sm:$0x11]  ;;  %v519_v53 = vrot.slane %v517_v41, 5  ;;  %v531_v62 = vshll.u32 %v4182_v45, 16  ;;  %v537_v4 = vshll.u32 %v365_v49, 16  ;;  %v2990_v20 = vcombine.high %v4140_v38, %v4179_v44  ;;  %v3608_v41 = vld [vmem:[#allocation6 + $0xa8] sm:$0xff]  }
  0x96   : > { %3265 = vmatprep.subr.bf16.mxu1 %v3594_v58  ;;  %958 = vmatprep.mubr.bf16.mxu0 %v2876_v14  ;;  %v495_v39 = vshll.u32 %v362_v30, 16  ;;  %v492_v58 = vor.u32 %v491_v50, %v488_v46  ;;  %v511_v3 = vrot.slane %v509_v57, 5  ;;  %v530_v9 = vrot.slane %v528_v61, 4  ;;  %v4205_v46 = vld [vmem:[%s4076_s5 + $0xc0] sm:$0xff]  ;;  %v366_v50 = vld [vmem:[%s4076_s5 + $0xd0] sm:$0x11] }
  0x97   : > { %959 = vmatmul.mubr.bf16.gmra.mrb[4].mxu0 %v2875_v16  ;;  %1023 = vmatprep.mubr.bf16.mxu1 %v2878_v27  ;;  %v520_v60 = vor.u32 %v519_v53, %v516_v52  ;;  %v533_v10 = vrot.slane %v531_v62, 5  ;;  %v539_v14 = vrot.slane %v537_v4, 5  ;;  %v3605_v27 = vld [vmem:[#allocation6 + $0x68] sm:$0xff]   ;;  %v4208_v49 = vld [vmem:[%s4076_s5 + $0xe0] sm:$0xff]  ;;  %v542_v52 = vshrl.u32 %v4205_v46, 16 }
  0x98   : > { %3226 = vmatpush3.bf16.msra.mxu0 %v3595_v6  ;;  %1024 = vmatmul.mubr.bf16.gmra.mrb[4].mxu1 %v2877_v28  ;;  %v497_v51 = vrot.slane %v495_v39, 5  ;;  %v493_v5 = vrot.slane %v492_v58, 4  ;;  %v2987_v28 = vcombine.low %v4128_v25, %v4165_v26  ;;  %v3607_v39 = vld [vmem:[#allocation6 + $0x28] sm:$0xff]   ;;  %v545_v53 = vshll.u32 %v4205_v46, 16  ;;  %v367_v62 = vld [vmem:[%s4076_s5 + $0xd8] sm:$0x11] }
  0x99   : > { %3266 = vmatpush3.bf16.msra.mxu1 %v3596_v11  ;;  %3227 = vmatprep.subr.bf16.mxu0 %v3597_v17  ;;  %v521_v6 = vrot.slane %v520_v60, 4  ;;  %v506_v11 = vor.u32 %v505_v2, %v502_v1  ;;  %v534_v18 = vor.u32 %v533_v10, %v530_v9  ;;  %v570_v55 = vshrl.u32 %v4208_v49, 16  ;;  %v4217_v57 = vld [vmem:[%s4076_s5 + $0xc8] sm:$0xff] }
  0x9a   : > { %3267 = vmatprep.subr.bf16.mxu1 %v3598_v19  ;;  %v498_v16 = vsel %vm4112_vm2, %v493_v5, %v497_v51  ;;  %v3604_v19 = vld [vmem:[#allocation6 + $0xa0] sm:$0xff]   ;;  %v368_v51 = vld [vmem:[%s4076_s5 + $0xf0] sm:$0x11]  ;;  %v573_v56 = vshll.u32 %v4208_v49, 16  ;;  %v4220_v58 = vld [vmem:[%s4076_s5 + $0xe8] sm:$0xff]  ;;  %v544_v60 = vrot.slane %v542_v52, 4 }
  0x9b   : > { %v526_v17 = vsel %vm4112_vm2, %v521_v6, %v525_v54  ;;  %v507_v22 = vrot.slane %v506_v11, 4  ;;  %v535_v30 = vrot.slane %v534_v18, 4  ;;  %v551_v54 = vshll.u32 %v366_v50, 16 }
  0x9c   : > { %3228 = vmatpush3.bf16.msra.mxu0 %v3599_v21  ;;  %v2880_v21 = vcombine.high %v498_v16, %v526_v17  ;;  %v579_v61 = vshll.u32 %v368_v51, 16  ;;  %v572_v2 = vrot.slane %v570_v55, 4  ;;  %v556_v5 = vshrl.u32 %v4217_v57, 16  ;;  %v3612_v51 = vld [vmem:[#allocation6 + $0xb0] sm:$0xff]   ;;  %v3613_v55 = vld [vmem:[#allocation6 + $0x78] sm:$0xff]  }
  0x9d   : > { %3268 = vmatpush3.bf16.msra.mxu1 %v3600_v23  ;;  %3229 = vmatprep.subr.bf16.mxu0 %v3601_v63  ;;  %v2879_v23 = vcombine.low %v498_v16, %v526_v17  ;;  %v512_v36 = vsel %vm4112_vm2, %v507_v22, %v511_v3  ;;  %v540_v40 = vsel %vm4112_vm2, %v535_v30, %v539_v14  ;;  %v369_v63 = vld [vmem:[%s4076_s5 + $0xf8] sm:$0x11]  ;;  %v553_v1 = vrot.slane %v551_v54, 5  ;;  %v3609_v16 = vld [vmem:[#allocation6 + $0x70] sm:$0xff]  }
  0x9e   : > { %3269 = vmatprep.subr.bf16.mxu1 %v3602_v0  ;;  %966 = vmatprep.mubr.bf16.mxu0 %v2880_v21  ;;  %v2882_v47 = vcombine.high %v512_v36, %v540_v40  ;;  %v2881_v48 = vcombine.low %v512_v36, %v540_v40  ;;  %v547_v0 = vrot.slane %v545_v53, 5  ;;  %v575_v3 = vrot.slane %v573_v56, 5  ;;  %v3610_v17 = vld [vmem:[#allocation6 + $0xf0] sm:$0xff]  }
  0x9f   : > { %967 = vmatmul.mubr.bf16.gmra.mrb[8].mxu0 %v2879_v23  ;;  %v581_v4 = vrot.slane %v579_v61, 5  ;;  %v559_v6 = vshll.u32 %v4217_v57, 16  ;;  %v565_v9 = vshll.u32 %v367_v62, 16  ;;  %v584_v14 = vshrl.u32 %v4220_v58, 16  ;;  %v3614_v61 = vld [vmem:[#allocation6 + $0xf8] sm:$0xff]  }
  0xa0   : > { %3230 = vmatpush3.bf16.msra.mxu0 %v3603_v15  ;;  %1031 = vmatprep.mubr.bf16.mxu1 %v2882_v47  ;;  %v548_v10 = vor.u32 %v547_v0, %v544_v60  ;;  %v576_v11 = vor.u32 %v575_v3, %v572_v2  ;;  %v587_v15 = vshll.u32 %v4220_v58, 16  ;;  %v558_v18 = vrot.slane %v556_v5, 4  ;;  %v3615_v0 = vld [vmem:[#allocation6 + $0x38] sm:$0xff]  }
  0xa1   : > { %3270 = vmatpush3.bf16.msra.mxu1 %v3604_v19  ;;  %3231 = vmatprep.subr.bf16.mxu0 %v3605_v27  ;;  %v561_v19 = vrot.slane %v559_v6, 5  ;;  %v593_v21 = vshll.u32 %v369_v63, 16  ;;  %v586_v27 = vrot.slane %v584_v14, 4  ;;  %v567_v36 = vrot.slane %v565_v9, 5  ;;  %v3616_v2 = vld [vmem:[#allocation6 + $0xb8] sm:$0xff]   ;;  %v3617_v6 = vld [vmem:[#allocation6 + $0x240] sm:$0xff]  }
  0xa2   : > { %3271 = vmatprep.subr.bf16.mxu1 %v3606_v31  ;;  %1032 = vmatmul.mubr.bf16.gmra.mrb[8].mxu1 %v2881_v48  ;;  %v549_v22 = vrot.slane %v548_v10, 4  ;;  %v577_v23 = vrot.slane %v576_v11, 4  ;;  %v589_v30 = vrot.slane %v587_v15, 5  ;;  %v2920_v40 = vcombine.high %v4087_v32, %v4090_v33  ;;  %v3618_v9 = vld [vmem:[#allocation6 + $0x2c0] sm:$0xff]   ;;  %v3621_v15 = vld [vmem:[#allocation6 + $0x248] sm:$0xff]  }
  0xa3   : > { %v562_v31 = vor.u32 %v561_v19, %v558_v18  ;;  %v595_v50 = vrot.slane %v593_v21, 5  ;;  %v2991_v56 = vcombine.low %v4168_v29, %v4205_v46  ;;  %v2993_v62 = vcombine.low %v4182_v45, %v4217_v57  ;;  %v3619_v11 = vld [vmem:[#allocation6 + $0x200] sm:$0xff]   ;;  %v3623_v18 = vld [vmem:[#allocation6 + $0x208] sm:$0xff]  }
  0xa4   : > { %3232 = vmatpush3.bf16.msra.mxu0 %v3607_v39  ;;  %v3611_v39 = vld [vmem:[#allocation6 + $0x30] sm:$0xff]   ;;  %v582_v47 = vsel %vm4112_vm2, %v577_v23, %v581_v4  ;;  %v590_v48 = vor.u32 %v589_v30, %v586_v27  ;;  %v2922_v5 = vcombine.high %v4099_v42, %v4102_v43  ;;  %v2919_v10 = vcombine.low %v4087_v32, %v4090_v33  ;;  %v3622_v19 = vld [vmem:[#allocation6 + $0x2c8] sm:$0xff]  }
  0xa5   : > { %3272 = vmatpush3.bf16.msra.mxu1 %v3608_v41  ;;  %3233 = vmatprep.subr.bf16.mxu0 %v3609_v16  ;;  %v554_v41 = vsel %vm4112_vm2, %v549_v22, %v553_v1  ;;  %v563_v53 = vrot.slane %v562_v31, 4  ;;  %v2924_v14 = vcombine.high %v4125_v24, %v4128_v25  ;;  %v2921_v16 = vcombine.low %v4099_v42, %v4102_v43  ;;  %v3624_v21 = vld [vmem:[#allocation6 + $0x288] sm:$0xff]   ;;  %v3625_v22 = vld [vmem:[#allocation6 + $0x250] sm:$0xff]   ;;  %v3629_v42 = vld [vmem:[#allocation6 + $0x258] sm:$0xff]  }
  0xa6   : > { %3273 = vmatprep.subr.bf16.mxu1 %v3610_v17  ;;  %v2884_v52 = vcombine.high %v554_v41, %v582_v47  ;;  %v2883_v54 = vcombine.low %v554_v41, %v582_v47  ;;  %v591_v60 = vrot.slane %v590_v48, 4  ;;  %v3620_v17 = vld [vmem:[#allocation6 + $0x280] sm:$0xff]   ;;  %v2926_v32 = vcombine.high %v4137_v37, %v4140_v38  ;;  %v3626_v27 = vld [vmem:[#allocation6 + $0x2d0] sm:$0xff]   ;;  %v3630_v41 = vld [vmem:[#allocation6 + $0x2d8] sm:$0xff]  }
  0xa7   : > { %v568_v63 = vsel %vm4112_vm2, %v563_v53, %v567_v36  ;;  %v2923_v23 = vcombine.low %v4125_v24, %v4128_v25  ;;  %v3627_v30 = vld [vmem:[#allocation6 + $0x210] sm:$0xff]   ;;  %v2928_v31 = vcombine.high %v4165_v26, %v4168_v29  ;;  %v2925_v36 = vcombine.low %v4137_v37, %v4140_v38  ;;  %v3632_v48 = vld [vmem:[#allocation6 + $0x298] sm:$0xff]   ;;  %v3635_v53 = vld [vmem:[#allocation6 + $0x220] sm:$0xff]  }
  0xa8   : > { %3234 = vmatpush3.bf16.msra.mxu0 %v3611_v39  ;;  %974 = vmatprep.mubr.bf16.mxu0 %v2884_v52  ;;  %v596_v1 = vsel %vm4112_vm2, %v591_v60, %v595_v50  ;;  %v3628_v39 = vld [vmem:[#allocation6 + $0x290] sm:$0xff]   ;;  %v2930_v47 = vcombine.high %v4179_v44, %v4182_v45  ;;  %v3633_v50 = vld [vmem:[#allocation6 + $0x260] sm:$0xff]   ;;  %v2929_v60 = vcombine.low %v4179_v44, %v4182_v45  ;;  %v3661_v24 = vld [vmem:[#allocation6 + $0x358] sm:$0xff]  }
  0xa9   : > { %3274 = vmatpush3.bf16.msra.mxu1 %v3612_v51  ;;  %3235 = vmatprep.subr.bf16.mxu0 %v3613_v55  ;;  %v2886_v3 = vcombine.high %v568_v63, %v596_v1  ;;  %v2885_v4 = vcombine.low %v568_v63, %v596_v1  ;;  %v2927_v51 = vcombine.low %v4165_v26, %v4168_v29  ;;  %v3634_v52 = vld [vmem:[#allocation6 + $0x2e0] sm:$0xff]   ;;  %v3639_v63 = vld [vmem:[#allocation6 + $0x228] sm:$0xff]   ;;  %v3659_v33 = vld [vmem:[#allocation6 + $0x310] sm:$0xff]  }
  0xaa   : > { %975 = vmatmul.mubr.bf16.gmra.mrb[12].mxu0 %v2883_v54  ;;  %3275 = vmatprep.subr.bf16.mxu1 %v3614_v61  ;;  %v3637_v54 = vld [vmem:[#allocation6 + $0x268] sm:$0xff]   ;;  %v2932_v55 = vcombine.high %v4205_v46, %v4208_v49  ;;  %v3636_v61 = vld [vmem:[#allocation6 + $0x2a0] sm:$0xff]   ;;  %v2934_v1 = vcombine.high %v4217_v57, %v4220_v58  ;;  %v3660_v43 = vld [vmem:[#allocation6 + $0x390] sm:$0xff]  }
  0xab   : > { %1352 = vmatprep.mubr.bf16.mxu0 %v2920_v40  ;;  %1039 = vmatprep.mubr.bf16.mxu1 %v2886_v3  ;;  %v3631_v40 = vld [vmem:[#allocation6 + $0x218] sm:$0xff]   ;;  %v3641_v3 = vld [vmem:[#allocation6 + $0x270] sm:$0xff]   ;;  %v3666_v25 = vld [vmem:[#allocation6 + $0x3e0] sm:$0xff]  }
  0xac   : > { %3236 = vmatpush3.bf16.msra.mxu0 %v3615_v0  ;;  %1040 = vmatmul.mubr.bf16.gmra.mrb[12].mxu1 %v2885_v4  ;;  %v3638_v0 = vld [vmem:[#allocation6 + $0x2e8] sm:$0xff]   ;;  %v2931_v4 = vcombine.low %v4205_v46, %v4208_v49  ;;  %v3663_v37 = vld [vmem:[#allocation6 + $0x318] sm:$0xff]   ;;  %v3667_v26 = vld [vmem:[#allocation6 + $0x320] sm:$0xff]  }
  0xad   : > { %3276 = vmatpush3.bf16.msra.mxu1 %v3616_v2  ;;  %3301 = vmatprep.subr.bf16.mxu0 %v3617_v6  ;;  %v3640_v2 = vld [vmem:[#allocation6 + $0x2a8] sm:$0xff]   ;;  %v3643_v6 = vld [vmem:[#allocation6 + $0x230] sm:$0xff]  }
  0xae   : > { %3341 = vmatprep.subr.bf16.mxu1 %v3618_v9  ;;  %1417 = vmatprep.mubr.bf16.mxu1 %v2922_v5  ;;  %v3642_v5 = vld [vmem:[#allocation6 + $0x2f0] sm:$0xff]   ;;  %v3645_v9 = vld [vmem:[#allocation6 + $0x278] sm:$0xff]   ;;  %v2982_v44 = vld [vmem:[%s4076_s5 + $0x108] sm:$0xff] }
  0xb2   : > { %1353 = vmatmul.mubr.bf16.vlgmr.msra.gmra.mrb[16].mxu0 %v2919_v10  ;;  %v2933_v10 = vcombine.low %v4217_v57, %v4220_v58 }
  0xb3   : > { %3302 = vmatpush3.bf16.msra.mxu0 %v3619_v11  ;;  %1360 = vmatprep.mubr.bf16.mxu0 %v2924_v14  ;;  %v3644_v11 = vld [vmem:[#allocation6 + $0x2b0] sm:$0xff]   ;;  %v3647_v14 = vld [vmem:[#allocation6 + $0x238] sm:$0xff]  }
  0xb4   : > { %3303 = vmatprep.subr.bf16.mxu0 %v3621_v15  ;;  %1418 = vmatmul.mubr.bf16.vlgmr.msra.gmra.mrb[16].mxu1 %v2921_v16  ;;  %v3646_v15 = vld [vmem:[#allocation6 + $0x2f8] sm:$0xff]  }
  0xb5   : > { %3342 = vmatpush3.bf16.msra.mxu1 %v3620_v17  ;;  %1425 = vmatprep.mubr.bf16.mxu1 %v2926_v32  ;;  %v3648_v16 = vld [vmem:[#allocation6 + $0x2b8] sm:$0xff]   ;;  %v3649_v17 = vld [vmem:[#allocation6 + $0x340] sm:$0xff]   ;;  %v3653_v32 = vld [vmem:[#allocation6 + $0x348] sm:$0xff]  }
  0xb6   : > { %3343 = vmatprep.subr.bf16.mxu1 %v3622_v19  ;;  %v3651_v19 = vld [vmem:[#allocation6 + $0x300] sm:$0xff]  }
  0xb7   : > { %3304 = vmatpush3.bf16.msra.mxu0 %v3623_v18  ;;  %v3650_v18 = vld [vmem:[#allocation6 + $0x3c0] sm:$0xff]  }
  0xb8   : > { %3305 = vmatprep.subr.bf16.mxu0 %v3625_v22  ;;  %v3654_v22 = vld [vmem:[#allocation6 + $0x3c8] sm:$0xff]  }
  0xb9   : > { %3344 = vmatpush3.bf16.msra.mxu1 %v3624_v21  ;;  %v3652_v21 = vld [vmem:[#allocation6 + $0x380] sm:$0xff]  }
  0xba   : > { %1361 = vmatmul.mubr.bf16.gmra.mrb[20].mxu0 %v2923_v23  ;;  %3345 = vmatprep.subr.bf16.mxu1 %v3626_v27  ;;  %v3656_v23 = vld [vmem:[#allocation6 + $0x388] sm:$0xff]   ;;  %v3657_v27 = vld [vmem:[#allocation6 + $0x350] sm:$0xff]  }
  0xbb   : > { %3306 = vmatpush3.bf16.msra.mxu0 %v3627_v30  ;;  %1368 = vmatprep.mubr.bf16.mxu0 %v2928_v31  ;;  %v3665_v30 = vld [vmem:[#allocation6 + $0x360] sm:$0xff]   ;;  %v3671_v31 = vld [vmem:[#allocation6 + $0x328] sm:$0xff]  }
  0xbc   : > { %3307 = vmatprep.subr.bf16.mxu0 %v3629_v42  ;;  %1426 = vmatmul.mubr.bf16.gmra.mrb[20].mxu1 %v2925_v36  ;;  %v3668_v42 = vld [vmem:[#allocation6 + $0x3a0] sm:$0xff]  }
  0xbd   : > { %3346 = vmatpush3.bf16.msra.mxu1 %v3628_v39  ;;  %1433 = vmatprep.mubr.bf16.mxu1 %v2930_v47  ;;  %v2981_v36 = vld [vmem:[%s4076_s5 + $0x100] sm:$0xff]  ;;  %v3670_v39 = vld [vmem:[#allocation6 + $0x3e8] sm:$0xff]  }
  0xbe   : > { %3347 = vmatprep.subr.bf16.mxu1 %v3630_v41  ;;  %v2996_v38 = vcombine.high %v4208_v49, %v2981_v36  ;;  %v2174_v41 = vshll.u32 %v2981_v36, 16  ;;  %v3672_v47 = vld [vmem:[#allocation6 + $0x3a8] sm:$0xff]  }
  0xbf   : > { %3308 = vmatpush3.bf16.msra.mxu0 %v3631_v40  ;;  %v2998_v40 = vcombine.high %v4220_v58, %v2982_v44 }
  0xc0   : > { %3309 = vmatprep.subr.bf16.mxu0 %v3633_v50 }
  0xc1   : > { %3348 = vmatpush3.bf16.msra.mxu1 %v3632_v48  ;;  %v3673_v48 = vld [vmem:[#allocation6 + $0x370] sm:$0xff]  }
  0xc2   : > { %1369 = vmatmul.mubr.bf16.gmra.mrb[24].mxu0 %v2927_v51  ;;  %3349 = vmatprep.subr.bf16.mxu1 %v3634_v52  ;;  %v3675_v51 = vld [vmem:[#allocation6 + $0x330] sm:$0xff]   ;;  %v2185_v52 = vshrl.u32 %v2982_v44, 16 }
  0xc3   : > { %3310 = vmatpush3.bf16.msra.mxu0 %v3635_v53  ;;  %1376 = vmatprep.mubr.bf16.mxu0 %v2932_v55  ;;  %v3677_v53 = vld [vmem:[#allocation6 + $0x378] sm:$0xff]   ;;  %v2188_v55 = vshll.u32 %v2982_v44, 16 }
  0xc4   : > { %3311 = vmatprep.subr.bf16.mxu0 %v3637_v54  ;;  %1434 = vmatmul.mubr.bf16.gmra.mrb[24].mxu1 %v2929_v60  ;;  %v3679_v60 = vld [vmem:[#allocation6 + $0x338] sm:$0xff]  }
  0xc5   : > { %3350 = vmatpush3.bf16.msra.mxu1 %v3636_v61  ;;  %1441 = vmatprep.mubr.bf16.mxu1 %v2934_v1  ;;  %v3031_v61 = vld [vmem:[%s4076_s5 + $0x20] sm:$0xff]  ;;  %v4318_v1 = vrot.slane %v2188_v55, 5  ;;  %v3042_v55 = vld [vmem:[%s4076_s5 + $0x78] sm:$0x11] }
  0xc6   : > { %3351 = vmatprep.subr.bf16.mxu1 %v3638_v0 }
  0xc7   : > { %3312 = vmatpush3.bf16.msra.mxu0 %v3639_v63  ;;  %v3033_v63 = vld [vmem:[%s4076_s5 + $0x30] sm:$0x11] }
  0xc8   : > { %3313 = vmatprep.subr.bf16.mxu0 %v3641_v3  ;;  %v1975_v3 = vshrl.u32 %v3031_v61, 16 }
  0xc9   : > { %3352 = vmatpush3.bf16.msra.mxu1 %v3640_v2  ;;  %v3035_v2 = vld [vmem:[%s4076_s5 + $0x40] sm:$0xff] }
  0xca   : > { %1377 = vmatmul.mubr.bf16.gmra.mrb[28].mxu0 %v2931_v4  ;;  %3353 = vmatprep.subr.bf16.mxu1 %v3642_v5  ;;  %v1978_v4 = vshll.u32 %v3031_v61, 16  ;;  %v1984_v5 = vshll.u32 %v3033_v63, 16 }
  0xcb   : > { %3314 = vmatpush3.bf16.msra.mxu0 %v3643_v6  ;;  %1836 = vmatprep.mubr.bf16.mxu0 %v2984_v8  ;;  %v3655_v8 = vld [vmem:[#allocation6 + $0x308] sm:$0xff]   ;;  %v2003_v6 = vshrl.u32 %v3035_v2, 16 }
  0xcc   : > { %3315 = vmatprep.subr.bf16.mxu0 %v3645_v9  ;;  %1442 = vmatmul.mubr.bf16.gmra.mrb[28].mxu1 %v2933_v10  ;;  %v2006_v9 = vshll.u32 %v3035_v2, 16 }
  0xcd   : > { %3354 = vmatpush3.bf16.msra.mxu1 %v3644_v11  ;;  %1901 = vmatprep.mubr.bf16.mxu1 %v2986_v13  ;;  %v3658_v13 = vld [vmem:[#allocation6 + $0x3d0] sm:$0xff]   ;;  %v3032_v11 = vld [vmem:[%s4076_s5 + $0x28] sm:$0xff] }
  0xce   : > { %3355 = vmatprep.subr.bf16.mxu1 %v3646_v15  ;;  %v1977_v15 = vrot.slane %v1975_v3, 4 }
  0xcf   : > { %3316 = vmatpush3.bf16.msra.mxu0 %v3647_v14  ;;  %v3034_v14 = vld [vmem:[%s4076_s5 + $0x38] sm:$0x11] }
  0xd0   : > { %3381 = vmatprep.subr.bf16.mxu0 %v3649_v17  ;;  %v1986_v17 = vrot.slane %v1984_v5, 5  ;;  %v3044_v5 = vld [vmem:[%s4076_s5 + $0x88] sm:$0xff] }
  0xd1   : > { %3356 = vmatpush3.bf16.msra.mxu1 %v3648_v16  ;;  %v1980_v16 = vrot.slane %v1978_v4, 5 }
  0xd2   : > { %1837 = vmatmul.mubr.bf16.vlgmr.msra.gmra.mrb[32].mxu0 %v2983_v7  ;;  %3421 = vmatprep.subr.bf16.mxu1 %v3650_v18  ;;  %v2992_v7 = vcombine.high %v4168_v29, %v4205_v46  ;;  %v2995_v29 = vcombine.low %v4208_v49, %v2981_v36  ;;  %v3674_v46 = vld [vmem:[#allocation6 + $0x3f0] sm:$0xff]   ;;  %v2997_v49 = vcombine.low %v4220_v58, %v2982_v44  ;;  %v3036_v18 = vld [vmem:[%s4076_s5 + $0x48] sm:$0xff] }
  0xd3   : > { %3382 = vmatpush3.bf16.msra.mxu0 %v3651_v19  ;;  %1844 = vmatprep.mubr.bf16.mxu0 %v2988_v35  ;;  %v2994_v35 = vcombine.high %v4182_v45, %v4217_v57  ;;  %v3676_v45 = vld [vmem:[#allocation6 + $0x3b0] sm:$0xff]   ;;  %v3678_v57 = vld [vmem:[#allocation6 + $0x3f8] sm:$0xff]  }
  0xd4   : > { %3383 = vmatprep.subr.bf16.mxu0 %v3653_v32  ;;  %1902 = vmatmul.mubr.bf16.vlgmr.msra.gmra.mrb[32].mxu1 %v2985_v12  ;;  %v3662_v12 = vld [vmem:[#allocation6 + $0x3d8] sm:$0xff]   ;;  %v3037_v58 = vld [vmem:[%s4076_s5 + $0x50] sm:$0x11] }
  0xd5   : > { %3422 = vmatpush3.bf16.msra.mxu1 %v3652_v21  ;;  %1909 = vmatprep.mubr.bf16.mxu1 %v2990_v20  ;;  %v3664_v20 = vld [vmem:[#allocation6 + $0x398] sm:$0xff]   ;;  %v2012_v10 = vshll.u32 %v3037_v58, 16  ;;  %v2005_v21 = vrot.slane %v2003_v6, 4 }
  0xd6   : > { %3423 = vmatprep.subr.bf16.mxu1 %v3654_v22  ;;  %v3038_v19 = vld [vmem:[%s4076_s5 + $0x58] sm:$0x11] }
  0xd7   : > { %3384 = vmatpush3.bf16.msra.mxu0 %v3655_v8  ;;  %v3680_v32 = vld [vmem:[#allocation6 + $0x3b8] sm:$0xff]   ;;  %v2008_v8 = vrot.slane %v2006_v9, 5  ;;  %v2014_v22 = vrot.slane %v2012_v10, 5  ;;  %v2054_v10 = vshll.u32 %v3042_v55, 16  ;;  %v3052_v55 = vld [vmem:[%s4076_s5 + $0xc8] sm:$0xff] }
  0xd8   : > { %3385 = vmatprep.subr.bf16.mxu0 %v3657_v27  ;;  %v1981_v27 = vor.u32 %v1980_v16, %v1977_v15  ;;  %v3046_v6 = vld [vmem:[%s4076_s5 + $0x98] sm:$0x11] }
  0xd9   : > { %3424 = vmatpush3.bf16.msra.mxu1 %v3656_v23  ;;  %v1989_v23 = vshrl.u32 %v3032_v11, 16 }
  0xda   : > { %1845 = vmatmul.mubr.bf16.gmra.mrb[36].mxu0 %v2987_v28  ;;  %3425 = vmatprep.subr.bf16.mxu1 %v3658_v13  ;;  %v3669_v28 = vld [vmem:[#allocation6 + $0x368] sm:$0xff]   ;;  %v1992_v13 = vshll.u32 %v3032_v11, 16 }
  0xdb   : > { %3386 = vmatpush3.bf16.msra.mxu0 %v3659_v33  ;;  %1852 = vmatprep.mubr.bf16.mxu0 %v2992_v7  ;;  %v1998_v33 = vshll.u32 %v3034_v14, 16  ;;  %v3039_v7 = vld [vmem:[%s4076_s5 + $0x60] sm:$0xff] }
  0xdc   : > { %3387 = vmatprep.subr.bf16.mxu0 %v3661_v24  ;;  %1910 = vmatmul.mubr.bf16.gmra.mrb[36].mxu1 %v2989_v34  ;;  %v2171_v34 = vshrl.u32 %v2981_v36, 16  ;;  %v2017_v24 = vshrl.u32 %v3036_v18, 16  ;;  %v2031_v44 = vshrl.u32 %v3039_v7, 16 }
  0xdd   : > { %3426 = vmatpush3.bf16.msra.mxu1 %v3660_v43  ;;  %1917 = vmatprep.mubr.bf16.mxu1 %v2994_v35  ;;  %v2009_v43 = vor.u32 %v2008_v8, %v2005_v21  ;;  %v2026_v35 = vshll.u32 %v3038_v19, 16  ;;  %v2056_v21 = vrot.slane %v2054_v10, 5  ;;  %v3049_v8 = vld [vmem:[%s4076_s5 + $0xb0] sm:$0x11] }
  0xde   : > { %3427 = vmatprep.subr.bf16.mxu1 %v3662_v12  ;;  %v2173_v50 = vrot.slane %v2171_v34, 4  ;;  %v2020_v12 = vshll.u32 %v3036_v18, 16 }
  0xdf   : > { %3388 = vmatpush3.bf16.msra.mxu0 %v3663_v37  ;;  %v1991_v37 = vrot.slane %v1989_v23, 4  ;;  %v2073_v23 = vshrl.u32 %v3044_v5, 16 }
  0xe0   : > { %3389 = vmatprep.subr.bf16.mxu0 %v3665_v30  ;;  %v1982_v30 = vrot.slane %v1981_v27, 4  ;;  %v2022_v36 = vrot.slane %v2020_v12, 5  ;;  %v2076_v27 = vshll.u32 %v3044_v5, 16 }
  0xe1   : > { %3428 = vmatpush3.bf16.msra.mxu1 %v3664_v20  ;;  %v3041_v20 = vld [vmem:[%s4076_s5 + $0x70] sm:$0x11] }
  0xe2   : > { %1853 = vmatmul.mubr.bf16.gmra.mrb[40].mxu0 %v2991_v56  ;;  %3429 = vmatprep.subr.bf16.mxu1 %v3666_v25  ;;  %v2176_v56 = vrot.slane %v2174_v41, 5  ;;  %v1994_v25 = vrot.slane %v1992_v13, 5  ;;  %v1987_v34 = vsel %vm4112_vm2, %v1982_v30, %v1986_v17  ;;  %v2040_v41 = vshll.u32 %v3041_v20, 16  ;;  %v3047_v17 = vld [vmem:[%s4076_s5 + $0xa0] sm:$0xff] }
  0xe3   : > { %3390 = vmatpush3.bf16.msra.mxu0 %v3667_v26  ;;  %1860 = vmatprep.mubr.bf16.mxu0 %v2996_v38  ;;  %v2000_v26 = vrot.slane %v1998_v33, 5  ;;  %v2028_v38 = vrot.slane %v2026_v35, 5  ;;  %v2082_v13 = vshll.u32 %v3046_v6, 16  ;;  %v2078_v12 = vrot.slane %v2076_v27, 5  ;;  %v3051_v20 = vld [vmem:[%s4076_s5 + $0xc0] sm:$0xff] }
  0xe4   : > { %3391 = vmatprep.subr.bf16.mxu0 %v3669_v28  ;;  %1918 = vmatmul.mubr.bf16.gmra.mrb[40].mxu1 %v2993_v62  ;;  %v2177_v54 = vor.u32 %v2176_v56, %v2173_v50  ;;  %v4312_v62 = vrot.slane %v2185_v52, 4  ;;  %v2019_v28 = vrot.slane %v2017_v24, 4  ;;  %v3045_v50 = vld [vmem:[%s4076_s5 + $0x90] sm:$0x11]  ;;  %v3040_v56 = vld [vmem:[%s4076_s5 + $0x68] sm:$0xff]  ;;  %v2096_v30 = vshll.u32 %v3049_v8, 16 }
  0xe5   : > { %3430 = vmatpush3.bf16.msra.mxu1 %v3668_v42  ;;  %1925 = vmatprep.mubr.bf16.mxu1 %v2998_v40  ;;  %v3043_v42 = vld [vmem:[%s4076_s5 + $0x80] sm:$0xff]  ;;  %v2034_v40 = vshll.u32 %v3039_v7, 16  ;;  %v2068_v2 = vshll.u32 %v3045_v50, 16  ;;  %v2045_v58 = vshrl.u32 %v3040_v56, 16  ;;  %v2048_v9 = vshll.u32 %v3040_v56, 16 }
  0xe6   : > { %3431 = vmatprep.subr.bf16.mxu1 %v3670_v39  ;;  %v4316_v0 = vrot.slane %v2177_v54, 4  ;;  %v1995_v39 = vor.u32 %v1994_v25, %v1991_v37  ;;  %v2087_v7 = vshrl.u32 %v3047_v17, 16  ;;  %v2075_v37 = vrot.slane %v2073_v23, 4  ;;  %v3057_v6 = vld [vmem:[%s4076_s5 + $0xf0] sm:$0x11] }
  0xe7   : > { %3392 = vmatpush3.bf16.msra.mxu0 %v3671_v31  ;;  %v2010_v31 = vrot.slane %v2009_v43, 4  ;;  %v2036_v54 = vrot.slane %v2034_v40, 5  ;;  %v2070_v16 = vrot.slane %v2068_v2, 5  ;;  %v2047_v19 = vrot.slane %v2045_v58, 4  ;;  %v3050_v40 = vld [vmem:[%s4076_s5 + $0xb8] sm:$0x11] }
  0xe8   : > { %3393 = vmatprep.subr.bf16.mxu0 %v3673_v48  ;;  %v2023_v48 = vor.u32 %v2022_v36, %v2019_v28  ;;  %v2090_v43 = vshll.u32 %v3047_v17, 16  ;;  %v2084_v35 = vrot.slane %v2082_v13, 5  ;;  %v3053_v28 = vld [vmem:[%s4076_s5 + $0xd0] sm:$0x11]  ;;  %v3048_v36 = vld [vmem:[%s4076_s5 + $0xa8] sm:$0xff]  ;;  %v2118_v50 = vshll.u32 %v3051_v20, 16 }
  0xe9   : > { %3432 = vmatpush3.bf16.msra.mxu1 %v3672_v47  ;;  %v2015_v47 = vsel %vm4112_vm2, %v2010_v31, %v2014_v22  ;;  %v2101_v56 = vshrl.u32 %v3048_v36, 16  ;;  %v3055_v2 = vld [vmem:[%s4076_s5 + $0xe0] sm:$0xff]  ;;  %v2152_v23 = vshll.u32 %v3057_v6, 16 }
  0xea   : > { %1861 = vmatmul.mubr.bf16.gmra.mrb[44].mxu0 %v2995_v29  ;;  %3433 = vmatprep.subr.bf16.mxu1 %v3674_v46  ;;  %v2033_v29 = vrot.slane %v2031_v44, 4  ;;  %v2059_v46 = vshrl.u32 %v3043_v42, 16  ;;  %v3064_v52 = vcombine.high %v1987_v34, %v2015_v47  ;;  %v2092_v31 = vrot.slane %v2090_v43, 5 }
  0xeb   : > { %3394 = vmatpush3.bf16.msra.mxu0 %v3675_v51  ;;  %v3063_v51 = vcombine.low %v1987_v34, %v2015_v47  ;;  %v2079_v44 = vor.u32 %v2078_v12, %v2075_v37  ;;  %v2143_v17 = vshrl.u32 %v3055_v2, 16 }
  0xec   : > { %3395 = vmatprep.subr.bf16.mxu0 %v3677_v53  ;;  %1926 = vmatmul.mubr.bf16.gmra.mrb[44].mxu1 %v2997_v49  ;;  %v1996_v53 = vrot.slane %v1995_v39, 4  ;;  %v2042_v49 = vrot.slane %v2040_v41, 5  ;;  %v2037_v63 = vor.u32 %v2036_v54, %v2033_v29  ;;  %v2098_v39 = vrot.slane %v2096_v30, 5 }
  0xed   : > { %3434 = vmatpush3.bf16.msra.mxu1 %v3676_v45  ;;  %v2024_v45 = vrot.slane %v2023_v48, 4  ;;  %2551 = vmatprep.mubr.bf16.mxu0 %v3064_v52  ;;  %v2115_v48 = vshrl.u32 %v3051_v20, 16  ;;  %v2080_v29 = vrot.slane %v2079_v44, 4  ;;  %v2120_v54 = vrot.slane %v2118_v50, 5  ;;  %v3062_v20 = vld [vmem:[%s4076_s5 + $0x118] sm:$0x11] }
  0xee   : > { %3435 = vmatprep.subr.bf16.mxu1 %v3678_v57  ;;  %v2061_v57 = vrot.slane %v2059_v46, 4  ;;  %v2001_v61 = vsel %vm4112_vm2, %v1996_v53, %v2000_v26  ;;  %v2038_v15 = vrot.slane %v2037_v63, 4  ;;  %v2124_v46 = vshll.u32 %v3053_v28, 16 }
  0xef   : > { %3396 = vmatpush3.bf16.msra.mxu0 %v3679_v60  ;;  %v2062_v60 = vshll.u32 %v3043_v42, 16  ;;  %v2029_v3 = vsel %vm4112_vm2, %v2024_v45, %v2028_v38  ;;  %v2089_v42 = vrot.slane %v2087_v7, 4  ;;  %v2117_v53 = vrot.slane %v2115_v48, 4 }
  0xf0   : > { %v3065_v11 = vcombine.low %v2001_v61, %v2029_v3  ;;  %v3066_v14 = vcombine.high %v2001_v61, %v2029_v3  ;;  %v2043_v22 = vsel %vm4112_vm2, %v2038_v15, %v2042_v49  ;;  %v2110_v45 = vshll.u32 %v3050_v40, 16 }
  0xf1   : > { %3436 = vmatpush3.bf16.msra.mxu1 %v3680_v32  ;;  %v2064_v4 = vrot.slane %v2062_v60, 5  ;;  %v2050_v32 = vrot.slane %v2048_v9, 5  ;;  %v2093_v47 = vor.u32 %v2092_v31, %v2089_v42  ;;  %v2085_v49 = vsel %vm4112_vm2, %v2080_v29, %v2084_v35  ;;  %v3054_v60 = vld [vmem:[%s4076_s5 + $0xd8] sm:$0x11] }
  0xf2   : > { %2552 = vmatmul.mubr.bf16.vlgmr.msra.gmra.mrb[48].mxu0 %v3063_v51  ;;  %2616 = vmatprep.mubr.bf16.mxu1 %v3066_v14  ;;  %v2104_v51 = vshll.u32 %v3048_v36, 16  ;;  %v2103_v61 = vrot.slane %v2101_v56, 4  ;;  %v2121_v5 = vor.u32 %v2120_v54, %v2117_v53  ;;  %v2112_v10 = vrot.slane %v2110_v45, 5 }
  0xf3   : > { %v2065_v18 = vor.u32 %v2064_v4, %v2061_v57  ;;  %v2051_v24 = vor.u32 %v2050_v32, %v2047_v19  ;;  %v2094_v52 = vrot.slane %v2093_v47, 4  ;;  %v2126_v57 = vrot.slane %v2124_v46, 5  ;;  %v3056_v19 = vld [vmem:[%s4076_s5 + $0xe8] sm:$0xff] }
  0xf4   : > { %2617 = vmatmul.mubr.bf16.vlgmr.msra.gmra.mrb[48].mxu1 %v3065_v11  ;;  %v2106_v63 = vrot.slane %v2104_v51, 5  ;;  %v2129_v11 = vshrl.u32 %v3052_v55, 16  ;;  %v2132_v14 = vshll.u32 %v3052_v55, 16  ;;  %v2122_v15 = vrot.slane %v2121_v5, 4 }
  0xf5   : > { %v2066_v33 = vrot.slane %v2065_v18, 4  ;;  %v2052_v26 = vrot.slane %v2051_v24, 4  ;;  %v2099_v4 = vsel %vm4112_vm2, %v2094_v52, %v2098_v39  ;;  %v2146_v18 = vshll.u32 %v3055_v2, 16  ;;  %v3058_v24 = vld [vmem:[%s4076_s5 + $0xf8] sm:$0x11] }
  0xf6   : > { %v2107_v9 = vor.u32 %v2106_v63, %v2103_v61  ;;  %v2134_v8 = vrot.slane %v2132_v14, 5  ;;  %v2127_v27 = vsel %vm4112_vm2, %v2122_v15, %v2126_v57  ;;  %v2145_v13 = vrot.slane %v2143_v17, 4 }
  0xf7   : > { %v2071_v25 = vsel %vm4112_vm2, %v2066_v33, %v2070_v16  ;;  %v2057_v41 = vsel %vm4112_vm2, %v2052_v26, %v2056_v21  ;;  %v2138_v16 = vshll.u32 %v3054_v60, 16  ;;  %v2131_v21 = vrot.slane %v2129_v11, 4 }
  0xf8   : > { %v3068_v38 = vcombine.high %v2043_v22, %v2071_v25  ;;  %v3067_v34 = vcombine.low %v2043_v22, %v2071_v25  ;;  %v3070_v58 = vcombine.high %v2057_v41, %v2085_v49  ;;  %v3069_v3 = vcombine.low %v2057_v41, %v2085_v49  ;;  %v3061_v22 = vld [vmem:[%s4076_s5 + $0x110] sm:$0x11] }
  0xf9   : > { %v2108_v32 = vrot.slane %v2107_v9, 4  ;;  %v2148_v33 = vrot.slane %v2146_v18, 5  ;;  %v2191_v7 = vor.u32 %v4318_v1, %v4312_v62  ;;  %v3072_v43 = vcombine.high %v2099_v4, %v2127_v27 }
  0xfa   : > { %2559 = vmatprep.mubr.bf16.mxu0 %v3068_v38  ;;  %2624 = vmatprep.mubr.bf16.mxu1 %v3070_v58  ;;  %v2135_v37 = vor.u32 %v2134_v8, %v2131_v21  ;;  %v2140_v12 = vrot.slane %v2138_v16, 5  ;;  %v3071_v35 = vcombine.low %v2099_v4, %v2127_v27  ;;  %v2154_v25 = vrot.slane %v2152_v23, 5 }
  0xfb   : > { %2560 = vmatmul.mubr.bf16.gmra.mrb[52].mxu0 %v3067_v34  ;;  %v2149_v30 = vor.u32 %v2148_v33, %v2145_v13  ;;  %v2180_v26 = vshll.u32 %v3061_v22, 16  ;;  %v2157_v28 = vshrl.u32 %v3056_v19, 16  ;;  %v2113_v42 = vsel %vm4112_vm2, %v2108_v32, %v2112_v10 }
  0xfc   : > { %2625 = vmatmul.mubr.bf16.gmra.mrb[52].mxu1 %v3069_v3  ;;  %2567 = vmatprep.mubr.bf16.mxu0 %v3072_v43  ;;  %v2136_v31 = vrot.slane %v2135_v37, 4  ;;  %v2160_v36 = vshll.u32 %v3056_v19, 16  ;;  %v2166_v38 = vshll.u32 %v3058_v24, 16  ;;  %v2194_v1 = vshll.u32 %v3062_v20, 16 }
  0xfd   : > { %v2150_v44 = vrot.slane %v2149_v30, 4  ;;  %v2182_v34 = vrot.slane %v2180_v26, 5  ;;  %v2159_v62 = vrot.slane %v2157_v28, 4  ;;  %v2192_v41 = vrot.slane %v2191_v7, 4 }
  0xfe   : > { %v2141_v39 = vsel %vm4112_vm2, %v2136_v31, %v2140_v12  ;;  %v2162_v40 = vrot.slane %v2160_v36, 5  ;;  %v2168_v51 = vrot.slane %v2166_v38, 5  ;;  %v2196_v52 = vrot.slane %v2194_v1, 5 }
  0xff   : > { %v3074_v47 = vcombine.high %v2113_v42, %v2141_v39  ;;  %v3073_v48 = vcombine.low %v2113_v42, %v2141_v39  ;;  %v2155_v50 = vsel %vm4112_vm2, %v2150_v44, %v2154_v25  ;;  %v2183_v29 = vsel %vm4112_vm2, %v4316_v0, %v2182_v34 }
 0x100   : > { %v3076_v46 = vcombine.high %v2155_v50, %v2183_v29  ;;  %v2163_v56 = vor.u32 %v2162_v40, %v2159_v62  ;;  %v3075_v53 = vcombine.low %v2155_v50, %v2183_v29  ;;  %v2197_v55 = vsel %vm4112_vm2, %v2192_v41, %v2196_v52 }
 0x101   : > { %2632 = vmatprep.mubr.bf16.mxu1 %v3074_v47 }
 0x102   : > { %v2164_v54 = vrot.slane %v2163_v56, 4 }
 0x103   : > { %2568 = vmatmul.mubr.bf16.gmra.mrb[56].mxu0 %v3071_v35 }
 0x104   : > { %2633 = vmatmul.mubr.bf16.gmra.mrb[56].mxu1 %v3073_v48  ;;  %2575 = vmatprep.mubr.bf16.mxu0 %v3076_v46  ;;  %v2169_v45 = vsel %vm4112_vm2, %v2164_v54, %v2168_v51 }
 0x105   : > { %v3078_v49 = vcombine.high %v2169_v45, %v2197_v55  ;;  %v3077_v57 = vcombine.low %v2169_v45, %v2197_v55 }
 0x107   : > { %2640 = vmatprep.mubr.bf16.mxu1 %v3078_v49 }
 0x10b   : > { %2576 = vmatmul.mubr.bf16.gmra.mrb[60].mxu0 %v3075_v53 }
 0x10c   : > { %2641 = vmatmul.mubr.bf16.gmra.mrb[60].mxu1 %v3077_v57 }
 0x162   : > { %v3157_v0 = vpop.f32.mrb[0].mxu0 }
 0x163   : > { %v3158_v60 = vpop.f32.mrb[1].mxu0  ;;  %v3197_v2 = vpop.f32.mrb[0].mxu1 }
 0x164   : > { %v3159_v61 = vadd.f32 %v3158_v60, %v3157_v0  ;;  %v3160_v63 = vpop.f32.mrb[2].mxu0  ;;  %v3198_v3 = vpop.f32.mrb[1].mxu1 }
 0x165   : > { %v3161_v58 = vpop.f32.mrb[3].mxu0  ;;  %v3199_v5 = vadd.f32 %v3198_v3, %v3197_v2  ;;  %v3200_v6 = vpop.f32.mrb[2].mxu1 }
 0x166   : > { %v3162_v4 = vadd.f32 %v3161_v58, %v3160_v63  ;;  %v3201_v9 = vpop.f32.mrb[3].mxu1 }
 0x167   : > { %v1018_v10 = vadd.f32 %v3199_v5, %v3159_v61  ;;  %v3202_v11 = vadd.f32 %v3201_v9, %v3200_v6 }
 0x169   : > { %v1021_v59 = vadd.f32 %v3202_v11, %v3162_v4 }
 0x16a   : > { %v3163_v14 = vpop.f32.mrb[4].mxu0 }
 0x16b   : > { %v3164_v15 = vpop.f32.mrb[5].mxu0  ;;  %v3203_v19 = vpop.f32.mrb[4].mxu1 }
 0x16c   : > { %v3165_v16 = vadd.f32 %v3164_v15, %v3163_v14  ;;  %v3166_v17 = vpop.f32.mrb[6].mxu0  ;;  %v3204_v21 = vpop.f32.mrb[5].mxu1 }
 0x16d   : > { %v3167_v18 = vpop.f32.mrb[7].mxu0  ;;  %v3205_v8 = vadd.f32 %v3204_v21, %v3203_v19  ;;  %v3206_v22 = vpop.f32.mrb[6].mxu1 }
 0x16e   : > { %v3168_v32 = vadd.f32 %v3167_v18, %v3166_v17  ;;  %v3207_v23 = vpop.f32.mrb[7].mxu1 }
 0x16f   : > { %v1026_v27 = vadd.f32 %v3205_v8, %v3165_v16  ;;  %v3208_v13 = vadd.f32 %v3207_v23, %v3206_v22 }
 0x171   : > { %v1029_v33 = vadd.f32 %v3208_v13, %v3168_v32 }
 0x172   : > { %v3169_v24 = vpop.f32.mrb[8].mxu0 }
 0x173   : > { %v3170_v7 = vpop.f32.mrb[9].mxu0 }
 0x174   : > { %v3171_v43 = vadd.f32 %v3170_v7, %v3169_v24  ;;  %v3172_v37 = vpop.f32.mrb[10].mxu0 }
 0x175   : > { %v3173_v12 = vpop.f32.mrb[11].mxu0  ;;  %v3209_v35 = vpop.f32.mrb[8].mxu1 }
 0x176   : > { %v3174_v20 = vadd.f32 %v3173_v12, %v3172_v37  ;;  %v3210_v30 = vpop.f32.mrb[9].mxu1 }
 0x177   : > { %v3211_v25 = vadd.f32 %v3210_v30, %v3209_v35  ;;  %v3212_v26 = vpop.f32.mrb[10].mxu1 }
 0x178   : > { %v3213_v28 = vpop.f32.mrb[11].mxu1 }
 0x179   : > { %v1034_v42 = vadd.f32 %v3211_v25, %v3171_v43  ;;  %v3214_v31 = vadd.f32 %v3213_v28, %v3212_v26 }
 0x17b   : > { %v1037_v36 = vadd.f32 %v3214_v31, %v3174_v20 }
 0x17d   : > { %v3175_v38 = vpop.f32.mrb[12].mxu0 }
 0x17e   : > { %v3176_v44 = vpop.f32.mrb[13].mxu0 }
 0x17f   : > { %v3177_v34 = vadd.f32 %v3176_v44, %v3175_v38  ;;  %v3178_v62 = vpop.f32.mrb[14].mxu0  ;;  %v3215_v39 = vpop.f32.mrb[12].mxu1 }
 0x180   : > { %v3179_v1 = vpop.f32.mrb[15].mxu0  ;;  %v3216_v41 = vpop.f32.mrb[13].mxu1 }
 0x181   : > { %v3180_v40 = vadd.f32 %v3179_v1, %v3178_v62  ;;  %v3217_v47 = vadd.f32 %v3216_v41, %v3215_v39  ;;  %v3218_v48 = vpop.f32.mrb[14].mxu1 }
 0x182   : > { %v3219_v50 = vpop.f32.mrb[15].mxu1 }
 0x183   : > { %v1042_v29 = vadd.f32 %v3217_v47, %v3177_v34  ;;  %v3220_v46 = vadd.f32 %v3219_v50, %v3218_v48 }
 0x185   : > { %v3237_v56 = vpop.f32.mrb[16].mxu0  ;;  %v1045_v52 = vadd.f32 %v3220_v46, %v3180_v40 }
 0x186   : > { %v3238_v51 = vpop.f32.mrb[17].mxu0 }
 0x187   : > { %v3239_v53 = vadd.f32 %v3238_v51, %v3237_v56  ;;  %v3240_v54 = vpop.f32.mrb[18].mxu0  ;;  %v3277_v45 = vpop.f32.mrb[16].mxu1 }
 0x188   : > { %v3241_v55 = vpop.f32.mrb[19].mxu0  ;;  %v3278_v0 = vpop.f32.mrb[17].mxu1 }
 0x189   : > { %v1355_v49 = vadd.f32 %v3239_v53, %v1018_v10  ;;  %v3242_v57 = vadd.f32 %v3241_v55, %v3240_v54  ;;  %v3279_v60 = vadd.f32 %v3278_v0, %v3277_v45  ;;  %v3280_v61 = vpop.f32.mrb[18].mxu1 }
 0x18a   : > { %v3281_v2 = vpop.f32.mrb[19].mxu1 }
 0x18b   : > { %v1358_v63 = vadd.f32 %v3242_v57, %v1021_v59  ;;  %v4383_v58 = vadd.f32 %v3279_v60, %v1355_v49  ;;  %v3282_v3 = vadd.f32 %v3281_v2, %v3280_v61 }
 0x18d   : > { %v3243_v4 = vpop.f32.mrb[20].mxu0  ;;  %v4385_v6 = vadd.f32 %v3282_v3, %v1358_v63 }
 0x18e   : > { %v3244_v5 = vpop.f32.mrb[21].mxu0 }
 0x18f   : > { %v3245_v9 = vadd.f32 %v3244_v5, %v3243_v4  ;;  %v3246_v11 = vpop.f32.mrb[22].mxu0  ;;  %v3283_v15 = vpop.f32.mrb[20].mxu1 }
 0x190   : > { %v3247_v14 = vpop.f32.mrb[23].mxu0  ;;  %v3284_v10 = vpop.f32.mrb[21].mxu1 }
 0x191   : > { %v1363_v16 = vadd.f32 %v3245_v9, %v1026_v27  ;;  %v3248_v17 = vadd.f32 %v3247_v14, %v3246_v11  ;;  %v3285_v18 = vadd.f32 %v3284_v10, %v3283_v15  ;;  %v3286_v19 = vpop.f32.mrb[22].mxu1 }
 0x192   : > { %v3287_v21 = vpop.f32.mrb[23].mxu1 }
 0x193   : > { %v1366_v32 = vadd.f32 %v3248_v17, %v1029_v33  ;;  %v4387_v59 = vadd.f32 %v3285_v18, %v1363_v16  ;;  %v3288_v8 = vadd.f32 %v3287_v21, %v3286_v19 }
 0x195   : > { %v3249_v22 = vpop.f32.mrb[24].mxu0  ;;  %v4389_v13 = vadd.f32 %v3288_v8, %v1366_v32 }
 0x196   : > { %v3250_v23 = vpop.f32.mrb[25].mxu0 }
 0x197   : > { %v3251_v24 = vadd.f32 %v3250_v23, %v3249_v22  ;;  %v3252_v7 = vpop.f32.mrb[26].mxu0  ;;  %v3289_v37 = vpop.f32.mrb[24].mxu1 }
 0x198   : > { %v3253_v43 = vpop.f32.mrb[27].mxu0  ;;  %v3290_v27 = vpop.f32.mrb[25].mxu1 }
 0x199   : > { %v1371_v12 = vadd.f32 %v3251_v24, %v1034_v42  ;;  %v3254_v35 = vadd.f32 %v3253_v43, %v3252_v7  ;;  %v3291_v20 = vadd.f32 %v3290_v27, %v3289_v37  ;;  %v3292_v30 = vpop.f32.mrb[26].mxu1 }
 0x19a   : > { %v3293_v26 = vpop.f32.mrb[27].mxu1 }
 0x19b   : > { %v1374_v25 = vadd.f32 %v3254_v35, %v1037_v36  ;;  %v4391_v33 = vadd.f32 %v3291_v20, %v1371_v12  ;;  %v3294_v28 = vadd.f32 %v3293_v26, %v3292_v30 }
 0x19d   : > { %v3255_v31 = vpop.f32.mrb[28].mxu0  ;;  %v4393_v44 = vadd.f32 %v3294_v28, %v1374_v25 }
 0x19e   : > { %v3256_v38 = vpop.f32.mrb[29].mxu0 }
 0x19f   : > { %v3257_v34 = vadd.f32 %v3256_v38, %v3255_v31  ;;  %v3258_v62 = vpop.f32.mrb[30].mxu0  ;;  %v3295_v39 = vpop.f32.mrb[28].mxu1 }
 0x1a0   : > { %v3259_v1 = vpop.f32.mrb[31].mxu0  ;;  %v3296_v42 = vpop.f32.mrb[29].mxu1 }
 0x1a1   : > { %v1379_v40 = vadd.f32 %v3257_v34, %v1042_v29  ;;  %v3260_v41 = vadd.f32 %v3259_v1, %v3258_v62  ;;  %v3297_v47 = vadd.f32 %v3296_v42, %v3295_v39  ;;  %v3298_v48 = vpop.f32.mrb[30].mxu1 }
 0x1a2   : > { %v3299_v46 = vpop.f32.mrb[31].mxu1 }
 0x1a3   : > { %v1382_v50 = vadd.f32 %v3260_v41, %v1045_v52  ;;  %v4395_v36 = vadd.f32 %v3297_v47, %v1379_v40  ;;  %v3300_v56 = vadd.f32 %v3299_v46, %v3298_v48 }
 0x1a5   : > { %v3317_v51 = vpop.f32.mrb[32].mxu0  ;;  %v1447_v54 = vadd.f32 %v3300_v56, %v1382_v50 }
 0x1a6   : > { %v3318_v53 = vpop.f32.mrb[33].mxu0 }
 0x1a7   : > { %v3319_v55 = vadd.f32 %v3318_v53, %v3317_v51  ;;  %v3320_v45 = vpop.f32.mrb[34].mxu0  ;;  %v3357_v57 = vpop.f32.mrb[32].mxu1 }
 0x1a8   : > { %v3321_v49 = vpop.f32.mrb[35].mxu0  ;;  %v3358_v60 = vpop.f32.mrb[33].mxu1 }
 0x1a9   : > { %v3322_v0 = vadd.f32 %v3321_v49, %v3320_v45  ;;  %v3359_v61 = vadd.f32 %v3358_v60, %v3357_v57  ;;  %v3360_v29 = vpop.f32.mrb[34].mxu1 }
 0x1aa   : > { %v3361_v63 = vpop.f32.mrb[35].mxu1 }
 0x1ab   : > { %v1904_v2 = vadd.f32 %v3359_v61, %v3319_v55  ;;  %v3362_v3 = vadd.f32 %v3361_v63, %v3360_v29 }
 0x1ad   : > { %v3323_v4 = vpop.f32.mrb[36].mxu0  ;;  %v4398_v5 = vadd.f32 %v1904_v2, %v4383_v58  ;;  %v1907_v9 = vadd.f32 %v3362_v3, %v3322_v0 }
 0x1ae   : > { %v3324_v52 = vpop.f32.mrb[37].mxu0 }
 0x1af   : > { %v3325_v11 = vadd.f32 %v3324_v52, %v3323_v4  ;;  %v3326_v14 = vpop.f32.mrb[38].mxu0  ;;  %v4401_v16 = vadd.f32 %v1907_v9, %v4385_v6  ;;  %v3363_v17 = vpop.f32.mrb[36].mxu1  ;;  %v4420_v9 = vld [vmem:[#allocation8] ss:$0 sm:$0xff] }
 0x1b0   : > { %v3327_v15 = vpop.f32.mrb[39].mxu0  ;;  %v3364_v18 = vpop.f32.mrb[37].mxu1 }
 0x1b1   : > { %v3328_v10 = vadd.f32 %v3327_v15, %v3326_v14  ;;  %v3365_v19 = vadd.f32 %v3364_v18, %v3363_v17  ;;  %v3366_v32 = vpop.f32.mrb[38].mxu1 }
 0x1b2   : > { %v3367_v21 = vpop.f32.mrb[39].mxu1 }
 0x1b3   : > { %v1912_v8 = vadd.f32 %v3365_v19, %v3325_v11  ;;  %v3368_v22 = vadd.f32 %v3367_v21, %v3366_v32 }
 0x1b5   : > { %v3329_v23 = vpop.f32.mrb[40].mxu0  ;;  %v4404_v58 = vadd.f32 %v1912_v8, %v4387_v59  ;;  %v1915_v7 = vadd.f32 %v3368_v22, %v3328_v10 }
 0x1b6   : > { %v3330_v24 = vpop.f32.mrb[41].mxu0 }
 0x1b7   : > { %v3331_v43 = vadd.f32 %v3330_v24, %v3329_v23  ;;  %v3332_v37 = vpop.f32.mrb[42].mxu0  ;;  %v4407_v6 = vadd.f32 %v1915_v7, %v4389_v13  ;;  %v3369_v35 = vpop.f32.mrb[40].mxu1 }
 0x1b8   : > { %v3333_v12 = vpop.f32.mrb[43].mxu0  ;;  %v3370_v20 = vpop.f32.mrb[41].mxu1 }
 0x1b9   : > { %v3334_v27 = vadd.f32 %v3333_v12, %v3332_v37  ;;  %v3371_v30 = vadd.f32 %v3370_v20, %v3369_v35  ;;  %v3372_v25 = vpop.f32.mrb[42].mxu1 }
 0x1ba   : > { %v3373_v26 = vpop.f32.mrb[43].mxu1 }
 0x1bb   : > { %v1920_v28 = vadd.f32 %v3371_v30, %v3331_v43  ;;  %v3374_v31 = vadd.f32 %v3373_v26, %v3372_v25 }
 0x1bd   : > { %v3335_v38 = vpop.f32.mrb[44].mxu0  ;;  %v4410_v59 = vadd.f32 %v1920_v28, %v4391_v33  ;;  %v1923_v62 = vadd.f32 %v3374_v31, %v3334_v27 }
 0x1be   : > { %v3336_v34 = vpop.f32.mrb[45].mxu0 }
 0x1bf   : > { %v3337_v1 = vadd.f32 %v3336_v34, %v3335_v38  ;;  %v3338_v39 = vpop.f32.mrb[46].mxu0  ;;  %v4413_v13 = vadd.f32 %v1923_v62, %v4393_v44  ;;  %v3375_v41 = vpop.f32.mrb[44].mxu1 }
 0x1c0   : > { %v3339_v40 = vpop.f32.mrb[47].mxu0  ;;  %v3376_v47 = vpop.f32.mrb[45].mxu1 }
 0x1c1   : > { %v3340_v42 = vadd.f32 %v3339_v40, %v3338_v39  ;;  %v3377_v48 = vadd.f32 %v3376_v47, %v3375_v41  ;;  %v3378_v50 = vpop.f32.mrb[46].mxu1 }
 0x1c2   : > { %v3379_v46 = vpop.f32.mrb[47].mxu1 }
 0x1c3   : > { %v1928_v56 = vadd.f32 %v3377_v48, %v3337_v1  ;;  %v3380_v51 = vadd.f32 %v3379_v46, %v3378_v50 }
 0x1c5   : > { %v4416_v53 = vadd.f32 %v1928_v56, %v4395_v36  ;;  %v1931_v33 = vadd.f32 %v3380_v51, %v3340_v42  ;;  %v3397_v45 = vpop.f32.mrb[48].mxu0 }
 0x1c6   : > { %v3398_v49 = vpop.f32.mrb[49].mxu0 }
 0x1c7   : > { %v4418_v55 = vadd.f32 %v1931_v33, %v1447_v54  ;;  %v3399_v57 = vadd.f32 %v3398_v49, %v3397_v45  ;;  %v3400_v0 = vpop.f32.mrb[50].mxu0  ;;  %v3437_v60 = vpop.f32.mrb[48].mxu1 }
 0x1c8   : > { %v3401_v44 = vpop.f32.mrb[51].mxu0  ;;  %v3438_v29 = vpop.f32.mrb[49].mxu1 }
 0x1c9   : > { %v3402_v61 = vadd.f32 %v3401_v44, %v3400_v0  ;;  %v3439_v63 = vadd.f32 %v3438_v29, %v3437_v60  ;;  %v3440_v2 = vpop.f32.mrb[50].mxu1 }
 0x1ca   : > { %v3441_v3 = vpop.f32.mrb[51].mxu1 }
 0x1cb   : > { %v2619_v4 = vadd.f32 %v3439_v63, %v3399_v57  ;;  %v3442_v52 = vadd.f32 %v3441_v3, %v3440_v2 }
 0x1cd   : > { %v2649_v36 = vadd.f32 %v2619_v4, %v4398_v5  ;;  %v2622_v54 = vadd.f32 %v3442_v52, %v3402_v61 }
 0x1ce   : > { %v3403_v11 = vpop.f32.mrb[52].mxu0 }
 0x1cf   : > { %v3404_v14 = vpop.f32.mrb[53].mxu0  ;;  %v2699_v15 = vadd.f32 %v4420_v9, %v2649_v36  ;;  %v2650_v17 = vadd.f32 %v2622_v54, %v4401_v16  ;;  %v3443_v8 = vpop.f32.mrb[52].mxu1 }
 0x1d0   : > { %v3405_v10 = vadd.f32 %v3404_v14, %v3403_v11  ;;  %v3406_v18 = vpop.f32.mrb[54].mxu0  ;;  %v3444_v24 = vpop.f32.mrb[53].mxu1 }
 0x1d1   : > { %v3407_v19 = vpop.f32.mrb[55].mxu0  ;;  %v2700_v32 = vadd.f32 %v4420_v9, %v2650_v17  ;;  %v2707_v22 = vmax.f32 %v2699_v15, 0.0  ;;  %v3445_v7 = vadd.f32 %v3444_v24, %v3443_v8  ;;  %v3446_v5 = vpop.f32.mrb[54].mxu1 }
 0x1d2   : > { %v3408_v21 = vadd.f32 %v3407_v19, %v3406_v18  ;;  %v3447_v37 = vpop.f32.mrb[55].mxu1 }
 0x1d3   : > { %v2708_v23 = vmax.f32 %v2700_v32, 0.0  ;;  %v2627_v12 = vadd.f32 %v3445_v7, %v3405_v10  ;;  %v3448_v35 = vadd.f32 %v3447_v37, %v3446_v5 }
 0x1d5   : > { %v3121_v43 = vpack.c.bf16 %v2708_v23, %v2707_v22  ;;  %v2651_v27 = vadd.f32 %v2627_v12, %v4404_v58  ;;  %v2630_v20 = vadd.f32 %v3448_v35, %v3408_v21 }
 0x1d6   : > { %v3409_v16 = vpop.f32.mrb[56].mxu0 }
 0x1d7   : > { %3122 = vst [vmem:[%s4427_s22] sm:$0xff] %v3121_v43   ;;  %v3410_v30 = vpop.f32.mrb[57].mxu0  ;;  %v2701_v28 = vadd.f32 %v4420_v9, %v2651_v27  ;;  %v2652_v31 = vadd.f32 %v2630_v20, %v4407_v6  ;;  %v3449_v1 = vpop.f32.mrb[56].mxu1 }
 0x1d8   : > { %v3411_v25 = vadd.f32 %v3410_v30, %v3409_v16  ;;  %v3412_v26 = vpop.f32.mrb[58].mxu0  ;;  %v3450_v39 = vpop.f32.mrb[57].mxu1 }
 0x1d9   : > { %v3413_v38 = vpop.f32.mrb[59].mxu0  ;;  %v2702_v62 = vadd.f32 %v4420_v9, %v2652_v31  ;;  %v2709_v40 = vmax.f32 %v2701_v28, 0.0  ;;  %v3451_v42 = vadd.f32 %v3450_v39, %v3449_v1  ;;  %v3452_v47 = vpop.f32.mrb[58].mxu1 }
 0x1da   : > { %v3414_v34 = vadd.f32 %v3413_v38, %v3412_v26  ;;  %v3453_v58 = vpop.f32.mrb[59].mxu1 }
 0x1db   : > { %v2710_v41 = vmax.f32 %v2702_v62, 0.0  ;;  %v2635_v46 = vadd.f32 %v3451_v42, %v3411_v25  ;;  %v3454_v56 = vadd.f32 %v3453_v58, %v3452_v47 }
 0x1dd   : > { %v3126_v50 = vpack.c.bf16 %v2710_v41, %v2709_v40  ;;  %v2653_v6 = vadd.f32 %v2635_v46, %v4410_v59  ;;  %v2638_v49 = vadd.f32 %v3454_v56, %v3414_v34 }
 0x1de   : > { %v3415_v48 = vpop.f32.mrb[60].mxu0 }
 0x1df   : > { %v3416_v51 = vpop.f32.mrb[61].mxu0  ;;  %3138 = vst [vmem:[%s4427_s22 + $0x8] sm:$0xff] %v3126_v50   ;;  %v2703_v44 = vadd.f32 %v4420_v9, %v2653_v6  ;;  %v2654_v60 = vadd.f32 %v2638_v49, %v4413_v13  ;;  %v3455_v61 = vpop.f32.mrb[60].mxu1 }
 0x1e0   : > { %v3417_v33 = vadd.f32 %v3416_v51, %v3415_v48  ;;  %v3418_v45 = vpop.f32.mrb[62].mxu0  ;;  %v3456_v29 = vpop.f32.mrb[61].mxu1 }
 0x1e1   : > { %v3419_v57 = vpop.f32.mrb[63].mxu0  ;;  %v2704_v63 = vadd.f32 %v4420_v9, %v2654_v60  ;;  %v3457_v2 = vadd.f32 %v3456_v29, %v3455_v61  ;;  %v3458_v3 = vpop.f32.mrb[62].mxu1  ;;  %v2711_v52 = vmax.f32 %v2703_v44, 0.0 }
 0x1e2   : > { %v3420_v0 = vadd.f32 %v3419_v57, %v3418_v45  ;;  %v3459_v4 = vpop.f32.mrb[63].mxu1 }
 0x1e3   : > { %v2712_v36 = vmax.f32 %v2704_v63, 0.0  ;;  %v2643_v59 = vadd.f32 %v3457_v2, %v3417_v33  ;;  %v3460_v54 = vadd.f32 %v3459_v4, %v3458_v3 }
 0x1e5   : > { %v3131_v11 = vpack.c.bf16 %v2712_v36, %v2711_v52  ;;  %v2655_v14 = vadd.f32 %v2643_v59, %v4416_v53  ;;  %v2646_v15 = vadd.f32 %v3460_v54, %v3420_v0 }
 0x1e7   : > { %3139 = vst [vmem:[%s4427_s22 + $0x10] sm:$0xff] %v3131_v11   ;;  %v2705_v13 = vadd.f32 %v4420_v9, %v2655_v14  ;;  %v2656_v17 = vadd.f32 %v2646_v15, %v4418_v55 }
 0x1e9   : > { %v2706_v10 = vadd.f32 %v4420_v9, %v2656_v17  ;;  %v2713_v18 = vmax.f32 %v2705_v13, 0.0 }
 0x1eb   : > { %v2714_v19 = vmax.f32 %v2706_v10, 0.0 }
 0x1ed   : > { %v3136_v53 = vpack.c.bf16 %v2714_v19, %v2713_v18 }
 0x1ef   : > { %3140 = vst [vmem:[%s4427_s22 + $0x18] sm:$0xff] %v3136_v53  }
 0x1f0   : > { %3780 = shalt.err (!%p3777_p2)
}
 0x1f1   : > { %s3781_s10 = scalar_lea.hbm %s4449_s9, 512  ;;  %s3785_s29 = scalar_lea.hbm %s4504_s3, 1024 }
 0x1f2   : > { %p3782_p0 = scmp.ne.s32.totalorder %s4449_s9, %s3781_s10  ;;  %p3786_p6 = scmp.lt.u32.totalorder %s4449_s9, %s4504_s3 }
 0x1f3   : > { %p3787_p7 = scmp.lt.u32.totalorder %s3785_s29, %s3781_s10  ;;  %p3789_p8 = scmp.lt.u32.totalorder %s3781_s10, %s4449_s9 }
 0x1f4   : > { %p3783_p4 = pnand %p3782_p0, %p4521_p12 }
 0x1f5   : > { %p3788_p11 = por %p3787_p7, %p3786_p6 }
 0x1f6   : > { %p3784_p13 = pneg %p3783_p4 }
 0x1f7   : > { %p3790_p1 = por %p3789_p8, %p3788_p11 }
 0x1f9   : > { %p3791_p10 = pnand %p3790_p1, %p3784_p13 }
 0x1fb   : > { %3794 = shalt.err (!%p3791_p10)
}
 0x1fc   : > { %s3863_s22 = smov 64   ;;  %s3864_s24 = smov 4  }
 0x1fd   : > { %3474 = dma.vmem_to_hbm [thread:$0]  (%p4521_p12), %s4451_s30, 512, %s4449_s9, %s2732_s28, %s3863_s22, %s3863_s22, %s3864_s24  }
 0x1fe PF: > { %s2761_s7 = sand.u32 1, %s3833_s12   ;;  %p4522_p3 = scmp.ne.s32.totalorder %s4512_s23, 0 }
 0x1ff   : > { %p4523_p5 = scmp.ge.s32.totalorder %s3853_s17, 2  ;;  %s2762_s26 = scalar_lea.sflag [#allocation5], %s2761_s7 }
 0x201   : > { %p3488_p9 = pnand %p4523_p5, %p4522_p3 }
 0x203   : > { %3828 = dma.done.wait (!%p3488_p9), %s2762_s26, 512  }
 0x204   : > { %3830 = vsyncadd (!%p3488_p9), %s2762_s26, 4294966784  ;;  %s20_s17 = sadd.s32 1, %s3853_s17   ;;  %s4524_s12 = smov %s3837_s13 }
 0x205   : > { %p17_p2 = scmp.ge.s32.totalorder %s20_s17, 4   ;;  %s4525_s13 = smov %s3841_s14 }
 0x206   : > { %s4526_s14 = smov %s4031_s4  ;;  %s4527_s15 = smov %s3849_s16 }
 0x207   : > { %s4528_s16 = smov %s4530_s18  ;;  %19 = sbr.rel (!%p17_p2) target bundleno = 7 (0x7), region = 99 }
 0x20e   :  { %2767 = vsyncpa [#allocation4], 1 }
 0x20f   :  { %2769 = vsyncpa [#allocation4 + $0x1], 1 }
 0x210   :  { %2770 = vsyncpa [#allocation7], 1 }
 0x211   :  { %2771 = vsyncpa [#allocation5], 1 }
 0x212   :  { %2773 = vsyncpa [#allocation5 + $0x1], 1 }

// kernel: corblock_s_forward.14
= control target key start
LH: loop header
LB: loop body
LE: loop exit
PB: predicated region body
PF: predicated region fallthrough
CT: control target
= control target key end

     0   :  { %8 = vsyncpa [#allocation4], 0  ;;  %s4055_s0 = inlined_call_operand.hbm [shape: bf16[2,10,10,128], index: 0, kind: input, shape index: {}]   ;;  %s4056_s1 = inlined_call_operand.hbm [shape: bf16[3,3,128,128], index: 1, kind: input, shape index: {}]   ;;  %s4057_s2 = inlined_call_operand.hbm [shape: f32[1,128], index: 2, kind: input, shape index: {}]   ;;  %s4058_s3 = inlined_call_operand.hbm [shape: bf16[2,8,8,128], index: 3, kind: output, shape index: {}]  }
   0x1   :  { %10 = vsyncpa [#allocation4 + $0x1], 0 }
   0x2   :  { %11 = vsyncpa [#allocation7], 0 }
   0x3   :  { %12 = vsyncpa [#allocation5], 0 }
   0x4   :  { %14 = vsyncpa [#allocation5 + $0x1], 0  ;;  %s3460_s12 = smov 0   ;;  %s3462_s13 = smov 0  }
   0x5   :  { %s3464_s14 = smov 0   ;;  %s3466_s15 = smov 0  }
   0x6   :  { %s3468_s16 = smov 0   ;;  %s3470_s17 = smov 0  }
   0x7 LB: > { %s2443_s18 = sadd.s32 4294967295, %s3430_s17   ;;  %s2444_s19 = sadd.s32 4294967294, %s3430_s17   ;;  %s3430_s17 = sphi %s3470_s17, %s20_s17   ;;  %s3426_s16 = sphi %s3468_s16, %s4084_s16   ;;  %s3422_s15 = sphi %s3466_s15, %s4083_s15   ;;  %s3418_s14 = sphi %s3464_s14, %s4082_s14   ;;  %s3414_s13 = sphi %s3462_s13, %s4081_s13   ;;  %s3410_s12 = sphi %s3460_s12, %s4080_s12  }
   0x8   : > { %p61_p0 = scmp.ne.s32.totalorder %s3414_s13, %s3410_s12  ;;  %p3494_p1 = scmp.eq.s32.totalorder %s2443_s18, 0 }
   0x9   : > { %p3498_p2 = scmp.eq.s32.totalorder %s2443_s18, 1  ;;  %p147_p3 = scmp.eq.s32.totalorder %s2444_s19, 1 }
   0xa   : > { %s4063_s20 = scalar_select %p3494_p1, 1, 0 }
   0xb   : > { %p3504_p4 = por %p3494_p1, %p61_p0  ;;  %p2445_p5 = scmp.ge.s32.totalorder %s3430_s17, 1 }
   0xc   : > { %p3509_p6 = por %p147_p3, %p61_p0  ;;  %p154_p7 = scmp.lt.s32.totalorder %s3430_s17, 3 }
   0xd   : > { %s4065_s22 = scalar_select %p3504_p4, 1, 0 }
   0xe   : > { %s4066_s23 = scalar_select %p3509_p6, 1, 0 }
   0xf   : > { %p3514_p8 = pnand %p2445_p5, %p154_p7  ;;  %s3432_s25 = smov [#allocation6]  }
  0x10   : > { %s170_s26 = sshll.u32 %s3432_s25, 4  ;;  %s3433_s28 = smov [#allocation8]   ;;  %s3518_s26 = int_to_ptr.vmem [resolvable:$true] %s170_s26 }
  0x11   : > { %p3099_p9 = pneg %p3514_p8  ;;  %s186_s29 = sshll.u32 %s3433_s28, 4  ;;  %s3529_s29 = int_to_ptr.vmem [resolvable:$true] %s186_s29 }
  0x12   : > { %s3258_s5 = scalar_lea.hbm %s4056_s1, 9216 }
  0x13   : > { %p3525_p11 = pnand %p3099_p9, %p3494_p1  ;;  %p3259_p12 = scmp.ne.s32.totalorder %s4056_s1, %s3258_s5 }
  0x14   : > { %p3265_p5 = scmp.lt.u32.totalorder %s3258_s5, %s4056_s1 }
  0x15   : > { %p3260_p13 = pneg %p3525_p11 }
  0x17   : > { %p3261_p0 = pnand %p3260_p13, %p3259_p12 }
  0x19   : > { %p3262_p3 = pneg %p3261_p0 }
  0x1b   : > { %p3267_p7 = pnand %p3265_p5, %p3262_p3 }
  0x1d   : > { %3270 = shalt.err (!%p3267_p7)
}
  0x1e   : > { %s3271_s10 = scalar_lea.vmem %s3518_s26, 9216  ;;  %p3279_p1 = scmp.lt.s32.totalorder %s3518_s26, %s3518_s26 }
  0x1f   : > { %p3272_p9 = scmp.ne.s32.totalorder %s3518_s26, %s3271_s10  ;;  %p3280_p12 = scmp.lt.s32.totalorder %s3271_s10, %s3271_s10 }
  0x21   : > { %p3274_p10 = pnand %p3272_p9, %p3260_p13  ;;  %p3281_p0 = por %p3280_p12, %p3279_p1 }
  0x23   : > { %p3275_p6 = pneg %p3274_p10 }
  0x25   : > { %p3282_p4 = pnand %p3281_p0, %p3275_p6 }
  0x27   : > { %3285 = shalt.err (!%p3282_p4)
}
  0x28   : > { %s3434_s11 = smov 64   ;;  %s3435_s18 = smov 4  }
  0x29   : > { %3102 = dma.hbm_to_vmem [thread:$0]  (!%p3525_p11), %s4056_s1, 9216, %s3518_s26, [#allocation7], %s3434_s11, %s3434_s11, %s3435_s18  }
  0x2a   : > { %s3286_s4 = scalar_lea.hbm %s4057_s2, 16 }
  0x2b   : > { %p3287_p1 = scmp.ne.s32.totalorder %s4057_s2, %s3286_s4  ;;  %p3293_p10 = scmp.lt.u32.totalorder %s3286_s4, %s4057_s2 }
  0x2d   : > { %p3289_p4 = pnand %p3287_p1, %p3260_p13 }
  0x2f   : > { %p3290_p6 = pneg %p3289_p4 }
  0x31   : > { %p3295_p3 = pnand %p3293_p10, %p3290_p6 }
  0x33   : > { %3298 = shalt.err (!%p3295_p3)
}
  0x34   : > { %s3299_s26 = scalar_lea.vmem %s3529_s29, 16  ;;  %s3306_s9 = scalar_lea.vmem %s3529_s29, 32 }
  0x35   : > { %p3300_p5 = scmp.ne.s32.totalorder %s3529_s29, %s3299_s26  ;;  %p3307_p12 = scmp.lt.s32.totalorder %s3529_s29, %s3529_s29 }
  0x36   : > { %p3308_p0 = scmp.lt.s32.totalorder %s3306_s9, %s3299_s26 }
  0x37   : > { %p3302_p7 = pnand %p3300_p5, %p3260_p13 }
  0x38   : > { %p3309_p1 = por %p3308_p0, %p3307_p12 }
  0x39   : > { %p3303_p9 = pneg %p3302_p7 }
  0x3b   : > { %p3310_p4 = pnand %p3309_p1, %p3303_p9 }
  0x3d   : > { %3313 = shalt.err (!%p3310_p4)
}
  0x3e   : > { %3105 = dma.hbm_to_vmem [thread:$0]  (!%p3525_p11), %s4057_s2, 16, %s3529_s29, [#allocation7]  }
  0x3f   : > { %s39_s25 = sadd.s32 1, %s3426_s16  ;;  %s48_s28 = sadd.s32 1, %s3418_s14 }
  0x40   : > { %p41_p13 = scmp.ge.s32.totalorder %s39_s25, 2  ;;  %p55_p6 = scmp.ne.s32.totalorder %s3418_s14, %s3414_s13 }
  0x41   : > { %p56_p10 = scmp.eq.s32.totalorder %s3430_s17, 0  ;;  %p3116_p3 = scmp.lt.s32.totalorder %s3430_s17, 2 }
  0x42   : > { %s4086_s25 = smov (%p41_p13, %s39_s25), 0  ;;  %p3597_p7 = por %p3498_p2, %p55_p6 }
  0x43   : > { %p57_p5 = por %p56_p10, %p55_p6  ;;  %s43_s30 = ssub.s32 %s3426_s16, %s4086_s25 }
  0x44   : > { %s4069_s27 = scalar_select %p3597_p7, 1, 0 }
  0x45   : > { %s197_s4 = sand.u32 1, %s3418_s14   ;;  %p46_p9 = scmp.eq.s32.totalorder %s43_s30, 0 }
  0x46   : > { %s3084_s29 = smul.u32 80, %s197_s4  ;;  %p3604_p11 = pnand %p3116_p3, %p57_p5 }
  0x47   : > { %s3609_s6 = scalar_select %p46_p9, %s3418_s14, %s48_s28  }
  0x48   : > { %s3085_s7 = smul.u32 1280, %s3426_s16  ;;  %s201_s8 = scalar_lea.vmem [#allocation3], %s3084_s29 }
  0x49   : > { %s209_s26 = sshll.u32 %s201_s8, 4  ;;  %s3619_s19 = scalar_lea.sflag [#allocation4], %s197_s4  ;;  %s3617_s26 = int_to_ptr.vmem [resolvable:$true] %s209_s26 }
  0x4a   : > { %s3615_s10 = scalar_lea.hbm %s4055_s0, %s3085_s7  ;;  %p3316_p12 = pneg %p3604_p11 }
  0x4b   : > { %s3314_s30 = scalar_lea.hbm %s3615_s10, 1280  ;;  %s3319_s7 = scalar_lea.hbm %s4055_s0, 2560 }
  0x4c   : > { %p3315_p2 = scmp.ne.s32.totalorder %s3615_s10, %s3314_s30  ;;  %p3320_p4 = scmp.lt.u32.totalorder %s3615_s10, %s4055_s0 }
  0x4d   : > { %p3321_p13 = scmp.lt.u32.totalorder %s3319_s7, %s3314_s30  ;;  %p3323_p10 = scmp.lt.u32.totalorder %s3314_s30, %s3615_s10 }
  0x4e   : > { %p3317_p0 = pnand %p3316_p12, %p3315_p2 }
  0x4f   : > { %p3322_p6 = por %p3321_p13, %p3320_p4 }
  0x50   : > { %p3318_p1 = pneg %p3317_p0 }
  0x51   : > { %p3324_p3 = por %p3323_p10, %p3322_p6 }
  0x53   : > { %p3325_p5 = pnand %p3324_p3, %p3318_p1 }
  0x55   : > { %3328 = shalt.err (!%p3325_p5)
}
  0x56   : > { %s3329_s4 = scalar_lea.vmem %s3617_s26, 1280  ;;  %s3436_s9 = smov [#allocation3]  }
  0x57   : > { %p3330_p9 = scmp.ne.s32.totalorder %s3617_s26, %s3329_s4  ;;  %s3334_s28 = sshll.u32 %s3436_s9, 4  ;;  %s3335_s28 = int_to_ptr.vmem [resolvable:$false] %s3334_s28 }
  0x58   : > { %s3336_s29 = scalar_lea.vmem %s3335_s28, 2560  ;;  %p3337_p7 = scmp.lt.s32.totalorder %s3617_s26, %s3335_s28 }
  0x59   : > { %p3332_p2 = pnand %p3330_p9, %p3316_p12  ;;  %p3338_p4 = scmp.lt.s32.totalorder %s3336_s29, %s3329_s4 }
  0x5b   : > { %p3333_p0 = pneg %p3332_p2  ;;  %p3339_p13 = por %p3338_p4, %p3337_p7 }
  0x5d   : > { %p3340_p6 = pnand %p3339_p13, %p3333_p0 }
  0x5f   : > { %3343 = shalt.err (!%p3340_p6)
}
  0x60   : > { %3109 = dma.hbm_to_vmem [thread:$0]  (!%p3604_p11), %s3615_s10, 1280, %s3617_s26, %s3619_s19, %s3434_s11, %s3434_s11, %s3435_s18  }
  0x61   : > { %221 = sbr.rel (%p3514_p8) target bundleno = 510 (0x1fe), region = 32  ;;  %s3653_s30 = sand.u32 (!%p3514_p8), 1, %s3414_s13  }
  0x62   : > { %s3086_s7 = smul.u32 (!%p3514_p8), 80, %s3653_s30  ;;  %s224_s8 = scalar_lea.sflag (!%p3514_p8), [#allocation4], %s3653_s30 }
  0x63   : > { %p4071_p7 = scmp.ne.s32.totalorder (!%p3514_p8), %s4065_s22, 0 }
  0x64   : > { %s3657_s21 = scalar_lea.vmem (!%p3514_p8), [#allocation3], %s3086_s7 }
  0x68   : > { %3397 = dma.done.wait (%p4071_p7), %s224_s8, 1280  }
  0x69   : > { %3399 = vsyncadd (%p4071_p7), %s224_s8, 4294966016  ;;  %p4072_p11 = scmp.ne.s32.totalorder %s4063_s20, 0 }
  0x6b   : > { %3401 = dma.done.wait (%p4072_p11), [#allocation7], 9232  }
  0x6c   : > { %3403 = vsyncadd (%p4072_p11), [#allocation7], 4294958064  ;;  %v3174_v0 = vld [vmem:[#allocation6 + $0x40] sm:$0xff]   ;;  %v3176_v2 = vld [vmem:[#allocation6 + $0x48] sm:$0xff]   ;;  %vm304_vm0 = vsmask.f32 3328 }
  0x6d   : > { %v3175_v1 = vld [vmem:[#allocation6 + $0x100] sm:$0xff]   ;;  %2788 = vmatprep.subr.bf16.mxu1 %v3174_v0  ;;  %v3177_v3 = vld [vmem:[#allocation6 + $0x108] sm:$0xff]   ;;  %v3178_v4 = vld [vmem:[#allocation6 + $0x50] sm:$0xff]   ;;  %vm305_vm1 = vsmask.f32 7440  ;;  %vm726_vm3 = vcmask 1042432  }
  0x6e   : > { %2884 = vmatprep.subr.bf16.mxu0 %v3175_v1  ;;  %2789 = vmatpush3.bf16.msra.mxu1 %v3174_v0  ;;  %v3179_v5 = vld [vmem:[#allocation6 + $0x110] sm:$0xff]   ;;  %v3180_v6 = vld [vmem:[#allocation6 + $0x58] sm:$0xff]   ;;  %v3182_v8 = vld [vmem:[#allocation6 + $0x60] sm:$0xff]   ;;  %vm727_vm4 = vcmask 1046532   ;;  %s2453_s20 = sshll.u32 %s3653_s30, 5  ;;  %s2656_s11 = sshll.u32 %s3422_s15, 9 }
  0x6f   : > { %2885 = vmatpush3.bf16.msra.mxu0 %v3175_v1  ;;  %2790 = vmatprep.subr.bf16.mxu1 %v3176_v2  ;;  %v3181_v7 = vld [vmem:[#allocation6 + $0x118] sm:$0xff]   ;;  %v3183_v9 = vld [vmem:[#allocation6 + $0x120] sm:$0xff]   ;;  %v3184_v10 = vld [vmem:[#allocation6 + $0x68] sm:$0xff]   ;;  %s257_s22 = scalar_lea.vmem [#allocation9], %s2453_s20  ;;  %s4006_s26 = scalar_lea.hbm %s4058_s3, %s2656_s11 }
  0x70   : > { %2886 = vmatprep.subr.bf16.mxu0 %v3177_v3  ;;  %v3185_v11 = vld [vmem:[#allocation6 + $0x128] sm:$0xff]   ;;  %v3668_v12 = vld [vmem:[%s3657_s21] sm:$0xf]  ;;  %v3674_v14 = vld [vmem:[%s3657_s21 + $0x4] sm:$0x1]  ;;  %s2330_s24 = sshll.u32 %s257_s22, 4  ;;  %s4001_s24 = int_to_ptr.vmem [resolvable:$true] %s2330_s24 }
  0x71   : > { %v3671_v13 = vld [vmem:[%s3657_s21 + $0x8] sm:$0xf]  ;;  %v3677_v15 = vld [vmem:[%s3657_s21 + $0xc] sm:$0x1]  ;;  %v308_v16 = vshrl.u32 %v3668_v12, 16  ;;  %v311_v17 = vshll.u32 %v3668_v12, 16  ;;  %vm3695_vm2 = vmor %vm304_vm0, %vm305_vm1 }
  0x72   : > { %2791 = vmatpush3.bf16.msra.mxu1 %v3176_v2  ;;  %v317_v18 = vshll.u32 %v3674_v14, 16  ;;  %v322_v19 = vshrl.u32 %v3671_v13, 16  ;;  %v325_v20 = vshll.u32 %v3671_v13, 16  ;;  %v331_v21 = vshll.u32 %v3677_v15, 16  ;;  %v3186_v22 = vld [vmem:[#allocation6 + $0x70] sm:$0xff]   ;;  %v3188_v44 = vld [vmem:[#allocation6 + $0x78] sm:$0xff]   ;;  %vm3821_vm5 = vmor %vm726_vm3, %vm727_vm4 }
  0x73   : > { %2887 = vmatpush3.bf16.msra.mxu0 %v3177_v3  ;;  %2792 = vmatprep.subr.bf16.mxu1 %v3178_v4  ;;  %v310_v23 = vrot.slane %v308_v16, 4  ;;  %v313_v24 = vrot.slane %v311_v17, 5  ;;  %v3187_v26 = vld [vmem:[#allocation6 + $0x130] sm:$0xff]   ;;  %v2518_v30 = vld [vmem:[%s3657_s21 + $0x8] sm:$0xf]  ;;  %v3190_v61 = vld [vmem:[#allocation6] sm:$0xff]  }
  0x74   : > { %2888 = vmatprep.subr.bf16.mxu0 %v3179_v5  ;;  %v324_v25 = vrot.slane %v322_v19, 4  ;;  %v319_v27 = vrot.slane %v317_v18, 5  ;;  %v327_v28 = vrot.slane %v325_v20, 5  ;;  %v333_v29 = vrot.slane %v331_v21, 5  ;;  %v3687_v32 = vld [vmem:[%s3657_s21 + $0xc] sm:$0x1] }
  0x75   : > { %v314_v31 = vor.u32 %v313_v24, %v310_v23  ;;  %v2520_v33 = vld [vmem:[%s3657_s21 + $0x10] sm:$0xf]  ;;  %v3691_v34 = vld [vmem:[%s3657_s21 + $0x14] sm:$0x1]  ;;  %v1103_v37 = vshrl.u32 %v2518_v30, 16  ;;  %v1106_v38 = vshll.u32 %v2518_v30, 16 }
  0x76   : > { %2793 = vmatpush3.bf16.msra.mxu1 %v3178_v4  ;;  %v328_v36 = vor.u32 %v327_v28, %v324_v25  ;;  %v1112_v39 = vshll.u32 %v3687_v32, 16  ;;  %v1117_v41 = vshrl.u32 %v2520_v33, 16  ;;  %v1120_v42 = vshll.u32 %v2520_v33, 16  ;;  %v3702_v48 = vld [vmem:[%s3657_s21 + $0x10] sm:$0xf]  ;;  %v3189_v49 = vld [vmem:[#allocation6 + $0x138] sm:$0xff]  }
  0x77   : > { %2889 = vmatpush3.bf16.msra.mxu0 %v3179_v5  ;;  %2794 = vmatprep.subr.bf16.mxu1 %v3180_v6  ;;  %v315_v40 = vrot.slane %v314_v31, 4  ;;  %v1126_v43 = vshll.u32 %v3691_v34, 16  ;;  %v1105_v46 = vrot.slane %v1103_v37, 4  ;;  %v1108_v47 = vrot.slane %v1106_v38, 5  ;;  %v3707_v53 = vld [vmem:[%s3657_s21 + $0x18] sm:$0xf] }
  0x78   : > { %2890 = vmatprep.subr.bf16.mxu0 %v3181_v7  ;;  %v329_v45 = vrot.slane %v328_v36, 4  ;;  %v1119_v51 = vrot.slane %v1117_v41, 4  ;;  %v1122_v52 = vrot.slane %v1120_v42, 5  ;;  %v1114_v56 = vrot.slane %v1112_v39, 5  ;;  %v3712_v58 = vld [vmem:[%s3657_s21 + $0x14] sm:$0x1] }
  0x79   : > { %v320_v50 = vsel %vm3695_vm2, %v315_v40, %v319_v27  ;;  %v1109_v55 = vor.u32 %v1108_v47, %v1105_v46  ;;  %v1128_v57 = vrot.slane %v1126_v43, 5  ;;  %v3715_v59 = vld [vmem:[%s3657_s21 + $0x1c] sm:$0x1]  ;;  %v3717_v63 = vld [vmem:[#allocation6 + $0x140] sm:$0xff]   ;;  %v336_v0 = vshrl.u32 %v3702_v48, 16  ;;  %s2316_s15 = scalar_lea.sflag [#allocation5], %s3653_s30 }
  0x7a   : > { %2795 = vmatpush3.bf16.msra.mxu1 %v3180_v6  ;;  %v334_v54 = vsel %vm3695_vm2, %v329_v45, %v333_v29  ;;  %v1123_v62 = vor.u32 %v1122_v52, %v1119_v51  ;;  %v339_v1 = vshll.u32 %v3702_v48, 16  ;;  %v2522_v2 = vld [vmem:[%s3657_s21 + $0x18] sm:$0xf]  ;;  %v345_v4 = vshll.u32 %v3712_v58, 16  ;;  %v2524_v16 = vld [vmem:[%s3657_s21 + $0x20] sm:$0xf] }
  0x7b   : > { %2891 = vmatpush3.bf16.msra.mxu0 %v3181_v7  ;;  %2796 = vmatprep.subr.bf16.mxu1 %v3182_v8  ;;  %v2454_v60 = vcombine.low %v320_v50, %v334_v54  ;;  %v1110_v3 = vrot.slane %v1109_v55, 4  ;;  %v350_v5 = vshrl.u32 %v3707_v53, 16  ;;  %v353_v6 = vshll.u32 %v3707_v53, 16  ;;  %v3726_v7 = vld [vmem:[%s3657_s21 + $0x1c] sm:$0x1]  ;;  %s3344_s10 = scalar_lea.vmem %s4001_s24, 512 }
  0x7c   : > { %2892 = vmatprep.subr.bf16.mxu0 %v3183_v9  ;;  %v3733_v20 = vld [vmem:[%s3657_s21 + $0x24] sm:$0x1]  ;;  %v347_v23 = vrot.slane %v345_v4, 5  ;;  %v1131_v27 = vshrl.u32 %v2522_v2, 16  ;;  %v1134_v29 = vshll.u32 %v2522_v2, 16  ;;  %v1140_v30 = vshll.u32 %v3726_v7, 16  ;;  %p3345_p8 = scmp.ne.s32.totalorder %s4001_s24, %s3344_s10 }
  0x7d   : > { %2804 = vmatprep.mubr.bf16.mxu1 %v2454_v60  ;;  %v1115_v17 = vsel %vm3695_vm2, %v1110_v3, %v1114_v56  ;;  %v352_v18 = vrot.slane %v350_v5, 4  ;;  %v355_v19 = vrot.slane %v353_v6, 5  ;;  %v1145_v31 = vshrl.u32 %v2524_v16, 16  ;;  %v3193_v55 = vld [vmem:[#allocation6 + $0x148] sm:$0xff]   ;;  %v3194_v56 = vld [vmem:[#allocation6 + $0x10] sm:$0xff]   ;;  %p4077_p12 = scmp.ne.s32.totalorder %s4069_s27, 0 }
  0x7e   : > { %2797 = vmatpush3.bf16.msra.mxu1 %v3182_v8  ;;  %v1124_v8 = vrot.slane %v1123_v62, 4  ;;  %v1133_v36 = vrot.slane %v1131_v27, 4  ;;  %v1148_v37 = vshll.u32 %v2524_v16, 16  ;;  %v1154_v38 = vshll.u32 %v3733_v20, 16  ;;  %v3760_v3 = vld [vmem:[%s3657_s21 + $0x2c] sm:$0x1] }
  0x7f   : > { %2893 = vmatpush3.bf16.msra.mxu0 %v3183_v9  ;;  %2798 = vmatprep.subr.bf16.mxu1 %v3184_v10  ;;  %v338_v9 = vrot.slane %v336_v0, 4  ;;  %v356_v25 = vor.u32 %v355_v19, %v352_v18  ;;  %v1136_v40 = vrot.slane %v1134_v29, 5  ;;  %v1147_v41 = vrot.slane %v1145_v31, 4  ;;  %v3751_v0 = vld [vmem:[%s3657_s21 + $0x20] sm:$0xf]  ;;  %v3196_v16 = vld [vmem:[#allocation6 + $0x18] sm:$0xff]   ;;  %p3346_p1 = pnand %p3345_p8, %p4077_p12 }
  0x80   : > { %2894 = vmatprep.subr.bf16.mxu0 %v3185_v11  ;;  %v1129_v21 = vsel %vm3695_vm2, %v1124_v8, %v1128_v57  ;;  %v1150_v43 = vrot.slane %v1148_v37, 5  ;;  %v1142_v47 = vrot.slane %v1140_v30, 5  ;;  %v1394_v57 = vrot.slane %v3687_v32, 5  ;;  %v2528_v27 = vld [vmem:[%s3657_s21 + $0x30] sm:$0xf]  ;;  %s3437_s19 = smov [#allocation9]  }
  0x81   : > { %v2534_v24 = vcombine.low %v1115_v17, %v1129_v21  ;;  %v357_v33 = vrot.slane %v356_v25, 4  ;;  %v1137_v46 = vor.u32 %v1136_v40, %v1133_v36  ;;  %v1398_v60 = vrot.slane %v3691_v34, 5  ;;  %v3198_v29 = vld [vmem:[#allocation6 + $0x20] sm:$0xff]   ;;  %v3197_v36 = vld [vmem:[#allocation6 + $0x158] sm:$0xff]   ;;  %p3347_p10 = pneg %p3346_p1  ;;  %s3348_s4 = sshll.u32 %s3437_s19, 4  ;;  %s3349_s4 = int_to_ptr.vmem [resolvable:$false] %s3348_s4 }
  0x82   : > { %2799 = vmatpush3.bf16.msra.mxu1 %v3184_v10  ;;  %v341_v10 = vrot.slane %v339_v1, 5  ;;  %v1151_v50 = vor.u32 %v1150_v43, %v1147_v41  ;;  %v3754_v1 = vld [vmem:[%s3657_s21 + $0x28] sm:$0xf]  ;;  %v364_v4 = vshrl.u32 %v3751_v0, 16  ;;  %v367_v5 = vshll.u32 %v3751_v0, 16  ;;  %s3350_s9 = scalar_lea.vmem %s3349_s4, 1024  ;;  %p3351_p3 = scmp.lt.s32.totalorder %s4001_s24, %s3349_s4 }
  0x83   : > { %2895 = vmatpush3.bf16.msra.mxu0 %v3185_v11  ;;  %2800 = vmatprep.subr.bf16.mxu1 %v3186_v22  ;;  %v359_v11 = vshll.u32 %v3715_v59, 16  ;;  %v1138_v51 = vrot.slane %v1137_v46, 4  ;;  %v378_v8 = vshrl.u32 %v3754_v1, 16  ;;  %v3200_v46 = vld [vmem:[#allocation6 + $0x28] sm:$0xff]   ;;  %v1406_v32 = vrot.slane %v3733_v20, 5  ;;  %p3352_p5 = scmp.lt.s32.totalorder %s3350_s9, %s3344_s10 }
  0x84   : > { %2896 = vmatprep.subr.bf16.mxu0 %v3187_v26  ;;  %2900 = vmatprep.mubr.bf16.mxu0 %v2534_v24  ;;  %v1152_v52 = vrot.slane %v1151_v50, 4  ;;  %v366_v17 = vrot.slane %v364_v4, 4  ;;  %v369_v18 = vrot.slane %v367_v5, 5  ;;  %v2526_v24 = vld [vmem:[%s3657_s21 + $0x28] sm:$0xf]  ;;  %v3199_v5 = vld [vmem:[#allocation6 + $0x160] sm:$0xff]  }
  0x85   : > { %v1143_v54 = vsel %vm3695_vm2, %v1138_v51, %v1142_v47  ;;  %v380_v21 = vrot.slane %v378_v8, 4  ;;  %v1159_v31 = vshrl.u32 %v2526_v24, 16  ;;  %p3353_p9 = por %p3352_p5, %p3351_p3 }
  0x86   : > { %2801 = vmatpush3.bf16.msra.mxu1 %v3186_v22  ;;  %v342_v22 = vor.u32 %v341_v10, %v338_v9  ;;  %v381_v9 = vshll.u32 %v3754_v1, 16  ;;  %v387_v10 = vshll.u32 %v3760_v3, 16  ;;  %v370_v25 = vor.u32 %v369_v18, %v366_v17  ;;  %v3801_v17 = vld [vmem:[%s3657_s21 + $0x3c] sm:$0x1] }
  0x87   : > { %2897 = vmatpush3.bf16.msra.mxu0 %v3187_v26  ;;  %2802 = vmatprep.subr.bf16.mxu1 %v3188_v44  ;;  %v361_v26 = vrot.slane %v359_v11, 5  ;;  %v3195_v11 = vld [vmem:[#allocation6 + $0x150] sm:$0xff]   ;;  %p3354_p2 = pnand %p3353_p9, %p3347_p10 }
  0x88   : > { %2898 = vmatprep.subr.bf16.mxu0 %v3189_v49  ;;  %v343_v28 = vrot.slane %v342_v22, 4  ;;  %v383_v22 = vrot.slane %v381_v9, 5  ;;  %v371_v37 = vrot.slane %v370_v25, 4 }
  0x89   : > { %v362_v42 = vsel %vm3695_vm2, %v357_v33, %v361_v26  ;;  %v3771_v26 = vld [vmem:[%s3657_s21 + $0x2c] sm:$0x1]  ;;  %v1162_v33 = vshll.u32 %v2526_v24, 16 }
  0x8a   : > { %2803 = vmatpush3.bf16.msra.mxu1 %v3188_v44  ;;  %v348_v39 = vsel %vm3695_vm2, %v343_v28, %v347_v23  ;;  %v3192_v44 = vld [vmem:[#allocation6 + $0x8] sm:$0xff]   ;;  %v389_v23 = vrot.slane %v387_v10, 5  ;;  %v3775_v28 = vld [vmem:[%s3657_s21 + $0x34] sm:$0x1]  ;;  %v384_v30 = vor.u32 %v383_v22, %v380_v21 }
  0x8b   : > { %2899 = vmatpush3.bf16.msra.mxu0 %v3189_v49  ;;  %2812 = vmatprep.subr.bf16.mxu1 %v3190_v61  ;;  %v2455_v45 = vcombine.low %v348_v39, %v362_v42  ;;  %v1156_v49 = vrot.slane %v1154_v38, 5  ;;  %v1173_v38 = vshrl.u32 %v2528_v27, 16  ;;  %v1176_v39 = vshll.u32 %v2528_v27, 16 }
  0x8c   : > { %2908 = vmatprep.subr.bf16.mxu0 %v3717_v63  ;;  %v1182_v40 = vshll.u32 %v3775_v28, 16  ;;  %v385_v41 = vrot.slane %v384_v30, 4  ;;  %v1161_v42 = vrot.slane %v1159_v31, 4  ;;  %v1164_v43 = vrot.slane %v1162_v33, 5  ;;  %v3807_v31 = vld [vmem:[%s3657_s21 + $0x44] sm:$0x1] }
  0x8d   : > { %2805 = vmatmul.mubr.bf16.vlgmr.msra.gmra.mrb[0].mxu1 %v2455_v45  ;;  %v1157_v62 = vsel %vm3695_vm2, %v1152_v52, %v1156_v49  ;;  %v3780_v45 = vld [vmem:[%s3657_s21 + $0x30] sm:$0xf]  ;;  %v1175_v49 = vrot.slane %v1173_v38, 4  ;;  %v1178_v50 = vrot.slane %v1176_v39, 5  ;;  %v3785_v52 = vld [vmem:[%s3657_s21 + $0x38] sm:$0xf] }
  0x8e   : > { %2813 = vmatpush3.bf16.msra.mxu1 %v3190_v61  ;;  %v2535_v2 = vcombine.low %v1143_v54, %v1157_v62  ;;  %v3757_v61 = vld [vmem:[%s3657_s21 + $0x24] sm:$0x1]  ;;  %v1184_v51 = vrot.slane %v1182_v40, 5  ;;  %v390_v54 = vsel %vm3695_vm2, %v385_v41, %v389_v23  ;;  %v3793_v62 = vld [vmem:[%s3657_s21 + $0x3c] sm:$0x1]  ;;  %v395_v4 = vshll.u32 %v3780_v45, 16 }
  0x8f   : > { %2814 = vmatprep.subr.bf16.mxu1 %v3192_v44  ;;  %v373_v6 = vshll.u32 %v3757_v61, 16  ;;  %v1179_v8 = vor.u32 %v1178_v50, %v1175_v49  ;;  %v406_v10 = vshrl.u32 %v3785_v52, 16  ;;  %v409_v22 = vshll.u32 %v3785_v52, 16  ;;  %v2532_v23 = vld [vmem:[%s3657_s21 + $0x40] sm:$0xf]  ;;  %v3201_v38 = vld [vmem:[#allocation6 + $0x168] sm:$0xff]  }
  0x90   : > { %2901 = vmatmul.mubr.bf16.vlgmr.msra.gmra.mrb[0].mxu0 %v2535_v2  ;;  %v392_v2 = vshrl.u32 %v3780_v45, 16  ;;  %v397_v21 = vrot.slane %v395_v4, 5  ;;  %v415_v30 = vshll.u32 %v3793_v62, 16  ;;  %v3202_v39 = vld [vmem:[#allocation6 + $0x30] sm:$0xff]  }
  0x91   : > { %2909 = vmatpush3.bf16.msra.mxu0 %v3717_v63  ;;  %v375_v19 = vrot.slane %v373_v6, 5  ;;  %v1168_v63 = vshll.u32 %v3771_v26, 16  ;;  %v1180_v24 = vrot.slane %v1179_v8, 4  ;;  %v408_v27 = vrot.slane %v406_v10, 4  ;;  %v2546_v8 = vld [vmem:[%s3657_s21 + $0x8] sm:$0xe] }
  0x92   : > { %2815 = vmatpush3.bf16.msra.mxu1 %v3192_v44  ;;  %2910 = vmatprep.subr.bf16.mxu0 %v3193_v55  ;;  %v417_v41 = vrot.slane %v415_v30, 5 }
  0x93   : > { %2816 = vmatprep.subr.bf16.mxu1 %v3194_v56  ;;  %v1170_v44 = vrot.slane %v1168_v63, 5  ;;  %v376_v47 = vsel %vm3695_vm2, %v371_v37, %v375_v19  ;;  %v394_v19 = vrot.slane %v392_v2, 4  ;;  %v411_v63 = vrot.slane %v409_v22, 5 }
  0x94   : > { %v2456_v6 = vcombine.low %v376_v47, %v390_v54  ;;  %v1185_v40 = vsel %vm3695_vm2, %v1180_v24, %v1184_v51  ;;  %v1204_v2 = vshll.u32 %v2532_v23, 16 }
  0x95   : > { %2911 = vmatpush3.bf16.msra.mxu0 %v3193_v55  ;;  %v1165_v55 = vor.u32 %v1164_v43, %v1161_v42  ;;  %v1196_v43 = vshll.u32 %v3801_v17, 16  ;;  %v412_v49 = vor.u32 %v411_v63, %v408_v27 }
  0x96   : > { %2817 = vmatpush3.bf16.msra.mxu1 %v3194_v56  ;;  %2912 = vmatprep.subr.bf16.mxu0 %v3195_v11  ;;  %v3790_v56 = vld [vmem:[%s3657_s21 + $0x34] sm:$0x1] }
  0x97   : > { %2818 = vmatprep.subr.bf16.mxu1 %v3196_v16  ;;  %v401_v9 = vshll.u32 %v3790_v56, 16  ;;  %v1166_v18 = vrot.slane %v1165_v55, 4  ;;  %2808 = vmatprep.mubr.bf16.mxu1 %v2456_v6  ;;  %v1198_v54 = vrot.slane %v1196_v43, 5  ;;  %v1201_v55 = vshrl.u32 %v2532_v23, 16  ;;  %v3205_v43 = vld [vmem:[#allocation6 + $0x178] sm:$0xff]  }
  0x98   : > { %v413_v4 = vrot.slane %v412_v49, 4  ;;  %v1210_v6 = vshll.u32 %v3807_v31, 16  ;;  %v2466_v23 = vcombine.low %v3668_v12, %v3671_v13  ;;  %v3208_v49 = vld [vmem:[#allocation6 + $0x180] sm:$0xff]  }
  0x99   : > { %2913 = vmatpush3.bf16.msra.mxu0 %v3195_v11  ;;  %v403_v25 = vrot.slane %v401_v9, 5  ;;  %v1171_v33 = vsel %vm3695_vm2, %v1166_v18, %v1170_v44  ;;  %v398_v11 = vor.u32 %v397_v21, %v394_v19  ;;  %v1203_v10 = vrot.slane %v1201_v55, 4  ;;  %v3204_v18 = vld [vmem:[#allocation6 + $0x38] sm:$0xff]   ;;  %v3203_v21 = vld [vmem:[#allocation6 + $0x170] sm:$0xff]  }
  0x9a   : > { %2819 = vmatpush3.bf16.msra.mxu1 %v3196_v16  ;;  %v2530_v16 = vld [vmem:[%s3657_s21 + $0x38] sm:$0xf]  ;;  %2914 = vmatprep.subr.bf16.mxu0 %v3197_v36  ;;  %v418_v22 = vsel %vm3695_vm2, %v413_v4, %v417_v41  ;;  %v2551_v55 = vld [vmem:[%s3657_s21 + $0x30] sm:$0xe] }
  0x9b   : > { %2820 = vmatprep.subr.bf16.mxu1 %v3198_v29  ;;  %v1187_v37 = vshrl.u32 %v2530_v16, 16  ;;  %v1190_v42 = vshll.u32 %v2530_v16, 16  ;;  %v399_v47 = vrot.slane %v398_v11, 4  ;;  %v1206_v16 = vrot.slane %v1204_v2, 5  ;;  %v2548_v11 = vld [vmem:[%s3657_s21 + $0x18] sm:$0xe] }
  0x9c   : > { %v2552_v4 = vld [vmem:[%s3657_s21 + $0x38] sm:$0xe] }
  0x9d   : > { %2915 = vmatpush3.bf16.msra.mxu0 %v3197_v36  ;;  %v1189_v44 = vrot.slane %v1187_v37, 4  ;;  %v1192_v50 = vrot.slane %v1190_v42, 5  ;;  %v404_v51 = vsel %vm3695_vm2, %v399_v47, %v403_v25  ;;  %v2547_v36 = vld [vmem:[%s3657_s21 + $0x10] sm:$0xe]  ;;  %v1207_v30 = vor.u32 %v1206_v16, %v1203_v10  ;;  %v2549_v37 = vld [vmem:[%s3657_s21 + $0x20] sm:$0xe] }
  0x9e   : > { %2821 = vmatpush3.bf16.msra.mxu1 %v3198_v29  ;;  %v2536_v29 = vcombine.low %v1171_v33, %v1185_v40  ;;  %2916 = vmatprep.subr.bf16.mxu0 %v3199_v5  ;;  %v2555_v24 = vrot.slane %v2547_v36, 9  ;;  %v2457_v25 = vcombine.low %v404_v51, %v418_v22  ;;  %v1212_v33 = vrot.slane %v1210_v6, 5  ;;  %v3207_v40 = vld [vmem:[#allocation6 + $0x80] sm:$0xff]   ;;  %v3210_v47 = vld [vmem:[#allocation6 + $0x88] sm:$0xff]   ;;  %v3214_v10 = vld [vmem:[#allocation6 + $0x98] sm:$0xff]  }
  0x9f   : > { %2822 = vmatprep.subr.bf16.mxu1 %v3200_v46  ;;  %v1193_v9 = vor.u32 %v1192_v50, %v1189_v44  ;;  %v1208_v13 = vrot.slane %v1207_v30, 4  ;;  %v2557_v41 = vrot.slane %v2549_v37, 9  ;;  %v731_v44 = vrot.slane %v3674_v14, 5  ;;  %v2550_v50 = vld [vmem:[%s3657_s21 + $0x28] sm:$0xe] }
  0xa0   : > { %2904 = vmatprep.mubr.bf16.mxu0 %v2536_v29  ;;  %v1399_v63 = vsel %vm3821_vm5, %v2555_v24, %v1398_v60  ;;  %2809 = vmatmul.mubr.bf16.gmra.mrb[4].mxu1 %v2457_v25  ;;  %v2556_v60 = vrot.slane %v2548_v11, 9  ;;  %v2467_v29 = vcombine.low %v3702_v48, %v3707_v53  ;;  %v1410_v48 = vrot.slane %v3771_v26, 5  ;;  %v2553_v36 = vld [vmem:[%s3657_s21 + $0x40] sm:$0xe]  ;;  %v3215_v25 = vld [vmem:[#allocation6 + $0x198] sm:$0xff]  }
  0xa1   : > { %2917 = vmatpush3.bf16.msra.mxu0 %v3199_v5  ;;  %v1194_v27 = vrot.slane %v1193_v9, 4  ;;  %2828 = vmatprep.mubr.bf16.mxu1 %v2466_v23  ;;  %v1213_v34 = vsel %vm3695_vm2, %v1208_v13, %v1212_v33  ;;  %v2558_v2 = vrot.slane %v2550_v50, 9  ;;  %v1418_v51 = vrot.slane %v3801_v17, 5  ;;  %v3213_v17 = vld [vmem:[#allocation6 + $0x190] sm:$0xff]   ;;  %v3228_v50 = vld [vmem:[#allocation6 + $0x1c0] sm:$0xff]  }
  0xa2   : > { %2823 = vmatpush3.bf16.msra.mxu1 %v3200_v46  ;;  %v2554_v46 = vrot.slane %v2546_v8, 9  ;;  %2918 = vmatprep.subr.bf16.mxu0 %v3201_v38  ;;  %v2559_v14 = vrot.slane %v2551_v55, 9  ;;  %v1422_v26 = vrot.slane %v3807_v31, 5  ;;  %v735_v6 = vrot.slane %v3677_v15, 5  ;;  %v3227_v37 = vld [vmem:[%s3657_s21 + $0x10] ss:$8 sps:$4 sm:$0xff]  }
  0xa3   : > { %2824 = vmatprep.subr.bf16.mxu1 %v3202_v39  ;;  %v1199_v12 = vsel %vm3695_vm2, %v1194_v27, %v1198_v54  ;;  %v1414_v54 = vrot.slane %v3775_v28, 5  ;;  %v1411_v8 = vsel %vm3821_vm5, %v2558_v2, %v1410_v48  ;;  %v2469_v28 = vcombine.low %v3780_v45, %v3785_v52  ;;  %v3216_v27 = vld [vmem:[#allocation6 + $0xa0] sm:$0xff]  }
  0xa4   : > { %v1395_v5 = vsel %vm3821_vm5, %v2554_v46, %v1394_v57  ;;  %v2537_v42 = vcombine.low %v1199_v12, %v1213_v34  ;;  %v2560_v9 = vrot.slane %v2552_v4, 9  ;;  %v2561_v31 = vrot.slane %v2553_v36, 9  ;;  %v702_v46 = vld [vmem:[%s3657_s21] sm:$0xe]  ;;  %v708_v48 = vld [vmem:[%s3657_s21 + $0x30] sm:$0xe] }
  0xa5   : > { %2919 = vmatpush3.bf16.msra.mxu0 %v3201_v38  ;;  %v2562_v57 = vcombine.low %v1395_v5, %v1399_v63  ;;  %v1407_v38 = vsel %vm3821_vm5, %v2557_v41, %v1406_v32  ;;  %v1415_v16 = vsel %vm3821_vm5, %v2559_v14, %v1414_v54  ;;  %v2478_v52 = vrot.slane %v702_v46, 9  ;;  %v704_v63 = vld [vmem:[%s3657_s21 + $0x10] sm:$0xe]  ;;  %v3902_v4 = vld [vmem:[%s3657_s21 + $0x14] sm:$0x1] }
  0xa6   : > { %2825 = vmatpush3.bf16.msra.mxu1 %v3202_v39  ;;  %v1402_v39 = vrot.slane %v3726_v7, 5  ;;  %2920 = vmatprep.subr.bf16.mxu0 %v3203_v21  ;;  %v2468_v7 = vcombine.low %v3751_v0, %v3754_v1  ;;  %v3211_v0 = vld [vmem:[#allocation6 + $0x188] sm:$0xff]   ;;  %v3212_v1 = vld [vmem:[#allocation6 + $0x90] sm:$0xff]   ;;  %v2564_v15 = vcombine.low %v1411_v8, %v1415_v16  ;;  %v1423_v45 = vsel %vm3821_vm5, %v2561_v31, %v1422_v26  ;;  %v3217_v34 = vld [vmem:[#allocation6 + $0x1a0] sm:$0xff]  }
  0xa7   : > { %2826 = vmatprep.subr.bf16.mxu1 %v3204_v18  ;;  %2905 = vmatmul.mubr.bf16.gmra.mrb[4].mxu0 %v2537_v42  ;;  %v739_v23 = vrot.slane %v3712_v58, 5  ;;  %v743_v24 = vrot.slane %v3715_v59, 5  ;;  %v732_v33 = vsel %vm3821_vm5, %v2478_v52, %v731_v44  ;;  %v705_v58 = vld [vmem:[%s3657_s21 + $0x18] sm:$0xe]  ;;  %v2480_v12 = vrot.slane %v704_v63, 9  ;;  %v3226_v44 = vld [vmem:[#allocation6 + $0xc0] sm:$0xff]  }
  0xa8   : > { %2924 = vmatprep.mubr.bf16.mxu0 %v2562_v57  ;;  %v1403_v20 = vsel %vm3821_vm5, %v2556_v60, %v1402_v39  ;;  %v2481_v13 = vrot.slane %v705_v58, 9  ;;  %v3218_v39 = vld [vmem:[#allocation6 + $0xa8] sm:$0xff]   ;;  %v3221_v57 = vld [vmem:[#allocation6 + $0xb0] sm:$0xff]   ;;  %v747_v41 = vrot.slane %v3757_v61, 5  ;;  %v3224_v42 = vld [vmem:[#allocation6 + $0xb8] sm:$0xff]   ;;  %v2484_v55 = vrot.slane %v708_v48, 9 }
  0xa9   : > { %2921 = vmatpush3.bf16.msra.mxu0 %v3203_v21  ;;  %v2563_v53 = vcombine.low %v1403_v20, %v1407_v38  ;;  %v703_v21 = vld [vmem:[%s3657_s21 + $0x8] sm:$0xe]  ;;  %v740_v59 = vsel %vm3821_vm5, %v2480_v12, %v739_v23  ;;  %v3222_v20 = vld [vmem:[#allocation6 + $0x1b0] sm:$0xff]   ;;  %v2596_v26 = vld [vmem:[%s3657_s21 + $0x18] sm:$0xf] }
  0xaa   : > { %2827 = vmatpush3.bf16.msra.mxu1 %v3204_v18  ;;  %2922 = vmatprep.subr.bf16.mxu0 %v3205_v43  ;;  %v1419_v18 = vsel %vm3821_vm5, %v2560_v9, %v1418_v51  ;;  %v2479_v22 = vrot.slane %v703_v21, 9  ;;  %v3219_v60 = vld [vmem:[#allocation6 + $0x1a8] sm:$0xff]   ;;  %v2594_v14 = vld [vmem:[%s3657_s21 + $0x10] sm:$0xf] }
  0xab   : > { %2836 = vmatprep.subr.bf16.mxu1 %v3207_v40  ;;  %v2565_v30 = vcombine.low %v1419_v18, %v1423_v45  ;;  %v3230_v51 = vld [vmem:[#allocation6 + $0xc8] sm:$0xff]   ;;  %v1769_v8 = vshll.u32 %v2594_v14, 16  ;;  %v3232_v31 = vld [vmem:[#allocation6 + $0xd0] sm:$0xff]  }
  0xac   : > { %v736_v11 = vsel %vm3821_vm5, %v2479_v22, %v735_v6  ;;  %v3906_v6 = vld [vmem:[%s3657_s21 + $0x1c] sm:$0x1]  ;;  %v3229_v36 = vld [vmem:[%s3657_s21 + $0x20] ss:$8 sps:$4 sm:$0xff]   ;;  %v3240_v45 = vld [vmem:[%s3657_s21 + $0x30] ss:$8 sps:$4 sm:$0xff]  }
  0xad   : > { %2829 = vmatmul.mubr.bf16.vlgmr.msra.gmra.mrb[0].mxu1 %v2467_v29  ;;  %2923 = vmatpush3.bf16.msra.mxu0 %v3205_v43  ;;  %v2486_v5 = vcombine.low %v732_v33, %v736_v11  ;;  %v751_v43 = vrot.slane %v3760_v3, 5  ;;  %v706_v29 = vld [vmem:[%s3657_s21 + $0x20] sm:$0xe]  ;;  %v1789_v16 = vshll.u32 %v3906_v6, 16  ;;  %v1771_v18 = vrot.slane %v1769_v8, 5  ;;  %v3231_v21 = vld [vmem:[#allocation6 + $0x1c8] sm:$0xff]  }
  0xae   : > { %2837 = vmatpush3.bf16.msra.mxu1 %v3207_v40  ;;  %2832 = vmatprep.mubr.bf16.mxu1 %v2468_v7  ;;  %v744_v40 = vsel %vm3821_vm5, %v2481_v13, %v743_v24  ;;  %v707_v7 = vld [vmem:[%s3657_s21 + $0x28] sm:$0xe]  ;;  %v2482_v38 = vrot.slane %v706_v29, 9  ;;  %v3233_v63 = vld [vmem:[#allocation6 + $0x1d0] sm:$0xff]   ;;  %v3930_v48 = vld [vmem:[%s3657_s21 + $0x2c] sm:$0x1] }
  0xaf   : > { %2838 = vmatprep.subr.bf16.mxu1 %v3210_v47  ;;  %2932 = vmatprep.subr.bf16.mxu0 %v3208_v49  ;;  %v2487_v32 = vcombine.low %v740_v59, %v744_v40  ;;  %v3234_v33 = vld [vmem:[#allocation6 + $0xd8] sm:$0xff]   ;;  %v2602_v40 = vld [vmem:[%s3657_s21 + $0x30] sm:$0xf] }
  0xb0   : > { %2925 = vmatmul.mubr.bf16.vlgmr.msra.gmra.mrb[0].mxu0 %v2563_v53  ;;  %v748_v61 = vsel %vm3821_vm5, %v2482_v38, %v747_v41  ;;  %v709_v53 = vld [vmem:[%s3657_s21 + $0x38] sm:$0xe]  ;;  %v3242_v13 = vld [vmem:[%s3657_s21 + $0x40] ss:$8 sps:$4 sm:$0xff]   ;;  %v1822_v29 = vshrl.u32 %v2602_v40, 16 }
  0xb1   : > { %2933 = vmatpush3.bf16.msra.mxu0 %v3208_v49  ;;  %2928 = vmatprep.mubr.bf16.mxu0 %v2564_v15  ;;  %v3225_v49 = vld [vmem:[#allocation6 + $0x1b8] sm:$0xff]   ;;  %v2485_v2 = vrot.slane %v709_v53, 9 }
  0xb2   : > { %2839 = vmatpush3.bf16.msra.mxu1 %v3210_v47  ;;  %2934 = vmatprep.subr.bf16.mxu0 %v3211_v0  ;;  %v2483_v47 = vrot.slane %v707_v7, 9  ;;  %v1825_v7 = vshll.u32 %v2602_v40, 16  ;;  %v3245_v40 = vld [vmem:[#allocation6 + $0x1f8] sm:$0xff]  }
  0xb3   : > { %2840 = vmatprep.subr.bf16.mxu1 %v3212_v1 }
  0xb4   : > { %v752_v3 = vsel %vm3821_vm5, %v2483_v47, %v751_v43 }
  0xb5   : > { %2833 = vmatmul.mubr.bf16.gmra.mrb[4].mxu1 %v2469_v28  ;;  %2935 = vmatpush3.bf16.msra.mxu0 %v3211_v0  ;;  %v755_v0 = vrot.slane %v3790_v56, 5  ;;  %v2488_v54 = vcombine.low %v748_v61, %v752_v3  ;;  %v1766_v56 = vshrl.u32 %v2594_v14, 16  ;;  %v1780_v28 = vshrl.u32 %v2596_v26, 16 }
  0xb6   : > { %2841 = vmatpush3.bf16.msra.mxu1 %v3212_v1  ;;  %2936 = vmatprep.subr.bf16.mxu0 %v3213_v17  ;;  %v759_v1 = vrot.slane %v3793_v62, 5  ;;  %v1775_v62 = vshll.u32 %v3902_v4, 16 }
  0xb7   : > { %2842 = vmatprep.subr.bf16.mxu1 %v3214_v10  ;;  %2852 = vmatprep.mubr.bf16.mxu1 %v2486_v5  ;;  %v756_v9 = vsel %vm3821_vm5, %v2484_v55, %v755_v0  ;;  %v1768_v15 = vrot.slane %v1766_v56, 4  ;;  %v1782_v46 = vrot.slane %v1780_v28, 4  ;;  %v2598_v5 = vld [vmem:[%s3657_s21 + $0x20] sm:$0xf]  ;;  %v1824_v55 = vrot.slane %v1822_v29, 4 }
  0xb8   : > { %2929 = vmatmul.mubr.bf16.gmra.mrb[4].mxu0 %v2565_v30  ;;  %v1777_v24 = vrot.slane %v1775_v62, 5  ;;  %v1791_v30 = vrot.slane %v1789_v16, 5  ;;  %v1797_v41 = vshll.u32 %v2598_v5, 16  ;;  %v2606_v56 = vld [vmem:[%s3657_s21 + $0x40] sm:$0xf]  ;;  %v1817_v62 = vshll.u32 %v3930_v48, 16 }
  0xb9   : > { %2937 = vmatpush3.bf16.msra.mxu0 %v3213_v17  ;;  %2948 = vmatprep.mubr.bf16.mxu0 %v3227_v37  ;;  %v760_v17 = vsel %vm3821_vm5, %v2485_v2, %v759_v1  ;;  %v1772_v23 = vor.u32 %v1771_v18, %v1768_v15  ;;  %v2600_v37 = vld [vmem:[%s3657_s21 + $0x28] sm:$0xf]  ;;  %v3933_v1 = vld [vmem:[%s3657_s21 + $0x34] sm:$0x1]  ;;  %v1827_v2 = vrot.slane %v1825_v7, 5  ;;  %v1853_v15 = vshll.u32 %v2606_v56, 16 }
  0xba   : > { %2843 = vmatpush3.bf16.msra.mxu1 %v3214_v10  ;;  %2938 = vmatprep.subr.bf16.mxu0 %v3215_v25  ;;  %v1783_v10 = vshll.u32 %v2596_v26, 16  ;;  %v2489_v22 = vcombine.low %v756_v9, %v760_v17  ;;  %v1811_v43 = vshll.u32 %v2600_v37, 16  ;;  %v1799_v3 = vrot.slane %v1797_v41, 5  ;;  %v2608_v28 = vld [vmem:[%s3657_s21 + $0x48] sm:$0xf]  ;;  %v3243_v18 = vld [vmem:[#allocation6 + $0x1f0] sm:$0xff]  }
  0xbb   : > { %2844 = vmatprep.subr.bf16.mxu1 %v3216_v27  ;;  %v1773_v11 = vrot.slane %v1772_v23, 4  ;;  %v1831_v17 = vshll.u32 %v3933_v1, 16  ;;  %v1828_v16 = vor.u32 %v1827_v2, %v1824_v55 }
  0xbc   : > { %v1785_v52 = vrot.slane %v1783_v10, 5  ;;  %v1813_v0 = vrot.slane %v1811_v43, 5  ;;  %v3250_v43 = vld [vmem:[%s3657_s21 + $0x28] ss:$8 sps:$4 sm:$0xff]  }
  0xbd   : > { %2939 = vmatpush3.bf16.msra.mxu0 %v3215_v25  ;;  %v3246_v25 = vld [vmem:[%s3657_s21 + $0x8] ss:$8 sps:$4 sm:$0xff]   ;;  %v1778_v12 = vsel %vm3695_vm2, %v1773_v11, %v1777_v24  ;;  %v3945_v11 = vld [vmem:[%s3657_s21 + $0x44] sm:$0x1] }
  0xbe   : > { %2845 = vmatpush3.bf16.msra.mxu1 %v3216_v27  ;;  %2940 = vmatprep.subr.bf16.mxu0 %v3217_v34  ;;  %v1786_v27 = vor.u32 %v1785_v52, %v1782_v46  ;;  %v3244_v52 = vld [vmem:[#allocation6 + $0xf8] sm:$0xff]   ;;  %v1859_v41 = vshll.u32 %v3945_v11, 16 }
  0xbf   : > { %2846 = vmatprep.subr.bf16.mxu1 %v3218_v39 }
  0xc0   : > { %v1787_v58 = vrot.slane %v1786_v27, 4  ;;  %v1829_v27 = vrot.slane %v1828_v16, 4  ;;  %v1861_v55 = vrot.slane %v1859_v41, 5 }
  0xc1   : > { %2941 = vmatpush3.bf16.msra.mxu0 %v3217_v34  ;;  %v2604_v34 = vld [vmem:[%s3657_s21 + $0x38] sm:$0xf] }
  0xc2   : > { %2847 = vmatpush3.bf16.msra.mxu1 %v3218_v39  ;;  %2942 = vmatprep.subr.bf16.mxu0 %v3219_v60  ;;  %v1792_v59 = vsel %vm3695_vm2, %v1787_v58, %v1791_v30  ;;  %v3236_v39 = vld [vmem:[#allocation6 + $0xe0] sm:$0xff]   ;;  %v1836_v38 = vshrl.u32 %v2604_v34, 16  ;;  %v1839_v47 = vshll.u32 %v2604_v34, 16  ;;  %v1833_v30 = vrot.slane %v1831_v17, 5  ;;  %v3948_v58 = vld [vmem:[%s3657_s21 + $0x4c] sm:$0x1] }
  0xc3   : > { %2848 = vmatprep.subr.bf16.mxu1 %v3221_v57  ;;  %v3247_v34 = vld [vmem:[%s3657_s21 + $0x18] ss:$8 sps:$4 sm:$0xff]   ;;  %v2061_v17 = vrot.slane %v3906_v6, 5 }
  0xc4   : > { %v1838_v14 = vrot.slane %v1836_v38, 4  ;;  %v1841_v26 = vrot.slane %v1839_v47, 5  ;;  %v1834_v29 = vsel %vm3695_vm2, %v1829_v27, %v1833_v30  ;;  %v3249_v47 = vld [vmem:[#allocation6 + $0x208] sm:$0xff]   ;;  %v3257_v30 = vld [vmem:[#allocation6 + $0x238] sm:$0xff]  }
  0xc5   : > { %2943 = vmatpush3.bf16.msra.mxu0 %v3219_v60  ;;  %v2610_v60 = vcombine.low %v1778_v12, %v1792_v59  ;;  %v3248_v59 = vld [vmem:[#allocation6 + $0x200] sm:$0xff]  }
  0xc6   : > { %2849 = vmatpush3.bf16.msra.mxu1 %v3221_v57  ;;  %2944 = vmatprep.subr.bf16.mxu0 %v3222_v20  ;;  %v3235_v57 = vld [vmem:[#allocation6 + $0x1d8] sm:$0xff]   ;;  %v1842_v46 = vor.u32 %v1841_v26, %v1838_v14 }
  0xc7   : > { %2850 = vmatprep.subr.bf16.mxu1 %v3224_v42  ;;  %v2623_v14 = vld [vmem:[%s3657_s21 + $0x18] sm:$0xe] }
  0xc9   : > { %2945 = vmatpush3.bf16.msra.mxu0 %v3222_v20  ;;  %v3237_v20 = vld [vmem:[#allocation6 + $0x1e0] sm:$0xff]  }
  0xca   : > { %2851 = vmatpush3.bf16.msra.mxu1 %v3224_v42  ;;  %2946 = vmatprep.subr.bf16.mxu0 %v3225_v49  ;;  %v1808_v42 = vshrl.u32 %v2600_v37, 16  ;;  %v1855_v37 = vrot.slane %v1853_v15, 5  ;;  %v3253_v15 = vld [vmem:[#allocation6 + $0x218] sm:$0xff]  }
  0xcb   : > { %2860 = vmatprep.subr.bf16.mxu1 %v3226_v44 }
  0xcc   : > { %v1810_v53 = vrot.slane %v1808_v42, 4  ;;  %v1873_v42 = vshll.u32 %v3948_v58, 16 }
  0xcd   : > { %2853 = vmatmul.mubr.bf16.vlgmr.msra.gmra.mrb[0].mxu1 %v2487_v32  ;;  %2947 = vmatpush3.bf16.msra.mxu0 %v3225_v49  ;;  %v1794_v32 = vshrl.u32 %v2598_v5, 16  ;;  %v3238_v49 = vld [vmem:[#allocation6 + $0xe8] sm:$0xff]  }
  0xce   : > { %2861 = vmatpush3.bf16.msra.mxu1 %v3226_v44  ;;  %2856 = vmatprep.mubr.bf16.mxu1 %v2488_v54  ;;  %v3927_v44 = vld [vmem:[%s3657_s21 + $0x24] sm:$0x1]  ;;  %v3936_v54 = vld [vmem:[%s3657_s21 + $0x3c] sm:$0x1]  ;;  %v1814_v9 = vor.u32 %v1813_v0, %v1810_v53  ;;  %v1875_v2 = vrot.slane %v1873_v42, 5 }
  0xcf   : > { %2862 = vmatprep.subr.bf16.mxu1 %v3230_v51  ;;  %2956 = vmatprep.subr.bf16.mxu0 %v3228_v50  ;;  %v1796_v61 = vrot.slane %v1794_v32, 4  ;;  %v1803_v8 = vshll.u32 %v3927_v44, 16  ;;  %v1845_v10 = vshll.u32 %v3936_v54, 16  ;;  %v2627_v32 = vld [vmem:[%s3657_s21 + $0x38] sm:$0xe]  ;;  %v2077_v53 = vrot.slane %v3936_v54, 5 }
  0xd0   : > { %2949 = vmatmul.mubr.bf16.vlgmr.msra.gmra.mrb[0].mxu0 %v3229_v36  ;;  %v1815_v24 = vrot.slane %v1814_v9, 4  ;;  %v2631_v9 = vrot.slane %v2623_v14, 9 }
  0xd1   : > { %2957 = vmatpush3.bf16.msra.mxu0 %v3228_v50  ;;  %2952 = vmatprep.mubr.bf16.mxu0 %v3240_v45  ;;  %v3241_v50 = vld [vmem:[#allocation6 + $0xf0] sm:$0xff]   ;;  %v1800_v36 = vor.u32 %v1799_v3, %v1796_v61  ;;  %v1867_v45 = vshll.u32 %v2608_v28, 16  ;;  %v1805_v23 = vrot.slane %v1803_v8, 5  ;;  %v2073_v61 = vrot.slane %v3933_v1, 5 }
  0xd2   : > { %2863 = vmatpush3.bf16.msra.mxu1 %v3230_v51  ;;  %2958 = vmatprep.subr.bf16.mxu0 %v3231_v21  ;;  %v3239_v51 = vld [vmem:[#allocation6 + $0x1e8] sm:$0xff]   ;;  %v2635_v3 = vrot.slane %v2627_v32, 9  ;;  %v3252_v8 = vld [vmem:[#allocation6 + $0x210] sm:$0xff]   ;;  %v2062_v6 = vsel %vm3821_vm5, %v2631_v9, %v2061_v17 }
  0xd3   : > { %2864 = vmatprep.subr.bf16.mxu1 %v3232_v31 }
  0xd4   : > { %v2078_v54 = vsel %vm3821_vm5, %v2635_v3, %v2077_v53  ;;  %v2650_v3 = vld [vmem:[#allocation8] ss:$0 sm:$0xff] }
  0xd5   : > { %2857 = vmatmul.mubr.bf16.gmra.mrb[4].mxu1 %v2489_v22  ;;  %2959 = vmatpush3.bf16.msra.mxu0 %v3231_v21  ;;  %v1864_v21 = vshrl.u32 %v2608_v28, 16  ;;  %v1801_v22 = vrot.slane %v1800_v36, 4  ;;  %v2057_v36 = vrot.slane %v3902_v4, 5 }
  0xd6   : > { %2865 = vmatpush3.bf16.msra.mxu1 %v3232_v31  ;;  %2876 = vmatprep.mubr.bf16.mxu1 %v3246_v25  ;;  %v1850_v31 = vshrl.u32 %v2606_v56, 16  ;;  %v1819_v25 = vrot.slane %v1817_v62, 5  ;;  %v3251_v62 = vld [vmem:[%s3657_s21 + $0x38] ss:$8 sps:$4 sm:$0xff]  }
  0xd7   : > { %2866 = vmatprep.subr.bf16.mxu1 %v3234_v33  ;;  %2960 = vmatprep.subr.bf16.mxu0 %v3233_v63  ;;  %v1866_v12 = vrot.slane %v1864_v21, 4  ;;  %v3255_v21 = vld [vmem:[#allocation6 + $0x228] sm:$0xff]  }
  0xd8   : > { %2953 = vmatmul.mubr.bf16.gmra.mrb[4].mxu0 %v3242_v13  ;;  %v1852_v5 = vrot.slane %v1850_v31, 4  ;;  %v1869_v13 = vrot.slane %v1867_v45, 5  ;;  %v3256_v45 = vld [vmem:[#allocation6 + $0x230] sm:$0xff]  }
  0xd9   : > { %2961 = vmatpush3.bf16.msra.mxu0 %v3233_v63  ;;  %2972 = vmatprep.mubr.bf16.mxu0 %v2610_v60  ;;  %v1843_v63 = vrot.slane %v1842_v46, 4  ;;  %v1820_v60 = vsel %vm3695_vm2, %v1815_v24, %v1819_v25  ;;  %v3254_v46 = vld [vmem:[#allocation6 + $0x220] sm:$0xff]   ;;  %v2085_v24 = vrot.slane %v3948_v58, 5  ;;  %v2065_v58 = vrot.slane %v3927_v44, 5 }
  0xda   : > { %2867 = vmatpush3.bf16.msra.mxu1 %v3234_v33  ;;  %2962 = vmatprep.subr.bf16.mxu0 %v3235_v57  ;;  %v1847_v33 = vrot.slane %v1845_v10, 5  ;;  %v1870_v38 = vor.u32 %v1869_v13, %v1866_v12  ;;  %v2069_v13 = vrot.slane %v3930_v48, 5 }
  0xdb   : > { %2868 = vmatprep.subr.bf16.mxu1 %v3236_v39 }
  0xdc   : > { %v1848_v7 = vsel %vm3695_vm2, %v1843_v63, %v1847_v33  ;;  %v1871_v56 = vrot.slane %v1870_v38, 4  ;;  %v2624_v33 = vld [vmem:[%s3657_s21 + $0x20] sm:$0xe] }
  0xdd   : > { %2963 = vmatpush3.bf16.msra.mxu0 %v3235_v57  ;;  %v1806_v57 = vsel %vm3695_vm2, %v1801_v22, %v1805_v23  ;;  %v2629_v22 = vld [vmem:[%s3657_s21 + $0x48] sm:$0xe]  ;;  %v2081_v23 = vrot.slane %v3945_v11, 5  ;;  %v2632_v11 = vrot.slane %v2624_v33, 9 }
  0xde   : > { %2869 = vmatpush3.bf16.msra.mxu1 %v3236_v39  ;;  %2964 = vmatprep.subr.bf16.mxu0 %v3237_v20  ;;  %v2626_v39 = vld [vmem:[%s3657_s21 + $0x30] sm:$0xe]  ;;  %v2611_v0 = vcombine.low %v1806_v57, %v1820_v60  ;;  %v1876_v31 = vsel %vm3695_vm2, %v1871_v56, %v1875_v2  ;;  %v2637_v27 = vrot.slane %v2629_v22, 9 }
  0xdf   : > { %2870 = vmatprep.subr.bf16.mxu1 %v3238_v49 }
  0xe1   : > { %2965 = vmatpush3.bf16.msra.mxu0 %v3237_v20  ;;  %v1856_v20 = vor.u32 %v1855_v37, %v1852_v5  ;;  %v2625_v5 = vld [vmem:[%s3657_s21 + $0x28] sm:$0xe]  ;;  %v2086_v37 = vsel %vm3821_vm5, %v2637_v27, %v2085_v24 }
  0xe2   : > { %2871 = vmatpush3.bf16.msra.mxu1 %v3238_v49  ;;  %2966 = vmatprep.subr.bf16.mxu0 %v3239_v51  ;;  %v2634_v49 = vrot.slane %v2626_v39, 9  ;;  %v2633_v12 = vrot.slane %v2625_v5, 9 }
  0xe3   : > { %2872 = vmatprep.subr.bf16.mxu1 %v3241_v50  ;;  %v1857_v26 = vrot.slane %v1856_v20, 4 }
  0xe4   : > { %v2074_v1 = vsel %vm3821_vm5, %v2634_v49, %v2073_v61  ;;  %v2070_v39 = vsel %vm3821_vm5, %v2633_v12, %v2069_v13 }
  0xe5   : > { %2967 = vmatpush3.bf16.msra.mxu0 %v3239_v51  ;;  %v2622_v51 = vld [vmem:[%s3657_s21 + $0x10] sm:$0xe]  ;;  %v2640_v10 = vcombine.low %v2074_v1, %v2078_v54  ;;  %v1862_v16 = vsel %vm3695_vm2, %v1857_v26, %v1861_v55 }
  0xe6   : > { %2873 = vmatpush3.bf16.msra.mxu1 %v3241_v50  ;;  %2968 = vmatprep.subr.bf16.mxu0 %v3243_v18  ;;  %v2612_v50 = vcombine.low %v1834_v29, %v1848_v7  ;;  %v2630_v28 = vrot.slane %v2622_v51, 9 }
  0xe7   : > { %2874 = vmatprep.subr.bf16.mxu1 %v3244_v52 }
  0xe8   : > { %v2058_v4 = vsel %vm3821_vm5, %v2630_v28, %v2057_v36 }
  0xe9   : > { %2969 = vmatpush3.bf16.msra.mxu0 %v3243_v18  ;;  %v2613_v18 = vcombine.low %v1862_v16, %v1876_v31  ;;  %v2638_v35 = vcombine.low %v2058_v4, %v2062_v6 }
  0xea   : > { %2875 = vmatpush3.bf16.msra.mxu1 %v3244_v52  ;;  %2970 = vmatprep.subr.bf16.mxu0 %v3245_v40  ;;  %v2628_v52 = vld [vmem:[%s3657_s21 + $0x40] sm:$0xe] }
  0xeb   : > { %3004 = vmatprep.subr.bf16.mxu1 %v3248_v59  ;;  %v2636_v25 = vrot.slane %v2628_v52, 9 }
  0xed   : > { %2877 = vmatmul.mubr.bf16.vlgmr.msra.gmra.mrb[0].mxu1 %v3247_v34  ;;  %2971 = vmatpush3.bf16.msra.mxu0 %v3245_v40  ;;  %v2082_v63 = vsel %vm3821_vm5, %v2636_v25, %v2081_v23  ;;  %v2066_v40 = vsel %vm3821_vm5, %v2632_v11, %v2065_v58 }
  0xee   : > { %3012 = vmatpush3.bf16.msra.mxu1 %v3248_v59  ;;  %2880 = vmatprep.mubr.bf16.mxu1 %v3250_v43  ;;  %v2639_v32 = vcombine.low %v2066_v40, %v2070_v39 }
  0xef   : > { %3005 = vmatprep.subr.bf16.mxu1 %v3249_v47  ;;  %2980 = vmatprep.subr.bf16.mxu0 %v3248_v59 }
  0xf0   : > { %2973 = vmatmul.mubr.bf16.vlgmr.msra.gmra.mrb[0].mxu0 %v2611_v0 }
  0xf1   : > { %2981 = vmatpush3.bf16.msra.mxu0 %v3248_v59  ;;  %2976 = vmatprep.mubr.bf16.mxu0 %v2612_v50  ;;  %v2641_v59 = vcombine.low %v2082_v63, %v2086_v37 }
  0xf2   : > { %3013 = vmatpush3.bf16.msra.mxu1 %v3249_v47  ;;  %2982 = vmatprep.subr.bf16.mxu0 %v3249_v47 }
  0xf3   : > { %3006 = vmatprep.subr.bf16.mxu1 %v3252_v8 }
  0xf5   : > { %2881 = vmatmul.mubr.bf16.gmra.mrb[4].mxu1 %v3251_v62  ;;  %2983 = vmatpush3.bf16.msra.mxu0 %v3249_v47 }
  0xf6   : > { %3014 = vmatpush3.bf16.msra.mxu1 %v3252_v8  ;;  %3000 = vmatprep.mubr.bf16.mxu1 %v2640_v10 }
  0xf7   : > { %3007 = vmatprep.subr.bf16.mxu1 %v3253_v15  ;;  %2984 = vmatprep.subr.bf16.mxu0 %v3252_v8 }
  0xf8   : > { %2977 = vmatmul.mubr.bf16.gmra.mrb[4].mxu0 %v2613_v18 }
  0xf9   : > { %2985 = vmatpush3.bf16.msra.mxu0 %v3252_v8  ;;  %2996 = vmatprep.mubr.bf16.mxu0 %v2638_v35 }
  0xfa   : > { %3015 = vmatpush3.bf16.msra.mxu1 %v3253_v15  ;;  %2986 = vmatprep.subr.bf16.mxu0 %v3253_v15 }
  0xfb   : > { %3008 = vmatprep.subr.bf16.mxu1 %v3254_v46 }
  0xfd   : > { %2987 = vmatpush3.bf16.msra.mxu0 %v3253_v15 }
  0xfe   : > { %3016 = vmatpush3.bf16.msra.mxu1 %v3254_v46  ;;  %2988 = vmatprep.subr.bf16.mxu0 %v3254_v46 }
  0xff   : > { %3009 = vmatprep.subr.bf16.mxu1 %v3255_v21 }
 0x101   : > { %2989 = vmatpush3.bf16.msra.mxu0 %v3254_v46 }
 0x102   : > { %3017 = vmatpush3.bf16.msra.mxu1 %v3255_v21  ;;  %2990 = vmatprep.subr.bf16.mxu0 %v3255_v21 }
 0x103   : > { %3010 = vmatprep.subr.bf16.mxu1 %v3256_v45 }
 0x105   : > { %2991 = vmatpush3.bf16.msra.mxu0 %v3255_v21 }
 0x106   : > { %3018 = vmatpush3.bf16.msra.mxu1 %v3256_v45  ;;  %2992 = vmatprep.subr.bf16.mxu0 %v3256_v45 }
 0x107   : > { %3011 = vmatprep.subr.bf16.mxu1 %v3257_v30 }
 0x109   : > { %2993 = vmatpush3.bf16.msra.mxu0 %v3256_v45 }
 0x10a   : > { %3019 = vmatpush3.bf16.msra.mxu1 %v3257_v30  ;;  %2994 = vmatprep.subr.bf16.mxu0 %v3257_v30 }
 0x10d   : > { %3001 = vmatmul.mubr.bf16.vlgmr.msra.gmra.mrb[8].mxu1 %v2641_v59  ;;  %2995 = vmatpush3.bf16.msra.mxu0 %v3257_v30 }
 0x110   : > { %2997 = vmatmul.mubr.bf16.vlgmr.msra.gmra.mrb[0].mxu0 %v2639_v32 }
 0x1c0   : > { %v2878_v34 = vpop.f32.mrb[0].mxu1 }
 0x1c1   : > { %v1047_v44 = vpop.f32.mrb[1].mxu1 }
 0x1c2   : > { %v2879_v57 = vpop.f32.mrb[2].mxu1 }
 0x1c3   : > { %v1050_v60 = vpop.f32.mrb[3].mxu1 }
 0x1c8   : > { %v2882_v48 = vpop.f32.mrb[4].mxu1 }
 0x1c9   : > { %v1063_v41 = vpop.f32.mrb[5].mxu1 }
 0x1ca   : > { %v2883_v42 = vpop.f32.mrb[6].mxu1 }
 0x1cb   : > { %v1066_v43 = vpop.f32.mrb[7].mxu1  ;;  %v2978_v29 = vpop.f32.mrb[4].mxu0 }
 0x1cc   : > { %v3024_v7 = vadd.f32 %v2978_v29, %v2882_v48  ;;  %v2008_v20 = vpop.f32.mrb[5].mxu0 }
 0x1cd   : > { %v3026_v38 = vadd.f32 %v2008_v20, %v1063_v41  ;;  %v2979_v19 = vpop.f32.mrb[6].mxu0 }
 0x1ce   : > { %v3028_v47 = vadd.f32 %v2979_v19, %v2883_v42  ;;  %v2011_v49 = vpop.f32.mrb[7].mxu0 }
 0x1cf   : > { %v3030_v61 = vadd.f32 %v2011_v49, %v1066_v43 }
 0x1e0   : > { %v3002_v53 = vpop.f32.mrb[8].mxu1 }
 0x1e1   : > { %v3025_v0 = vadd.f32 %v3024_v7, %v3002_v53  ;;  %v2218_v50 = vpop.f32.mrb[9].mxu1 }
 0x1e2   : > { %v3027_v55 = vadd.f32 %v3026_v38, %v2218_v50  ;;  %v3003_v2 = vpop.f32.mrb[10].mxu1 }
 0x1e3   : > { %v2289_v51 = vadd.f32 %v3025_v0, %v2650_v3  ;;  %v3029_v14 = vadd.f32 %v3028_v47, %v3003_v2  ;;  %v2221_v26 = vpop.f32.mrb[11].mxu1  ;;  %v2998_v54 = vpop.f32.mrb[0].mxu0 }
 0x1e4   : > { %v2287_v56 = vadd.f32 %v3027_v55, %v2650_v3  ;;  %v3031_v1 = vadd.f32 %v3030_v61, %v2221_v26  ;;  %v3020_v62 = vadd.f32 %v2998_v54, %v2878_v34  ;;  %v2202_v28 = vpop.f32.mrb[1].mxu0 }
 0x1e5   : > { %v2290_v8 = vadd.f32 %v3029_v14, %v2650_v3  ;;  %v2297_v9 = vmax.f32 %v2289_v51, 0.0  ;;  %v3021_v17 = vadd.f32 %v2202_v28, %v1047_v44  ;;  %v2999_v10 = vpop.f32.mrb[2].mxu0 }
 0x1e6   : > { %v2288_v36 = vadd.f32 %v3031_v1, %v2650_v3  ;;  %v2285_v31 = vadd.f32 %v3020_v62, %v2650_v3  ;;  %v2295_v15 = vmax.f32 %v2287_v56, 0.0  ;;  %v3022_v4 = vadd.f32 %v2999_v10, %v2879_v57  ;;  %v2205_v6 = vpop.f32.mrb[3].mxu0 }
 0x1e7   : > { %v2298_v16 = vmax.f32 %v2290_v8, 0.0  ;;  %v2283_v46 = vadd.f32 %v3021_v17, %v2650_v3  ;;  %v3023_v21 = vadd.f32 %v2205_v6, %v1050_v60 }
 0x1e8   : > { %v2296_v18 = vmax.f32 %v2288_v36, 0.0  ;;  %v2286_v45 = vadd.f32 %v3022_v4, %v2650_v3  ;;  %v2293_v23 = vmax.f32 %v2285_v31, 0.0 }
 0x1e9   : > { %v2675_v35 = vpack.c.bf16 %v2298_v16, %v2297_v9  ;;  %v2284_v22 = vadd.f32 %v3023_v21, %v2650_v3  ;;  %v2291_v25 = vmax.f32 %v2283_v46, 0.0 }
 0x1ea   : > { %v2670_v52 = vpack.c.bf16 %v2296_v18, %v2295_v15  ;;  %v2294_v24 = vmax.f32 %v2286_v45, 0.0 }
 0x1eb   : > { %2679 = vst [vmem:[%s257_s22 + $0x18] sm:$0xff] %v2675_v35   ;;  %v2292_v27 = vmax.f32 %v2284_v22, 0.0 }
 0x1ec   : > { %2678 = vst [vmem:[%s257_s22 + $0x10] sm:$0xff] %v2670_v52   ;;  %v2665_v30 = vpack.c.bf16 %v2294_v24, %v2293_v23 }
 0x1ed   : > { %v2660_v33 = vpack.c.bf16 %v2292_v27, %v2291_v25 }
 0x1ee   : > { %2677 = vst [vmem:[%s257_s22 + $0x8] sm:$0xff] %v2665_v30  }
 0x1ef   : > { %2661 = vst [vmem:[%s257_s22] sm:$0xff] %v2660_v33  }
 0x1f0   : > { %3357 = shalt.err (!%p3354_p2)
}
 0x1f1   : > { %s3358_s28 = scalar_lea.hbm %s4006_s26, 512  ;;  %s3362_s8 = scalar_lea.hbm %s4058_s3, 1024 }
 0x1f2   : > { %p3359_p0 = scmp.ne.s32.totalorder %s4006_s26, %s3358_s28  ;;  %p3363_p6 = scmp.lt.u32.totalorder %s4006_s26, %s4058_s3 }
 0x1f3   : > { %p3364_p7 = scmp.lt.u32.totalorder %s3362_s8, %s3358_s28  ;;  %p3366_p8 = scmp.lt.u32.totalorder %s3358_s28, %s4006_s26 }
 0x1f4   : > { %p3360_p4 = pnand %p3359_p0, %p4077_p12 }
 0x1f5   : > { %p3365_p11 = por %p3364_p7, %p3363_p6 }
 0x1f6   : > { %p3361_p13 = pneg %p3360_p4 }
 0x1f7   : > { %p3367_p1 = por %p3366_p8, %p3365_p11 }
 0x1f9   : > { %p3368_p10 = pnand %p3367_p1, %p3361_p13 }
 0x1fb   : > { %3371 = shalt.err (!%p3368_p10)
}
 0x1fc   : > { %s3438_s22 = smov 64   ;;  %s3439_s11 = smov 4  }
 0x1fd   : > { %3097 = dma.vmem_to_hbm [thread:$0]  (%p4077_p12), %s4001_s24, 512, %s4006_s26, %s2316_s15, %s3438_s22, %s3438_s22, %s3439_s11  }
 0x1fe PF: > { %s2345_s18 = sand.u32 1, %s3410_s12   ;;  %p4078_p3 = scmp.ne.s32.totalorder %s4066_s23, 0 }
 0x1ff   : > { %p4079_p5 = scmp.ge.s32.totalorder %s3430_s17, 2  ;;  %s2346_s5 = scalar_lea.sflag [#allocation5], %s2345_s18 }
 0x201   : > { %p3111_p9 = pnand %p4079_p5, %p4078_p3 }
 0x203   : > { %3405 = dma.done.wait (!%p3111_p9), %s2346_s5, 512  }
 0x204   : > { %3407 = vsyncadd (!%p3111_p9), %s2346_s5, 4294966784  ;;  %s20_s17 = sadd.s32 1, %s3430_s17   ;;  %s4080_s12 = smov %s3414_s13 }
 0x205   : > { %p17_p2 = scmp.ge.s32.totalorder %s20_s17, 4   ;;  %s4081_s13 = smov %s3418_s14 }
 0x206   : > { %s4082_s14 = smov %s3609_s6  ;;  %s4083_s15 = smov %s3426_s16 }
 0x207   : > { %s4084_s16 = smov %s4086_s25  ;;  %19 = sbr.rel (!%p17_p2) target bundleno = 7 (0x7), region = 105 }
 0x20e   :  { %2351 = vsyncpa [#allocation4], 1 }
 0x20f   :  { %2353 = vsyncpa [#allocation4 + $0x1], 1 }
 0x210   :  { %2354 = vsyncpa [#allocation7], 1 }
 0x211   :  { %2355 = vsyncpa [#allocation5], 1 }
 0x212   :  { %2357 = vsyncpa [#allocation5 + $0x1], 1 }

</bundles_post_ra>
